<compile_context>
chip_gen: v7x
topology: tpu7x:2x2x1
jax: 0.10.0
libtpu: 0.0.40
codegen_flags: <defaults>
</compile_context>

<pallas_src>
import functools
import math

import jax
import jax.numpy as jnp
from jax.experimental import pallas as pl
from jax.experimental.pallas import tpu as pltpu


# Fixed flattening order for the weight pytree -> flat pallas_call arguments.
_PARAM_ORDER = (
    'pe', 'class_query',
    'enc_wqkv', 'enc_bqkv', 'enc_wo', 'enc_bo',
    'enc_ln1_g', 'enc_ln1_b', 'enc_w1', 'enc_b1', 'enc_w2', 'enc_b2',
    'enc_ln2_g', 'enc_ln2_b',
    'enc_norm_g', 'enc_norm_b',
    'dec_sa_wqkv', 'dec_sa_bqkv', 'dec_sa_wo', 'dec_sa_bo',
    'dec_ca_wq', 'dec_ca_bq', 'dec_ca_wkv', 'dec_ca_bkv', 'dec_ca_wo', 'dec_ca_bo',
    'dec_ln1_g', 'dec_ln1_b', 'dec_ln2_g', 'dec_ln2_b', 'dec_ln3_g', 'dec_ln3_b',
    'dec_w1', 'dec_b1', 'dec_w2', 'dec_b2',
    'dec_norm_g', 'dec_norm_b',
    'proj_w', 'proj_b',
)


# ------------------------------- fused kernel --------------------------------

def _spoter_kernel(*args, names, nhead, n_enc, n_dec):
    refs = dict(zip(names, args[:len(names)]))
    out_ref = args[len(names)]
    f32 = jnp.float32

    def layer_norm(x, g, b, eps=1e-5):
        mu = jnp.mean(x, axis=-1, keepdims=True)
        xc = x - mu
        var = jnp.mean(xc * xc, axis=-1, keepdims=True)
        return xc * jax.lax.rsqrt(var + eps) * g + b

    def softmax_rows(s):
        m = jnp.max(s, axis=-1, keepdims=True)
        p = jnp.exp(s - m)
        return p * pl.reciprocal(jnp.sum(p, axis=-1, keepdims=True), approx=True)

    def mha(q, k, v, wo, bo):
        # q: (Sq, E), k/v: (Sk, E).  Heads split via static lane slices; head outputs
        # concatenated and fed through a single output projection matmul.
        Sq, E = q.shape
        D = E // nhead
        scale = 1.0 / math.sqrt(D)          # PyTorch MHA: 1/sqrt(head_dim)
        outs = []
        for h in range(nhead):              # unrolled; static slices are free views
            sl = slice(h * D, (h + 1) * D)
            qh = q[:, sl] * scale
            kh = k[:, sl]
            vh = v[:, sl]
            s = jax.lax.dot_general(qh, kh, (((1,), (1,)), ((), ())),
                                    preferred_element_type=f32)        # (Sq, Sk)
            outs.append(jnp.dot(softmax_rows(s), vh,
                                preferred_element_type=f32))            # (Sq, D)
        o = jnp.concatenate(outs, axis=-1)                              # (Sq, E)
        return jnp.dot(o, wo, preferred_element_type=f32) + bo

    E = refs['x'].shape[-1]

    # ---- AbsolutePE: x + pe (dropout disabled at inference) ----
    x = refs['x'][0] + refs['pe'][0]                                    # (S, E)

    # ---- encoder: post-norm TransformerEncoderLayer (relu activation) ----
    for l in range(n_enc):
        qkv = (jnp.dot(x, refs['enc_wqkv'][l], preferred_element_type=f32)
               + refs['enc_bqkv'][l])                                   # (S, 3E)
        q, k, v = qkv[:, :E], qkv[:, E:2 * E], qkv[:, 2 * E:]
        a = mha(q, k, v, refs['enc_wo'][l], refs['enc_bo'][l])
        x = layer_norm(x + a, refs['enc_ln1_g'][l], refs['enc_ln1_b'][l])
        h = jnp.maximum(jnp.dot(x, refs['enc_w1'][l], preferred_element_type=f32)
                        + refs['enc_b1'][l], 0.0)
        h = jnp.dot(h, refs['enc_w2'][l], preferred_element_type=f32) + refs['enc_b2'][l]
        x = layer_norm(x + h, refs['enc_ln2_g'][l], refs['enc_ln2_b'][l])
    memory = layer_norm(x, refs['enc_norm_g'][...], refs['enc_norm_b'][...])   # (S, E)

    # ---- decoder: post-norm (self-attn, cross-attn, FFN); target length == 1 ----
    t = refs['class_query'][...]                                        # (1, E)
    for l in range(n_dec):
        # Self-attention over a single token: softmax over one key == 1, so the
        # attention output equals the value projection (exact, no softmax needed).
        wv = refs['dec_sa_wqkv'][l][:, 2 * E:]
        bv = refs['dec_sa_bqkv'][l][:, 2 * E:]
        v = jnp.dot(t, wv, preferred_element_type=f32) + bv
        a = (jnp.dot(v, refs['dec_sa_wo'][l], preferred_element_type=f32)
             + refs['dec_sa_bo'][l])
        t = layer_norm(t + a, refs['dec_ln1_g'][l], refs['dec_ln1_b'][l])

        # Cross-attention against the encoder memory (Sq = 1).
        q = (jnp.dot(t, refs['dec_ca_wq'][l], preferred_element_type=f32)
             + refs['dec_ca_bq'][l])                                    # (1, E)
        kv = (jnp.dot(memory, refs['dec_ca_wkv'][l], preferred_element_type=f32)
              + refs['dec_ca_bkv'][l])                                  # (S, 2E)
        c = mha(q, kv[:, :E], kv[:, E:], refs['dec_ca_wo'][l], refs['dec_ca_bo'][l])
        t = layer_norm(t + c, refs['dec_ln2_g'][l], refs['dec_ln2_b'][l])

        h = jnp.maximum(jnp.dot(t, refs['dec_w1'][l], preferred_element_type=f32)
                        + refs['dec_b1'][l], 0.0)
        h = jnp.dot(h, refs['dec_w2'][l], preferred_element_type=f32) + refs['dec_b2'][l]
        t = layer_norm(t + h, refs['dec_ln3_g'][l], refs['dec_ln3_b'][l])
    t = layer_norm(t, refs['dec_norm_g'][...], refs['dec_norm_b'][...])

    # ---- classification head ----
    out = (jnp.dot(t, refs['proj_w'][...], preferred_element_type=f32)
           + refs['proj_b'][...])                                       # (1, C)
    out_ref[...] = out.reshape(1, 1, -1)


# ------------------------------- host wrapper ---------------------------------

def spoter_forward(params, l_hand, r_hand, body, cfg, training=False):
    del training  # dropout disabled (inference), matching the PyTorch eval path
    nhead = cfg['nhead']
    E, C = cfg['num_hid'], cfg['num_classes']
    B = l_hand.shape[0]

    inputs = jnp.concatenate([l_hand, r_hand, body], axis=-2)           # (B, S, P, 2)
    S = inputs.shape[1]
    x = inputs.reshape(B, S, -1).astype(jnp.float32)                    # (B, S, E)
    assert x.shape[-1] == E

    names = ('x',) + _PARAM_ORDER
    arrays = [x, params['pe'][:, :S].astype(jnp.float32)]
    arrays += [params[n] for n in _PARAM_ORDER[1:]]

    # Per-batch block for x / the output; every weight is one full-array VMEM block
    # whose block index is constant across the grid (DMA'd once, stays resident).
    in_specs = [pl.BlockSpec((1, S, E), lambda b: (b, 0, 0))]
    for arr in arrays[1:]:
        in_specs.append(pl.BlockSpec(arr.shape, lambda b, nd=arr.ndim: (0,) * nd))

    kernel = functools.partial(_spoter_kernel, names=names, nhead=nhead,
                               n_enc=cfg['num_enc_layers'], n_dec=cfg['num_dec_layers'])

    out = pl.pallas_call(
        kernel,
        grid=(B,),
        in_specs=in_specs,
        out_specs=pl.BlockSpec((1, 1, C), lambda b: (b, 0, 0)),
        out_shape=jax.ShapeDtypeStruct((B, 1, C), jnp.float32),
        compiler_params=pltpu.CompilerParams(
            dimension_semantics=("parallel",)),      # v7x: batch split across the 2 TCs
    )(*arrays)

    # PyTorch does `.squeeze()` (drops ALL size-1 dims — including batch when B == 1);
    # replicated verbatim for fidelity.
    return jnp.squeeze(out)


# ------------------------------ parameter setup --------------------------------

def make_positional_encoding(d_model, max_len, scale_factor=1.0):
    position = jnp.arange(max_len, dtype=jnp.float32)[:, None]
    div_term = jnp.exp(jnp.arange(0, d_model, 2, dtype=jnp.float32) *
                       (-math.log(10000.0) / d_model))
    arg = position * div_term * (d_model / max_len)
    pe = jnp.zeros((max_len, d_model), jnp.float32)
    pe = pe.at[:, 0::2].set(jnp.sin(arg))
    pe = pe.at[:, 1::2].set(jnp.cos(arg))
    return scale_factor * pe[None]                                      # (1, max_len, d_model)


def init_params(key, cfg):
    E, F, C = cfg['num_hid'], cfg['ffn'], cfg['num_classes']
    Le, Ld = cfg['num_enc_layers'], cfg['num_dec_layers']
    kit = iter(jax.random.split(key, 64))

    def w(shape, scale=0.05):
        return scale * jax.random.normal(next(kit), shape, jnp.float32)

    zeros = lambda shape: jnp.zeros(shape, jnp.float32)
    ones = lambda shape: jnp.ones(shape, jnp.float32)

    return dict(
        pe=make_positional_encoding(E, cfg['seq_len']),
        class_query=jax.random.uniform(next(kit), (1, E), jnp.float32),  # torch.rand
        # encoder layers (stacked along a leading layer axis)
        enc_wqkv=w((Le, E, 3 * E)), enc_bqkv=zeros((Le, 1, 3 * E)),
        enc_wo=w((Le, E, E)), enc_bo=zeros((Le, 1, E)),
        enc_ln1_g=ones((Le, 1, E)), enc_ln1_b=zeros((Le, 1, E)),
        enc_w1=w((Le, E, F)), enc_b1=zeros((Le, 1, F)),
        enc_w2=w((Le, F, E)), enc_b2=zeros((Le, 1, E)),
        enc_ln2_g=ones((Le, 1, E)), enc_ln2_b=zeros((Le, 1, E)),
        enc_norm_g=ones((1, E)), enc_norm_b=zeros((1, E)),
        # decoder layers
        dec_sa_wqkv=w((Ld, E, 3 * E)), dec_sa_bqkv=zeros((Ld, 1, 3 * E)),
        dec_sa_wo=w((Ld, E, E)), dec_sa_bo=zeros((Ld, 1, E)),
        dec_ca_wq=w((Ld, E, E)), dec_ca_bq=zeros((Ld, 1, E)),
        dec_ca_wkv=w((Ld, E, 2 * E)), dec_ca_bkv=zeros((Ld, 1, 2 * E)),
        dec_ca_wo=w((Ld, E, E)), dec_ca_bo=zeros((Ld, 1, E)),
        dec_ln1_g=ones((Ld, 1, E)), dec_ln1_b=zeros((Ld, 1, E)),
        dec_ln2_g=ones((Ld, 1, E)), dec_ln2_b=zeros((Ld, 1, E)),
        dec_ln3_g=ones((Ld, 1, E)), dec_ln3_b=zeros((Ld, 1, E)),
        dec_w1=w((Ld, E, F)), dec_b1=zeros((Ld, 1, F)),
        dec_w2=w((Ld, F, E)), dec_b2=zeros((Ld, 1, E)),
        dec_norm_g=ones((1, E)), dec_norm_b=zeros((1, E)),
        proj_w=w((E, C)), proj_b=zeros((1, C)),
    )


# ----------------------------------- main ---------------------------------------

if __name__ == "__main__":
    # Small, shape-consistent config (original: num_hid=108, nhead=9, seq_len=204).
    cfg = dict(num_classes=5, num_hid=36, nhead=9,
               num_enc_layers=3, num_dec_layers=2, seq_len=16, ffn=64)

    key = jax.random.PRNGKey(0)
    kp, kl, kr, kb = jax.random.split(key, 4)
    params = init_params(kp, cfg)

    batch = 2
    # 7 + 7 + 4 = 18 keypoints * 2 coords = num_hid (36)
    l_hand = jax.random.normal(kl, (batch, cfg['seq_len'], 7, 2), jnp.float32)
    r_hand = jax.random.normal(kr, (batch, cfg['seq_len'], 7, 2), jnp.float32)
    body = jax.random.normal(kb, (batch, cfg['seq_len'], 4, 2), jnp.float32)

    out = spoter_forward(params, l_hand, r_hand, body, cfg, training=False)
    out = jax.block_until_ready(out)
    assert out.shape == (batch, cfg['num_classes']), out.shape
    assert bool(jnp.all(jnp.isfinite(out)))
    print("KERNEL_OK")
</pallas_src>

<mosaic_0001>
module attributes {stable_mosaic.version = 11 : i64} {
  func.func @_spoter_kernel(%arg0: i32, %arg1: memref<1x16x36xf32, #tpu.memory_space<vmem>>, %arg2: memref<1x16x36xf32, #tpu.memory_space<vmem>>, %arg3: memref<1x36xf32, #tpu.memory_space<vmem>>, %arg4: memref<3x36x108xf32, #tpu.memory_space<vmem>>, %arg5: memref<3x1x108xf32, #tpu.memory_space<vmem>>, %arg6: memref<3x36x36xf32, #tpu.memory_space<vmem>>, %arg7: memref<3x1x36xf32, #tpu.memory_space<vmem>>, %arg8: memref<3x1x36xf32, #tpu.memory_space<vmem>>, %arg9: memref<3x1x36xf32, #tpu.memory_space<vmem>>, %arg10: memref<3x36x64xf32, #tpu.memory_space<vmem>>, %arg11: memref<3x1x64xf32, #tpu.memory_space<vmem>>, %arg12: memref<3x64x36xf32, #tpu.memory_space<vmem>>, %arg13: memref<3x1x36xf32, #tpu.memory_space<vmem>>, %arg14: memref<3x1x36xf32, #tpu.memory_space<vmem>>, %arg15: memref<3x1x36xf32, #tpu.memory_space<vmem>>, %arg16: memref<1x36xf32, #tpu.memory_space<vmem>>, %arg17: memref<1x36xf32, #tpu.memory_space<vmem>>, %arg18: memref<2x36x108xf32, #tpu.memory_space<vmem>>, %arg19: memref<2x1x108xf32, #tpu.memory_space<vmem>>, %arg20: memref<2x36x36xf32, #tpu.memory_space<vmem>>, %arg21: memref<2x1x36xf32, #tpu.memory_space<vmem>>, %arg22: memref<2x36x36xf32, #tpu.memory_space<vmem>>, %arg23: memref<2x1x36xf32, #tpu.memory_space<vmem>>, %arg24: memref<2x36x72xf32, #tpu.memory_space<vmem>>, %arg25: memref<2x1x72xf32, #tpu.memory_space<vmem>>, %arg26: memref<2x36x36xf32, #tpu.memory_space<vmem>>, %arg27: memref<2x1x36xf32, #tpu.memory_space<vmem>>, %arg28: memref<2x1x36xf32, #tpu.memory_space<vmem>>, %arg29: memref<2x1x36xf32, #tpu.memory_space<vmem>>, %arg30: memref<2x1x36xf32, #tpu.memory_space<vmem>>, %arg31: memref<2x1x36xf32, #tpu.memory_space<vmem>>, %arg32: memref<2x1x36xf32, #tpu.memory_space<vmem>>, %arg33: memref<2x1x36xf32, #tpu.memory_space<vmem>>, %arg34: memref<2x36x64xf32, #tpu.memory_space<vmem>>, %arg35: memref<2x1x64xf32, #tpu.memory_space<vmem>>, %arg36: memref<2x64x36xf32, #tpu.memory_space<vmem>>, %arg37: memref<2x1x36xf32, #tpu.memory_space<vmem>>, %arg38: memref<1x36xf32, #tpu.memory_space<vmem>>, %arg39: memref<1x36xf32, #tpu.memory_space<vmem>>, %arg40: memref<36x5xf32, #tpu.memory_space<vmem>>, %arg41: memref<1x5xf32, #tpu.memory_space<vmem>>, %arg42: memref<1x1x5xf32, #tpu.memory_space<vmem>>) attributes {dimension_semantics = [#tpu.dimension_semantics<parallel>], iteration_bounds = array<i64: 2>, scalar_prefetch = 0 : i64, scratch_operands = 0 : i64, tpu.core_type = #tpu.core_type<tc>, window_params = [{transform_indices = @transform_0, window_bounds = array<i64: 1, 16, 36>}, {pipeline_mode = #tpu.pipeline_mode<synchronous>, transform_indices = @transform_1, window_bounds = array<i64: 1, 16, 36>}, {pipeline_mode = #tpu.pipeline_mode<synchronous>, transform_indices = @transform_2, window_bounds = array<i64: 1, 36>}, {pipeline_mode = #tpu.pipeline_mode<synchronous>, transform_indices = @transform_3, window_bounds = array<i64: 3, 36, 108>}, {pipeline_mode = #tpu.pipeline_mode<synchronous>, transform_indices = @transform_4, window_bounds = array<i64: 3, 1, 108>}, {pipeline_mode = #tpu.pipeline_mode<synchronous>, transform_indices = @transform_5, window_bounds = array<i64: 3, 36, 36>}, {pipeline_mode = #tpu.pipeline_mode<synchronous>, transform_indices = @transform_6, window_bounds = array<i64: 3, 1, 36>}, {pipeline_mode = #tpu.pipeline_mode<synchronous>, transform_indices = @transform_7, window_bounds = array<i64: 3, 1, 36>}, {pipeline_mode = #tpu.pipeline_mode<synchronous>, transform_indices = @transform_8, window_bounds = array<i64: 3, 1, 36>}, {pipeline_mode = #tpu.pipeline_mode<synchronous>, transform_indices = @transform_9, window_bounds = array<i64: 3, 36, 64>}, {pipeline_mode = #tpu.pipeline_mode<synchronous>, transform_indices = @transform_10, window_bounds = array<i64: 3, 1, 64>}, {pipeline_mode = #tpu.pipeline_mode<synchronous>, transform_indices = @transform_11, window_bounds = array<i64: 3, 64, 36>}, {pipeline_mode = #tpu.pipeline_mode<synchronous>, transform_indices = @transform_12, window_bounds = array<i64: 3, 1, 36>}, {pipeline_mode = #tpu.pipeline_mode<synchronous>, transform_indices = @transform_13, window_bounds = array<i64: 3, 1, 36>}, {pipeline_mode = #tpu.pipeline_mode<synchronous>, transform_indices = @transform_14, window_bounds = array<i64: 3, 1, 36>}, {pipeline_mode = #tpu.pipeline_mode<synchronous>, transform_indices = @transform_15, window_bounds = array<i64: 1, 36>}, {pipeline_mode = #tpu.pipeline_mode<synchronous>, transform_indices = @transform_16, window_bounds = array<i64: 1, 36>}, {pipeline_mode = #tpu.pipeline_mode<synchronous>, transform_indices = @transform_17, window_bounds = array<i64: 2, 36, 108>}, {pipeline_mode = #tpu.pipeline_mode<synchronous>, transform_indices = @transform_18, window_bounds = array<i64: 2, 1, 108>}, {pipeline_mode = #tpu.pipeline_mode<synchronous>, transform_indices = @transform_19, window_bounds = array<i64: 2, 36, 36>}, {pipeline_mode = #tpu.pipeline_mode<synchronous>, transform_indices = @transform_20, window_bounds = array<i64: 2, 1, 36>}, {pipeline_mode = #tpu.pipeline_mode<synchronous>, transform_indices = @transform_21, window_bounds = array<i64: 2, 36, 36>}, {pipeline_mode = #tpu.pipeline_mode<synchronous>, transform_indices = @transform_22, window_bounds = array<i64: 2, 1, 36>}, {pipeline_mode = #tpu.pipeline_mode<synchronous>, transform_indices = @transform_23, window_bounds = array<i64: 2, 36, 72>}, {pipeline_mode = #tpu.pipeline_mode<synchronous>, transform_indices = @transform_24, window_bounds = array<i64: 2, 1, 72>}, {pipeline_mode = #tpu.pipeline_mode<synchronous>, transform_indices = @transform_25, window_bounds = array<i64: 2, 36, 36>}, {pipeline_mode = #tpu.pipeline_mode<synchronous>, transform_indices = @transform_26, window_bounds = array<i64: 2, 1, 36>}, {pipeline_mode = #tpu.pipeline_mode<synchronous>, transform_indices = @transform_27, window_bounds = array<i64: 2, 1, 36>}, {pipeline_mode = #tpu.pipeline_mode<synchronous>, transform_indices = @transform_28, window_bounds = array<i64: 2, 1, 36>}, {pipeline_mode = #tpu.pipeline_mode<synchronous>, transform_indices = @transform_29, window_bounds = array<i64: 2, 1, 36>}, {pipeline_mode = #tpu.pipeline_mode<synchronous>, transform_indices = @transform_30, window_bounds = array<i64: 2, 1, 36>}, {pipeline_mode = #tpu.pipeline_mode<synchronous>, transform_indices = @transform_31, window_bounds = array<i64: 2, 1, 36>}, {pipeline_mode = #tpu.pipeline_mode<synchronous>, transform_indices = @transform_32, window_bounds = array<i64: 2, 1, 36>}, {pipeline_mode = #tpu.pipeline_mode<synchronous>, transform_indices = @transform_33, window_bounds = array<i64: 2, 36, 64>}, {pipeline_mode = #tpu.pipeline_mode<synchronous>, transform_indices = @transform_34, window_bounds = array<i64: 2, 1, 64>}, {pipeline_mode = #tpu.pipeline_mode<synchronous>, transform_indices = @transform_35, window_bounds = array<i64: 2, 64, 36>}, {pipeline_mode = #tpu.pipeline_mode<synchronous>, transform_indices = @transform_36, window_bounds = array<i64: 2, 1, 36>}, {pipeline_mode = #tpu.pipeline_mode<synchronous>, transform_indices = @transform_37, window_bounds = array<i64: 1, 36>}, {pipeline_mode = #tpu.pipeline_mode<synchronous>, transform_indices = @transform_38, window_bounds = array<i64: 1, 36>}, {pipeline_mode = #tpu.pipeline_mode<synchronous>, transform_indices = @transform_39, window_bounds = array<i64: 36, 5>}, {pipeline_mode = #tpu.pipeline_mode<synchronous>, transform_indices = @transform_40, window_bounds = array<i64: 1, 5>}, {transform_indices = @transform_41, window_bounds = array<i64: 1, 1, 5>}]} {
    %c0 = arith.constant 0 : index
    %c0_0 = arith.constant 0 : index
    %c0_1 = arith.constant 0 : index
    %0 = vector.load %arg1[%c0, %c0_0, %c0_1] : memref<1x16x36xf32, #tpu.memory_space<vmem>>, vector<1x16x36xf32>
    %1 = vector.shape_cast %0 : vector<1x16x36xf32> to vector<16x36xf32>
    %c0_2 = arith.constant 0 : index
    %c0_3 = arith.constant 0 : index
    %c0_4 = arith.constant 0 : index
    %2 = vector.load %arg2[%c0_2, %c0_3, %c0_4] : memref<1x16x36xf32, #tpu.memory_space<vmem>>, vector<1x16x36xf32>
    %3 = vector.shape_cast %2 : vector<1x16x36xf32> to vector<16x36xf32>
    %4 = arith.addf %1, %3 : vector<16x36xf32>
    %c0_5 = arith.constant 0 : index
    %c0_6 = arith.constant 0 : index
    %c0_7 = arith.constant 0 : index
    %5 = vector.load %arg4[%c0_5, %c0_6, %c0_7] : memref<3x36x108xf32, #tpu.memory_space<vmem>>, vector<1x36x108xf32>
    %6 = vector.shape_cast %5 : vector<1x36x108xf32> to vector<36x108xf32>
    %cst = arith.constant dense<0.000000e+00> : vector<16x108xf32>
    %7 = tpu.matmul %4, %6, %cst {dimension_numbers = #tpu.dot_dimension_numbers<[1], [0], [0], [1], [0, 0, 1, 1], [], []>} : vector<16x36xf32>, vector<36x108xf32>, vector<16x108xf32> -> vector<16x108xf32>
    %c0_8 = arith.constant 0 : index
    %c0_9 = arith.constant 0 : index
    %c0_10 = arith.constant 0 : index
    %8 = vector.load %arg5[%c0_8, %c0_9, %c0_10] : memref<3x1x108xf32, #tpu.memory_space<vmem>>, vector<1x1x108xf32>
    %9 = vector.shape_cast %8 : vector<1x1x108xf32> to vector<1x108xf32>
    %10 = vector.broadcast %9 : vector<1x108xf32> to vector<16x108xf32>
    %11 = arith.addf %7, %10 : vector<16x108xf32>
    %12 = vector.extract_strided_slice %11 {offsets = [0, 0], sizes = [16, 36], strides = [1, 1]} : vector<16x108xf32> to vector<16x36xf32>
    %13 = vector.extract_strided_slice %11 {offsets = [0, 36], sizes = [16, 36], strides = [1, 1]} : vector<16x108xf32> to vector<16x36xf32>
    %14 = vector.extract_strided_slice %11 {offsets = [0, 72], sizes = [16, 36], strides = [1, 1]} : vector<16x108xf32> to vector<16x36xf32>
    %c0_11 = arith.constant 0 : index
    %c0_12 = arith.constant 0 : index
    %c0_13 = arith.constant 0 : index
    %15 = vector.load %arg6[%c0_11, %c0_12, %c0_13] : memref<3x36x36xf32, #tpu.memory_space<vmem>>, vector<1x36x36xf32>
    %16 = vector.shape_cast %15 : vector<1x36x36xf32> to vector<36x36xf32>
    %c0_14 = arith.constant 0 : index
    %c0_15 = arith.constant 0 : index
    %c0_16 = arith.constant 0 : index
    %17 = vector.load %arg7[%c0_14, %c0_15, %c0_16] : memref<3x1x36xf32, #tpu.memory_space<vmem>>, vector<1x1x36xf32>
    %18 = vector.shape_cast %17 : vector<1x1x36xf32> to vector<1x36xf32>
    %19 = vector.extract_strided_slice %12 {offsets = [0, 0], sizes = [16, 4], strides = [1, 1]} : vector<16x36xf32> to vector<16x4xf32>
    %cst_17 = arith.constant 5.000000e-01 : f32
    %20 = vector.broadcast %cst_17 : f32 to vector<16x4xf32>
    %21 = arith.mulf %19, %20 : vector<16x4xf32>
    %22 = vector.extract_strided_slice %13 {offsets = [0, 0], sizes = [16, 4], strides = [1, 1]} : vector<16x36xf32> to vector<16x4xf32>
    %23 = vector.extract_strided_slice %14 {offsets = [0, 0], sizes = [16, 4], strides = [1, 1]} : vector<16x36xf32> to vector<16x4xf32>
    %cst_18 = arith.constant dense<0.000000e+00> : vector<16x16xf32>
    %24 = tpu.matmul %21, %22, %cst_18 {dimension_numbers = #tpu.dot_dimension_numbers<[1], [1], [0], [0], [0, 0, 1, 0], [], []>} : vector<16x4xf32>, vector<16x4xf32>, vector<16x16xf32> -> vector<16x16xf32>
    %cst_19 = arith.constant dense<0xFF800000> : vector<16xf32>
    %25 = vector.multi_reduction <maximumf>, %24, %cst_19 [1] : vector<16x16xf32> to vector<16xf32>
    %26 = vector.shape_cast %25 : vector<16xf32> to vector<16x1xf32>
    %27 = vector.broadcast %26 : vector<16x1xf32> to vector<16x16xf32>
    %28 = arith.subf %24, %27 : vector<16x16xf32>
    %29 = math.exp %28 : vector<16x16xf32>
    %cst_20 = arith.constant dense<0.000000e+00> : vector<16xf32>
    %30 = vector.multi_reduction <add>, %29, %cst_20 [1] : vector<16x16xf32> to vector<16xf32>
    %31 = vector.shape_cast %30 : vector<16xf32> to vector<16x1xf32>
    %32 = tpu.reciprocal %31 {approx = true} : vector<16x1xf32> -> vector<16x1xf32>
    %33 = vector.broadcast %32 : vector<16x1xf32> to vector<16x16xf32>
    %34 = arith.mulf %29, %33 : vector<16x16xf32>
    %cst_21 = arith.constant dense<0.000000e+00> : vector<16x4xf32>
    %35 = tpu.matmul %34, %23, %cst_21 {dimension_numbers = #tpu.dot_dimension_numbers<[1], [0], [0], [1], [0, 0, 1, 1], [], []>} : vector<16x16xf32>, vector<16x4xf32>, vector<16x4xf32> -> vector<16x4xf32>
    %36 = vector.extract_strided_slice %12 {offsets = [0, 4], sizes = [16, 4], strides = [1, 1]} : vector<16x36xf32> to vector<16x4xf32>
    %cst_22 = arith.constant 5.000000e-01 : f32
    %37 = vector.broadcast %cst_22 : f32 to vector<16x4xf32>
    %38 = arith.mulf %36, %37 : vector<16x4xf32>
    %39 = vector.extract_strided_slice %13 {offsets = [0, 4], sizes = [16, 4], strides = [1, 1]} : vector<16x36xf32> to vector<16x4xf32>
    %40 = vector.extract_strided_slice %14 {offsets = [0, 4], sizes = [16, 4], strides = [1, 1]} : vector<16x36xf32> to vector<16x4xf32>
    %cst_23 = arith.constant dense<0.000000e+00> : vector<16x16xf32>
    %41 = tpu.matmul %38, %39, %cst_23 {dimension_numbers = #tpu.dot_dimension_numbers<[1], [1], [0], [0], [0, 0, 1, 0], [], []>} : vector<16x4xf32>, vector<16x4xf32>, vector<16x16xf32> -> vector<16x16xf32>
    %cst_24 = arith.constant dense<0xFF800000> : vector<16xf32>
    %42 = vector.multi_reduction <maximumf>, %41, %cst_24 [1] : vector<16x16xf32> to vector<16xf32>
    %43 = vector.shape_cast %42 : vector<16xf32> to vector<16x1xf32>
    %44 = vector.broadcast %43 : vector<16x1xf32> to vector<16x16xf32>
    %45 = arith.subf %41, %44 : vector<16x16xf32>
    %46 = math.exp %45 : vector<16x16xf32>
    %cst_25 = arith.constant dense<0.000000e+00> : vector<16xf32>
    %47 = vector.multi_reduction <add>, %46, %cst_25 [1] : vector<16x16xf32> to vector<16xf32>
    %48 = vector.shape_cast %47 : vector<16xf32> to vector<16x1xf32>
    %49 = tpu.reciprocal %48 {approx = true} : vector<16x1xf32> -> vector<16x1xf32>
    %50 = vector.broadcast %49 : vector<16x1xf32> to vector<16x16xf32>
    %51 = arith.mulf %46, %50 : vector<16x16xf32>
    %cst_26 = arith.constant dense<0.000000e+00> : vector<16x4xf32>
    %52 = tpu.matmul %51, %40, %cst_26 {dimension_numbers = #tpu.dot_dimension_numbers<[1], [0], [0], [1], [0, 0, 1, 1], [], []>} : vector<16x16xf32>, vector<16x4xf32>, vector<16x4xf32> -> vector<16x4xf32>
    %53 = vector.extract_strided_slice %12 {offsets = [0, 8], sizes = [16, 4], strides = [1, 1]} : vector<16x36xf32> to vector<16x4xf32>
    %cst_27 = arith.constant 5.000000e-01 : f32
    %54 = vector.broadcast %cst_27 : f32 to vector<16x4xf32>
    %55 = arith.mulf %53, %54 : vector<16x4xf32>
    %56 = vector.extract_strided_slice %13 {offsets = [0, 8], sizes = [16, 4], strides = [1, 1]} : vector<16x36xf32> to vector<16x4xf32>
    %57 = vector.extract_strided_slice %14 {offsets = [0, 8], sizes = [16, 4], strides = [1, 1]} : vector<16x36xf32> to vector<16x4xf32>
    %cst_28 = arith.constant dense<0.000000e+00> : vector<16x16xf32>
    %58 = tpu.matmul %55, %56, %cst_28 {dimension_numbers = #tpu.dot_dimension_numbers<[1], [1], [0], [0], [0, 0, 1, 0], [], []>} : vector<16x4xf32>, vector<16x4xf32>, vector<16x16xf32> -> vector<16x16xf32>
    %cst_29 = arith.constant dense<0xFF800000> : vector<16xf32>
    %59 = vector.multi_reduction <maximumf>, %58, %cst_29 [1] : vector<16x16xf32> to vector<16xf32>
    %60 = vector.shape_cast %59 : vector<16xf32> to vector<16x1xf32>
    %61 = vector.broadcast %60 : vector<16x1xf32> to vector<16x16xf32>
    %62 = arith.subf %58, %61 : vector<16x16xf32>
    %63 = math.exp %62 : vector<16x16xf32>
    %cst_30 = arith.constant dense<0.000000e+00> : vector<16xf32>
    %64 = vector.multi_reduction <add>, %63, %cst_30 [1] : vector<16x16xf32> to vector<16xf32>
    %65 = vector.shape_cast %64 : vector<16xf32> to vector<16x1xf32>
    %66 = tpu.reciprocal %65 {approx = true} : vector<16x1xf32> -> vector<16x1xf32>
    %67 = vector.broadcast %66 : vector<16x1xf32> to vector<16x16xf32>
    %68 = arith.mulf %63, %67 : vector<16x16xf32>
    %cst_31 = arith.constant dense<0.000000e+00> : vector<16x4xf32>
    %69 = tpu.matmul %68, %57, %cst_31 {dimension_numbers = #tpu.dot_dimension_numbers<[1], [0], [0], [1], [0, 0, 1, 1], [], []>} : vector<16x16xf32>, vector<16x4xf32>, vector<16x4xf32> -> vector<16x4xf32>
    %70 = vector.extract_strided_slice %12 {offsets = [0, 12], sizes = [16, 4], strides = [1, 1]} : vector<16x36xf32> to vector<16x4xf32>
    %cst_32 = arith.constant 5.000000e-01 : f32
    %71 = vector.broadcast %cst_32 : f32 to vector<16x4xf32>
    %72 = arith.mulf %70, %71 : vector<16x4xf32>
    %73 = vector.extract_strided_slice %13 {offsets = [0, 12], sizes = [16, 4], strides = [1, 1]} : vector<16x36xf32> to vector<16x4xf32>
    %74 = vector.extract_strided_slice %14 {offsets = [0, 12], sizes = [16, 4], strides = [1, 1]} : vector<16x36xf32> to vector<16x4xf32>
    %cst_33 = arith.constant dense<0.000000e+00> : vector<16x16xf32>
    %75 = tpu.matmul %72, %73, %cst_33 {dimension_numbers = #tpu.dot_dimension_numbers<[1], [1], [0], [0], [0, 0, 1, 0], [], []>} : vector<16x4xf32>, vector<16x4xf32>, vector<16x16xf32> -> vector<16x16xf32>
    %cst_34 = arith.constant dense<0xFF800000> : vector<16xf32>
    %76 = vector.multi_reduction <maximumf>, %75, %cst_34 [1] : vector<16x16xf32> to vector<16xf32>
    %77 = vector.shape_cast %76 : vector<16xf32> to vector<16x1xf32>
    %78 = vector.broadcast %77 : vector<16x1xf32> to vector<16x16xf32>
    %79 = arith.subf %75, %78 : vector<16x16xf32>
    %80 = math.exp %79 : vector<16x16xf32>
    %cst_35 = arith.constant dense<0.000000e+00> : vector<16xf32>
    %81 = vector.multi_reduction <add>, %80, %cst_35 [1] : vector<16x16xf32> to vector<16xf32>
    %82 = vector.shape_cast %81 : vector<16xf32> to vector<16x1xf32>
    %83 = tpu.reciprocal %82 {approx = true} : vector<16x1xf32> -> vector<16x1xf32>
    %84 = vector.broadcast %83 : vector<16x1xf32> to vector<16x16xf32>
    %85 = arith.mulf %80, %84 : vector<16x16xf32>
    %cst_36 = arith.constant dense<0.000000e+00> : vector<16x4xf32>
    %86 = tpu.matmul %85, %74, %cst_36 {dimension_numbers = #tpu.dot_dimension_numbers<[1], [0], [0], [1], [0, 0, 1, 1], [], []>} : vector<16x16xf32>, vector<16x4xf32>, vector<16x4xf32> -> vector<16x4xf32>
    %87 = vector.extract_strided_slice %12 {offsets = [0, 16], sizes = [16, 4], strides = [1, 1]} : vector<16x36xf32> to vector<16x4xf32>
    %cst_37 = arith.constant 5.000000e-01 : f32
    %88 = vector.broadcast %cst_37 : f32 to vector<16x4xf32>
    %89 = arith.mulf %87, %88 : vector<16x4xf32>
    %90 = vector.extract_strided_slice %13 {offsets = [0, 16], sizes = [16, 4], strides = [1, 1]} : vector<16x36xf32> to vector<16x4xf32>
    %91 = vector.extract_strided_slice %14 {offsets = [0, 16], sizes = [16, 4], strides = [1, 1]} : vector<16x36xf32> to vector<16x4xf32>
    %cst_38 = arith.constant dense<0.000000e+00> : vector<16x16xf32>
    %92 = tpu.matmul %89, %90, %cst_38 {dimension_numbers = #tpu.dot_dimension_numbers<[1], [1], [0], [0], [0, 0, 1, 0], [], []>} : vector<16x4xf32>, vector<16x4xf32>, vector<16x16xf32> -> vector<16x16xf32>
    %cst_39 = arith.constant dense<0xFF800000> : vector<16xf32>
    %93 = vector.multi_reduction <maximumf>, %92, %cst_39 [1] : vector<16x16xf32> to vector<16xf32>
    %94 = vector.shape_cast %93 : vector<16xf32> to vector<16x1xf32>
    %95 = vector.broadcast %94 : vector<16x1xf32> to vector<16x16xf32>
    %96 = arith.subf %92, %95 : vector<16x16xf32>
    %97 = math.exp %96 : vector<16x16xf32>
    %cst_40 = arith.constant dense<0.000000e+00> : vector<16xf32>
    %98 = vector.multi_reduction <add>, %97, %cst_40 [1] : vector<16x16xf32> to vector<16xf32>
    %99 = vector.shape_cast %98 : vector<16xf32> to vector<16x1xf32>
    %100 = tpu.reciprocal %99 {approx = true} : vector<16x1xf32> -> vector<16x1xf32>
    %101 = vector.broadcast %100 : vector<16x1xf32> to vector<16x16xf32>
    %102 = arith.mulf %97, %101 : vector<16x16xf32>
    %cst_41 = arith.constant dense<0.000000e+00> : vector<16x4xf32>
    %103 = tpu.matmul %102, %91, %cst_41 {dimension_numbers = #tpu.dot_dimension_numbers<[1], [0], [0], [1], [0, 0, 1, 1], [], []>} : vector<16x16xf32>, vector<16x4xf32>, vector<16x4xf32> -> vector<16x4xf32>
    %104 = vector.extract_strided_slice %12 {offsets = [0, 20], sizes = [16, 4], strides = [1, 1]} : vector<16x36xf32> to vector<16x4xf32>
    %cst_42 = arith.constant 5.000000e-01 : f32
    %105 = vector.broadcast %cst_42 : f32 to vector<16x4xf32>
    %106 = arith.mulf %104, %105 : vector<16x4xf32>
    %107 = vector.extract_strided_slice %13 {offsets = [0, 20], sizes = [16, 4], strides = [1, 1]} : vector<16x36xf32> to vector<16x4xf32>
    %108 = vector.extract_strided_slice %14 {offsets = [0, 20], sizes = [16, 4], strides = [1, 1]} : vector<16x36xf32> to vector<16x4xf32>
    %cst_43 = arith.constant dense<0.000000e+00> : vector<16x16xf32>
    %109 = tpu.matmul %106, %107, %cst_43 {dimension_numbers = #tpu.dot_dimension_numbers<[1], [1], [0], [0], [0, 0, 1, 0], [], []>} : vector<16x4xf32>, vector<16x4xf32>, vector<16x16xf32> -> vector<16x16xf32>
    %cst_44 = arith.constant dense<0xFF800000> : vector<16xf32>
    %110 = vector.multi_reduction <maximumf>, %109, %cst_44 [1] : vector<16x16xf32> to vector<16xf32>
    %111 = vector.shape_cast %110 : vector<16xf32> to vector<16x1xf32>
    %112 = vector.broadcast %111 : vector<16x1xf32> to vector<16x16xf32>
    %113 = arith.subf %109, %112 : vector<16x16xf32>
    %114 = math.exp %113 : vector<16x16xf32>
    %cst_45 = arith.constant dense<0.000000e+00> : vector<16xf32>
    %115 = vector.multi_reduction <add>, %114, %cst_45 [1] : vector<16x16xf32> to vector<16xf32>
    %116 = vector.shape_cast %115 : vector<16xf32> to vector<16x1xf32>
    %117 = tpu.reciprocal %116 {approx = true} : vector<16x1xf32> -> vector<16x1xf32>
    %118 = vector.broadcast %117 : vector<16x1xf32> to vector<16x16xf32>
    %119 = arith.mulf %114, %118 : vector<16x16xf32>
    %cst_46 = arith.constant dense<0.000000e+00> : vector<16x4xf32>
    %120 = tpu.matmul %119, %108, %cst_46 {dimension_numbers = #tpu.dot_dimension_numbers<[1], [0], [0], [1], [0, 0, 1, 1], [], []>} : vector<16x16xf32>, vector<16x4xf32>, vector<16x4xf32> -> vector<16x4xf32>
    %121 = vector.extract_strided_slice %12 {offsets = [0, 24], sizes = [16, 4], strides = [1, 1]} : vector<16x36xf32> to vector<16x4xf32>
    %cst_47 = arith.constant 5.000000e-01 : f32
    %122 = vector.broadcast %cst_47 : f32 to vector<16x4xf32>
    %123 = arith.mulf %121, %122 : vector<16x4xf32>
    %124 = vector.extract_strided_slice %13 {offsets = [0, 24], sizes = [16, 4], strides = [1, 1]} : vector<16x36xf32> to vector<16x4xf32>
    %125 = vector.extract_strided_slice %14 {offsets = [0, 24], sizes = [16, 4], strides = [1, 1]} : vector<16x36xf32> to vector<16x4xf32>
    %cst_48 = arith.constant dense<0.000000e+00> : vector<16x16xf32>
    %126 = tpu.matmul %123, %124, %cst_48 {dimension_numbers = #tpu.dot_dimension_numbers<[1], [1], [0], [0], [0, 0, 1, 0], [], []>} : vector<16x4xf32>, vector<16x4xf32>, vector<16x16xf32> -> vector<16x16xf32>
    %cst_49 = arith.constant dense<0xFF800000> : vector<16xf32>
    %127 = vector.multi_reduction <maximumf>, %126, %cst_49 [1] : vector<16x16xf32> to vector<16xf32>
    %128 = vector.shape_cast %127 : vector<16xf32> to vector<16x1xf32>
    %129 = vector.broadcast %128 : vector<16x1xf32> to vector<16x16xf32>
    %130 = arith.subf %126, %129 : vector<16x16xf32>
    %131 = math.exp %130 : vector<16x16xf32>
    %cst_50 = arith.constant dense<0.000000e+00> : vector<16xf32>
    %132 = vector.multi_reduction <add>, %131, %cst_50 [1] : vector<16x16xf32> to vector<16xf32>
    %133 = vector.shape_cast %132 : vector<16xf32> to vector<16x1xf32>
    %134 = tpu.reciprocal %133 {approx = true} : vector<16x1xf32> -> vector<16x1xf32>
    %135 = vector.broadcast %134 : vector<16x1xf32> to vector<16x16xf32>
    %136 = arith.mulf %131, %135 : vector<16x16xf32>
    %cst_51 = arith.constant dense<0.000000e+00> : vector<16x4xf32>
    %137 = tpu.matmul %136, %125, %cst_51 {dimension_numbers = #tpu.dot_dimension_numbers<[1], [0], [0], [1], [0, 0, 1, 1], [], []>} : vector<16x16xf32>, vector<16x4xf32>, vector<16x4xf32> -> vector<16x4xf32>
    %138 = vector.extract_strided_slice %12 {offsets = [0, 28], sizes = [16, 4], strides = [1, 1]} : vector<16x36xf32> to vector<16x4xf32>
    %cst_52 = arith.constant 5.000000e-01 : f32
    %139 = vector.broadcast %cst_52 : f32 to vector<16x4xf32>
    %140 = arith.mulf %138, %139 : vector<16x4xf32>
    %141 = vector.extract_strided_slice %13 {offsets = [0, 28], sizes = [16, 4], strides = [1, 1]} : vector<16x36xf32> to vector<16x4xf32>
    %142 = vector.extract_strided_slice %14 {offsets = [0, 28], sizes = [16, 4], strides = [1, 1]} : vector<16x36xf32> to vector<16x4xf32>
    %cst_53 = arith.constant dense<0.000000e+00> : vector<16x16xf32>
    %143 = tpu.matmul %140, %141, %cst_53 {dimension_numbers = #tpu.dot_dimension_numbers<[1], [1], [0], [0], [0, 0, 1, 0], [], []>} : vector<16x4xf32>, vector<16x4xf32>, vector<16x16xf32> -> vector<16x16xf32>
    %cst_54 = arith.constant dense<0xFF800000> : vector<16xf32>
    %144 = vector.multi_reduction <maximumf>, %143, %cst_54 [1] : vector<16x16xf32> to vector<16xf32>
    %145 = vector.shape_cast %144 : vector<16xf32> to vector<16x1xf32>
    %146 = vector.broadcast %145 : vector<16x1xf32> to vector<16x16xf32>
    %147 = arith.subf %143, %146 : vector<16x16xf32>
    %148 = math.exp %147 : vector<16x16xf32>
    %cst_55 = arith.constant dense<0.000000e+00> : vector<16xf32>
    %149 = vector.multi_reduction <add>, %148, %cst_55 [1] : vector<16x16xf32> to vector<16xf32>
    %150 = vector.shape_cast %149 : vector<16xf32> to vector<16x1xf32>
    %151 = tpu.reciprocal %150 {approx = true} : vector<16x1xf32> -> vector<16x1xf32>
    %152 = vector.broadcast %151 : vector<16x1xf32> to vector<16x16xf32>
    %153 = arith.mulf %148, %152 : vector<16x16xf32>
    %cst_56 = arith.constant dense<0.000000e+00> : vector<16x4xf32>
    %154 = tpu.matmul %153, %142, %cst_56 {dimension_numbers = #tpu.dot_dimension_numbers<[1], [0], [0], [1], [0, 0, 1, 1], [], []>} : vector<16x16xf32>, vector<16x4xf32>, vector<16x4xf32> -> vector<16x4xf32>
    %155 = vector.extract_strided_slice %12 {offsets = [0, 32], sizes = [16, 4], strides = [1, 1]} : vector<16x36xf32> to vector<16x4xf32>
    %cst_57 = arith.constant 5.000000e-01 : f32
    %156 = vector.broadcast %cst_57 : f32 to vector<16x4xf32>
    %157 = arith.mulf %155, %156 : vector<16x4xf32>
    %158 = vector.extract_strided_slice %13 {offsets = [0, 32], sizes = [16, 4], strides = [1, 1]} : vector<16x36xf32> to vector<16x4xf32>
    %159 = vector.extract_strided_slice %14 {offsets = [0, 32], sizes = [16, 4], strides = [1, 1]} : vector<16x36xf32> to vector<16x4xf32>
    %cst_58 = arith.constant dense<0.000000e+00> : vector<16x16xf32>
    %160 = tpu.matmul %157, %158, %cst_58 {dimension_numbers = #tpu.dot_dimension_numbers<[1], [1], [0], [0], [0, 0, 1, 0], [], []>} : vector<16x4xf32>, vector<16x4xf32>, vector<16x16xf32> -> vector<16x16xf32>
    %cst_59 = arith.constant dense<0xFF800000> : vector<16xf32>
    %161 = vector.multi_reduction <maximumf>, %160, %cst_59 [1] : vector<16x16xf32> to vector<16xf32>
    %162 = vector.shape_cast %161 : vector<16xf32> to vector<16x1xf32>
    %163 = vector.broadcast %162 : vector<16x1xf32> to vector<16x16xf32>
    %164 = arith.subf %160, %163 : vector<16x16xf32>
    %165 = math.exp %164 : vector<16x16xf32>
    %cst_60 = arith.constant dense<0.000000e+00> : vector<16xf32>
    %166 = vector.multi_reduction <add>, %165, %cst_60 [1] : vector<16x16xf32> to vector<16xf32>
    %167 = vector.shape_cast %166 : vector<16xf32> to vector<16x1xf32>
    %168 = tpu.reciprocal %167 {approx = true} : vector<16x1xf32> -> vector<16x1xf32>
    %169 = vector.broadcast %168 : vector<16x1xf32> to vector<16x16xf32>
    %170 = arith.mulf %165, %169 : vector<16x16xf32>
    %cst_61 = arith.constant dense<0.000000e+00> : vector<16x4xf32>
    %171 = tpu.matmul %170, %159, %cst_61 {dimension_numbers = #tpu.dot_dimension_numbers<[1], [0], [0], [1], [0, 0, 1, 1], [], []>} : vector<16x16xf32>, vector<16x4xf32>, vector<16x4xf32> -> vector<16x4xf32>
    %172 = tpu.concatenate %35, %52, %69, %86, %103, %120, %137, %154, %171 in 1 : vector<16x4xf32>, vector<16x4xf32>, vector<16x4xf32>, vector<16x4xf32>, vector<16x4xf32>, vector<16x4xf32>, vector<16x4xf32>, vector<16x4xf32>, vector<16x4xf32> -> vector<16x36xf32>
    %cst_62 = arith.constant dense<0.000000e+00> : vector<16x36xf32>
    %173 = tpu.matmul %172, %16, %cst_62 {dimension_numbers = #tpu.dot_dimension_numbers<[1], [0], [0], [1], [0, 0, 1, 1], [], []>} : vector<16x36xf32>, vector<36x36xf32>, vector<16x36xf32> -> vector<16x36xf32>
    %174 = vector.broadcast %18 : vector<1x36xf32> to vector<16x36xf32>
    %175 = arith.addf %173, %174 : vector<16x36xf32>
    %176 = arith.addf %4, %175 : vector<16x36xf32>
    %c0_63 = arith.constant 0 : index
    %c0_64 = arith.constant 0 : index
    %c0_65 = arith.constant 0 : index
    %177 = vector.load %arg8[%c0_63, %c0_64, %c0_65] : memref<3x1x36xf32, #tpu.memory_space<vmem>>, vector<1x1x36xf32>
    %178 = vector.shape_cast %177 : vector<1x1x36xf32> to vector<1x36xf32>
    %c0_66 = arith.constant 0 : index
    %c0_67 = arith.constant 0 : index
    %c0_68 = arith.constant 0 : index
    %179 = vector.load %arg9[%c0_66, %c0_67, %c0_68] : memref<3x1x36xf32, #tpu.memory_space<vmem>>, vector<1x1x36xf32>
    %180 = vector.shape_cast %179 : vector<1x1x36xf32> to vector<1x36xf32>
    %cst_69 = arith.constant dense<0.000000e+00> : vector<16xf32>
    %181 = vector.multi_reduction <add>, %176, %cst_69 [1] : vector<16x36xf32> to vector<16xf32>
    %182 = vector.shape_cast %181 : vector<16xf32> to vector<16x1xf32>
    %cst_70 = arith.constant 3.600000e+01 : f32
    %183 = vector.broadcast %cst_70 : f32 to vector<16x1xf32>
    %184 = arith.divf %182, %183 : vector<16x1xf32>
    %185 = vector.broadcast %184 : vector<16x1xf32> to vector<16x36xf32>
    %186 = arith.subf %176, %185 : vector<16x36xf32>
    %187 = arith.mulf %186, %186 : vector<16x36xf32>
    %cst_71 = arith.constant dense<0.000000e+00> : vector<16xf32>
    %188 = vector.multi_reduction <add>, %187, %cst_71 [1] : vector<16x36xf32> to vector<16xf32>
    %189 = vector.shape_cast %188 : vector<16xf32> to vector<16x1xf32>
    %cst_72 = arith.constant 3.600000e+01 : f32
    %190 = vector.broadcast %cst_72 : f32 to vector<16x1xf32>
    %191 = arith.divf %189, %190 : vector<16x1xf32>
    %cst_73 = arith.constant 9.99999974E-6 : f32
    %192 = vector.broadcast %cst_73 : f32 to vector<16x1xf32>
    %193 = arith.addf %191, %192 : vector<16x1xf32>
    %194 = math.rsqrt %193 : vector<16x1xf32>
    %195 = vector.broadcast %194 : vector<16x1xf32> to vector<16x36xf32>
    %196 = arith.mulf %186, %195 : vector<16x36xf32>
    %197 = vector.broadcast %178 : vector<1x36xf32> to vector<16x36xf32>
    %198 = arith.mulf %196, %197 : vector<16x36xf32>
    %199 = vector.broadcast %180 : vector<1x36xf32> to vector<16x36xf32>
    %200 = arith.addf %198, %199 : vector<16x36xf32>
    %c0_74 = arith.constant 0 : index
    %c0_75 = arith.constant 0 : index
    %c0_76 = arith.constant 0 : index
    %201 = vector.load %arg10[%c0_74, %c0_75, %c0_76] : memref<3x36x64xf32, #tpu.memory_space<vmem>>, vector<1x36x64xf32>
    %202 = vector.shape_cast %201 : vector<1x36x64xf32> to vector<36x64xf32>
    %cst_77 = arith.constant dense<0.000000e+00> : vector<16x64xf32>
    %203 = tpu.matmul %200, %202, %cst_77 {dimension_numbers = #tpu.dot_dimension_numbers<[1], [0], [0], [1], [0, 0, 1, 1], [], []>} : vector<16x36xf32>, vector<36x64xf32>, vector<16x64xf32> -> vector<16x64xf32>
    %c0_78 = arith.constant 0 : index
    %c0_79 = arith.constant 0 : index
    %c0_80 = arith.constant 0 : index
    %204 = vector.load %arg11[%c0_78, %c0_79, %c0_80] : memref<3x1x64xf32, #tpu.memory_space<vmem>>, vector<1x1x64xf32>
    %205 = vector.shape_cast %204 : vector<1x1x64xf32> to vector<1x64xf32>
    %206 = vector.broadcast %205 : vector<1x64xf32> to vector<16x64xf32>
    %207 = arith.addf %203, %206 : vector<16x64xf32>
    %cst_81 = arith.constant 0.000000e+00 : f32
    %208 = vector.broadcast %cst_81 : f32 to vector<16x64xf32>
    %209 = arith.maximumf %207, %208 : vector<16x64xf32>
    %c0_82 = arith.constant 0 : index
    %c0_83 = arith.constant 0 : index
    %c0_84 = arith.constant 0 : index
    %210 = vector.load %arg12[%c0_82, %c0_83, %c0_84] : memref<3x64x36xf32, #tpu.memory_space<vmem>>, vector<1x64x36xf32>
    %211 = vector.shape_cast %210 : vector<1x64x36xf32> to vector<64x36xf32>
    %cst_85 = arith.constant dense<0.000000e+00> : vector<16x36xf32>
    %212 = tpu.matmul %209, %211, %cst_85 {dimension_numbers = #tpu.dot_dimension_numbers<[1], [0], [0], [1], [0, 0, 1, 1], [], []>} : vector<16x64xf32>, vector<64x36xf32>, vector<16x36xf32> -> vector<16x36xf32>
    %c0_86 = arith.constant 0 : index
    %c0_87 = arith.constant 0 : index
    %c0_88 = arith.constant 0 : index
    %213 = vector.load %arg13[%c0_86, %c0_87, %c0_88] : memref<3x1x36xf32, #tpu.memory_space<vmem>>, vector<1x1x36xf32>
    %214 = vector.shape_cast %213 : vector<1x1x36xf32> to vector<1x36xf32>
    %215 = vector.broadcast %214 : vector<1x36xf32> to vector<16x36xf32>
    %216 = arith.addf %212, %215 : vector<16x36xf32>
    %217 = arith.addf %200, %216 : vector<16x36xf32>
    %c0_89 = arith.constant 0 : index
    %c0_90 = arith.constant 0 : index
    %c0_91 = arith.constant 0 : index
    %218 = vector.load %arg14[%c0_89, %c0_90, %c0_91] : memref<3x1x36xf32, #tpu.memory_space<vmem>>, vector<1x1x36xf32>
    %219 = vector.shape_cast %218 : vector<1x1x36xf32> to vector<1x36xf32>
    %c0_92 = arith.constant 0 : index
    %c0_93 = arith.constant 0 : index
    %c0_94 = arith.constant 0 : index
    %220 = vector.load %arg15[%c0_92, %c0_93, %c0_94] : memref<3x1x36xf32, #tpu.memory_space<vmem>>, vector<1x1x36xf32>
    %221 = vector.shape_cast %220 : vector<1x1x36xf32> to vector<1x36xf32>
    %cst_95 = arith.constant dense<0.000000e+00> : vector<16xf32>
    %222 = vector.multi_reduction <add>, %217, %cst_95 [1] : vector<16x36xf32> to vector<16xf32>
    %223 = vector.shape_cast %222 : vector<16xf32> to vector<16x1xf32>
    %cst_96 = arith.constant 3.600000e+01 : f32
    %224 = vector.broadcast %cst_96 : f32 to vector<16x1xf32>
    %225 = arith.divf %223, %224 : vector<16x1xf32>
    %226 = vector.broadcast %225 : vector<16x1xf32> to vector<16x36xf32>
    %227 = arith.subf %217, %226 : vector<16x36xf32>
    %228 = arith.mulf %227, %227 : vector<16x36xf32>
    %cst_97 = arith.constant dense<0.000000e+00> : vector<16xf32>
    %229 = vector.multi_reduction <add>, %228, %cst_97 [1] : vector<16x36xf32> to vector<16xf32>
    %230 = vector.shape_cast %229 : vector<16xf32> to vector<16x1xf32>
    %cst_98 = arith.constant 3.600000e+01 : f32
    %231 = vector.broadcast %cst_98 : f32 to vector<16x1xf32>
    %232 = arith.divf %230, %231 : vector<16x1xf32>
    %cst_99 = arith.constant 9.99999974E-6 : f32
    %233 = vector.broadcast %cst_99 : f32 to vector<16x1xf32>
    %234 = arith.addf %232, %233 : vector<16x1xf32>
    %235 = math.rsqrt %234 : vector<16x1xf32>
    %236 = vector.broadcast %235 : vector<16x1xf32> to vector<16x36xf32>
    %237 = arith.mulf %227, %236 : vector<16x36xf32>
    %238 = vector.broadcast %219 : vector<1x36xf32> to vector<16x36xf32>
    %239 = arith.mulf %237, %238 : vector<16x36xf32>
    %240 = vector.broadcast %221 : vector<1x36xf32> to vector<16x36xf32>
    %241 = arith.addf %239, %240 : vector<16x36xf32>
    %c1 = arith.constant 1 : index
    %c0_100 = arith.constant 0 : index
    %c0_101 = arith.constant 0 : index
    %242 = vector.load %arg4[%c1, %c0_100, %c0_101] : memref<3x36x108xf32, #tpu.memory_space<vmem>>, vector<1x36x108xf32>
    %243 = vector.shape_cast %242 : vector<1x36x108xf32> to vector<36x108xf32>
    %cst_102 = arith.constant dense<0.000000e+00> : vector<16x108xf32>
    %244 = tpu.matmul %241, %243, %cst_102 {dimension_numbers = #tpu.dot_dimension_numbers<[1], [0], [0], [1], [0, 0, 1, 1], [], []>} : vector<16x36xf32>, vector<36x108xf32>, vector<16x108xf32> -> vector<16x108xf32>
    %c1_103 = arith.constant 1 : index
    %c0_104 = arith.constant 0 : index
    %c0_105 = arith.constant 0 : index
    %245 = vector.load %arg5[%c1_103, %c0_104, %c0_105] : memref<3x1x108xf32, #tpu.memory_space<vmem>>, vector<1x1x108xf32>
    %246 = vector.shape_cast %245 : vector<1x1x108xf32> to vector<1x108xf32>
    %247 = vector.broadcast %246 : vector<1x108xf32> to vector<16x108xf32>
    %248 = arith.addf %244, %247 : vector<16x108xf32>
    %249 = vector.extract_strided_slice %248 {offsets = [0, 0], sizes = [16, 36], strides = [1, 1]} : vector<16x108xf32> to vector<16x36xf32>
    %250 = vector.extract_strided_slice %248 {offsets = [0, 36], sizes = [16, 36], strides = [1, 1]} : vector<16x108xf32> to vector<16x36xf32>
    %251 = vector.extract_strided_slice %248 {offsets = [0, 72], sizes = [16, 36], strides = [1, 1]} : vector<16x108xf32> to vector<16x36xf32>
    %c1_106 = arith.constant 1 : index
    %c0_107 = arith.constant 0 : index
    %c0_108 = arith.constant 0 : index
    %252 = vector.load %arg6[%c1_106, %c0_107, %c0_108] : memref<3x36x36xf32, #tpu.memory_space<vmem>>, vector<1x36x36xf32>
    %253 = vector.shape_cast %252 : vector<1x36x36xf32> to vector<36x36xf32>
    %c1_109 = arith.constant 1 : index
    %c0_110 = arith.constant 0 : index
    %c0_111 = arith.constant 0 : index
    %254 = vector.load %arg7[%c1_109, %c0_110, %c0_111] : memref<3x1x36xf32, #tpu.memory_space<vmem>>, vector<1x1x36xf32>
    %255 = vector.shape_cast %254 : vector<1x1x36xf32> to vector<1x36xf32>
    %256 = vector.extract_strided_slice %249 {offsets = [0, 0], sizes = [16, 4], strides = [1, 1]} : vector<16x36xf32> to vector<16x4xf32>
    %cst_112 = arith.constant 5.000000e-01 : f32
    %257 = vector.broadcast %cst_112 : f32 to vector<16x4xf32>
    %258 = arith.mulf %256, %257 : vector<16x4xf32>
    %259 = vector.extract_strided_slice %250 {offsets = [0, 0], sizes = [16, 4], strides = [1, 1]} : vector<16x36xf32> to vector<16x4xf32>
    %260 = vector.extract_strided_slice %251 {offsets = [0, 0], sizes = [16, 4], strides = [1, 1]} : vector<16x36xf32> to vector<16x4xf32>
    %cst_113 = arith.constant dense<0.000000e+00> : vector<16x16xf32>
    %261 = tpu.matmul %258, %259, %cst_113 {dimension_numbers = #tpu.dot_dimension_numbers<[1], [1], [0], [0], [0, 0, 1, 0], [], []>} : vector<16x4xf32>, vector<16x4xf32>, vector<16x16xf32> -> vector<16x16xf32>
    %cst_114 = arith.constant dense<0xFF800000> : vector<16xf32>
    %262 = vector.multi_reduction <maximumf>, %261, %cst_114 [1] : vector<16x16xf32> to vector<16xf32>
    %263 = vector.shape_cast %262 : vector<16xf32> to vector<16x1xf32>
    %264 = vector.broadcast %263 : vector<16x1xf32> to vector<16x16xf32>
    %265 = arith.subf %261, %264 : vector<16x16xf32>
    %266 = math.exp %265 : vector<16x16xf32>
    %cst_115 = arith.constant dense<0.000000e+00> : vector<16xf32>
    %267 = vector.multi_reduction <add>, %266, %cst_115 [1] : vector<16x16xf32> to vector<16xf32>
    %268 = vector.shape_cast %267 : vector<16xf32> to vector<16x1xf32>
    %269 = tpu.reciprocal %268 {approx = true} : vector<16x1xf32> -> vector<16x1xf32>
    %270 = vector.broadcast %269 : vector<16x1xf32> to vector<16x16xf32>
    %271 = arith.mulf %266, %270 : vector<16x16xf32>
    %cst_116 = arith.constant dense<0.000000e+00> : vector<16x4xf32>
    %272 = tpu.matmul %271, %260, %cst_116 {dimension_numbers = #tpu.dot_dimension_numbers<[1], [0], [0], [1], [0, 0, 1, 1], [], []>} : vector<16x16xf32>, vector<16x4xf32>, vector<16x4xf32> -> vector<16x4xf32>
    %273 = vector.extract_strided_slice %249 {offsets = [0, 4], sizes = [16, 4], strides = [1, 1]} : vector<16x36xf32> to vector<16x4xf32>
    %cst_117 = arith.constant 5.000000e-01 : f32
    %274 = vector.broadcast %cst_117 : f32 to vector<16x4xf32>
    %275 = arith.mulf %273, %274 : vector<16x4xf32>
    %276 = vector.extract_strided_slice %250 {offsets = [0, 4], sizes = [16, 4], strides = [1, 1]} : vector<16x36xf32> to vector<16x4xf32>
    %277 = vector.extract_strided_slice %251 {offsets = [0, 4], sizes = [16, 4], strides = [1, 1]} : vector<16x36xf32> to vector<16x4xf32>
    %cst_118 = arith.constant dense<0.000000e+00> : vector<16x16xf32>
    %278 = tpu.matmul %275, %276, %cst_118 {dimension_numbers = #tpu.dot_dimension_numbers<[1], [1], [0], [0], [0, 0, 1, 0], [], []>} : vector<16x4xf32>, vector<16x4xf32>, vector<16x16xf32> -> vector<16x16xf32>
    %cst_119 = arith.constant dense<0xFF800000> : vector<16xf32>
    %279 = vector.multi_reduction <maximumf>, %278, %cst_119 [1] : vector<16x16xf32> to vector<16xf32>
    %280 = vector.shape_cast %279 : vector<16xf32> to vector<16x1xf32>
    %281 = vector.broadcast %280 : vector<16x1xf32> to vector<16x16xf32>
    %282 = arith.subf %278, %281 : vector<16x16xf32>
    %283 = math.exp %282 : vector<16x16xf32>
    %cst_120 = arith.constant dense<0.000000e+00> : vector<16xf32>
    %284 = vector.multi_reduction <add>, %283, %cst_120 [1] : vector<16x16xf32> to vector<16xf32>
    %285 = vector.shape_cast %284 : vector<16xf32> to vector<16x1xf32>
    %286 = tpu.reciprocal %285 {approx = true} : vector<16x1xf32> -> vector<16x1xf32>
    %287 = vector.broadcast %286 : vector<16x1xf32> to vector<16x16xf32>
    %288 = arith.mulf %283, %287 : vector<16x16xf32>
    %cst_121 = arith.constant dense<0.000000e+00> : vector<16x4xf32>
    %289 = tpu.matmul %288, %277, %cst_121 {dimension_numbers = #tpu.dot_dimension_numbers<[1], [0], [0], [1], [0, 0, 1, 1], [], []>} : vector<16x16xf32>, vector<16x4xf32>, vector<16x4xf32> -> vector<16x4xf32>
    %290 = vector.extract_strided_slice %249 {offsets = [0, 8], sizes = [16, 4], strides = [1, 1]} : vector<16x36xf32> to vector<16x4xf32>
    %cst_122 = arith.constant 5.000000e-01 : f32
    %291 = vector.broadcast %cst_122 : f32 to vector<16x4xf32>
    %292 = arith.mulf %290, %291 : vector<16x4xf32>
    %293 = vector.extract_strided_slice %250 {offsets = [0, 8], sizes = [16, 4], strides = [1, 1]} : vector<16x36xf32> to vector<16x4xf32>
    %294 = vector.extract_strided_slice %251 {offsets = [0, 8], sizes = [16, 4], strides = [1, 1]} : vector<16x36xf32> to vector<16x4xf32>
    %cst_123 = arith.constant dense<0.000000e+00> : vector<16x16xf32>
    %295 = tpu.matmul %292, %293, %cst_123 {dimension_numbers = #tpu.dot_dimension_numbers<[1], [1], [0], [0], [0, 0, 1, 0], [], []>} : vector<16x4xf32>, vector<16x4xf32>, vector<16x16xf32> -> vector<16x16xf32>
    %cst_124 = arith.constant dense<0xFF800000> : vector<16xf32>
    %296 = vector.multi_reduction <maximumf>, %295, %cst_124 [1] : vector<16x16xf32> to vector<16xf32>
    %297 = vector.shape_cast %296 : vector<16xf32> to vector<16x1xf32>
    %298 = vector.broadcast %297 : vector<16x1xf32> to vector<16x16xf32>
    %299 = arith.subf %295, %298 : vector<16x16xf32>
    %300 = math.exp %299 : vector<16x16xf32>
    %cst_125 = arith.constant dense<0.000000e+00> : vector<16xf32>
    %301 = vector.multi_reduction <add>, %300, %cst_125 [1] : vector<16x16xf32> to vector<16xf32>
    %302 = vector.shape_cast %301 : vector<16xf32> to vector<16x1xf32>
    %303 = tpu.reciprocal %302 {approx = true} : vector<16x1xf32> -> vector<16x1xf32>
    %304 = vector.broadcast %303 : vector<16x1xf32> to vector<16x16xf32>
    %305 = arith.mulf %300, %304 : vector<16x16xf32>
    %cst_126 = arith.constant dense<0.000000e+00> : vector<16x4xf32>
    %306 = tpu.matmul %305, %294, %cst_126 {dimension_numbers = #tpu.dot_dimension_numbers<[1], [0], [0], [1], [0, 0, 1, 1], [], []>} : vector<16x16xf32>, vector<16x4xf32>, vector<16x4xf32> -> vector<16x4xf32>
    %307 = vector.extract_strided_slice %249 {offsets = [0, 12], sizes = [16, 4], strides = [1, 1]} : vector<16x36xf32> to vector<16x4xf32>
    %cst_127 = arith.constant 5.000000e-01 : f32
    %308 = vector.broadcast %cst_127 : f32 to vector<16x4xf32>
    %309 = arith.mulf %307, %308 : vector<16x4xf32>
    %310 = vector.extract_strided_slice %250 {offsets = [0, 12], sizes = [16, 4], strides = [1, 1]} : vector<16x36xf32> to vector<16x4xf32>
    %311 = vector.extract_strided_slice %251 {offsets = [0, 12], sizes = [16, 4], strides = [1, 1]} : vector<16x36xf32> to vector<16x4xf32>
    %cst_128 = arith.constant dense<0.000000e+00> : vector<16x16xf32>
    %312 = tpu.matmul %309, %310, %cst_128 {dimension_numbers = #tpu.dot_dimension_numbers<[1], [1], [0], [0], [0, 0, 1, 0], [], []>} : vector<16x4xf32>, vector<16x4xf32>, vector<16x16xf32> -> vector<16x16xf32>
    %cst_129 = arith.constant dense<0xFF800000> : vector<16xf32>
    %313 = vector.multi_reduction <maximumf>, %312, %cst_129 [1] : vector<16x16xf32> to vector<16xf32>
    %314 = vector.shape_cast %313 : vector<16xf32> to vector<16x1xf32>
    %315 = vector.broadcast %314 : vector<16x1xf32> to vector<16x16xf32>
    %316 = arith.subf %312, %315 : vector<16x16xf32>
    %317 = math.exp %316 : vector<16x16xf32>
    %cst_130 = arith.constant dense<0.000000e+00> : vector<16xf32>
    %318 = vector.multi_reduction <add>, %317, %cst_130 [1] : vector<16x16xf32> to vector<16xf32>
    %319 = vector.shape_cast %318 : vector<16xf32> to vector<16x1xf32>
    %320 = tpu.reciprocal %319 {approx = true} : vector<16x1xf32> -> vector<16x1xf32>
    %321 = vector.broadcast %320 : vector<16x1xf32> to vector<16x16xf32>
    %322 = arith.mulf %317, %321 : vector<16x16xf32>
    %cst_131 = arith.constant dense<0.000000e+00> : vector<16x4xf32>
    %323 = tpu.matmul %322, %311, %cst_131 {dimension_numbers = #tpu.dot_dimension_numbers<[1], [0], [0], [1], [0, 0, 1, 1], [], []>} : vector<16x16xf32>, vector<16x4xf32>, vector<16x4xf32> -> vector<16x4xf32>
    %324 = vector.extract_strided_slice %249 {offsets = [0, 16], sizes = [16, 4], strides = [1, 1]} : vector<16x36xf32> to vector<16x4xf32>
    %cst_132 = arith.constant 5.000000e-01 : f32
    %325 = vector.broadcast %cst_132 : f32 to vector<16x4xf32>
    %326 = arith.mulf %324, %325 : vector<16x4xf32>
    %327 = vector.extract_strided_slice %250 {offsets = [0, 16], sizes = [16, 4], strides = [1, 1]} : vector<16x36xf32> to vector<16x4xf32>
    %328 = vector.extract_strided_slice %251 {offsets = [0, 16], sizes = [16, 4], strides = [1, 1]} : vector<16x36xf32> to vector<16x4xf32>
    %cst_133 = arith.constant dense<0.000000e+00> : vector<16x16xf32>
    %329 = tpu.matmul %326, %327, %cst_133 {dimension_numbers = #tpu.dot_dimension_numbers<[1], [1], [0], [0], [0, 0, 1, 0], [], []>} : vector<16x4xf32>, vector<16x4xf32>, vector<16x16xf32> -> vector<16x16xf32>
    %cst_134 = arith.constant dense<0xFF800000> : vector<16xf32>
    %330 = vector.multi_reduction <maximumf>, %329, %cst_134 [1] : vector<16x16xf32> to vector<16xf32>
    %331 = vector.shape_cast %330 : vector<16xf32> to vector<16x1xf32>
    %332 = vector.broadcast %331 : vector<16x1xf32> to vector<16x16xf32>
    %333 = arith.subf %329, %332 : vector<16x16xf32>
    %334 = math.exp %333 : vector<16x16xf32>
    %cst_135 = arith.constant dense<0.000000e+00> : vector<16xf32>
    %335 = vector.multi_reduction <add>, %334, %cst_135 [1] : vector<16x16xf32> to vector<16xf32>
    %336 = vector.shape_cast %335 : vector<16xf32> to vector<16x1xf32>
    %337 = tpu.reciprocal %336 {approx = true} : vector<16x1xf32> -> vector<16x1xf32>
    %338 = vector.broadcast %337 : vector<16x1xf32> to vector<16x16xf32>
    %339 = arith.mulf %334, %338 : vector<16x16xf32>
    %cst_136 = arith.constant dense<0.000000e+00> : vector<16x4xf32>
    %340 = tpu.matmul %339, %328, %cst_136 {dimension_numbers = #tpu.dot_dimension_numbers<[1], [0], [0], [1], [0, 0, 1, 1], [], []>} : vector<16x16xf32>, vector<16x4xf32>, vector<16x4xf32> -> vector<16x4xf32>
    %341 = vector.extract_strided_slice %249 {offsets = [0, 20], sizes = [16, 4], strides = [1, 1]} : vector<16x36xf32> to vector<16x4xf32>
    %cst_137 = arith.constant 5.000000e-01 : f32
    %342 = vector.broadcast %cst_137 : f32 to vector<16x4xf32>
    %343 = arith.mulf %341, %342 : vector<16x4xf32>
    %344 = vector.extract_strided_slice %250 {offsets = [0, 20], sizes = [16, 4], strides = [1, 1]} : vector<16x36xf32> to vector<16x4xf32>
    %345 = vector.extract_strided_slice %251 {offsets = [0, 20], sizes = [16, 4], strides = [1, 1]} : vector<16x36xf32> to vector<16x4xf32>
    %cst_138 = arith.constant dense<0.000000e+00> : vector<16x16xf32>
    %346 = tpu.matmul %343, %344, %cst_138 {dimension_numbers = #tpu.dot_dimension_numbers<[1], [1], [0], [0], [0, 0, 1, 0], [], []>} : vector<16x4xf32>, vector<16x4xf32>, vector<16x16xf32> -> vector<16x16xf32>
    %cst_139 = arith.constant dense<0xFF800000> : vector<16xf32>
    %347 = vector.multi_reduction <maximumf>, %346, %cst_139 [1] : vector<16x16xf32> to vector<16xf32>
    %348 = vector.shape_cast %347 : vector<16xf32> to vector<16x1xf32>
    %349 = vector.broadcast %348 : vector<16x1xf32> to vector<16x16xf32>
    %350 = arith.subf %346, %349 : vector<16x16xf32>
    %351 = math.exp %350 : vector<16x16xf32>
    %cst_140 = arith.constant dense<0.000000e+00> : vector<16xf32>
    %352 = vector.multi_reduction <add>, %351, %cst_140 [1] : vector<16x16xf32> to vector<16xf32>
    %353 = vector.shape_cast %352 : vector<16xf32> to vector<16x1xf32>
    %354 = tpu.reciprocal %353 {approx = true} : vector<16x1xf32> -> vector<16x1xf32>
    %355 = vector.broadcast %354 : vector<16x1xf32> to vector<16x16xf32>
    %356 = arith.mulf %351, %355 : vector<16x16xf32>
    %cst_141 = arith.constant dense<0.000000e+00> : vector<16x4xf32>
    %357 = tpu.matmul %356, %345, %cst_141 {dimension_numbers = #tpu.dot_dimension_numbers<[1], [0], [0], [1], [0, 0, 1, 1], [], []>} : vector<16x16xf32>, vector<16x4xf32>, vector<16x4xf32> -> vector<16x4xf32>
    %358 = vector.extract_strided_slice %249 {offsets = [0, 24], sizes = [16, 4], strides = [1, 1]} : vector<16x36xf32> to vector<16x4xf32>
    %cst_142 = arith.constant 5.000000e-01 : f32
    %359 = vector.broadcast %cst_142 : f32 to vector<16x4xf32>
    %360 = arith.mulf %358, %359 : vector<16x4xf32>
    %361 = vector.extract_strided_slice %250 {offsets = [0, 24], sizes = [16, 4], strides = [1, 1]} : vector<16x36xf32> to vector<16x4xf32>
    %362 = vector.extract_strided_slice %251 {offsets = [0, 24], sizes = [16, 4], strides = [1, 1]} : vector<16x36xf32> to vector<16x4xf32>
    %cst_143 = arith.constant dense<0.000000e+00> : vector<16x16xf32>
    %363 = tpu.matmul %360, %361, %cst_143 {dimension_numbers = #tpu.dot_dimension_numbers<[1], [1], [0], [0], [0, 0, 1, 0], [], []>} : vector<16x4xf32>, vector<16x4xf32>, vector<16x16xf32> -> vector<16x16xf32>
    %cst_144 = arith.constant dense<0xFF800000> : vector<16xf32>
    %364 = vector.multi_reduction <maximumf>, %363, %cst_144 [1] : vector<16x16xf32> to vector<16xf32>
    %365 = vector.shape_cast %364 : vector<16xf32> to vector<16x1xf32>
    %366 = vector.broadcast %365 : vector<16x1xf32> to vector<16x16xf32>
    %367 = arith.subf %363, %366 : vector<16x16xf32>
    %368 = math.exp %367 : vector<16x16xf32>
    %cst_145 = arith.constant dense<0.000000e+00> : vector<16xf32>
    %369 = vector.multi_reduction <add>, %368, %cst_145 [1] : vector<16x16xf32> to vector<16xf32>
    %370 = vector.shape_cast %369 : vector<16xf32> to vector<16x1xf32>
    %371 = tpu.reciprocal %370 {approx = true} : vector<16x1xf32> -> vector<16x1xf32>
    %372 = vector.broadcast %371 : vector<16x1xf32> to vector<16x16xf32>
    %373 = arith.mulf %368, %372 : vector<16x16xf32>
    %cst_146 = arith.constant dense<0.000000e+00> : vector<16x4xf32>
    %374 = tpu.matmul %373, %362, %cst_146 {dimension_numbers = #tpu.dot_dimension_numbers<[1], [0], [0], [1], [0, 0, 1, 1], [], []>} : vector<16x16xf32>, vector<16x4xf32>, vector<16x4xf32> -> vector<16x4xf32>
    %375 = vector.extract_strided_slice %249 {offsets = [0, 28], sizes = [16, 4], strides = [1, 1]} : vector<16x36xf32> to vector<16x4xf32>
    %cst_147 = arith.constant 5.000000e-01 : f32
    %376 = vector.broadcast %cst_147 : f32 to vector<16x4xf32>
    %377 = arith.mulf %375, %376 : vector<16x4xf32>
    %378 = vector.extract_strided_slice %250 {offsets = [0, 28], sizes = [16, 4], strides = [1, 1]} : vector<16x36xf32> to vector<16x4xf32>
    %379 = vector.extract_strided_slice %251 {offsets = [0, 28], sizes = [16, 4], strides = [1, 1]} : vector<16x36xf32> to vector<16x4xf32>
    %cst_148 = arith.constant dense<0.000000e+00> : vector<16x16xf32>
    %380 = tpu.matmul %377, %378, %cst_148 {dimension_numbers = #tpu.dot_dimension_numbers<[1], [1], [0], [0], [0, 0, 1, 0], [], []>} : vector<16x4xf32>, vector<16x4xf32>, vector<16x16xf32> -> vector<16x16xf32>
    %cst_149 = arith.constant dense<0xFF800000> : vector<16xf32>
    %381 = vector.multi_reduction <maximumf>, %380, %cst_149 [1] : vector<16x16xf32> to vector<16xf32>
    %382 = vector.shape_cast %381 : vector<16xf32> to vector<16x1xf32>
    %383 = vector.broadcast %382 : vector<16x1xf32> to vector<16x16xf32>
    %384 = arith.subf %380, %383 : vector<16x16xf32>
    %385 = math.exp %384 : vector<16x16xf32>
    %cst_150 = arith.constant dense<0.000000e+00> : vector<16xf32>
    %386 = vector.multi_reduction <add>, %385, %cst_150 [1] : vector<16x16xf32> to vector<16xf32>
    %387 = vector.shape_cast %386 : vector<16xf32> to vector<16x1xf32>
    %388 = tpu.reciprocal %387 {approx = true} : vector<16x1xf32> -> vector<16x1xf32>
    %389 = vector.broadcast %388 : vector<16x1xf32> to vector<16x16xf32>
    %390 = arith.mulf %385, %389 : vector<16x16xf32>
    %cst_151 = arith.constant dense<0.000000e+00> : vector<16x4xf32>
    %391 = tpu.matmul %390, %379, %cst_151 {dimension_numbers = #tpu.dot_dimension_numbers<[1], [0], [0], [1], [0, 0, 1, 1], [], []>} : vector<16x16xf32>, vector<16x4xf32>, vector<16x4xf32> -> vector<16x4xf32>
    %392 = vector.extract_strided_slice %249 {offsets = [0, 32], sizes = [16, 4], strides = [1, 1]} : vector<16x36xf32> to vector<16x4xf32>
    %cst_152 = arith.constant 5.000000e-01 : f32
    %393 = vector.broadcast %cst_152 : f32 to vector<16x4xf32>
    %394 = arith.mulf %392, %393 : vector<16x4xf32>
    %395 = vector.extract_strided_slice %250 {offsets = [0, 32], sizes = [16, 4], strides = [1, 1]} : vector<16x36xf32> to vector<16x4xf32>
    %396 = vector.extract_strided_slice %251 {offsets = [0, 32], sizes = [16, 4], strides = [1, 1]} : vector<16x36xf32> to vector<16x4xf32>
    %cst_153 = arith.constant dense<0.000000e+00> : vector<16x16xf32>
    %397 = tpu.matmul %394, %395, %cst_153 {dimension_numbers = #tpu.dot_dimension_numbers<[1], [1], [0], [0], [0, 0, 1, 0], [], []>} : vector<16x4xf32>, vector<16x4xf32>, vector<16x16xf32> -> vector<16x16xf32>
    %cst_154 = arith.constant dense<0xFF800000> : vector<16xf32>
    %398 = vector.multi_reduction <maximumf>, %397, %cst_154 [1] : vector<16x16xf32> to vector<16xf32>
    %399 = vector.shape_cast %398 : vector<16xf32> to vector<16x1xf32>
    %400 = vector.broadcast %399 : vector<16x1xf32> to vector<16x16xf32>
    %401 = arith.subf %397, %400 : vector<16x16xf32>
    %402 = math.exp %401 : vector<16x16xf32>
    %cst_155 = arith.constant dense<0.000000e+00> : vector<16xf32>
    %403 = vector.multi_reduction <add>, %402, %cst_155 [1] : vector<16x16xf32> to vector<16xf32>
    %404 = vector.shape_cast %403 : vector<16xf32> to vector<16x1xf32>
    %405 = tpu.reciprocal %404 {approx = true} : vector<16x1xf32> -> vector<16x1xf32>
    %406 = vector.broadcast %405 : vector<16x1xf32> to vector<16x16xf32>
    %407 = arith.mulf %402, %406 : vector<16x16xf32>
    %cst_156 = arith.constant dense<0.000000e+00> : vector<16x4xf32>
    %408 = tpu.matmul %407, %396, %cst_156 {dimension_numbers = #tpu.dot_dimension_numbers<[1], [0], [0], [1], [0, 0, 1, 1], [], []>} : vector<16x16xf32>, vector<16x4xf32>, vector<16x4xf32> -> vector<16x4xf32>
    %409 = tpu.concatenate %272, %289, %306, %323, %340, %357, %374, %391, %408 in 1 : vector<16x4xf32>, vector<16x4xf32>, vector<16x4xf32>, vector<16x4xf32>, vector<16x4xf32>, vector<16x4xf32>, vector<16x4xf32>, vector<16x4xf32>, vector<16x4xf32> -> vector<16x36xf32>
    %cst_157 = arith.constant dense<0.000000e+00> : vector<16x36xf32>
    %410 = tpu.matmul %409, %253, %cst_157 {dimension_numbers = #tpu.dot_dimension_numbers<[1], [0], [0], [1], [0, 0, 1, 1], [], []>} : vector<16x36xf32>, vector<36x36xf32>, vector<16x36xf32> -> vector<16x36xf32>
    %411 = vector.broadcast %255 : vector<1x36xf32> to vector<16x36xf32>
    %412 = arith.addf %410, %411 : vector<16x36xf32>
    %413 = arith.addf %241, %412 : vector<16x36xf32>
    %c1_158 = arith.constant 1 : index
    %c0_159 = arith.constant 0 : index
    %c0_160 = arith.constant 0 : index
    %414 = vector.load %arg8[%c1_158, %c0_159, %c0_160] : memref<3x1x36xf32, #tpu.memory_space<vmem>>, vector<1x1x36xf32>
    %415 = vector.shape_cast %414 : vector<1x1x36xf32> to vector<1x36xf32>
    %c1_161 = arith.constant 1 : index
    %c0_162 = arith.constant 0 : index
    %c0_163 = arith.constant 0 : index
    %416 = vector.load %arg9[%c1_161, %c0_162, %c0_163] : memref<3x1x36xf32, #tpu.memory_space<vmem>>, vector<1x1x36xf32>
    %417 = vector.shape_cast %416 : vector<1x1x36xf32> to vector<1x36xf32>
    %cst_164 = arith.constant dense<0.000000e+00> : vector<16xf32>
    %418 = vector.multi_reduction <add>, %413, %cst_164 [1] : vector<16x36xf32> to vector<16xf32>
    %419 = vector.shape_cast %418 : vector<16xf32> to vector<16x1xf32>
    %cst_165 = arith.constant 3.600000e+01 : f32
    %420 = vector.broadcast %cst_165 : f32 to vector<16x1xf32>
    %421 = arith.divf %419, %420 : vector<16x1xf32>
    %422 = vector.broadcast %421 : vector<16x1xf32> to vector<16x36xf32>
    %423 = arith.subf %413, %422 : vector<16x36xf32>
    %424 = arith.mulf %423, %423 : vector<16x36xf32>
    %cst_166 = arith.constant dense<0.000000e+00> : vector<16xf32>
    %425 = vector.multi_reduction <add>, %424, %cst_166 [1] : vector<16x36xf32> to vector<16xf32>
    %426 = vector.shape_cast %425 : vector<16xf32> to vector<16x1xf32>
    %cst_167 = arith.constant 3.600000e+01 : f32
    %427 = vector.broadcast %cst_167 : f32 to vector<16x1xf32>
    %428 = arith.divf %426, %427 : vector<16x1xf32>
    %cst_168 = arith.constant 9.99999974E-6 : f32
    %429 = vector.broadcast %cst_168 : f32 to vector<16x1xf32>
    %430 = arith.addf %428, %429 : vector<16x1xf32>
    %431 = math.rsqrt %430 : vector<16x1xf32>
    %432 = vector.broadcast %431 : vector<16x1xf32> to vector<16x36xf32>
    %433 = arith.mulf %423, %432 : vector<16x36xf32>
    %434 = vector.broadcast %415 : vector<1x36xf32> to vector<16x36xf32>
    %435 = arith.mulf %433, %434 : vector<16x36xf32>
    %436 = vector.broadcast %417 : vector<1x36xf32> to vector<16x36xf32>
    %437 = arith.addf %435, %436 : vector<16x36xf32>
    %c1_169 = arith.constant 1 : index
    %c0_170 = arith.constant 0 : index
    %c0_171 = arith.constant 0 : index
    %438 = vector.load %arg10[%c1_169, %c0_170, %c0_171] : memref<3x36x64xf32, #tpu.memory_space<vmem>>, vector<1x36x64xf32>
    %439 = vector.shape_cast %438 : vector<1x36x64xf32> to vector<36x64xf32>
    %cst_172 = arith.constant dense<0.000000e+00> : vector<16x64xf32>
    %440 = tpu.matmul %437, %439, %cst_172 {dimension_numbers = #tpu.dot_dimension_numbers<[1], [0], [0], [1], [0, 0, 1, 1], [], []>} : vector<16x36xf32>, vector<36x64xf32>, vector<16x64xf32> -> vector<16x64xf32>
    %c1_173 = arith.constant 1 : index
    %c0_174 = arith.constant 0 : index
    %c0_175 = arith.constant 0 : index
    %441 = vector.load %arg11[%c1_173, %c0_174, %c0_175] : memref<3x1x64xf32, #tpu.memory_space<vmem>>, vector<1x1x64xf32>
    %442 = vector.shape_cast %441 : vector<1x1x64xf32> to vector<1x64xf32>
    %443 = vector.broadcast %442 : vector<1x64xf32> to vector<16x64xf32>
    %444 = arith.addf %440, %443 : vector<16x64xf32>
    %cst_176 = arith.constant 0.000000e+00 : f32
    %445 = vector.broadcast %cst_176 : f32 to vector<16x64xf32>
    %446 = arith.maximumf %444, %445 : vector<16x64xf32>
    %c1_177 = arith.constant 1 : index
    %c0_178 = arith.constant 0 : index
    %c0_179 = arith.constant 0 : index
    %447 = vector.load %arg12[%c1_177, %c0_178, %c0_179] : memref<3x64x36xf32, #tpu.memory_space<vmem>>, vector<1x64x36xf32>
    %448 = vector.shape_cast %447 : vector<1x64x36xf32> to vector<64x36xf32>
    %cst_180 = arith.constant dense<0.000000e+00> : vector<16x36xf32>
    %449 = tpu.matmul %446, %448, %cst_180 {dimension_numbers = #tpu.dot_dimension_numbers<[1], [0], [0], [1], [0, 0, 1, 1], [], []>} : vector<16x64xf32>, vector<64x36xf32>, vector<16x36xf32> -> vector<16x36xf32>
    %c1_181 = arith.constant 1 : index
    %c0_182 = arith.constant 0 : index
    %c0_183 = arith.constant 0 : index
    %450 = vector.load %arg13[%c1_181, %c0_182, %c0_183] : memref<3x1x36xf32, #tpu.memory_space<vmem>>, vector<1x1x36xf32>
    %451 = vector.shape_cast %450 : vector<1x1x36xf32> to vector<1x36xf32>
    %452 = vector.broadcast %451 : vector<1x36xf32> to vector<16x36xf32>
    %453 = arith.addf %449, %452 : vector<16x36xf32>
    %454 = arith.addf %437, %453 : vector<16x36xf32>
    %c1_184 = arith.constant 1 : index
    %c0_185 = arith.constant 0 : index
    %c0_186 = arith.constant 0 : index
    %455 = vector.load %arg14[%c1_184, %c0_185, %c0_186] : memref<3x1x36xf32, #tpu.memory_space<vmem>>, vector<1x1x36xf32>
    %456 = vector.shape_cast %455 : vector<1x1x36xf32> to vector<1x36xf32>
    %c1_187 = arith.constant 1 : index
    %c0_188 = arith.constant 0 : index
    %c0_189 = arith.constant 0 : index
    %457 = vector.load %arg15[%c1_187, %c0_188, %c0_189] : memref<3x1x36xf32, #tpu.memory_space<vmem>>, vector<1x1x36xf32>
    %458 = vector.shape_cast %457 : vector<1x1x36xf32> to vector<1x36xf32>
    %cst_190 = arith.constant dense<0.000000e+00> : vector<16xf32>
    %459 = vector.multi_reduction <add>, %454, %cst_190 [1] : vector<16x36xf32> to vector<16xf32>
    %460 = vector.shape_cast %459 : vector<16xf32> to vector<16x1xf32>
    %cst_191 = arith.constant 3.600000e+01 : f32
    %461 = vector.broadcast %cst_191 : f32 to vector<16x1xf32>
    %462 = arith.divf %460, %461 : vector<16x1xf32>
    %463 = vector.broadcast %462 : vector<16x1xf32> to vector<16x36xf32>
    %464 = arith.subf %454, %463 : vector<16x36xf32>
    %465 = arith.mulf %464, %464 : vector<16x36xf32>
    %cst_192 = arith.constant dense<0.000000e+00> : vector<16xf32>
    %466 = vector.multi_reduction <add>, %465, %cst_192 [1] : vector<16x36xf32> to vector<16xf32>
    %467 = vector.shape_cast %466 : vector<16xf32> to vector<16x1xf32>
    %cst_193 = arith.constant 3.600000e+01 : f32
    %468 = vector.broadcast %cst_193 : f32 to vector<16x1xf32>
    %469 = arith.divf %467, %468 : vector<16x1xf32>
    %cst_194 = arith.constant 9.99999974E-6 : f32
    %470 = vector.broadcast %cst_194 : f32 to vector<16x1xf32>
    %471 = arith.addf %469, %470 : vector<16x1xf32>
    %472 = math.rsqrt %471 : vector<16x1xf32>
    %473 = vector.broadcast %472 : vector<16x1xf32> to vector<16x36xf32>
    %474 = arith.mulf %464, %473 : vector<16x36xf32>
    %475 = vector.broadcast %456 : vector<1x36xf32> to vector<16x36xf32>
    %476 = arith.mulf %474, %475 : vector<16x36xf32>
    %477 = vector.broadcast %458 : vector<1x36xf32> to vector<16x36xf32>
    %478 = arith.addf %476, %477 : vector<16x36xf32>
    %c2 = arith.constant 2 : index
    %c0_195 = arith.constant 0 : index
    %c0_196 = arith.constant 0 : index
    %479 = vector.load %arg4[%c2, %c0_195, %c0_196] : memref<3x36x108xf32, #tpu.memory_space<vmem>>, vector<1x36x108xf32>
    %480 = vector.shape_cast %479 : vector<1x36x108xf32> to vector<36x108xf32>
    %cst_197 = arith.constant dense<0.000000e+00> : vector<16x108xf32>
    %481 = tpu.matmul %478, %480, %cst_197 {dimension_numbers = #tpu.dot_dimension_numbers<[1], [0], [0], [1], [0, 0, 1, 1], [], []>} : vector<16x36xf32>, vector<36x108xf32>, vector<16x108xf32> -> vector<16x108xf32>
    %c2_198 = arith.constant 2 : index
    %c0_199 = arith.constant 0 : index
    %c0_200 = arith.constant 0 : index
    %482 = vector.load %arg5[%c2_198, %c0_199, %c0_200] : memref<3x1x108xf32, #tpu.memory_space<vmem>>, vector<1x1x108xf32>
    %483 = vector.shape_cast %482 : vector<1x1x108xf32> to vector<1x108xf32>
    %484 = vector.broadcast %483 : vector<1x108xf32> to vector<16x108xf32>
    %485 = arith.addf %481, %484 : vector<16x108xf32>
    %486 = vector.extract_strided_slice %485 {offsets = [0, 0], sizes = [16, 36], strides = [1, 1]} : vector<16x108xf32> to vector<16x36xf32>
    %487 = vector.extract_strided_slice %485 {offsets = [0, 36], sizes = [16, 36], strides = [1, 1]} : vector<16x108xf32> to vector<16x36xf32>
    %488 = vector.extract_strided_slice %485 {offsets = [0, 72], sizes = [16, 36], strides = [1, 1]} : vector<16x108xf32> to vector<16x36xf32>
    %c2_201 = arith.constant 2 : index
    %c0_202 = arith.constant 0 : index
    %c0_203 = arith.constant 0 : index
    %489 = vector.load %arg6[%c2_201, %c0_202, %c0_203] : memref<3x36x36xf32, #tpu.memory_space<vmem>>, vector<1x36x36xf32>
    %490 = vector.shape_cast %489 : vector<1x36x36xf32> to vector<36x36xf32>
    %c2_204 = arith.constant 2 : index
    %c0_205 = arith.constant 0 : index
    %c0_206 = arith.constant 0 : index
    %491 = vector.load %arg7[%c2_204, %c0_205, %c0_206] : memref<3x1x36xf32, #tpu.memory_space<vmem>>, vector<1x1x36xf32>
    %492 = vector.shape_cast %491 : vector<1x1x36xf32> to vector<1x36xf32>
    %493 = vector.extract_strided_slice %486 {offsets = [0, 0], sizes = [16, 4], strides = [1, 1]} : vector<16x36xf32> to vector<16x4xf32>
    %cst_207 = arith.constant 5.000000e-01 : f32
    %494 = vector.broadcast %cst_207 : f32 to vector<16x4xf32>
    %495 = arith.mulf %493, %494 : vector<16x4xf32>
    %496 = vector.extract_strided_slice %487 {offsets = [0, 0], sizes = [16, 4], strides = [1, 1]} : vector<16x36xf32> to vector<16x4xf32>
    %497 = vector.extract_strided_slice %488 {offsets = [0, 0], sizes = [16, 4], strides = [1, 1]} : vector<16x36xf32> to vector<16x4xf32>
    %cst_208 = arith.constant dense<0.000000e+00> : vector<16x16xf32>
    %498 = tpu.matmul %495, %496, %cst_208 {dimension_numbers = #tpu.dot_dimension_numbers<[1], [1], [0], [0], [0, 0, 1, 0], [], []>} : vector<16x4xf32>, vector<16x4xf32>, vector<16x16xf32> -> vector<16x16xf32>
    %cst_209 = arith.constant dense<0xFF800000> : vector<16xf32>
    %499 = vector.multi_reduction <maximumf>, %498, %cst_209 [1] : vector<16x16xf32> to vector<16xf32>
    %500 = vector.shape_cast %499 : vector<16xf32> to vector<16x1xf32>
    %501 = vector.broadcast %500 : vector<16x1xf32> to vector<16x16xf32>
    %502 = arith.subf %498, %501 : vector<16x16xf32>
    %503 = math.exp %502 : vector<16x16xf32>
    %cst_210 = arith.constant dense<0.000000e+00> : vector<16xf32>
    %504 = vector.multi_reduction <add>, %503, %cst_210 [1] : vector<16x16xf32> to vector<16xf32>
    %505 = vector.shape_cast %504 : vector<16xf32> to vector<16x1xf32>
    %506 = tpu.reciprocal %505 {approx = true} : vector<16x1xf32> -> vector<16x1xf32>
    %507 = vector.broadcast %506 : vector<16x1xf32> to vector<16x16xf32>
    %508 = arith.mulf %503, %507 : vector<16x16xf32>
    %cst_211 = arith.constant dense<0.000000e+00> : vector<16x4xf32>
    %509 = tpu.matmul %508, %497, %cst_211 {dimension_numbers = #tpu.dot_dimension_numbers<[1], [0], [0], [1], [0, 0, 1, 1], [], []>} : vector<16x16xf32>, vector<16x4xf32>, vector<16x4xf32> -> vector<16x4xf32>
    %510 = vector.extract_strided_slice %486 {offsets = [0, 4], sizes = [16, 4], strides = [1, 1]} : vector<16x36xf32> to vector<16x4xf32>
    %cst_212 = arith.constant 5.000000e-01 : f32
    %511 = vector.broadcast %cst_212 : f32 to vector<16x4xf32>
    %512 = arith.mulf %510, %511 : vector<16x4xf32>
    %513 = vector.extract_strided_slice %487 {offsets = [0, 4], sizes = [16, 4], strides = [1, 1]} : vector<16x36xf32> to vector<16x4xf32>
    %514 = vector.extract_strided_slice %488 {offsets = [0, 4], sizes = [16, 4], strides = [1, 1]} : vector<16x36xf32> to vector<16x4xf32>
    %cst_213 = arith.constant dense<0.000000e+00> : vector<16x16xf32>
    %515 = tpu.matmul %512, %513, %cst_213 {dimension_numbers = #tpu.dot_dimension_numbers<[1], [1], [0], [0], [0, 0, 1, 0], [], []>} : vector<16x4xf32>, vector<16x4xf32>, vector<16x16xf32> -> vector<16x16xf32>
    %cst_214 = arith.constant dense<0xFF800000> : vector<16xf32>
    %516 = vector.multi_reduction <maximumf>, %515, %cst_214 [1] : vector<16x16xf32> to vector<16xf32>
    %517 = vector.shape_cast %516 : vector<16xf32> to vector<16x1xf32>
    %518 = vector.broadcast %517 : vector<16x1xf32> to vector<16x16xf32>
    %519 = arith.subf %515, %518 : vector<16x16xf32>
    %520 = math.exp %519 : vector<16x16xf32>
    %cst_215 = arith.constant dense<0.000000e+00> : vector<16xf32>
    %521 = vector.multi_reduction <add>, %520, %cst_215 [1] : vector<16x16xf32> to vector<16xf32>
    %522 = vector.shape_cast %521 : vector<16xf32> to vector<16x1xf32>
    %523 = tpu.reciprocal %522 {approx = true} : vector<16x1xf32> -> vector<16x1xf32>
    %524 = vector.broadcast %523 : vector<16x1xf32> to vector<16x16xf32>
    %525 = arith.mulf %520, %524 : vector<16x16xf32>
    %cst_216 = arith.constant dense<0.000000e+00> : vector<16x4xf32>
    %526 = tpu.matmul %525, %514, %cst_216 {dimension_numbers = #tpu.dot_dimension_numbers<[1], [0], [0], [1], [0, 0, 1, 1], [], []>} : vector<16x16xf32>, vector<16x4xf32>, vector<16x4xf32> -> vector<16x4xf32>
    %527 = vector.extract_strided_slice %486 {offsets = [0, 8], sizes = [16, 4], strides = [1, 1]} : vector<16x36xf32> to vector<16x4xf32>
    %cst_217 = arith.constant 5.000000e-01 : f32
    %528 = vector.broadcast %cst_217 : f32 to vector<16x4xf32>
    %529 = arith.mulf %527, %528 : vector<16x4xf32>
    %530 = vector.extract_strided_slice %487 {offsets = [0, 8], sizes = [16, 4], strides = [1, 1]} : vector<16x36xf32> to vector<16x4xf32>
    %531 = vector.extract_strided_slice %488 {offsets = [0, 8], sizes = [16, 4], strides = [1, 1]} : vector<16x36xf32> to vector<16x4xf32>
    %cst_218 = arith.constant dense<0.000000e+00> : vector<16x16xf32>
    %532 = tpu.matmul %529, %530, %cst_218 {dimension_numbers = #tpu.dot_dimension_numbers<[1], [1], [0], [0], [0, 0, 1, 0], [], []>} : vector<16x4xf32>, vector<16x4xf32>, vector<16x16xf32> -> vector<16x16xf32>
    %cst_219 = arith.constant dense<0xFF800000> : vector<16xf32>
    %533 = vector.multi_reduction <maximumf>, %532, %cst_219 [1] : vector<16x16xf32> to vector<16xf32>
    %534 = vector.shape_cast %533 : vector<16xf32> to vector<16x1xf32>
    %535 = vector.broadcast %534 : vector<16x1xf32> to vector<16x16xf32>
    %536 = arith.subf %532, %535 : vector<16x16xf32>
    %537 = math.exp %536 : vector<16x16xf32>
    %cst_220 = arith.constant dense<0.000000e+00> : vector<16xf32>
    %538 = vector.multi_reduction <add>, %537, %cst_220 [1] : vector<16x16xf32> to vector<16xf32>
    %539 = vector.shape_cast %538 : vector<16xf32> to vector<16x1xf32>
    %540 = tpu.reciprocal %539 {approx = true} : vector<16x1xf32> -> vector<16x1xf32>
    %541 = vector.broadcast %540 : vector<16x1xf32> to vector<16x16xf32>
    %542 = arith.mulf %537, %541 : vector<16x16xf32>
    %cst_221 = arith.constant dense<0.000000e+00> : vector<16x4xf32>
    %543 = tpu.matmul %542, %531, %cst_221 {dimension_numbers = #tpu.dot_dimension_numbers<[1], [0], [0], [1], [0, 0, 1, 1], [], []>} : vector<16x16xf32>, vector<16x4xf32>, vector<16x4xf32> -> vector<16x4xf32>
    %544 = vector.extract_strided_slice %486 {offsets = [0, 12], sizes = [16, 4], strides = [1, 1]} : vector<16x36xf32> to vector<16x4xf32>
    %cst_222 = arith.constant 5.000000e-01 : f32
    %545 = vector.broadcast %cst_222 : f32 to vector<16x4xf32>
    %546 = arith.mulf %544, %545 : vector<16x4xf32>
    %547 = vector.extract_strided_slice %487 {offsets = [0, 12], sizes = [16, 4], strides = [1, 1]} : vector<16x36xf32> to vector<16x4xf32>
    %548 = vector.extract_strided_slice %488 {offsets = [0, 12], sizes = [16, 4], strides = [1, 1]} : vector<16x36xf32> to vector<16x4xf32>
    %cst_223 = arith.constant dense<0.000000e+00> : vector<16x16xf32>
    %549 = tpu.matmul %546, %547, %cst_223 {dimension_numbers = #tpu.dot_dimension_numbers<[1], [1], [0], [0], [0, 0, 1, 0], [], []>} : vector<16x4xf32>, vector<16x4xf32>, vector<16x16xf32> -> vector<16x16xf32>
    %cst_224 = arith.constant dense<0xFF800000> : vector<16xf32>
    %550 = vector.multi_reduction <maximumf>, %549, %cst_224 [1] : vector<16x16xf32> to vector<16xf32>
    %551 = vector.shape_cast %550 : vector<16xf32> to vector<16x1xf32>
    %552 = vector.broadcast %551 : vector<16x1xf32> to vector<16x16xf32>
    %553 = arith.subf %549, %552 : vector<16x16xf32>
    %554 = math.exp %553 : vector<16x16xf32>
    %cst_225 = arith.constant dense<0.000000e+00> : vector<16xf32>
    %555 = vector.multi_reduction <add>, %554, %cst_225 [1] : vector<16x16xf32> to vector<16xf32>
    %556 = vector.shape_cast %555 : vector<16xf32> to vector<16x1xf32>
    %557 = tpu.reciprocal %556 {approx = true} : vector<16x1xf32> -> vector<16x1xf32>
    %558 = vector.broadcast %557 : vector<16x1xf32> to vector<16x16xf32>
    %559 = arith.mulf %554, %558 : vector<16x16xf32>
    %cst_226 = arith.constant dense<0.000000e+00> : vector<16x4xf32>
    %560 = tpu.matmul %559, %548, %cst_226 {dimension_numbers = #tpu.dot_dimension_numbers<[1], [0], [0], [1], [0, 0, 1, 1], [], []>} : vector<16x16xf32>, vector<16x4xf32>, vector<16x4xf32> -> vector<16x4xf32>
    %561 = vector.extract_strided_slice %486 {offsets = [0, 16], sizes = [16, 4], strides = [1, 1]} : vector<16x36xf32> to vector<16x4xf32>
    %cst_227 = arith.constant 5.000000e-01 : f32
    %562 = vector.broadcast %cst_227 : f32 to vector<16x4xf32>
    %563 = arith.mulf %561, %562 : vector<16x4xf32>
    %564 = vector.extract_strided_slice %487 {offsets = [0, 16], sizes = [16, 4], strides = [1, 1]} : vector<16x36xf32> to vector<16x4xf32>
    %565 = vector.extract_strided_slice %488 {offsets = [0, 16], sizes = [16, 4], strides = [1, 1]} : vector<16x36xf32> to vector<16x4xf32>
    %cst_228 = arith.constant dense<0.000000e+00> : vector<16x16xf32>
    %566 = tpu.matmul %563, %564, %cst_228 {dimension_numbers = #tpu.dot_dimension_numbers<[1], [1], [0], [0], [0, 0, 1, 0], [], []>} : vector<16x4xf32>, vector<16x4xf32>, vector<16x16xf32> -> vector<16x16xf32>
    %cst_229 = arith.constant dense<0xFF800000> : vector<16xf32>
    %567 = vector.multi_reduction <maximumf>, %566, %cst_229 [1] : vector<16x16xf32> to vector<16xf32>
    %568 = vector.shape_cast %567 : vector<16xf32> to vector<16x1xf32>
    %569 = vector.broadcast %568 : vector<16x1xf32> to vector<16x16xf32>
    %570 = arith.subf %566, %569 : vector<16x16xf32>
    %571 = math.exp %570 : vector<16x16xf32>
    %cst_230 = arith.constant dense<0.000000e+00> : vector<16xf32>
    %572 = vector.multi_reduction <add>, %571, %cst_230 [1] : vector<16x16xf32> to vector<16xf32>
    %573 = vector.shape_cast %572 : vector<16xf32> to vector<16x1xf32>
    %574 = tpu.reciprocal %573 {approx = true} : vector<16x1xf32> -> vector<16x1xf32>
    %575 = vector.broadcast %574 : vector<16x1xf32> to vector<16x16xf32>
    %576 = arith.mulf %571, %575 : vector<16x16xf32>
    %cst_231 = arith.constant dense<0.000000e+00> : vector<16x4xf32>
    %577 = tpu.matmul %576, %565, %cst_231 {dimension_numbers = #tpu.dot_dimension_numbers<[1], [0], [0], [1], [0, 0, 1, 1], [], []>} : vector<16x16xf32>, vector<16x4xf32>, vector<16x4xf32> -> vector<16x4xf32>
    %578 = vector.extract_strided_slice %486 {offsets = [0, 20], sizes = [16, 4], strides = [1, 1]} : vector<16x36xf32> to vector<16x4xf32>
    %cst_232 = arith.constant 5.000000e-01 : f32
    %579 = vector.broadcast %cst_232 : f32 to vector<16x4xf32>
    %580 = arith.mulf %578, %579 : vector<16x4xf32>
    %581 = vector.extract_strided_slice %487 {offsets = [0, 20], sizes = [16, 4], strides = [1, 1]} : vector<16x36xf32> to vector<16x4xf32>
    %582 = vector.extract_strided_slice %488 {offsets = [0, 20], sizes = [16, 4], strides = [1, 1]} : vector<16x36xf32> to vector<16x4xf32>
    %cst_233 = arith.constant dense<0.000000e+00> : vector<16x16xf32>
    %583 = tpu.matmul %580, %581, %cst_233 {dimension_numbers = #tpu.dot_dimension_numbers<[1], [1], [0], [0], [0, 0, 1, 0], [], []>} : vector<16x4xf32>, vector<16x4xf32>, vector<16x16xf32> -> vector<16x16xf32>
    %cst_234 = arith.constant dense<0xFF800000> : vector<16xf32>
    %584 = vector.multi_reduction <maximumf>, %583, %cst_234 [1] : vector<16x16xf32> to vector<16xf32>
    %585 = vector.shape_cast %584 : vector<16xf32> to vector<16x1xf32>
    %586 = vector.broadcast %585 : vector<16x1xf32> to vector<16x16xf32>
    %587 = arith.subf %583, %586 : vector<16x16xf32>
    %588 = math.exp %587 : vector<16x16xf32>
    %cst_235 = arith.constant dense<0.000000e+00> : vector<16xf32>
    %589 = vector.multi_reduction <add>, %588, %cst_235 [1] : vector<16x16xf32> to vector<16xf32>
    %590 = vector.shape_cast %589 : vector<16xf32> to vector<16x1xf32>
    %591 = tpu.reciprocal %590 {approx = true} : vector<16x1xf32> -> vector<16x1xf32>
    %592 = vector.broadcast %591 : vector<16x1xf32> to vector<16x16xf32>
    %593 = arith.mulf %588, %592 : vector<16x16xf32>
    %cst_236 = arith.constant dense<0.000000e+00> : vector<16x4xf32>
    %594 = tpu.matmul %593, %582, %cst_236 {dimension_numbers = #tpu.dot_dimension_numbers<[1], [0], [0], [1], [0, 0, 1, 1], [], []>} : vector<16x16xf32>, vector<16x4xf32>, vector<16x4xf32> -> vector<16x4xf32>
    %595 = vector.extract_strided_slice %486 {offsets = [0, 24], sizes = [16, 4], strides = [1, 1]} : vector<16x36xf32> to vector<16x4xf32>
    %cst_237 = arith.constant 5.000000e-01 : f32
    %596 = vector.broadcast %cst_237 : f32 to vector<16x4xf32>
    %597 = arith.mulf %595, %596 : vector<16x4xf32>
    %598 = vector.extract_strided_slice %487 {offsets = [0, 24], sizes = [16, 4], strides = [1, 1]} : vector<16x36xf32> to vector<16x4xf32>
    %599 = vector.extract_strided_slice %488 {offsets = [0, 24], sizes = [16, 4], strides = [1, 1]} : vector<16x36xf32> to vector<16x4xf32>
    %cst_238 = arith.constant dense<0.000000e+00> : vector<16x16xf32>
    %600 = tpu.matmul %597, %598, %cst_238 {dimension_numbers = #tpu.dot_dimension_numbers<[1], [1], [0], [0], [0, 0, 1, 0], [], []>} : vector<16x4xf32>, vector<16x4xf32>, vector<16x16xf32> -> vector<16x16xf32>
    %cst_239 = arith.constant dense<0xFF800000> : vector<16xf32>
    %601 = vector.multi_reduction <maximumf>, %600, %cst_239 [1] : vector<16x16xf32> to vector<16xf32>
    %602 = vector.shape_cast %601 : vector<16xf32> to vector<16x1xf32>
    %603 = vector.broadcast %602 : vector<16x1xf32> to vector<16x16xf32>
    %604 = arith.subf %600, %603 : vector<16x16xf32>
    %605 = math.exp %604 : vector<16x16xf32>
    %cst_240 = arith.constant dense<0.000000e+00> : vector<16xf32>
    %606 = vector.multi_reduction <add>, %605, %cst_240 [1] : vector<16x16xf32> to vector<16xf32>
    %607 = vector.shape_cast %606 : vector<16xf32> to vector<16x1xf32>
    %608 = tpu.reciprocal %607 {approx = true} : vector<16x1xf32> -> vector<16x1xf32>
    %609 = vector.broadcast %608 : vector<16x1xf32> to vector<16x16xf32>
    %610 = arith.mulf %605, %609 : vector<16x16xf32>
    %cst_241 = arith.constant dense<0.000000e+00> : vector<16x4xf32>
    %611 = tpu.matmul %610, %599, %cst_241 {dimension_numbers = #tpu.dot_dimension_numbers<[1], [0], [0], [1], [0, 0, 1, 1], [], []>} : vector<16x16xf32>, vector<16x4xf32>, vector<16x4xf32> -> vector<16x4xf32>
    %612 = vector.extract_strided_slice %486 {offsets = [0, 28], sizes = [16, 4], strides = [1, 1]} : vector<16x36xf32> to vector<16x4xf32>
    %cst_242 = arith.constant 5.000000e-01 : f32
    %613 = vector.broadcast %cst_242 : f32 to vector<16x4xf32>
    %614 = arith.mulf %612, %613 : vector<16x4xf32>
    %615 = vector.extract_strided_slice %487 {offsets = [0, 28], sizes = [16, 4], strides = [1, 1]} : vector<16x36xf32> to vector<16x4xf32>
    %616 = vector.extract_strided_slice %488 {offsets = [0, 28], sizes = [16, 4], strides = [1, 1]} : vector<16x36xf32> to vector<16x4xf32>
    %cst_243 = arith.constant dense<0.000000e+00> : vector<16x16xf32>
    %617 = tpu.matmul %614, %615, %cst_243 {dimension_numbers = #tpu.dot_dimension_numbers<[1], [1], [0], [0], [0, 0, 1, 0], [], []>} : vector<16x4xf32>, vector<16x4xf32>, vector<16x16xf32> -> vector<16x16xf32>
    %cst_244 = arith.constant dense<0xFF800000> : vector<16xf32>
    %618 = vector.multi_reduction <maximumf>, %617, %cst_244 [1] : vector<16x16xf32> to vector<16xf32>
    %619 = vector.shape_cast %618 : vector<16xf32> to vector<16x1xf32>
    %620 = vector.broadcast %619 : vector<16x1xf32> to vector<16x16xf32>
    %621 = arith.subf %617, %620 : vector<16x16xf32>
    %622 = math.exp %621 : vector<16x16xf32>
    %cst_245 = arith.constant dense<0.000000e+00> : vector<16xf32>
    %623 = vector.multi_reduction <add>, %622, %cst_245 [1] : vector<16x16xf32> to vector<16xf32>
    %624 = vector.shape_cast %623 : vector<16xf32> to vector<16x1xf32>
    %625 = tpu.reciprocal %624 {approx = true} : vector<16x1xf32> -> vector<16x1xf32>
    %626 = vector.broadcast %625 : vector<16x1xf32> to vector<16x16xf32>
    %627 = arith.mulf %622, %626 : vector<16x16xf32>
    %cst_246 = arith.constant dense<0.000000e+00> : vector<16x4xf32>
    %628 = tpu.matmul %627, %616, %cst_246 {dimension_numbers = #tpu.dot_dimension_numbers<[1], [0], [0], [1], [0, 0, 1, 1], [], []>} : vector<16x16xf32>, vector<16x4xf32>, vector<16x4xf32> -> vector<16x4xf32>
    %629 = vector.extract_strided_slice %486 {offsets = [0, 32], sizes = [16, 4], strides = [1, 1]} : vector<16x36xf32> to vector<16x4xf32>
    %cst_247 = arith.constant 5.000000e-01 : f32
    %630 = vector.broadcast %cst_247 : f32 to vector<16x4xf32>
    %631 = arith.mulf %629, %630 : vector<16x4xf32>
    %632 = vector.extract_strided_slice %487 {offsets = [0, 32], sizes = [16, 4], strides = [1, 1]} : vector<16x36xf32> to vector<16x4xf32>
    %633 = vector.extract_strided_slice %488 {offsets = [0, 32], sizes = [16, 4], strides = [1, 1]} : vector<16x36xf32> to vector<16x4xf32>
    %cst_248 = arith.constant dense<0.000000e+00> : vector<16x16xf32>
    %634 = tpu.matmul %631, %632, %cst_248 {dimension_numbers = #tpu.dot_dimension_numbers<[1], [1], [0], [0], [0, 0, 1, 0], [], []>} : vector<16x4xf32>, vector<16x4xf32>, vector<16x16xf32> -> vector<16x16xf32>
    %cst_249 = arith.constant dense<0xFF800000> : vector<16xf32>
    %635 = vector.multi_reduction <maximumf>, %634, %cst_249 [1] : vector<16x16xf32> to vector<16xf32>
    %636 = vector.shape_cast %635 : vector<16xf32> to vector<16x1xf32>
    %637 = vector.broadcast %636 : vector<16x1xf32> to vector<16x16xf32>
    %638 = arith.subf %634, %637 : vector<16x16xf32>
    %639 = math.exp %638 : vector<16x16xf32>
    %cst_250 = arith.constant dense<0.000000e+00> : vector<16xf32>
    %640 = vector.multi_reduction <add>, %639, %cst_250 [1] : vector<16x16xf32> to vector<16xf32>
    %641 = vector.shape_cast %640 : vector<16xf32> to vector<16x1xf32>
    %642 = tpu.reciprocal %641 {approx = true} : vector<16x1xf32> -> vector<16x1xf32>
    %643 = vector.broadcast %642 : vector<16x1xf32> to vector<16x16xf32>
    %644 = arith.mulf %639, %643 : vector<16x16xf32>
    %cst_251 = arith.constant dense<0.000000e+00> : vector<16x4xf32>
    %645 = tpu.matmul %644, %633, %cst_251 {dimension_numbers = #tpu.dot_dimension_numbers<[1], [0], [0], [1], [0, 0, 1, 1], [], []>} : vector<16x16xf32>, vector<16x4xf32>, vector<16x4xf32> -> vector<16x4xf32>
    %646 = tpu.concatenate %509, %526, %543, %560, %577, %594, %611, %628, %645 in 1 : vector<16x4xf32>, vector<16x4xf32>, vector<16x4xf32>, vector<16x4xf32>, vector<16x4xf32>, vector<16x4xf32>, vector<16x4xf32>, vector<16x4xf32>, vector<16x4xf32> -> vector<16x36xf32>
    %cst_252 = arith.constant dense<0.000000e+00> : vector<16x36xf32>
    %647 = tpu.matmul %646, %490, %cst_252 {dimension_numbers = #tpu.dot_dimension_numbers<[1], [0], [0], [1], [0, 0, 1, 1], [], []>} : vector<16x36xf32>, vector<36x36xf32>, vector<16x36xf32> -> vector<16x36xf32>
    %648 = vector.broadcast %492 : vector<1x36xf32> to vector<16x36xf32>
    %649 = arith.addf %647, %648 : vector<16x36xf32>
    %650 = arith.addf %478, %649 : vector<16x36xf32>
    %c2_253 = arith.constant 2 : index
    %c0_254 = arith.constant 0 : index
    %c0_255 = arith.constant 0 : index
    %651 = vector.load %arg8[%c2_253, %c0_254, %c0_255] : memref<3x1x36xf32, #tpu.memory_space<vmem>>, vector<1x1x36xf32>
    %652 = vector.shape_cast %651 : vector<1x1x36xf32> to vector<1x36xf32>
    %c2_256 = arith.constant 2 : index
    %c0_257 = arith.constant 0 : index
    %c0_258 = arith.constant 0 : index
    %653 = vector.load %arg9[%c2_256, %c0_257, %c0_258] : memref<3x1x36xf32, #tpu.memory_space<vmem>>, vector<1x1x36xf32>
    %654 = vector.shape_cast %653 : vector<1x1x36xf32> to vector<1x36xf32>
    %cst_259 = arith.constant dense<0.000000e+00> : vector<16xf32>
    %655 = vector.multi_reduction <add>, %650, %cst_259 [1] : vector<16x36xf32> to vector<16xf32>
    %656 = vector.shape_cast %655 : vector<16xf32> to vector<16x1xf32>
    %cst_260 = arith.constant 3.600000e+01 : f32
    %657 = vector.broadcast %cst_260 : f32 to vector<16x1xf32>
    %658 = arith.divf %656, %657 : vector<16x1xf32>
    %659 = vector.broadcast %658 : vector<16x1xf32> to vector<16x36xf32>
    %660 = arith.subf %650, %659 : vector<16x36xf32>
    %661 = arith.mulf %660, %660 : vector<16x36xf32>
    %cst_261 = arith.constant dense<0.000000e+00> : vector<16xf32>
    %662 = vector.multi_reduction <add>, %661, %cst_261 [1] : vector<16x36xf32> to vector<16xf32>
    %663 = vector.shape_cast %662 : vector<16xf32> to vector<16x1xf32>
    %cst_262 = arith.constant 3.600000e+01 : f32
    %664 = vector.broadcast %cst_262 : f32 to vector<16x1xf32>
    %665 = arith.divf %663, %664 : vector<16x1xf32>
    %cst_263 = arith.constant 9.99999974E-6 : f32
    %666 = vector.broadcast %cst_263 : f32 to vector<16x1xf32>
    %667 = arith.addf %665, %666 : vector<16x1xf32>
    %668 = math.rsqrt %667 : vector<16x1xf32>
    %669 = vector.broadcast %668 : vector<16x1xf32> to vector<16x36xf32>
    %670 = arith.mulf %660, %669 : vector<16x36xf32>
    %671 = vector.broadcast %652 : vector<1x36xf32> to vector<16x36xf32>
    %672 = arith.mulf %670, %671 : vector<16x36xf32>
    %673 = vector.broadcast %654 : vector<1x36xf32> to vector<16x36xf32>
    %674 = arith.addf %672, %673 : vector<16x36xf32>
    %c2_264 = arith.constant 2 : index
    %c0_265 = arith.constant 0 : index
    %c0_266 = arith.constant 0 : index
    %675 = vector.load %arg10[%c2_264, %c0_265, %c0_266] : memref<3x36x64xf32, #tpu.memory_space<vmem>>, vector<1x36x64xf32>
    %676 = vector.shape_cast %675 : vector<1x36x64xf32> to vector<36x64xf32>
    %cst_267 = arith.constant dense<0.000000e+00> : vector<16x64xf32>
    %677 = tpu.matmul %674, %676, %cst_267 {dimension_numbers = #tpu.dot_dimension_numbers<[1], [0], [0], [1], [0, 0, 1, 1], [], []>} : vector<16x36xf32>, vector<36x64xf32>, vector<16x64xf32> -> vector<16x64xf32>
    %c2_268 = arith.constant 2 : index
    %c0_269 = arith.constant 0 : index
    %c0_270 = arith.constant 0 : index
    %678 = vector.load %arg11[%c2_268, %c0_269, %c0_270] : memref<3x1x64xf32, #tpu.memory_space<vmem>>, vector<1x1x64xf32>
    %679 = vector.shape_cast %678 : vector<1x1x64xf32> to vector<1x64xf32>
    %680 = vector.broadcast %679 : vector<1x64xf32> to vector<16x64xf32>
    %681 = arith.addf %677, %680 : vector<16x64xf32>
    %cst_271 = arith.constant 0.000000e+00 : f32
    %682 = vector.broadcast %cst_271 : f32 to vector<16x64xf32>
    %683 = arith.maximumf %681, %682 : vector<16x64xf32>
    %c2_272 = arith.constant 2 : index
    %c0_273 = arith.constant 0 : index
    %c0_274 = arith.constant 0 : index
    %684 = vector.load %arg12[%c2_272, %c0_273, %c0_274] : memref<3x64x36xf32, #tpu.memory_space<vmem>>, vector<1x64x36xf32>
    %685 = vector.shape_cast %684 : vector<1x64x36xf32> to vector<64x36xf32>
    %cst_275 = arith.constant dense<0.000000e+00> : vector<16x36xf32>
    %686 = tpu.matmul %683, %685, %cst_275 {dimension_numbers = #tpu.dot_dimension_numbers<[1], [0], [0], [1], [0, 0, 1, 1], [], []>} : vector<16x64xf32>, vector<64x36xf32>, vector<16x36xf32> -> vector<16x36xf32>
    %c2_276 = arith.constant 2 : index
    %c0_277 = arith.constant 0 : index
    %c0_278 = arith.constant 0 : index
    %687 = vector.load %arg13[%c2_276, %c0_277, %c0_278] : memref<3x1x36xf32, #tpu.memory_space<vmem>>, vector<1x1x36xf32>
    %688 = vector.shape_cast %687 : vector<1x1x36xf32> to vector<1x36xf32>
    %689 = vector.broadcast %688 : vector<1x36xf32> to vector<16x36xf32>
    %690 = arith.addf %686, %689 : vector<16x36xf32>
    %691 = arith.addf %674, %690 : vector<16x36xf32>
    %c2_279 = arith.constant 2 : index
    %c0_280 = arith.constant 0 : index
    %c0_281 = arith.constant 0 : index
    %692 = vector.load %arg14[%c2_279, %c0_280, %c0_281] : memref<3x1x36xf32, #tpu.memory_space<vmem>>, vector<1x1x36xf32>
    %693 = vector.shape_cast %692 : vector<1x1x36xf32> to vector<1x36xf32>
    %c2_282 = arith.constant 2 : index
    %c0_283 = arith.constant 0 : index
    %c0_284 = arith.constant 0 : index
    %694 = vector.load %arg15[%c2_282, %c0_283, %c0_284] : memref<3x1x36xf32, #tpu.memory_space<vmem>>, vector<1x1x36xf32>
    %695 = vector.shape_cast %694 : vector<1x1x36xf32> to vector<1x36xf32>
    %cst_285 = arith.constant dense<0.000000e+00> : vector<16xf32>
    %696 = vector.multi_reduction <add>, %691, %cst_285 [1] : vector<16x36xf32> to vector<16xf32>
    %697 = vector.shape_cast %696 : vector<16xf32> to vector<16x1xf32>
    %cst_286 = arith.constant 3.600000e+01 : f32
    %698 = vector.broadcast %cst_286 : f32 to vector<16x1xf32>
    %699 = arith.divf %697, %698 : vector<16x1xf32>
    %700 = vector.broadcast %699 : vector<16x1xf32> to vector<16x36xf32>
    %701 = arith.subf %691, %700 : vector<16x36xf32>
    %702 = arith.mulf %701, %701 : vector<16x36xf32>
    %cst_287 = arith.constant dense<0.000000e+00> : vector<16xf32>
    %703 = vector.multi_reduction <add>, %702, %cst_287 [1] : vector<16x36xf32> to vector<16xf32>
    %704 = vector.shape_cast %703 : vector<16xf32> to vector<16x1xf32>
    %cst_288 = arith.constant 3.600000e+01 : f32
    %705 = vector.broadcast %cst_288 : f32 to vector<16x1xf32>
    %706 = arith.divf %704, %705 : vector<16x1xf32>
    %cst_289 = arith.constant 9.99999974E-6 : f32
    %707 = vector.broadcast %cst_289 : f32 to vector<16x1xf32>
    %708 = arith.addf %706, %707 : vector<16x1xf32>
    %709 = math.rsqrt %708 : vector<16x1xf32>
    %710 = vector.broadcast %709 : vector<16x1xf32> to vector<16x36xf32>
    %711 = arith.mulf %701, %710 : vector<16x36xf32>
    %712 = vector.broadcast %693 : vector<1x36xf32> to vector<16x36xf32>
    %713 = arith.mulf %711, %712 : vector<16x36xf32>
    %714 = vector.broadcast %695 : vector<1x36xf32> to vector<16x36xf32>
    %715 = arith.addf %713, %714 : vector<16x36xf32>
    %c0_290 = arith.constant 0 : index
    %c0_291 = arith.constant 0 : index
    %716 = vector.load %arg16[%c0_290, %c0_291] : memref<1x36xf32, #tpu.memory_space<vmem>>, vector<1x36xf32>
    %c0_292 = arith.constant 0 : index
    %c0_293 = arith.constant 0 : index
    %717 = vector.load %arg17[%c0_292, %c0_293] : memref<1x36xf32, #tpu.memory_space<vmem>>, vector<1x36xf32>
    %cst_294 = arith.constant dense<0.000000e+00> : vector<16xf32>
    %718 = vector.multi_reduction <add>, %715, %cst_294 [1] : vector<16x36xf32> to vector<16xf32>
    %719 = vector.shape_cast %718 : vector<16xf32> to vector<16x1xf32>
    %cst_295 = arith.constant 3.600000e+01 : f32
    %720 = vector.broadcast %cst_295 : f32 to vector<16x1xf32>
    %721 = arith.divf %719, %720 : vector<16x1xf32>
    %722 = vector.broadcast %721 : vector<16x1xf32> to vector<16x36xf32>
    %723 = arith.subf %715, %722 : vector<16x36xf32>
    %724 = arith.mulf %723, %723 : vector<16x36xf32>
    %cst_296 = arith.constant dense<0.000000e+00> : vector<16xf32>
    %725 = vector.multi_reduction <add>, %724, %cst_296 [1] : vector<16x36xf32> to vector<16xf32>
    %726 = vector.shape_cast %725 : vector<16xf32> to vector<16x1xf32>
    %cst_297 = arith.constant 3.600000e+01 : f32
    %727 = vector.broadcast %cst_297 : f32 to vector<16x1xf32>
    %728 = arith.divf %726, %727 : vector<16x1xf32>
    %cst_298 = arith.constant 9.99999974E-6 : f32
    %729 = vector.broadcast %cst_298 : f32 to vector<16x1xf32>
    %730 = arith.addf %728, %729 : vector<16x1xf32>
    %731 = math.rsqrt %730 : vector<16x1xf32>
    %732 = vector.broadcast %731 : vector<16x1xf32> to vector<16x36xf32>
    %733 = arith.mulf %723, %732 : vector<16x36xf32>
    %734 = vector.broadcast %716 : vector<1x36xf32> to vector<16x36xf32>
    %735 = arith.mulf %733, %734 : vector<16x36xf32>
    %736 = vector.broadcast %717 : vector<1x36xf32> to vector<16x36xf32>
    %737 = arith.addf %735, %736 : vector<16x36xf32>
    %c0_299 = arith.constant 0 : index
    %c0_300 = arith.constant 0 : index
    %738 = vector.load %arg3[%c0_299, %c0_300] : memref<1x36xf32, #tpu.memory_space<vmem>>, vector<1x36xf32>
    %c0_301 = arith.constant 0 : index
    %c0_302 = arith.constant 0 : index
    %c0_303 = arith.constant 0 : index
    %739 = vector.load %arg18[%c0_301, %c0_302, %c0_303] : memref<2x36x108xf32, #tpu.memory_space<vmem>>, vector<1x36x108xf32>
    %740 = vector.shape_cast %739 : vector<1x36x108xf32> to vector<36x108xf32>
    %741 = vector.extract_strided_slice %740 {offsets = [0, 72], sizes = [36, 36], strides = [1, 1]} : vector<36x108xf32> to vector<36x36xf32>
    %c0_304 = arith.constant 0 : index
    %c0_305 = arith.constant 0 : index
    %c0_306 = arith.constant 0 : index
    %742 = vector.load %arg19[%c0_304, %c0_305, %c0_306] : memref<2x1x108xf32, #tpu.memory_space<vmem>>, vector<1x1x108xf32>
    %743 = vector.shape_cast %742 : vector<1x1x108xf32> to vector<1x108xf32>
    %744 = vector.extract_strided_slice %743 {offsets = [0, 72], sizes = [1, 36], strides = [1, 1]} : vector<1x108xf32> to vector<1x36xf32>
    %cst_307 = arith.constant dense<0.000000e+00> : vector<1x36xf32>
    %745 = tpu.matmul %738, %741, %cst_307 {dimension_numbers = #tpu.dot_dimension_numbers<[1], [0], [0], [1], [0, 0, 1, 1], [], []>} : vector<1x36xf32>, vector<36x36xf32>, vector<1x36xf32> -> vector<1x36xf32>
    %746 = arith.addf %745, %744 : vector<1x36xf32>
    %c0_308 = arith.constant 0 : index
    %c0_309 = arith.constant 0 : index
    %c0_310 = arith.constant 0 : index
    %747 = vector.load %arg20[%c0_308, %c0_309, %c0_310] : memref<2x36x36xf32, #tpu.memory_space<vmem>>, vector<1x36x36xf32>
    %748 = vector.shape_cast %747 : vector<1x36x36xf32> to vector<36x36xf32>
    %cst_311 = arith.constant dense<0.000000e+00> : vector<1x36xf32>
    %749 = tpu.matmul %746, %748, %cst_311 {dimension_numbers = #tpu.dot_dimension_numbers<[1], [0], [0], [1], [0, 0, 1, 1], [], []>} : vector<1x36xf32>, vector<36x36xf32>, vector<1x36xf32> -> vector<1x36xf32>
    %c0_312 = arith.constant 0 : index
    %c0_313 = arith.constant 0 : index
    %c0_314 = arith.constant 0 : index
    %750 = vector.load %arg21[%c0_312, %c0_313, %c0_314] : memref<2x1x36xf32, #tpu.memory_space<vmem>>, vector<1x1x36xf32>
    %751 = vector.shape_cast %750 : vector<1x1x36xf32> to vector<1x36xf32>
    %752 = arith.addf %749, %751 : vector<1x36xf32>
    %753 = arith.addf %738, %752 : vector<1x36xf32>
    %c0_315 = arith.constant 0 : index
    %c0_316 = arith.constant 0 : index
    %c0_317 = arith.constant 0 : index
    %754 = vector.load %arg28[%c0_315, %c0_316, %c0_317] : memref<2x1x36xf32, #tpu.memory_space<vmem>>, vector<1x1x36xf32>
    %755 = vector.shape_cast %754 : vector<1x1x36xf32> to vector<1x36xf32>
    %c0_318 = arith.constant 0 : index
    %c0_319 = arith.constant 0 : index
    %c0_320 = arith.constant 0 : index
    %756 = vector.load %arg29[%c0_318, %c0_319, %c0_320] : memref<2x1x36xf32, #tpu.memory_space<vmem>>, vector<1x1x36xf32>
    %757 = vector.shape_cast %756 : vector<1x1x36xf32> to vector<1x36xf32>
    %cst_321 = arith.constant dense<0.000000e+00> : vector<1xf32>
    %758 = vector.multi_reduction <add>, %753, %cst_321 [1] : vector<1x36xf32> to vector<1xf32>
    %759 = vector.shape_cast %758 : vector<1xf32> to vector<1x1xf32>
    %cst_322 = arith.constant 3.600000e+01 : f32
    %760 = vector.broadcast %cst_322 : f32 to vector<1x1xf32>
    %761 = arith.divf %759, %760 : vector<1x1xf32>
    %762 = vector.broadcast %761 : vector<1x1xf32> to vector<1x36xf32>
    %763 = arith.subf %753, %762 : vector<1x36xf32>
    %764 = arith.mulf %763, %763 : vector<1x36xf32>
    %cst_323 = arith.constant dense<0.000000e+00> : vector<1xf32>
    %765 = vector.multi_reduction <add>, %764, %cst_323 [1] : vector<1x36xf32> to vector<1xf32>
    %766 = vector.shape_cast %765 : vector<1xf32> to vector<1x1xf32>
    %cst_324 = arith.constant 3.600000e+01 : f32
    %767 = vector.broadcast %cst_324 : f32 to vector<1x1xf32>
    %768 = arith.divf %766, %767 : vector<1x1xf32>
    %cst_325 = arith.constant 9.99999974E-6 : f32
    %769 = vector.broadcast %cst_325 : f32 to vector<1x1xf32>
    %770 = arith.addf %768, %769 : vector<1x1xf32>
    %771 = math.rsqrt %770 : vector<1x1xf32>
    %772 = vector.broadcast %771 : vector<1x1xf32> to vector<1x36xf32>
    %773 = arith.mulf %763, %772 : vector<1x36xf32>
    %774 = arith.mulf %773, %755 : vector<1x36xf32>
    %775 = arith.addf %774, %757 : vector<1x36xf32>
    %c0_326 = arith.constant 0 : index
    %c0_327 = arith.constant 0 : index
    %c0_328 = arith.constant 0 : index
    %776 = vector.load %arg22[%c0_326, %c0_327, %c0_328] : memref<2x36x36xf32, #tpu.memory_space<vmem>>, vector<1x36x36xf32>
    %777 = vector.shape_cast %776 : vector<1x36x36xf32> to vector<36x36xf32>
    %cst_329 = arith.constant dense<0.000000e+00> : vector<1x36xf32>
    %778 = tpu.matmul %775, %777, %cst_329 {dimension_numbers = #tpu.dot_dimension_numbers<[1], [0], [0], [1], [0, 0, 1, 1], [], []>} : vector<1x36xf32>, vector<36x36xf32>, vector<1x36xf32> -> vector<1x36xf32>
    %c0_330 = arith.constant 0 : index
    %c0_331 = arith.constant 0 : index
    %c0_332 = arith.constant 0 : index
    %779 = vector.load %arg23[%c0_330, %c0_331, %c0_332] : memref<2x1x36xf32, #tpu.memory_space<vmem>>, vector<1x1x36xf32>
    %780 = vector.shape_cast %779 : vector<1x1x36xf32> to vector<1x36xf32>
    %781 = arith.addf %778, %780 : vector<1x36xf32>
    %c0_333 = arith.constant 0 : index
    %c0_334 = arith.constant 0 : index
    %c0_335 = arith.constant 0 : index
    %782 = vector.load %arg24[%c0_333, %c0_334, %c0_335] : memref<2x36x72xf32, #tpu.memory_space<vmem>>, vector<1x36x72xf32>
    %783 = vector.shape_cast %782 : vector<1x36x72xf32> to vector<36x72xf32>
    %cst_336 = arith.constant dense<0.000000e+00> : vector<16x72xf32>
    %784 = tpu.matmul %737, %783, %cst_336 {dimension_numbers = #tpu.dot_dimension_numbers<[1], [0], [0], [1], [0, 0, 1, 1], [], []>} : vector<16x36xf32>, vector<36x72xf32>, vector<16x72xf32> -> vector<16x72xf32>
    %c0_337 = arith.constant 0 : index
    %c0_338 = arith.constant 0 : index
    %c0_339 = arith.constant 0 : index
    %785 = vector.load %arg25[%c0_337, %c0_338, %c0_339] : memref<2x1x72xf32, #tpu.memory_space<vmem>>, vector<1x1x72xf32>
    %786 = vector.shape_cast %785 : vector<1x1x72xf32> to vector<1x72xf32>
    %787 = vector.broadcast %786 : vector<1x72xf32> to vector<16x72xf32>
    %788 = arith.addf %784, %787 : vector<16x72xf32>
    %789 = vector.extract_strided_slice %788 {offsets = [0, 0], sizes = [16, 36], strides = [1, 1]} : vector<16x72xf32> to vector<16x36xf32>
    %790 = vector.extract_strided_slice %788 {offsets = [0, 36], sizes = [16, 36], strides = [1, 1]} : vector<16x72xf32> to vector<16x36xf32>
    %c0_340 = arith.constant 0 : index
    %c0_341 = arith.constant 0 : index
    %c0_342 = arith.constant 0 : index
    %791 = vector.load %arg26[%c0_340, %c0_341, %c0_342] : memref<2x36x36xf32, #tpu.memory_space<vmem>>, vector<1x36x36xf32>
    %792 = vector.shape_cast %791 : vector<1x36x36xf32> to vector<36x36xf32>
    %c0_343 = arith.constant 0 : index
    %c0_344 = arith.constant 0 : index
    %c0_345 = arith.constant 0 : index
    %793 = vector.load %arg27[%c0_343, %c0_344, %c0_345] : memref<2x1x36xf32, #tpu.memory_space<vmem>>, vector<1x1x36xf32>
    %794 = vector.shape_cast %793 : vector<1x1x36xf32> to vector<1x36xf32>
    %795 = vector.extract_strided_slice %781 {offsets = [0, 0], sizes = [1, 4], strides = [1, 1]} : vector<1x36xf32> to vector<1x4xf32>
    %cst_346 = arith.constant 5.000000e-01 : f32
    %796 = vector.broadcast %cst_346 : f32 to vector<1x4xf32>
    %797 = arith.mulf %795, %796 : vector<1x4xf32>
    %798 = vector.extract_strided_slice %789 {offsets = [0, 0], sizes = [16, 4], strides = [1, 1]} : vector<16x36xf32> to vector<16x4xf32>
    %799 = vector.extract_strided_slice %790 {offsets = [0, 0], sizes = [16, 4], strides = [1, 1]} : vector<16x36xf32> to vector<16x4xf32>
    %cst_347 = arith.constant dense<0.000000e+00> : vector<1x16xf32>
    %800 = tpu.matmul %797, %798, %cst_347 {dimension_numbers = #tpu.dot_dimension_numbers<[1], [1], [0], [0], [0, 0, 1, 0], [], []>} : vector<1x4xf32>, vector<16x4xf32>, vector<1x16xf32> -> vector<1x16xf32>
    %cst_348 = arith.constant dense<0xFF800000> : vector<1xf32>
    %801 = vector.multi_reduction <maximumf>, %800, %cst_348 [1] : vector<1x16xf32> to vector<1xf32>
    %802 = vector.shape_cast %801 : vector<1xf32> to vector<1x1xf32>
    %803 = vector.broadcast %802 : vector<1x1xf32> to vector<1x16xf32>
    %804 = arith.subf %800, %803 : vector<1x16xf32>
    %805 = math.exp %804 : vector<1x16xf32>
    %cst_349 = arith.constant dense<0.000000e+00> : vector<1xf32>
    %806 = vector.multi_reduction <add>, %805, %cst_349 [1] : vector<1x16xf32> to vector<1xf32>
    %807 = vector.shape_cast %806 : vector<1xf32> to vector<1x1xf32>
    %808 = tpu.reciprocal %807 {approx = true} : vector<1x1xf32> -> vector<1x1xf32>
    %809 = vector.broadcast %808 : vector<1x1xf32> to vector<1x16xf32>
    %810 = arith.mulf %805, %809 : vector<1x16xf32>
    %cst_350 = arith.constant dense<0.000000e+00> : vector<1x4xf32>
    %811 = tpu.matmul %810, %799, %cst_350 {dimension_numbers = #tpu.dot_dimension_numbers<[1], [0], [0], [1], [0, 0, 1, 1], [], []>} : vector<1x16xf32>, vector<16x4xf32>, vector<1x4xf32> -> vector<1x4xf32>
    %812 = vector.extract_strided_slice %781 {offsets = [0, 4], sizes = [1, 4], strides = [1, 1]} : vector<1x36xf32> to vector<1x4xf32>
    %cst_351 = arith.constant 5.000000e-01 : f32
    %813 = vector.broadcast %cst_351 : f32 to vector<1x4xf32>
    %814 = arith.mulf %812, %813 : vector<1x4xf32>
    %815 = vector.extract_strided_slice %789 {offsets = [0, 4], sizes = [16, 4], strides = [1, 1]} : vector<16x36xf32> to vector<16x4xf32>
    %816 = vector.extract_strided_slice %790 {offsets = [0, 4], sizes = [16, 4], strides = [1, 1]} : vector<16x36xf32> to vector<16x4xf32>
    %cst_352 = arith.constant dense<0.000000e+00> : vector<1x16xf32>
    %817 = tpu.matmul %814, %815, %cst_352 {dimension_numbers = #tpu.dot_dimension_numbers<[1], [1], [0], [0], [0, 0, 1, 0], [], []>} : vector<1x4xf32>, vector<16x4xf32>, vector<1x16xf32> -> vector<1x16xf32>
    %cst_353 = arith.constant dense<0xFF800000> : vector<1xf32>
    %818 = vector.multi_reduction <maximumf>, %817, %cst_353 [1] : vector<1x16xf32> to vector<1xf32>
    %819 = vector.shape_cast %818 : vector<1xf32> to vector<1x1xf32>
    %820 = vector.broadcast %819 : vector<1x1xf32> to vector<1x16xf32>
    %821 = arith.subf %817, %820 : vector<1x16xf32>
    %822 = math.exp %821 : vector<1x16xf32>
    %cst_354 = arith.constant dense<0.000000e+00> : vector<1xf32>
    %823 = vector.multi_reduction <add>, %822, %cst_354 [1] : vector<1x16xf32> to vector<1xf32>
    %824 = vector.shape_cast %823 : vector<1xf32> to vector<1x1xf32>
    %825 = tpu.reciprocal %824 {approx = true} : vector<1x1xf32> -> vector<1x1xf32>
    %826 = vector.broadcast %825 : vector<1x1xf32> to vector<1x16xf32>
    %827 = arith.mulf %822, %826 : vector<1x16xf32>
    %cst_355 = arith.constant dense<0.000000e+00> : vector<1x4xf32>
    %828 = tpu.matmul %827, %816, %cst_355 {dimension_numbers = #tpu.dot_dimension_numbers<[1], [0], [0], [1], [0, 0, 1, 1], [], []>} : vector<1x16xf32>, vector<16x4xf32>, vector<1x4xf32> -> vector<1x4xf32>
    %829 = vector.extract_strided_slice %781 {offsets = [0, 8], sizes = [1, 4], strides = [1, 1]} : vector<1x36xf32> to vector<1x4xf32>
    %cst_356 = arith.constant 5.000000e-01 : f32
    %830 = vector.broadcast %cst_356 : f32 to vector<1x4xf32>
    %831 = arith.mulf %829, %830 : vector<1x4xf32>
    %832 = vector.extract_strided_slice %789 {offsets = [0, 8], sizes = [16, 4], strides = [1, 1]} : vector<16x36xf32> to vector<16x4xf32>
    %833 = vector.extract_strided_slice %790 {offsets = [0, 8], sizes = [16, 4], strides = [1, 1]} : vector<16x36xf32> to vector<16x4xf32>
    %cst_357 = arith.constant dense<0.000000e+00> : vector<1x16xf32>
    %834 = tpu.matmul %831, %832, %cst_357 {dimension_numbers = #tpu.dot_dimension_numbers<[1], [1], [0], [0], [0, 0, 1, 0], [], []>} : vector<1x4xf32>, vector<16x4xf32>, vector<1x16xf32> -> vector<1x16xf32>
    %cst_358 = arith.constant dense<0xFF800000> : vector<1xf32>
    %835 = vector.multi_reduction <maximumf>, %834, %cst_358 [1] : vector<1x16xf32> to vector<1xf32>
    %836 = vector.shape_cast %835 : vector<1xf32> to vector<1x1xf32>
    %837 = vector.broadcast %836 : vector<1x1xf32> to vector<1x16xf32>
    %838 = arith.subf %834, %837 : vector<1x16xf32>
    %839 = math.exp %838 : vector<1x16xf32>
    %cst_359 = arith.constant dense<0.000000e+00> : vector<1xf32>
    %840 = vector.multi_reduction <add>, %839, %cst_359 [1] : vector<1x16xf32> to vector<1xf32>
    %841 = vector.shape_cast %840 : vector<1xf32> to vector<1x1xf32>
    %842 = tpu.reciprocal %841 {approx = true} : vector<1x1xf32> -> vector<1x1xf32>
    %843 = vector.broadcast %842 : vector<1x1xf32> to vector<1x16xf32>
    %844 = arith.mulf %839, %843 : vector<1x16xf32>
    %cst_360 = arith.constant dense<0.000000e+00> : vector<1x4xf32>
    %845 = tpu.matmul %844, %833, %cst_360 {dimension_numbers = #tpu.dot_dimension_numbers<[1], [0], [0], [1], [0, 0, 1, 1], [], []>} : vector<1x16xf32>, vector<16x4xf32>, vector<1x4xf32> -> vector<1x4xf32>
    %846 = vector.extract_strided_slice %781 {offsets = [0, 12], sizes = [1, 4], strides = [1, 1]} : vector<1x36xf32> to vector<1x4xf32>
    %cst_361 = arith.constant 5.000000e-01 : f32
    %847 = vector.broadcast %cst_361 : f32 to vector<1x4xf32>
    %848 = arith.mulf %846, %847 : vector<1x4xf32>
    %849 = vector.extract_strided_slice %789 {offsets = [0, 12], sizes = [16, 4], strides = [1, 1]} : vector<16x36xf32> to vector<16x4xf32>
    %850 = vector.extract_strided_slice %790 {offsets = [0, 12], sizes = [16, 4], strides = [1, 1]} : vector<16x36xf32> to vector<16x4xf32>
    %cst_362 = arith.constant dense<0.000000e+00> : vector<1x16xf32>
    %851 = tpu.matmul %848, %849, %cst_362 {dimension_numbers = #tpu.dot_dimension_numbers<[1], [1], [0], [0], [0, 0, 1, 0], [], []>} : vector<1x4xf32>, vector<16x4xf32>, vector<1x16xf32> -> vector<1x16xf32>
    %cst_363 = arith.constant dense<0xFF800000> : vector<1xf32>
    %852 = vector.multi_reduction <maximumf>, %851, %cst_363 [1] : vector<1x16xf32> to vector<1xf32>
    %853 = vector.shape_cast %852 : vector<1xf32> to vector<1x1xf32>
    %854 = vector.broadcast %853 : vector<1x1xf32> to vector<1x16xf32>
    %855 = arith.subf %851, %854 : vector<1x16xf32>
    %856 = math.exp %855 : vector<1x16xf32>
    %cst_364 = arith.constant dense<0.000000e+00> : vector<1xf32>
    %857 = vector.multi_reduction <add>, %856, %cst_364 [1] : vector<1x16xf32> to vector<1xf32>
    %858 = vector.shape_cast %857 : vector<1xf32> to vector<1x1xf32>
    %859 = tpu.reciprocal %858 {approx = true} : vector<1x1xf32> -> vector<1x1xf32>
    %860 = vector.broadcast %859 : vector<1x1xf32> to vector<1x16xf32>
    %861 = arith.mulf %856, %860 : vector<1x16xf32>
    %cst_365 = arith.constant dense<0.000000e+00> : vector<1x4xf32>
    %862 = tpu.matmul %861, %850, %cst_365 {dimension_numbers = #tpu.dot_dimension_numbers<[1], [0], [0], [1], [0, 0, 1, 1], [], []>} : vector<1x16xf32>, vector<16x4xf32>, vector<1x4xf32> -> vector<1x4xf32>
    %863 = vector.extract_strided_slice %781 {offsets = [0, 16], sizes = [1, 4], strides = [1, 1]} : vector<1x36xf32> to vector<1x4xf32>
    %cst_366 = arith.constant 5.000000e-01 : f32
    %864 = vector.broadcast %cst_366 : f32 to vector<1x4xf32>
    %865 = arith.mulf %863, %864 : vector<1x4xf32>
    %866 = vector.extract_strided_slice %789 {offsets = [0, 16], sizes = [16, 4], strides = [1, 1]} : vector<16x36xf32> to vector<16x4xf32>
    %867 = vector.extract_strided_slice %790 {offsets = [0, 16], sizes = [16, 4], strides = [1, 1]} : vector<16x36xf32> to vector<16x4xf32>
    %cst_367 = arith.constant dense<0.000000e+00> : vector<1x16xf32>
    %868 = tpu.matmul %865, %866, %cst_367 {dimension_numbers = #tpu.dot_dimension_numbers<[1], [1], [0], [0], [0, 0, 1, 0], [], []>} : vector<1x4xf32>, vector<16x4xf32>, vector<1x16xf32> -> vector<1x16xf32>
    %cst_368 = arith.constant dense<0xFF800000> : vector<1xf32>
    %869 = vector.multi_reduction <maximumf>, %868, %cst_368 [1] : vector<1x16xf32> to vector<1xf32>
    %870 = vector.shape_cast %869 : vector<1xf32> to vector<1x1xf32>
    %871 = vector.broadcast %870 : vector<1x1xf32> to vector<1x16xf32>
    %872 = arith.subf %868, %871 : vector<1x16xf32>
    %873 = math.exp %872 : vector<1x16xf32>
    %cst_369 = arith.constant dense<0.000000e+00> : vector<1xf32>
    %874 = vector.multi_reduction <add>, %873, %cst_369 [1] : vector<1x16xf32> to vector<1xf32>
    %875 = vector.shape_cast %874 : vector<1xf32> to vector<1x1xf32>
    %876 = tpu.reciprocal %875 {approx = true} : vector<1x1xf32> -> vector<1x1xf32>
    %877 = vector.broadcast %876 : vector<1x1xf32> to vector<1x16xf32>
    %878 = arith.mulf %873, %877 : vector<1x16xf32>
    %cst_370 = arith.constant dense<0.000000e+00> : vector<1x4xf32>
    %879 = tpu.matmul %878, %867, %cst_370 {dimension_numbers = #tpu.dot_dimension_numbers<[1], [0], [0], [1], [0, 0, 1, 1], [], []>} : vector<1x16xf32>, vector<16x4xf32>, vector<1x4xf32> -> vector<1x4xf32>
    %880 = vector.extract_strided_slice %781 {offsets = [0, 20], sizes = [1, 4], strides = [1, 1]} : vector<1x36xf32> to vector<1x4xf32>
    %cst_371 = arith.constant 5.000000e-01 : f32
    %881 = vector.broadcast %cst_371 : f32 to vector<1x4xf32>
    %882 = arith.mulf %880, %881 : vector<1x4xf32>
    %883 = vector.extract_strided_slice %789 {offsets = [0, 20], sizes = [16, 4], strides = [1, 1]} : vector<16x36xf32> to vector<16x4xf32>
    %884 = vector.extract_strided_slice %790 {offsets = [0, 20], sizes = [16, 4], strides = [1, 1]} : vector<16x36xf32> to vector<16x4xf32>
    %cst_372 = arith.constant dense<0.000000e+00> : vector<1x16xf32>
    %885 = tpu.matmul %882, %883, %cst_372 {dimension_numbers = #tpu.dot_dimension_numbers<[1], [1], [0], [0], [0, 0, 1, 0], [], []>} : vector<1x4xf32>, vector<16x4xf32>, vector<1x16xf32> -> vector<1x16xf32>
    %cst_373 = arith.constant dense<0xFF800000> : vector<1xf32>
    %886 = vector.multi_reduction <maximumf>, %885, %cst_373 [1] : vector<1x16xf32> to vector<1xf32>
    %887 = vector.shape_cast %886 : vector<1xf32> to vector<1x1xf32>
    %888 = vector.broadcast %887 : vector<1x1xf32> to vector<1x16xf32>
    %889 = arith.subf %885, %888 : vector<1x16xf32>
    %890 = math.exp %889 : vector<1x16xf32>
    %cst_374 = arith.constant dense<0.000000e+00> : vector<1xf32>
    %891 = vector.multi_reduction <add>, %890, %cst_374 [1] : vector<1x16xf32> to vector<1xf32>
    %892 = vector.shape_cast %891 : vector<1xf32> to vector<1x1xf32>
    %893 = tpu.reciprocal %892 {approx = true} : vector<1x1xf32> -> vector<1x1xf32>
    %894 = vector.broadcast %893 : vector<1x1xf32> to vector<1x16xf32>
    %895 = arith.mulf %890, %894 : vector<1x16xf32>
    %cst_375 = arith.constant dense<0.000000e+00> : vector<1x4xf32>
    %896 = tpu.matmul %895, %884, %cst_375 {dimension_numbers = #tpu.dot_dimension_numbers<[1], [0], [0], [1], [0, 0, 1, 1], [], []>} : vector<1x16xf32>, vector<16x4xf32>, vector<1x4xf32> -> vector<1x4xf32>
    %897 = vector.extract_strided_slice %781 {offsets = [0, 24], sizes = [1, 4], strides = [1, 1]} : vector<1x36xf32> to vector<1x4xf32>
    %cst_376 = arith.constant 5.000000e-01 : f32
    %898 = vector.broadcast %cst_376 : f32 to vector<1x4xf32>
    %899 = arith.mulf %897, %898 : vector<1x4xf32>
    %900 = vector.extract_strided_slice %789 {offsets = [0, 24], sizes = [16, 4], strides = [1, 1]} : vector<16x36xf32> to vector<16x4xf32>
    %901 = vector.extract_strided_slice %790 {offsets = [0, 24], sizes = [16, 4], strides = [1, 1]} : vector<16x36xf32> to vector<16x4xf32>
    %cst_377 = arith.constant dense<0.000000e+00> : vector<1x16xf32>
    %902 = tpu.matmul %899, %900, %cst_377 {dimension_numbers = #tpu.dot_dimension_numbers<[1], [1], [0], [0], [0, 0, 1, 0], [], []>} : vector<1x4xf32>, vector<16x4xf32>, vector<1x16xf32> -> vector<1x16xf32>
    %cst_378 = arith.constant dense<0xFF800000> : vector<1xf32>
    %903 = vector.multi_reduction <maximumf>, %902, %cst_378 [1] : vector<1x16xf32> to vector<1xf32>
    %904 = vector.shape_cast %903 : vector<1xf32> to vector<1x1xf32>
    %905 = vector.broadcast %904 : vector<1x1xf32> to vector<1x16xf32>
    %906 = arith.subf %902, %905 : vector<1x16xf32>
    %907 = math.exp %906 : vector<1x16xf32>
    %cst_379 = arith.constant dense<0.000000e+00> : vector<1xf32>
    %908 = vector.multi_reduction <add>, %907, %cst_379 [1] : vector<1x16xf32> to vector<1xf32>
    %909 = vector.shape_cast %908 : vector<1xf32> to vector<1x1xf32>
    %910 = tpu.reciprocal %909 {approx = true} : vector<1x1xf32> -> vector<1x1xf32>
    %911 = vector.broadcast %910 : vector<1x1xf32> to vector<1x16xf32>
    %912 = arith.mulf %907, %911 : vector<1x16xf32>
    %cst_380 = arith.constant dense<0.000000e+00> : vector<1x4xf32>
    %913 = tpu.matmul %912, %901, %cst_380 {dimension_numbers = #tpu.dot_dimension_numbers<[1], [0], [0], [1], [0, 0, 1, 1], [], []>} : vector<1x16xf32>, vector<16x4xf32>, vector<1x4xf32> -> vector<1x4xf32>
    %914 = vector.extract_strided_slice %781 {offsets = [0, 28], sizes = [1, 4], strides = [1, 1]} : vector<1x36xf32> to vector<1x4xf32>
    %cst_381 = arith.constant 5.000000e-01 : f32
    %915 = vector.broadcast %cst_381 : f32 to vector<1x4xf32>
    %916 = arith.mulf %914, %915 : vector<1x4xf32>
    %917 = vector.extract_strided_slice %789 {offsets = [0, 28], sizes = [16, 4], strides = [1, 1]} : vector<16x36xf32> to vector<16x4xf32>
    %918 = vector.extract_strided_slice %790 {offsets = [0, 28], sizes = [16, 4], strides = [1, 1]} : vector<16x36xf32> to vector<16x4xf32>
    %cst_382 = arith.constant dense<0.000000e+00> : vector<1x16xf32>
    %919 = tpu.matmul %916, %917, %cst_382 {dimension_numbers = #tpu.dot_dimension_numbers<[1], [1], [0], [0], [0, 0, 1, 0], [], []>} : vector<1x4xf32>, vector<16x4xf32>, vector<1x16xf32> -> vector<1x16xf32>
    %cst_383 = arith.constant dense<0xFF800000> : vector<1xf32>
    %920 = vector.multi_reduction <maximumf>, %919, %cst_383 [1] : vector<1x16xf32> to vector<1xf32>
    %921 = vector.shape_cast %920 : vector<1xf32> to vector<1x1xf32>
    %922 = vector.broadcast %921 : vector<1x1xf32> to vector<1x16xf32>
    %923 = arith.subf %919, %922 : vector<1x16xf32>
    %924 = math.exp %923 : vector<1x16xf32>
    %cst_384 = arith.constant dense<0.000000e+00> : vector<1xf32>
    %925 = vector.multi_reduction <add>, %924, %cst_384 [1] : vector<1x16xf32> to vector<1xf32>
    %926 = vector.shape_cast %925 : vector<1xf32> to vector<1x1xf32>
    %927 = tpu.reciprocal %926 {approx = true} : vector<1x1xf32> -> vector<1x1xf32>
    %928 = vector.broadcast %927 : vector<1x1xf32> to vector<1x16xf32>
    %929 = arith.mulf %924, %928 : vector<1x16xf32>
    %cst_385 = arith.constant dense<0.000000e+00> : vector<1x4xf32>
    %930 = tpu.matmul %929, %918, %cst_385 {dimension_numbers = #tpu.dot_dimension_numbers<[1], [0], [0], [1], [0, 0, 1, 1], [], []>} : vector<1x16xf32>, vector<16x4xf32>, vector<1x4xf32> -> vector<1x4xf32>
    %931 = vector.extract_strided_slice %781 {offsets = [0, 32], sizes = [1, 4], strides = [1, 1]} : vector<1x36xf32> to vector<1x4xf32>
    %cst_386 = arith.constant 5.000000e-01 : f32
    %932 = vector.broadcast %cst_386 : f32 to vector<1x4xf32>
    %933 = arith.mulf %931, %932 : vector<1x4xf32>
    %934 = vector.extract_strided_slice %789 {offsets = [0, 32], sizes = [16, 4], strides = [1, 1]} : vector<16x36xf32> to vector<16x4xf32>
    %935 = vector.extract_strided_slice %790 {offsets = [0, 32], sizes = [16, 4], strides = [1, 1]} : vector<16x36xf32> to vector<16x4xf32>
    %cst_387 = arith.constant dense<0.000000e+00> : vector<1x16xf32>
    %936 = tpu.matmul %933, %934, %cst_387 {dimension_numbers = #tpu.dot_dimension_numbers<[1], [1], [0], [0], [0, 0, 1, 0], [], []>} : vector<1x4xf32>, vector<16x4xf32>, vector<1x16xf32> -> vector<1x16xf32>
    %cst_388 = arith.constant dense<0xFF800000> : vector<1xf32>
    %937 = vector.multi_reduction <maximumf>, %936, %cst_388 [1] : vector<1x16xf32> to vector<1xf32>
    %938 = vector.shape_cast %937 : vector<1xf32> to vector<1x1xf32>
    %939 = vector.broadcast %938 : vector<1x1xf32> to vector<1x16xf32>
    %940 = arith.subf %936, %939 : vector<1x16xf32>
    %941 = math.exp %940 : vector<1x16xf32>
    %cst_389 = arith.constant dense<0.000000e+00> : vector<1xf32>
    %942 = vector.multi_reduction <add>, %941, %cst_389 [1] : vector<1x16xf32> to vector<1xf32>
    %943 = vector.shape_cast %942 : vector<1xf32> to vector<1x1xf32>
    %944 = tpu.reciprocal %943 {approx = true} : vector<1x1xf32> -> vector<1x1xf32>
    %945 = vector.broadcast %944 : vector<1x1xf32> to vector<1x16xf32>
    %946 = arith.mulf %941, %945 : vector<1x16xf32>
    %cst_390 = arith.constant dense<0.000000e+00> : vector<1x4xf32>
    %947 = tpu.matmul %946, %935, %cst_390 {dimension_numbers = #tpu.dot_dimension_numbers<[1], [0], [0], [1], [0, 0, 1, 1], [], []>} : vector<1x16xf32>, vector<16x4xf32>, vector<1x4xf32> -> vector<1x4xf32>
    %948 = tpu.concatenate %811, %828, %845, %862, %879, %896, %913, %930, %947 in 1 : vector<1x4xf32>, vector<1x4xf32>, vector<1x4xf32>, vector<1x4xf32>, vector<1x4xf32>, vector<1x4xf32>, vector<1x4xf32>, vector<1x4xf32>, vector<1x4xf32> -> vector<1x36xf32>
    %cst_391 = arith.constant dense<0.000000e+00> : vector<1x36xf32>
    %949 = tpu.matmul %948, %792, %cst_391 {dimension_numbers = #tpu.dot_dimension_numbers<[1], [0], [0], [1], [0, 0, 1, 1], [], []>} : vector<1x36xf32>, vector<36x36xf32>, vector<1x36xf32> -> vector<1x36xf32>
    %950 = arith.addf %949, %794 : vector<1x36xf32>
    %951 = arith.addf %775, %950 : vector<1x36xf32>
    %c0_392 = arith.constant 0 : index
    %c0_393 = arith.constant 0 : index
    %c0_394 = arith.constant 0 : index
    %952 = vector.load %arg30[%c0_392, %c0_393, %c0_394] : memref<2x1x36xf32, #tpu.memory_space<vmem>>, vector<1x1x36xf32>
    %953 = vector.shape_cast %952 : vector<1x1x36xf32> to vector<1x36xf32>
    %c0_395 = arith.constant 0 : index
    %c0_396 = arith.constant 0 : index
    %c0_397 = arith.constant 0 : index
    %954 = vector.load %arg31[%c0_395, %c0_396, %c0_397] : memref<2x1x36xf32, #tpu.memory_space<vmem>>, vector<1x1x36xf32>
    %955 = vector.shape_cast %954 : vector<1x1x36xf32> to vector<1x36xf32>
    %cst_398 = arith.constant dense<0.000000e+00> : vector<1xf32>
    %956 = vector.multi_reduction <add>, %951, %cst_398 [1] : vector<1x36xf32> to vector<1xf32>
    %957 = vector.shape_cast %956 : vector<1xf32> to vector<1x1xf32>
    %cst_399 = arith.constant 3.600000e+01 : f32
    %958 = vector.broadcast %cst_399 : f32 to vector<1x1xf32>
    %959 = arith.divf %957, %958 : vector<1x1xf32>
    %960 = vector.broadcast %959 : vector<1x1xf32> to vector<1x36xf32>
    %961 = arith.subf %951, %960 : vector<1x36xf32>
    %962 = arith.mulf %961, %961 : vector<1x36xf32>
    %cst_400 = arith.constant dense<0.000000e+00> : vector<1xf32>
    %963 = vector.multi_reduction <add>, %962, %cst_400 [1] : vector<1x36xf32> to vector<1xf32>
    %964 = vector.shape_cast %963 : vector<1xf32> to vector<1x1xf32>
    %cst_401 = arith.constant 3.600000e+01 : f32
    %965 = vector.broadcast %cst_401 : f32 to vector<1x1xf32>
    %966 = arith.divf %964, %965 : vector<1x1xf32>
    %cst_402 = arith.constant 9.99999974E-6 : f32
    %967 = vector.broadcast %cst_402 : f32 to vector<1x1xf32>
    %968 = arith.addf %966, %967 : vector<1x1xf32>
    %969 = math.rsqrt %968 : vector<1x1xf32>
    %970 = vector.broadcast %969 : vector<1x1xf32> to vector<1x36xf32>
    %971 = arith.mulf %961, %970 : vector<1x36xf32>
    %972 = arith.mulf %971, %953 : vector<1x36xf32>
    %973 = arith.addf %972, %955 : vector<1x36xf32>
    %c0_403 = arith.constant 0 : index
    %c0_404 = arith.constant 0 : index
    %c0_405 = arith.constant 0 : index
    %974 = vector.load %arg34[%c0_403, %c0_404, %c0_405] : memref<2x36x64xf32, #tpu.memory_space<vmem>>, vector<1x36x64xf32>
    %975 = vector.shape_cast %974 : vector<1x36x64xf32> to vector<36x64xf32>
    %cst_406 = arith.constant dense<0.000000e+00> : vector<1x64xf32>
    %976 = tpu.matmul %973, %975, %cst_406 {dimension_numbers = #tpu.dot_dimension_numbers<[1], [0], [0], [1], [0, 0, 1, 1], [], []>} : vector<1x36xf32>, vector<36x64xf32>, vector<1x64xf32> -> vector<1x64xf32>
    %c0_407 = arith.constant 0 : index
    %c0_408 = arith.constant 0 : index
    %c0_409 = arith.constant 0 : index
    %977 = vector.load %arg35[%c0_407, %c0_408, %c0_409] : memref<2x1x64xf32, #tpu.memory_space<vmem>>, vector<1x1x64xf32>
    %978 = vector.shape_cast %977 : vector<1x1x64xf32> to vector<1x64xf32>
    %979 = arith.addf %976, %978 : vector<1x64xf32>
    %cst_410 = arith.constant 0.000000e+00 : f32
    %980 = vector.broadcast %cst_410 : f32 to vector<1x64xf32>
    %981 = arith.maximumf %979, %980 : vector<1x64xf32>
    %c0_411 = arith.constant 0 : index
    %c0_412 = arith.constant 0 : index
    %c0_413 = arith.constant 0 : index
    %982 = vector.load %arg36[%c0_411, %c0_412, %c0_413] : memref<2x64x36xf32, #tpu.memory_space<vmem>>, vector<1x64x36xf32>
    %983 = vector.shape_cast %982 : vector<1x64x36xf32> to vector<64x36xf32>
    %cst_414 = arith.constant dense<0.000000e+00> : vector<1x36xf32>
    %984 = tpu.matmul %981, %983, %cst_414 {dimension_numbers = #tpu.dot_dimension_numbers<[1], [0], [0], [1], [0, 0, 1, 1], [], []>} : vector<1x64xf32>, vector<64x36xf32>, vector<1x36xf32> -> vector<1x36xf32>
    %c0_415 = arith.constant 0 : index
    %c0_416 = arith.constant 0 : index
    %c0_417 = arith.constant 0 : index
    %985 = vector.load %arg37[%c0_415, %c0_416, %c0_417] : memref<2x1x36xf32, #tpu.memory_space<vmem>>, vector<1x1x36xf32>
    %986 = vector.shape_cast %985 : vector<1x1x36xf32> to vector<1x36xf32>
    %987 = arith.addf %984, %986 : vector<1x36xf32>
    %988 = arith.addf %973, %987 : vector<1x36xf32>
    %c0_418 = arith.constant 0 : index
    %c0_419 = arith.constant 0 : index
    %c0_420 = arith.constant 0 : index
    %989 = vector.load %arg32[%c0_418, %c0_419, %c0_420] : memref<2x1x36xf32, #tpu.memory_space<vmem>>, vector<1x1x36xf32>
    %990 = vector.shape_cast %989 : vector<1x1x36xf32> to vector<1x36xf32>
    %c0_421 = arith.constant 0 : index
    %c0_422 = arith.constant 0 : index
    %c0_423 = arith.constant 0 : index
    %991 = vector.load %arg33[%c0_421, %c0_422, %c0_423] : memref<2x1x36xf32, #tpu.memory_space<vmem>>, vector<1x1x36xf32>
    %992 = vector.shape_cast %991 : vector<1x1x36xf32> to vector<1x36xf32>
    %cst_424 = arith.constant dense<0.000000e+00> : vector<1xf32>
    %993 = vector.multi_reduction <add>, %988, %cst_424 [1] : vector<1x36xf32> to vector<1xf32>
    %994 = vector.shape_cast %993 : vector<1xf32> to vector<1x1xf32>
    %cst_425 = arith.constant 3.600000e+01 : f32
    %995 = vector.broadcast %cst_425 : f32 to vector<1x1xf32>
    %996 = arith.divf %994, %995 : vector<1x1xf32>
    %997 = vector.broadcast %996 : vector<1x1xf32> to vector<1x36xf32>
    %998 = arith.subf %988, %997 : vector<1x36xf32>
    %999 = arith.mulf %998, %998 : vector<1x36xf32>
    %cst_426 = arith.constant dense<0.000000e+00> : vector<1xf32>
    %1000 = vector.multi_reduction <add>, %999, %cst_426 [1] : vector<1x36xf32> to vector<1xf32>
    %1001 = vector.shape_cast %1000 : vector<1xf32> to vector<1x1xf32>
    %cst_427 = arith.constant 3.600000e+01 : f32
    %1002 = vector.broadcast %cst_427 : f32 to vector<1x1xf32>
    %1003 = arith.divf %1001, %1002 : vector<1x1xf32>
    %cst_428 = arith.constant 9.99999974E-6 : f32
    %1004 = vector.broadcast %cst_428 : f32 to vector<1x1xf32>
    %1005 = arith.addf %1003, %1004 : vector<1x1xf32>
    %1006 = math.rsqrt %1005 : vector<1x1xf32>
    %1007 = vector.broadcast %1006 : vector<1x1xf32> to vector<1x36xf32>
    %1008 = arith.mulf %998, %1007 : vector<1x36xf32>
    %1009 = arith.mulf %1008, %990 : vector<1x36xf32>
    %1010 = arith.addf %1009, %992 : vector<1x36xf32>
    %c1_429 = arith.constant 1 : index
    %c0_430 = arith.constant 0 : index
    %c0_431 = arith.constant 0 : index
    %1011 = vector.load %arg18[%c1_429, %c0_430, %c0_431] : memref<2x36x108xf32, #tpu.memory_space<vmem>>, vector<1x36x108xf32>
    %1012 = vector.shape_cast %1011 : vector<1x36x108xf32> to vector<36x108xf32>
    %1013 = vector.extract_strided_slice %1012 {offsets = [0, 72], sizes = [36, 36], strides = [1, 1]} : vector<36x108xf32> to vector<36x36xf32>
    %c1_432 = arith.constant 1 : index
    %c0_433 = arith.constant 0 : index
    %c0_434 = arith.constant 0 : index
    %1014 = vector.load %arg19[%c1_432, %c0_433, %c0_434] : memref<2x1x108xf32, #tpu.memory_space<vmem>>, vector<1x1x108xf32>
    %1015 = vector.shape_cast %1014 : vector<1x1x108xf32> to vector<1x108xf32>
    %1016 = vector.extract_strided_slice %1015 {offsets = [0, 72], sizes = [1, 36], strides = [1, 1]} : vector<1x108xf32> to vector<1x36xf32>
    %cst_435 = arith.constant dense<0.000000e+00> : vector<1x36xf32>
    %1017 = tpu.matmul %1010, %1013, %cst_435 {dimension_numbers = #tpu.dot_dimension_numbers<[1], [0], [0], [1], [0, 0, 1, 1], [], []>} : vector<1x36xf32>, vector<36x36xf32>, vector<1x36xf32> -> vector<1x36xf32>
    %1018 = arith.addf %1017, %1016 : vector<1x36xf32>
    %c1_436 = arith.constant 1 : index
    %c0_437 = arith.constant 0 : index
    %c0_438 = arith.constant 0 : index
    %1019 = vector.load %arg20[%c1_436, %c0_437, %c0_438] : memref<2x36x36xf32, #tpu.memory_space<vmem>>, vector<1x36x36xf32>
    %1020 = vector.shape_cast %1019 : vector<1x36x36xf32> to vector<36x36xf32>
    %cst_439 = arith.constant dense<0.000000e+00> : vector<1x36xf32>
    %1021 = tpu.matmul %1018, %1020, %cst_439 {dimension_numbers = #tpu.dot_dimension_numbers<[1], [0], [0], [1], [0, 0, 1, 1], [], []>} : vector<1x36xf32>, vector<36x36xf32>, vector<1x36xf32> -> vector<1x36xf32>
    %c1_440 = arith.constant 1 : index
    %c0_441 = arith.constant 0 : index
    %c0_442 = arith.constant 0 : index
    %1022 = vector.load %arg21[%c1_440, %c0_441, %c0_442] : memref<2x1x36xf32, #tpu.memory_space<vmem>>, vector<1x1x36xf32>
    %1023 = vector.shape_cast %1022 : vector<1x1x36xf32> to vector<1x36xf32>
    %1024 = arith.addf %1021, %1023 : vector<1x36xf32>
    %1025 = arith.addf %1010, %1024 : vector<1x36xf32>
    %c1_443 = arith.constant 1 : index
    %c0_444 = arith.constant 0 : index
    %c0_445 = arith.constant 0 : index
    %1026 = vector.load %arg28[%c1_443, %c0_444, %c0_445] : memref<2x1x36xf32, #tpu.memory_space<vmem>>, vector<1x1x36xf32>
    %1027 = vector.shape_cast %1026 : vector<1x1x36xf32> to vector<1x36xf32>
    %c1_446 = arith.constant 1 : index
    %c0_447 = arith.constant 0 : index
    %c0_448 = arith.constant 0 : index
    %1028 = vector.load %arg29[%c1_446, %c0_447, %c0_448] : memref<2x1x36xf32, #tpu.memory_space<vmem>>, vector<1x1x36xf32>
    %1029 = vector.shape_cast %1028 : vector<1x1x36xf32> to vector<1x36xf32>
    %cst_449 = arith.constant dense<0.000000e+00> : vector<1xf32>
    %1030 = vector.multi_reduction <add>, %1025, %cst_449 [1] : vector<1x36xf32> to vector<1xf32>
    %1031 = vector.shape_cast %1030 : vector<1xf32> to vector<1x1xf32>
    %cst_450 = arith.constant 3.600000e+01 : f32
    %1032 = vector.broadcast %cst_450 : f32 to vector<1x1xf32>
    %1033 = arith.divf %1031, %1032 : vector<1x1xf32>
    %1034 = vector.broadcast %1033 : vector<1x1xf32> to vector<1x36xf32>
    %1035 = arith.subf %1025, %1034 : vector<1x36xf32>
    %1036 = arith.mulf %1035, %1035 : vector<1x36xf32>
    %cst_451 = arith.constant dense<0.000000e+00> : vector<1xf32>
    %1037 = vector.multi_reduction <add>, %1036, %cst_451 [1] : vector<1x36xf32> to vector<1xf32>
    %1038 = vector.shape_cast %1037 : vector<1xf32> to vector<1x1xf32>
    %cst_452 = arith.constant 3.600000e+01 : f32
    %1039 = vector.broadcast %cst_452 : f32 to vector<1x1xf32>
    %1040 = arith.divf %1038, %1039 : vector<1x1xf32>
    %cst_453 = arith.constant 9.99999974E-6 : f32
    %1041 = vector.broadcast %cst_453 : f32 to vector<1x1xf32>
    %1042 = arith.addf %1040, %1041 : vector<1x1xf32>
    %1043 = math.rsqrt %1042 : vector<1x1xf32>
    %1044 = vector.broadcast %1043 : vector<1x1xf32> to vector<1x36xf32>
    %1045 = arith.mulf %1035, %1044 : vector<1x36xf32>
    %1046 = arith.mulf %1045, %1027 : vector<1x36xf32>
    %1047 = arith.addf %1046, %1029 : vector<1x36xf32>
    %c1_454 = arith.constant 1 : index
    %c0_455 = arith.constant 0 : index
    %c0_456 = arith.constant 0 : index
    %1048 = vector.load %arg22[%c1_454, %c0_455, %c0_456] : memref<2x36x36xf32, #tpu.memory_space<vmem>>, vector<1x36x36xf32>
    %1049 = vector.shape_cast %1048 : vector<1x36x36xf32> to vector<36x36xf32>
    %cst_457 = arith.constant dense<0.000000e+00> : vector<1x36xf32>
    %1050 = tpu.matmul %1047, %1049, %cst_457 {dimension_numbers = #tpu.dot_dimension_numbers<[1], [0], [0], [1], [0, 0, 1, 1], [], []>} : vector<1x36xf32>, vector<36x36xf32>, vector<1x36xf32> -> vector<1x36xf32>
    %c1_458 = arith.constant 1 : index
    %c0_459 = arith.constant 0 : index
    %c0_460 = arith.constant 0 : index
    %1051 = vector.load %arg23[%c1_458, %c0_459, %c0_460] : memref<2x1x36xf32, #tpu.memory_space<vmem>>, vector<1x1x36xf32>
    %1052 = vector.shape_cast %1051 : vector<1x1x36xf32> to vector<1x36xf32>
    %1053 = arith.addf %1050, %1052 : vector<1x36xf32>
    %c1_461 = arith.constant 1 : index
    %c0_462 = arith.constant 0 : index
    %c0_463 = arith.constant 0 : index
    %1054 = vector.load %arg24[%c1_461, %c0_462, %c0_463] : memref<2x36x72xf32, #tpu.memory_space<vmem>>, vector<1x36x72xf32>
    %1055 = vector.shape_cast %1054 : vector<1x36x72xf32> to vector<36x72xf32>
    %cst_464 = arith.constant dense<0.000000e+00> : vector<16x72xf32>
    %1056 = tpu.matmul %737, %1055, %cst_464 {dimension_numbers = #tpu.dot_dimension_numbers<[1], [0], [0], [1], [0, 0, 1, 1], [], []>} : vector<16x36xf32>, vector<36x72xf32>, vector<16x72xf32> -> vector<16x72xf32>
    %c1_465 = arith.constant 1 : index
    %c0_466 = arith.constant 0 : index
    %c0_467 = arith.constant 0 : index
    %1057 = vector.load %arg25[%c1_465, %c0_466, %c0_467] : memref<2x1x72xf32, #tpu.memory_space<vmem>>, vector<1x1x72xf32>
    %1058 = vector.shape_cast %1057 : vector<1x1x72xf32> to vector<1x72xf32>
    %1059 = vector.broadcast %1058 : vector<1x72xf32> to vector<16x72xf32>
    %1060 = arith.addf %1056, %1059 : vector<16x72xf32>
    %1061 = vector.extract_strided_slice %1060 {offsets = [0, 0], sizes = [16, 36], strides = [1, 1]} : vector<16x72xf32> to vector<16x36xf32>
    %1062 = vector.extract_strided_slice %1060 {offsets = [0, 36], sizes = [16, 36], strides = [1, 1]} : vector<16x72xf32> to vector<16x36xf32>
    %c1_468 = arith.constant 1 : index
    %c0_469 = arith.constant 0 : index
    %c0_470 = arith.constant 0 : index
    %1063 = vector.load %arg26[%c1_468, %c0_469, %c0_470] : memref<2x36x36xf32, #tpu.memory_space<vmem>>, vector<1x36x36xf32>
    %1064 = vector.shape_cast %1063 : vector<1x36x36xf32> to vector<36x36xf32>
    %c1_471 = arith.constant 1 : index
    %c0_472 = arith.constant 0 : index
    %c0_473 = arith.constant 0 : index
    %1065 = vector.load %arg27[%c1_471, %c0_472, %c0_473] : memref<2x1x36xf32, #tpu.memory_space<vmem>>, vector<1x1x36xf32>
    %1066 = vector.shape_cast %1065 : vector<1x1x36xf32> to vector<1x36xf32>
    %1067 = vector.extract_strided_slice %1053 {offsets = [0, 0], sizes = [1, 4], strides = [1, 1]} : vector<1x36xf32> to vector<1x4xf32>
    %cst_474 = arith.constant 5.000000e-01 : f32
    %1068 = vector.broadcast %cst_474 : f32 to vector<1x4xf32>
    %1069 = arith.mulf %1067, %1068 : vector<1x4xf32>
    %1070 = vector.extract_strided_slice %1061 {offsets = [0, 0], sizes = [16, 4], strides = [1, 1]} : vector<16x36xf32> to vector<16x4xf32>
    %1071 = vector.extract_strided_slice %1062 {offsets = [0, 0], sizes = [16, 4], strides = [1, 1]} : vector<16x36xf32> to vector<16x4xf32>
    %cst_475 = arith.constant dense<0.000000e+00> : vector<1x16xf32>
    %1072 = tpu.matmul %1069, %1070, %cst_475 {dimension_numbers = #tpu.dot_dimension_numbers<[1], [1], [0], [0], [0, 0, 1, 0], [], []>} : vector<1x4xf32>, vector<16x4xf32>, vector<1x16xf32> -> vector<1x16xf32>
    %cst_476 = arith.constant dense<0xFF800000> : vector<1xf32>
    %1073 = vector.multi_reduction <maximumf>, %1072, %cst_476 [1] : vector<1x16xf32> to vector<1xf32>
    %1074 = vector.shape_cast %1073 : vector<1xf32> to vector<1x1xf32>
    %1075 = vector.broadcast %1074 : vector<1x1xf32> to vector<1x16xf32>
    %1076 = arith.subf %1072, %1075 : vector<1x16xf32>
    %1077 = math.exp %1076 : vector<1x16xf32>
    %cst_477 = arith.constant dense<0.000000e+00> : vector<1xf32>
    %1078 = vector.multi_reduction <add>, %1077, %cst_477 [1] : vector<1x16xf32> to vector<1xf32>
    %1079 = vector.shape_cast %1078 : vector<1xf32> to vector<1x1xf32>
    %1080 = tpu.reciprocal %1079 {approx = true} : vector<1x1xf32> -> vector<1x1xf32>
    %1081 = vector.broadcast %1080 : vector<1x1xf32> to vector<1x16xf32>
    %1082 = arith.mulf %1077, %1081 : vector<1x16xf32>
    %cst_478 = arith.constant dense<0.000000e+00> : vector<1x4xf32>
    %1083 = tpu.matmul %1082, %1071, %cst_478 {dimension_numbers = #tpu.dot_dimension_numbers<[1], [0], [0], [1], [0, 0, 1, 1], [], []>} : vector<1x16xf32>, vector<16x4xf32>, vector<1x4xf32> -> vector<1x4xf32>
    %1084 = vector.extract_strided_slice %1053 {offsets = [0, 4], sizes = [1, 4], strides = [1, 1]} : vector<1x36xf32> to vector<1x4xf32>
    %cst_479 = arith.constant 5.000000e-01 : f32
    %1085 = vector.broadcast %cst_479 : f32 to vector<1x4xf32>
    %1086 = arith.mulf %1084, %1085 : vector<1x4xf32>
    %1087 = vector.extract_strided_slice %1061 {offsets = [0, 4], sizes = [16, 4], strides = [1, 1]} : vector<16x36xf32> to vector<16x4xf32>
    %1088 = vector.extract_strided_slice %1062 {offsets = [0, 4], sizes = [16, 4], strides = [1, 1]} : vector<16x36xf32> to vector<16x4xf32>
    %cst_480 = arith.constant dense<0.000000e+00> : vector<1x16xf32>
    %1089 = tpu.matmul %1086, %1087, %cst_480 {dimension_numbers = #tpu.dot_dimension_numbers<[1], [1], [0], [0], [0, 0, 1, 0], [], []>} : vector<1x4xf32>, vector<16x4xf32>, vector<1x16xf32> -> vector<1x16xf32>
    %cst_481 = arith.constant dense<0xFF800000> : vector<1xf32>
    %1090 = vector.multi_reduction <maximumf>, %1089, %cst_481 [1] : vector<1x16xf32> to vector<1xf32>
    %1091 = vector.shape_cast %1090 : vector<1xf32> to vector<1x1xf32>
    %1092 = vector.broadcast %1091 : vector<1x1xf32> to vector<1x16xf32>
    %1093 = arith.subf %1089, %1092 : vector<1x16xf32>
    %1094 = math.exp %1093 : vector<1x16xf32>
    %cst_482 = arith.constant dense<0.000000e+00> : vector<1xf32>
    %1095 = vector.multi_reduction <add>, %1094, %cst_482 [1] : vector<1x16xf32> to vector<1xf32>
    %1096 = vector.shape_cast %1095 : vector<1xf32> to vector<1x1xf32>
    %1097 = tpu.reciprocal %1096 {approx = true} : vector<1x1xf32> -> vector<1x1xf32>
    %1098 = vector.broadcast %1097 : vector<1x1xf32> to vector<1x16xf32>
    %1099 = arith.mulf %1094, %1098 : vector<1x16xf32>
    %cst_483 = arith.constant dense<0.000000e+00> : vector<1x4xf32>
    %1100 = tpu.matmul %1099, %1088, %cst_483 {dimension_numbers = #tpu.dot_dimension_numbers<[1], [0], [0], [1], [0, 0, 1, 1], [], []>} : vector<1x16xf32>, vector<16x4xf32>, vector<1x4xf32> -> vector<1x4xf32>
    %1101 = vector.extract_strided_slice %1053 {offsets = [0, 8], sizes = [1, 4], strides = [1, 1]} : vector<1x36xf32> to vector<1x4xf32>
    %cst_484 = arith.constant 5.000000e-01 : f32
    %1102 = vector.broadcast %cst_484 : f32 to vector<1x4xf32>
    %1103 = arith.mulf %1101, %1102 : vector<1x4xf32>
    %1104 = vector.extract_strided_slice %1061 {offsets = [0, 8], sizes = [16, 4], strides = [1, 1]} : vector<16x36xf32> to vector<16x4xf32>
    %1105 = vector.extract_strided_slice %1062 {offsets = [0, 8], sizes = [16, 4], strides = [1, 1]} : vector<16x36xf32> to vector<16x4xf32>
    %cst_485 = arith.constant dense<0.000000e+00> : vector<1x16xf32>
    %1106 = tpu.matmul %1103, %1104, %cst_485 {dimension_numbers = #tpu.dot_dimension_numbers<[1], [1], [0], [0], [0, 0, 1, 0], [], []>} : vector<1x4xf32>, vector<16x4xf32>, vector<1x16xf32> -> vector<1x16xf32>
    %cst_486 = arith.constant dense<0xFF800000> : vector<1xf32>
    %1107 = vector.multi_reduction <maximumf>, %1106, %cst_486 [1] : vector<1x16xf32> to vector<1xf32>
    %1108 = vector.shape_cast %1107 : vector<1xf32> to vector<1x1xf32>
    %1109 = vector.broadcast %1108 : vector<1x1xf32> to vector<1x16xf32>
    %1110 = arith.subf %1106, %1109 : vector<1x16xf32>
    %1111 = math.exp %1110 : vector<1x16xf32>
    %cst_487 = arith.constant dense<0.000000e+00> : vector<1xf32>
    %1112 = vector.multi_reduction <add>, %1111, %cst_487 [1] : vector<1x16xf32> to vector<1xf32>
    %1113 = vector.shape_cast %1112 : vector<1xf32> to vector<1x1xf32>
    %1114 = tpu.reciprocal %1113 {approx = true} : vector<1x1xf32> -> vector<1x1xf32>
    %1115 = vector.broadcast %1114 : vector<1x1xf32> to vector<1x16xf32>
    %1116 = arith.mulf %1111, %1115 : vector<1x16xf32>
    %cst_488 = arith.constant dense<0.000000e+00> : vector<1x4xf32>
    %1117 = tpu.matmul %1116, %1105, %cst_488 {dimension_numbers = #tpu.dot_dimension_numbers<[1], [0], [0], [1], [0, 0, 1, 1], [], []>} : vector<1x16xf32>, vector<16x4xf32>, vector<1x4xf32> -> vector<1x4xf32>
    %1118 = vector.extract_strided_slice %1053 {offsets = [0, 12], sizes = [1, 4], strides = [1, 1]} : vector<1x36xf32> to vector<1x4xf32>
    %cst_489 = arith.constant 5.000000e-01 : f32
    %1119 = vector.broadcast %cst_489 : f32 to vector<1x4xf32>
    %1120 = arith.mulf %1118, %1119 : vector<1x4xf32>
    %1121 = vector.extract_strided_slice %1061 {offsets = [0, 12], sizes = [16, 4], strides = [1, 1]} : vector<16x36xf32> to vector<16x4xf32>
    %1122 = vector.extract_strided_slice %1062 {offsets = [0, 12], sizes = [16, 4], strides = [1, 1]} : vector<16x36xf32> to vector<16x4xf32>
    %cst_490 = arith.constant dense<0.000000e+00> : vector<1x16xf32>
    %1123 = tpu.matmul %1120, %1121, %cst_490 {dimension_numbers = #tpu.dot_dimension_numbers<[1], [1], [0], [0], [0, 0, 1, 0], [], []>} : vector<1x4xf32>, vector<16x4xf32>, vector<1x16xf32> -> vector<1x16xf32>
    %cst_491 = arith.constant dense<0xFF800000> : vector<1xf32>
    %1124 = vector.multi_reduction <maximumf>, %1123, %cst_491 [1] : vector<1x16xf32> to vector<1xf32>
    %1125 = vector.shape_cast %1124 : vector<1xf32> to vector<1x1xf32>
    %1126 = vector.broadcast %1125 : vector<1x1xf32> to vector<1x16xf32>
    %1127 = arith.subf %1123, %1126 : vector<1x16xf32>
    %1128 = math.exp %1127 : vector<1x16xf32>
    %cst_492 = arith.constant dense<0.000000e+00> : vector<1xf32>
    %1129 = vector.multi_reduction <add>, %1128, %cst_492 [1] : vector<1x16xf32> to vector<1xf32>
    %1130 = vector.shape_cast %1129 : vector<1xf32> to vector<1x1xf32>
    %1131 = tpu.reciprocal %1130 {approx = true} : vector<1x1xf32> -> vector<1x1xf32>
    %1132 = vector.broadcast %1131 : vector<1x1xf32> to vector<1x16xf32>
    %1133 = arith.mulf %1128, %1132 : vector<1x16xf32>
    %cst_493 = arith.constant dense<0.000000e+00> : vector<1x4xf32>
    %1134 = tpu.matmul %1133, %1122, %cst_493 {dimension_numbers = #tpu.dot_dimension_numbers<[1], [0], [0], [1], [0, 0, 1, 1], [], []>} : vector<1x16xf32>, vector<16x4xf32>, vector<1x4xf32> -> vector<1x4xf32>
    %1135 = vector.extract_strided_slice %1053 {offsets = [0, 16], sizes = [1, 4], strides = [1, 1]} : vector<1x36xf32> to vector<1x4xf32>
    %cst_494 = arith.constant 5.000000e-01 : f32
    %1136 = vector.broadcast %cst_494 : f32 to vector<1x4xf32>
    %1137 = arith.mulf %1135, %1136 : vector<1x4xf32>
    %1138 = vector.extract_strided_slice %1061 {offsets = [0, 16], sizes = [16, 4], strides = [1, 1]} : vector<16x36xf32> to vector<16x4xf32>
    %1139 = vector.extract_strided_slice %1062 {offsets = [0, 16], sizes = [16, 4], strides = [1, 1]} : vector<16x36xf32> to vector<16x4xf32>
    %cst_495 = arith.constant dense<0.000000e+00> : vector<1x16xf32>
    %1140 = tpu.matmul %1137, %1138, %cst_495 {dimension_numbers = #tpu.dot_dimension_numbers<[1], [1], [0], [0], [0, 0, 1, 0], [], []>} : vector<1x4xf32>, vector<16x4xf32>, vector<1x16xf32> -> vector<1x16xf32>
    %cst_496 = arith.constant dense<0xFF800000> : vector<1xf32>
    %1141 = vector.multi_reduction <maximumf>, %1140, %cst_496 [1] : vector<1x16xf32> to vector<1xf32>
    %1142 = vector.shape_cast %1141 : vector<1xf32> to vector<1x1xf32>
    %1143 = vector.broadcast %1142 : vector<1x1xf32> to vector<1x16xf32>
    %1144 = arith.subf %1140, %1143 : vector<1x16xf32>
    %1145 = math.exp %1144 : vector<1x16xf32>
    %cst_497 = arith.constant dense<0.000000e+00> : vector<1xf32>
    %1146 = vector.multi_reduction <add>, %1145, %cst_497 [1] : vector<1x16xf32> to vector<1xf32>
    %1147 = vector.shape_cast %1146 : vector<1xf32> to vector<1x1xf32>
    %1148 = tpu.reciprocal %1147 {approx = true} : vector<1x1xf32> -> vector<1x1xf32>
    %1149 = vector.broadcast %1148 : vector<1x1xf32> to vector<1x16xf32>
    %1150 = arith.mulf %1145, %1149 : vector<1x16xf32>
    %cst_498 = arith.constant dense<0.000000e+00> : vector<1x4xf32>
    %1151 = tpu.matmul %1150, %1139, %cst_498 {dimension_numbers = #tpu.dot_dimension_numbers<[1], [0], [0], [1], [0, 0, 1, 1], [], []>} : vector<1x16xf32>, vector<16x4xf32>, vector<1x4xf32> -> vector<1x4xf32>
    %1152 = vector.extract_strided_slice %1053 {offsets = [0, 20], sizes = [1, 4], strides = [1, 1]} : vector<1x36xf32> to vector<1x4xf32>
    %cst_499 = arith.constant 5.000000e-01 : f32
    %1153 = vector.broadcast %cst_499 : f32 to vector<1x4xf32>
    %1154 = arith.mulf %1152, %1153 : vector<1x4xf32>
    %1155 = vector.extract_strided_slice %1061 {offsets = [0, 20], sizes = [16, 4], strides = [1, 1]} : vector<16x36xf32> to vector<16x4xf32>
    %1156 = vector.extract_strided_slice %1062 {offsets = [0, 20], sizes = [16, 4], strides = [1, 1]} : vector<16x36xf32> to vector<16x4xf32>
    %cst_500 = arith.constant dense<0.000000e+00> : vector<1x16xf32>
    %1157 = tpu.matmul %1154, %1155, %cst_500 {dimension_numbers = #tpu.dot_dimension_numbers<[1], [1], [0], [0], [0, 0, 1, 0], [], []>} : vector<1x4xf32>, vector<16x4xf32>, vector<1x16xf32> -> vector<1x16xf32>
    %cst_501 = arith.constant dense<0xFF800000> : vector<1xf32>
    %1158 = vector.multi_reduction <maximumf>, %1157, %cst_501 [1] : vector<1x16xf32> to vector<1xf32>
    %1159 = vector.shape_cast %1158 : vector<1xf32> to vector<1x1xf32>
    %1160 = vector.broadcast %1159 : vector<1x1xf32> to vector<1x16xf32>
    %1161 = arith.subf %1157, %1160 : vector<1x16xf32>
    %1162 = math.exp %1161 : vector<1x16xf32>
    %cst_502 = arith.constant dense<0.000000e+00> : vector<1xf32>
    %1163 = vector.multi_reduction <add>, %1162, %cst_502 [1] : vector<1x16xf32> to vector<1xf32>
    %1164 = vector.shape_cast %1163 : vector<1xf32> to vector<1x1xf32>
    %1165 = tpu.reciprocal %1164 {approx = true} : vector<1x1xf32> -> vector<1x1xf32>
    %1166 = vector.broadcast %1165 : vector<1x1xf32> to vector<1x16xf32>
    %1167 = arith.mulf %1162, %1166 : vector<1x16xf32>
    %cst_503 = arith.constant dense<0.000000e+00> : vector<1x4xf32>
    %1168 = tpu.matmul %1167, %1156, %cst_503 {dimension_numbers = #tpu.dot_dimension_numbers<[1], [0], [0], [1], [0, 0, 1, 1], [], []>} : vector<1x16xf32>, vector<16x4xf32>, vector<1x4xf32> -> vector<1x4xf32>
    %1169 = vector.extract_strided_slice %1053 {offsets = [0, 24], sizes = [1, 4], strides = [1, 1]} : vector<1x36xf32> to vector<1x4xf32>
    %cst_504 = arith.constant 5.000000e-01 : f32
    %1170 = vector.broadcast %cst_504 : f32 to vector<1x4xf32>
    %1171 = arith.mulf %1169, %1170 : vector<1x4xf32>
    %1172 = vector.extract_strided_slice %1061 {offsets = [0, 24], sizes = [16, 4], strides = [1, 1]} : vector<16x36xf32> to vector<16x4xf32>
    %1173 = vector.extract_strided_slice %1062 {offsets = [0, 24], sizes = [16, 4], strides = [1, 1]} : vector<16x36xf32> to vector<16x4xf32>
    %cst_505 = arith.constant dense<0.000000e+00> : vector<1x16xf32>
    %1174 = tpu.matmul %1171, %1172, %cst_505 {dimension_numbers = #tpu.dot_dimension_numbers<[1], [1], [0], [0], [0, 0, 1, 0], [], []>} : vector<1x4xf32>, vector<16x4xf32>, vector<1x16xf32> -> vector<1x16xf32>
    %cst_506 = arith.constant dense<0xFF800000> : vector<1xf32>
    %1175 = vector.multi_reduction <maximumf>, %1174, %cst_506 [1] : vector<1x16xf32> to vector<1xf32>
    %1176 = vector.shape_cast %1175 : vector<1xf32> to vector<1x1xf32>
    %1177 = vector.broadcast %1176 : vector<1x1xf32> to vector<1x16xf32>
    %1178 = arith.subf %1174, %1177 : vector<1x16xf32>
    %1179 = math.exp %1178 : vector<1x16xf32>
    %cst_507 = arith.constant dense<0.000000e+00> : vector<1xf32>
    %1180 = vector.multi_reduction <add>, %1179, %cst_507 [1] : vector<1x16xf32> to vector<1xf32>
    %1181 = vector.shape_cast %1180 : vector<1xf32> to vector<1x1xf32>
    %1182 = tpu.reciprocal %1181 {approx = true} : vector<1x1xf32> -> vector<1x1xf32>
    %1183 = vector.broadcast %1182 : vector<1x1xf32> to vector<1x16xf32>
    %1184 = arith.mulf %1179, %1183 : vector<1x16xf32>
    %cst_508 = arith.constant dense<0.000000e+00> : vector<1x4xf32>
    %1185 = tpu.matmul %1184, %1173, %cst_508 {dimension_numbers = #tpu.dot_dimension_numbers<[1], [0], [0], [1], [0, 0, 1, 1], [], []>} : vector<1x16xf32>, vector<16x4xf32>, vector<1x4xf32> -> vector<1x4xf32>
    %1186 = vector.extract_strided_slice %1053 {offsets = [0, 28], sizes = [1, 4], strides = [1, 1]} : vector<1x36xf32> to vector<1x4xf32>
    %cst_509 = arith.constant 5.000000e-01 : f32
    %1187 = vector.broadcast %cst_509 : f32 to vector<1x4xf32>
    %1188 = arith.mulf %1186, %1187 : vector<1x4xf32>
    %1189 = vector.extract_strided_slice %1061 {offsets = [0, 28], sizes = [16, 4], strides = [1, 1]} : vector<16x36xf32> to vector<16x4xf32>
    %1190 = vector.extract_strided_slice %1062 {offsets = [0, 28], sizes = [16, 4], strides = [1, 1]} : vector<16x36xf32> to vector<16x4xf32>
    %cst_510 = arith.constant dense<0.000000e+00> : vector<1x16xf32>
    %1191 = tpu.matmul %1188, %1189, %cst_510 {dimension_numbers = #tpu.dot_dimension_numbers<[1], [1], [0], [0], [0, 0, 1, 0], [], []>} : vector<1x4xf32>, vector<16x4xf32>, vector<1x16xf32> -> vector<1x16xf32>
    %cst_511 = arith.constant dense<0xFF800000> : vector<1xf32>
    %1192 = vector.multi_reduction <maximumf>, %1191, %cst_511 [1] : vector<1x16xf32> to vector<1xf32>
    %1193 = vector.shape_cast %1192 : vector<1xf32> to vector<1x1xf32>
    %1194 = vector.broadcast %1193 : vector<1x1xf32> to vector<1x16xf32>
    %1195 = arith.subf %1191, %1194 : vector<1x16xf32>
    %1196 = math.exp %1195 : vector<1x16xf32>
    %cst_512 = arith.constant dense<0.000000e+00> : vector<1xf32>
    %1197 = vector.multi_reduction <add>, %1196, %cst_512 [1] : vector<1x16xf32> to vector<1xf32>
    %1198 = vector.shape_cast %1197 : vector<1xf32> to vector<1x1xf32>
    %1199 = tpu.reciprocal %1198 {approx = true} : vector<1x1xf32> -> vector<1x1xf32>
    %1200 = vector.broadcast %1199 : vector<1x1xf32> to vector<1x16xf32>
    %1201 = arith.mulf %1196, %1200 : vector<1x16xf32>
    %cst_513 = arith.constant dense<0.000000e+00> : vector<1x4xf32>
    %1202 = tpu.matmul %1201, %1190, %cst_513 {dimension_numbers = #tpu.dot_dimension_numbers<[1], [0], [0], [1], [0, 0, 1, 1], [], []>} : vector<1x16xf32>, vector<16x4xf32>, vector<1x4xf32> -> vector<1x4xf32>
    %1203 = vector.extract_strided_slice %1053 {offsets = [0, 32], sizes = [1, 4], strides = [1, 1]} : vector<1x36xf32> to vector<1x4xf32>
    %cst_514 = arith.constant 5.000000e-01 : f32
    %1204 = vector.broadcast %cst_514 : f32 to vector<1x4xf32>
    %1205 = arith.mulf %1203, %1204 : vector<1x4xf32>
    %1206 = vector.extract_strided_slice %1061 {offsets = [0, 32], sizes = [16, 4], strides = [1, 1]} : vector<16x36xf32> to vector<16x4xf32>
    %1207 = vector.extract_strided_slice %1062 {offsets = [0, 32], sizes = [16, 4], strides = [1, 1]} : vector<16x36xf32> to vector<16x4xf32>
    %cst_515 = arith.constant dense<0.000000e+00> : vector<1x16xf32>
    %1208 = tpu.matmul %1205, %1206, %cst_515 {dimension_numbers = #tpu.dot_dimension_numbers<[1], [1], [0], [0], [0, 0, 1, 0], [], []>} : vector<1x4xf32>, vector<16x4xf32>, vector<1x16xf32> -> vector<1x16xf32>
    %cst_516 = arith.constant dense<0xFF800000> : vector<1xf32>
    %1209 = vector.multi_reduction <maximumf>, %1208, %cst_516 [1] : vector<1x16xf32> to vector<1xf32>
    %1210 = vector.shape_cast %1209 : vector<1xf32> to vector<1x1xf32>
    %1211 = vector.broadcast %1210 : vector<1x1xf32> to vector<1x16xf32>
    %1212 = arith.subf %1208, %1211 : vector<1x16xf32>
    %1213 = math.exp %1212 : vector<1x16xf32>
    %cst_517 = arith.constant dense<0.000000e+00> : vector<1xf32>
    %1214 = vector.multi_reduction <add>, %1213, %cst_517 [1] : vector<1x16xf32> to vector<1xf32>
    %1215 = vector.shape_cast %1214 : vector<1xf32> to vector<1x1xf32>
    %1216 = tpu.reciprocal %1215 {approx = true} : vector<1x1xf32> -> vector<1x1xf32>
    %1217 = vector.broadcast %1216 : vector<1x1xf32> to vector<1x16xf32>
    %1218 = arith.mulf %1213, %1217 : vector<1x16xf32>
    %cst_518 = arith.constant dense<0.000000e+00> : vector<1x4xf32>
    %1219 = tpu.matmul %1218, %1207, %cst_518 {dimension_numbers = #tpu.dot_dimension_numbers<[1], [0], [0], [1], [0, 0, 1, 1], [], []>} : vector<1x16xf32>, vector<16x4xf32>, vector<1x4xf32> -> vector<1x4xf32>
    %1220 = tpu.concatenate %1083, %1100, %1117, %1134, %1151, %1168, %1185, %1202, %1219 in 1 : vector<1x4xf32>, vector<1x4xf32>, vector<1x4xf32>, vector<1x4xf32>, vector<1x4xf32>, vector<1x4xf32>, vector<1x4xf32>, vector<1x4xf32>, vector<1x4xf32> -> vector<1x36xf32>
    %cst_519 = arith.constant dense<0.000000e+00> : vector<1x36xf32>
    %1221 = tpu.matmul %1220, %1064, %cst_519 {dimension_numbers = #tpu.dot_dimension_numbers<[1], [0], [0], [1], [0, 0, 1, 1], [], []>} : vector<1x36xf32>, vector<36x36xf32>, vector<1x36xf32> -> vector<1x36xf32>
    %1222 = arith.addf %1221, %1066 : vector<1x36xf32>
    %1223 = arith.addf %1047, %1222 : vector<1x36xf32>
    %c1_520 = arith.constant 1 : index
    %c0_521 = arith.constant 0 : index
    %c0_522 = arith.constant 0 : index
    %1224 = vector.load %arg30[%c1_520, %c0_521, %c0_522] : memref<2x1x36xf32, #tpu.memory_space<vmem>>, vector<1x1x36xf32>
    %1225 = vector.shape_cast %1224 : vector<1x1x36xf32> to vector<1x36xf32>
    %c1_523 = arith.constant 1 : index
    %c0_524 = arith.constant 0 : index
    %c0_525 = arith.constant 0 : index
    %1226 = vector.load %arg31[%c1_523, %c0_524, %c0_525] : memref<2x1x36xf32, #tpu.memory_space<vmem>>, vector<1x1x36xf32>
    %1227 = vector.shape_cast %1226 : vector<1x1x36xf32> to vector<1x36xf32>
    %cst_526 = arith.constant dense<0.000000e+00> : vector<1xf32>
    %1228 = vector.multi_reduction <add>, %1223, %cst_526 [1] : vector<1x36xf32> to vector<1xf32>
    %1229 = vector.shape_cast %1228 : vector<1xf32> to vector<1x1xf32>
    %cst_527 = arith.constant 3.600000e+01 : f32
    %1230 = vector.broadcast %cst_527 : f32 to vector<1x1xf32>
    %1231 = arith.divf %1229, %1230 : vector<1x1xf32>
    %1232 = vector.broadcast %1231 : vector<1x1xf32> to vector<1x36xf32>
    %1233 = arith.subf %1223, %1232 : vector<1x36xf32>
    %1234 = arith.mulf %1233, %1233 : vector<1x36xf32>
    %cst_528 = arith.constant dense<0.000000e+00> : vector<1xf32>
    %1235 = vector.multi_reduction <add>, %1234, %cst_528 [1] : vector<1x36xf32> to vector<1xf32>
    %1236 = vector.shape_cast %1235 : vector<1xf32> to vector<1x1xf32>
    %cst_529 = arith.constant 3.600000e+01 : f32
    %1237 = vector.broadcast %cst_529 : f32 to vector<1x1xf32>
    %1238 = arith.divf %1236, %1237 : vector<1x1xf32>
    %cst_530 = arith.constant 9.99999974E-6 : f32
    %1239 = vector.broadcast %cst_530 : f32 to vector<1x1xf32>
    %1240 = arith.addf %1238, %1239 : vector<1x1xf32>
    %1241 = math.rsqrt %1240 : vector<1x1xf32>
    %1242 = vector.broadcast %1241 : vector<1x1xf32> to vector<1x36xf32>
    %1243 = arith.mulf %1233, %1242 : vector<1x36xf32>
    %1244 = arith.mulf %1243, %1225 : vector<1x36xf32>
    %1245 = arith.addf %1244, %1227 : vector<1x36xf32>
    %c1_531 = arith.constant 1 : index
    %c0_532 = arith.constant 0 : index
    %c0_533 = arith.constant 0 : index
    %1246 = vector.load %arg34[%c1_531, %c0_532, %c0_533] : memref<2x36x64xf32, #tpu.memory_space<vmem>>, vector<1x36x64xf32>
    %1247 = vector.shape_cast %1246 : vector<1x36x64xf32> to vector<36x64xf32>
    %cst_534 = arith.constant dense<0.000000e+00> : vector<1x64xf32>
    %1248 = tpu.matmul %1245, %1247, %cst_534 {dimension_numbers = #tpu.dot_dimension_numbers<[1], [0], [0], [1], [0, 0, 1, 1], [], []>} : vector<1x36xf32>, vector<36x64xf32>, vector<1x64xf32> -> vector<1x64xf32>
    %c1_535 = arith.constant 1 : index
    %c0_536 = arith.constant 0 : index
    %c0_537 = arith.constant 0 : index
    %1249 = vector.load %arg35[%c1_535, %c0_536, %c0_537] : memref<2x1x64xf32, #tpu.memory_space<vmem>>, vector<1x1x64xf32>
    %1250 = vector.shape_cast %1249 : vector<1x1x64xf32> to vector<1x64xf32>
    %1251 = arith.addf %1248, %1250 : vector<1x64xf32>
    %cst_538 = arith.constant 0.000000e+00 : f32
    %1252 = vector.broadcast %cst_538 : f32 to vector<1x64xf32>
    %1253 = arith.maximumf %1251, %1252 : vector<1x64xf32>
    %c1_539 = arith.constant 1 : index
    %c0_540 = arith.constant 0 : index
    %c0_541 = arith.constant 0 : index
    %1254 = vector.load %arg36[%c1_539, %c0_540, %c0_541] : memref<2x64x36xf32, #tpu.memory_space<vmem>>, vector<1x64x36xf32>
    %1255 = vector.shape_cast %1254 : vector<1x64x36xf32> to vector<64x36xf32>
    %cst_542 = arith.constant dense<0.000000e+00> : vector<1x36xf32>
    %1256 = tpu.matmul %1253, %1255, %cst_542 {dimension_numbers = #tpu.dot_dimension_numbers<[1], [0], [0], [1], [0, 0, 1, 1], [], []>} : vector<1x64xf32>, vector<64x36xf32>, vector<1x36xf32> -> vector<1x36xf32>
    %c1_543 = arith.constant 1 : index
    %c0_544 = arith.constant 0 : index
    %c0_545 = arith.constant 0 : index
    %1257 = vector.load %arg37[%c1_543, %c0_544, %c0_545] : memref<2x1x36xf32, #tpu.memory_space<vmem>>, vector<1x1x36xf32>
    %1258 = vector.shape_cast %1257 : vector<1x1x36xf32> to vector<1x36xf32>
    %1259 = arith.addf %1256, %1258 : vector<1x36xf32>
    %1260 = arith.addf %1245, %1259 : vector<1x36xf32>
    %c1_546 = arith.constant 1 : index
    %c0_547 = arith.constant 0 : index
    %c0_548 = arith.constant 0 : index
    %1261 = vector.load %arg32[%c1_546, %c0_547, %c0_548] : memref<2x1x36xf32, #tpu.memory_space<vmem>>, vector<1x1x36xf32>
    %1262 = vector.shape_cast %1261 : vector<1x1x36xf32> to vector<1x36xf32>
    %c1_549 = arith.constant 1 : index
    %c0_550 = arith.constant 0 : index
    %c0_551 = arith.constant 0 : index
    %1263 = vector.load %arg33[%c1_549, %c0_550, %c0_551] : memref<2x1x36xf32, #tpu.memory_space<vmem>>, vector<1x1x36xf32>
    %1264 = vector.shape_cast %1263 : vector<1x1x36xf32> to vector<1x36xf32>
    %cst_552 = arith.constant dense<0.000000e+00> : vector<1xf32>
    %1265 = vector.multi_reduction <add>, %1260, %cst_552 [1] : vector<1x36xf32> to vector<1xf32>
    %1266 = vector.shape_cast %1265 : vector<1xf32> to vector<1x1xf32>
    %cst_553 = arith.constant 3.600000e+01 : f32
    %1267 = vector.broadcast %cst_553 : f32 to vector<1x1xf32>
    %1268 = arith.divf %1266, %1267 : vector<1x1xf32>
    %1269 = vector.broadcast %1268 : vector<1x1xf32> to vector<1x36xf32>
    %1270 = arith.subf %1260, %1269 : vector<1x36xf32>
    %1271 = arith.mulf %1270, %1270 : vector<1x36xf32>
    %cst_554 = arith.constant dense<0.000000e+00> : vector<1xf32>
    %1272 = vector.multi_reduction <add>, %1271, %cst_554 [1] : vector<1x36xf32> to vector<1xf32>
    %1273 = vector.shape_cast %1272 : vector<1xf32> to vector<1x1xf32>
    %cst_555 = arith.constant 3.600000e+01 : f32
    %1274 = vector.broadcast %cst_555 : f32 to vector<1x1xf32>
    %1275 = arith.divf %1273, %1274 : vector<1x1xf32>
    %cst_556 = arith.constant 9.99999974E-6 : f32
    %1276 = vector.broadcast %cst_556 : f32 to vector<1x1xf32>
    %1277 = arith.addf %1275, %1276 : vector<1x1xf32>
    %1278 = math.rsqrt %1277 : vector<1x1xf32>
    %1279 = vector.broadcast %1278 : vector<1x1xf32> to vector<1x36xf32>
    %1280 = arith.mulf %1270, %1279 : vector<1x36xf32>
    %1281 = arith.mulf %1280, %1262 : vector<1x36xf32>
    %1282 = arith.addf %1281, %1264 : vector<1x36xf32>
    %c0_557 = arith.constant 0 : index
    %c0_558 = arith.constant 0 : index
    %1283 = vector.load %arg38[%c0_557, %c0_558] : memref<1x36xf32, #tpu.memory_space<vmem>>, vector<1x36xf32>
    %c0_559 = arith.constant 0 : index
    %c0_560 = arith.constant 0 : index
    %1284 = vector.load %arg39[%c0_559, %c0_560] : memref<1x36xf32, #tpu.memory_space<vmem>>, vector<1x36xf32>
    %cst_561 = arith.constant dense<0.000000e+00> : vector<1xf32>
    %1285 = vector.multi_reduction <add>, %1282, %cst_561 [1] : vector<1x36xf32> to vector<1xf32>
    %1286 = vector.shape_cast %1285 : vector<1xf32> to vector<1x1xf32>
    %cst_562 = arith.constant 3.600000e+01 : f32
    %1287 = vector.broadcast %cst_562 : f32 to vector<1x1xf32>
    %1288 = arith.divf %1286, %1287 : vector<1x1xf32>
    %1289 = vector.broadcast %1288 : vector<1x1xf32> to vector<1x36xf32>
    %1290 = arith.subf %1282, %1289 : vector<1x36xf32>
    %1291 = arith.mulf %1290, %1290 : vector<1x36xf32>
    %cst_563 = arith.constant dense<0.000000e+00> : vector<1xf32>
    %1292 = vector.multi_reduction <add>, %1291, %cst_563 [1] : vector<1x36xf32> to vector<1xf32>
    %1293 = vector.shape_cast %1292 : vector<1xf32> to vector<1x1xf32>
    %cst_564 = arith.constant 3.600000e+01 : f32
    %1294 = vector.broadcast %cst_564 : f32 to vector<1x1xf32>
    %1295 = arith.divf %1293, %1294 : vector<1x1xf32>
    %cst_565 = arith.constant 9.99999974E-6 : f32
    %1296 = vector.broadcast %cst_565 : f32 to vector<1x1xf32>
    %1297 = arith.addf %1295, %1296 : vector<1x1xf32>
    %1298 = math.rsqrt %1297 : vector<1x1xf32>
    %1299 = vector.broadcast %1298 : vector<1x1xf32> to vector<1x36xf32>
    %1300 = arith.mulf %1290, %1299 : vector<1x36xf32>
    %1301 = arith.mulf %1300, %1283 : vector<1x36xf32>
    %1302 = arith.addf %1301, %1284 : vector<1x36xf32>
    %c0_566 = arith.constant 0 : index
    %c0_567 = arith.constant 0 : index
    %1303 = vector.load %arg40[%c0_566, %c0_567] : memref<36x5xf32, #tpu.memory_space<vmem>>, vector<36x5xf32>
    %cst_568 = arith.constant dense<0.000000e+00> : vector<1x5xf32>
    %1304 = tpu.matmul %1302, %1303, %cst_568 {dimension_numbers = #tpu.dot_dimension_numbers<[1], [0], [0], [1], [0, 0, 1, 1], [], []>} : vector<1x36xf32>, vector<36x5xf32>, vector<1x5xf32> -> vector<1x5xf32>
    %c0_569 = arith.constant 0 : index
    %c0_570 = arith.constant 0 : index
    %1305 = vector.load %arg41[%c0_569, %c0_570] : memref<1x5xf32, #tpu.memory_space<vmem>>, vector<1x5xf32>
    %1306 = arith.addf %1304, %1305 : vector<1x5xf32>
    %1307 = vector.shape_cast %1306 : vector<1x5xf32> to vector<1x1x5xf32>
    %c0_571 = arith.constant 0 : index
    %c0_572 = arith.constant 0 : index
    %c0_573 = arith.constant 0 : index
    %1308 = vector.load %arg42[%c0_571, %c0_572, %c0_573] : memref<1x1x5xf32, #tpu.memory_space<vmem>>, vector<1x1x5xf32>
    tpu.vector_store %arg42[%c0_571, %c0_572, %c0_573], %1307 {strides = array<i32>} : memref<1x1x5xf32, #tpu.memory_space<vmem>>, vector<1x1x5xf32>,
    return
  }
  func.func @transform_0(%arg0: i32) -> (i32, i32, i32) {
    %c0_i32 = arith.constant 0 : i32
    %c0_i32_0 = arith.constant 0 : i32
    %c0_i32_1 = arith.constant 0 : i32
    return %arg0, %c0_i32, %c0_i32_0 : i32, i32, i32
  }
  func.func @transform_1(%arg0: i32) -> (i32, i32, i32) {
    %c0_i32 = arith.constant 0 : i32
    %c0_i32_0 = arith.constant 0 : i32
    %c0_i32_1 = arith.constant 0 : i32
    %c0_i32_2 = arith.constant 0 : i32
    return %c0_i32, %c0_i32_0, %c0_i32_1 : i32, i32, i32
  }
  func.func @transform_2(%arg0: i32) -> (i32, i32) {
    %c0_i32 = arith.constant 0 : i32
    %c0_i32_0 = arith.constant 0 : i32
    %c0_i32_1 = arith.constant 0 : i32
    return %c0_i32, %c0_i32_0 : i32, i32
  }
  func.func @transform_3(%arg0: i32) -> (i32, i32, i32) {
    %c0_i32 = arith.constant 0 : i32
    %c0_i32_0 = arith.constant 0 : i32
    %c0_i32_1 = arith.constant 0 : i32
    %c0_i32_2 = arith.constant 0 : i32
    return %c0_i32, %c0_i32_0, %c0_i32_1 : i32, i32, i32
  }
  func.func @transform_4(%arg0: i32) -> (i32, i32, i32) {
    %c0_i32 = arith.constant 0 : i32
    %c0_i32_0 = arith.constant 0 : i32
    %c0_i32_1 = arith.constant 0 : i32
    %c0_i32_2 = arith.constant 0 : i32
    return %c0_i32, %c0_i32_0, %c0_i32_1 : i32, i32, i32
  }
  func.func @transform_5(%arg0: i32) -> (i32, i32, i32) {
    %c0_i32 = arith.constant 0 : i32
    %c0_i32_0 = arith.constant 0 : i32
    %c0_i32_1 = arith.constant 0 : i32
    %c0_i32_2 = arith.constant 0 : i32
    return %c0_i32, %c0_i32_0, %c0_i32_1 : i32, i32, i32
  }
  func.func @transform_6(%arg0: i32) -> (i32, i32, i32) {
    %c0_i32 = arith.constant 0 : i32
    %c0_i32_0 = arith.constant 0 : i32
    %c0_i32_1 = arith.constant 0 : i32
    %c0_i32_2 = arith.constant 0 : i32
    return %c0_i32, %c0_i32_0, %c0_i32_1 : i32, i32, i32
  }
  func.func @transform_7(%arg0: i32) -> (i32, i32, i32) {
    %c0_i32 = arith.constant 0 : i32
    %c0_i32_0 = arith.constant 0 : i32
    %c0_i32_1 = arith.constant 0 : i32
    %c0_i32_2 = arith.constant 0 : i32
    return %c0_i32, %c0_i32_0, %c0_i32_1 : i32, i32, i32
  }
  func.func @transform_8(%arg0: i32) -> (i32, i32, i32) {
    %c0_i32 = arith.constant 0 : i32
    %c0_i32_0 = arith.constant 0 : i32
    %c0_i32_1 = arith.constant 0 : i32
    %c0_i32_2 = arith.constant 0 : i32
    return %c0_i32, %c0_i32_0, %c0_i32_1 : i32, i32, i32
  }
  func.func @transform_9(%arg0: i32) -> (i32, i32, i32) {
    %c0_i32 = arith.constant 0 : i32
    %c0_i32_0 = arith.constant 0 : i32
    %c0_i32_1 = arith.constant 0 : i32
    %c0_i32_2 = arith.constant 0 : i32
    return %c0_i32, %c0_i32_0, %c0_i32_1 : i32, i32, i32
  }
  func.func @transform_10(%arg0: i32) -> (i32, i32, i32) {
    %c0_i32 = arith.constant 0 : i32
    %c0_i32_0 = arith.constant 0 : i32
    %c0_i32_1 = arith.constant 0 : i32
    %c0_i32_2 = arith.constant 0 : i32
    return %c0_i32, %c0_i32_0, %c0_i32_1 : i32, i32, i32
  }
  func.func @transform_11(%arg0: i32) -> (i32, i32, i32) {
    %c0_i32 = arith.constant 0 : i32
    %c0_i32_0 = arith.constant 0 : i32
    %c0_i32_1 = arith.constant 0 : i32
    %c0_i32_2 = arith.constant 0 : i32
    return %c0_i32, %c0_i32_0, %c0_i32_1 : i32, i32, i32
  }
  func.func @transform_12(%arg0: i32) -> (i32, i32, i32) {
    %c0_i32 = arith.constant 0 : i32
    %c0_i32_0 = arith.constant 0 : i32
    %c0_i32_1 = arith.constant 0 : i32
    %c0_i32_2 = arith.constant 0 : i32
    return %c0_i32, %c0_i32_0, %c0_i32_1 : i32, i32, i32
  }
  func.func @transform_13(%arg0: i32) -> (i32, i32, i32) {
    %c0_i32 = arith.constant 0 : i32
    %c0_i32_0 = arith.constant 0 : i32
    %c0_i32_1 = arith.constant 0 : i32
    %c0_i32_2 = arith.constant 0 : i32
    return %c0_i32, %c0_i32_0, %c0_i32_1 : i32, i32, i32
  }
  func.func @transform_14(%arg0: i32) -> (i32, i32, i32) {
    %c0_i32 = arith.constant 0 : i32
    %c0_i32_0 = arith.constant 0 : i32
    %c0_i32_1 = arith.constant 0 : i32
    %c0_i32_2 = arith.constant 0 : i32
    return %c0_i32, %c0_i32_0, %c0_i32_1 : i32, i32, i32
  }
  func.func @transform_15(%arg0: i32) -> (i32, i32) {
    %c0_i32 = arith.constant 0 : i32
    %c0_i32_0 = arith.constant 0 : i32
    %c0_i32_1 = arith.constant 0 : i32
    return %c0_i32, %c0_i32_0 : i32, i32
  }
  func.func @transform_16(%arg0: i32) -> (i32, i32) {
    %c0_i32 = arith.constant 0 : i32
    %c0_i32_0 = arith.constant 0 : i32
    %c0_i32_1 = arith.constant 0 : i32
    return %c0_i32, %c0_i32_0 : i32, i32
  }
  func.func @transform_17(%arg0: i32) -> (i32, i32, i32) {
    %c0_i32 = arith.constant 0 : i32
    %c0_i32_0 = arith.constant 0 : i32
    %c0_i32_1 = arith.constant 0 : i32
    %c0_i32_2 = arith.constant 0 : i32
    return %c0_i32, %c0_i32_0, %c0_i32_1 : i32, i32, i32
  }
  func.func @transform_18(%arg0: i32) -> (i32, i32, i32) {
    %c0_i32 = arith.constant 0 : i32
    %c0_i32_0 = arith.constant 0 : i32
    %c0_i32_1 = arith.constant 0 : i32
    %c0_i32_2 = arith.constant 0 : i32
    return %c0_i32, %c0_i32_0, %c0_i32_1 : i32, i32, i32
  }
  func.func @transform_19(%arg0: i32) -> (i32, i32, i32) {
    %c0_i32 = arith.constant 0 : i32
    %c0_i32_0 = arith.constant 0 : i32
    %c0_i32_1 = arith.constant 0 : i32
    %c0_i32_2 = arith.constant 0 : i32
    return %c0_i32, %c0_i32_0, %c0_i32_1 : i32, i32, i32
  }
  func.func @transform_20(%arg0: i32) -> (i32, i32, i32) {
    %c0_i32 = arith.constant 0 : i32
    %c0_i32_0 = arith.constant 0 : i32
    %c0_i32_1 = arith.constant 0 : i32
    %c0_i32_2 = arith.constant 0 : i32
    return %c0_i32, %c0_i32_0, %c0_i32_1 : i32, i32, i32
  }
  func.func @transform_21(%arg0: i32) -> (i32, i32, i32) {
    %c0_i32 = arith.constant 0 : i32
    %c0_i32_0 = arith.constant 0 : i32
    %c0_i32_1 = arith.constant 0 : i32
    %c0_i32_2 = arith.constant 0 : i32
    return %c0_i32, %c0_i32_0, %c0_i32_1 : i32, i32, i32
  }
  func.func @transform_22(%arg0: i32) -> (i32, i32, i32) {
    %c0_i32 = arith.constant 0 : i32
    %c0_i32_0 = arith.constant 0 : i32
    %c0_i32_1 = arith.constant 0 : i32
    %c0_i32_2 = arith.constant 0 : i32
    return %c0_i32, %c0_i32_0, %c0_i32_1 : i32, i32, i32
  }
  func.func @transform_23(%arg0: i32) -> (i32, i32, i32) {
    %c0_i32 = arith.constant 0 : i32
    %c0_i32_0 = arith.constant 0 : i32
    %c0_i32_1 = arith.constant 0 : i32
    %c0_i32_2 = arith.constant 0 : i32
    return %c0_i32, %c0_i32_0, %c0_i32_1 : i32, i32, i32
  }
  func.func @transform_24(%arg0: i32) -> (i32, i32, i32) {
    %c0_i32 = arith.constant 0 : i32
    %c0_i32_0 = arith.constant 0 : i32
    %c0_i32_1 = arith.constant 0 : i32
    %c0_i32_2 = arith.constant 0 : i32
    return %c0_i32, %c0_i32_0, %c0_i32_1 : i32, i32, i32
  }
  func.func @transform_25(%arg0: i32) -> (i32, i32, i32) {
    %c0_i32 = arith.constant 0 : i32
    %c0_i32_0 = arith.constant 0 : i32
    %c0_i32_1 = arith.constant 0 : i32
    %c0_i32_2 = arith.constant 0 : i32
    return %c0_i32, %c0_i32_0, %c0_i32_1 : i32, i32, i32
  }
  func.func @transform_26(%arg0: i32) -> (i32, i32, i32) {
    %c0_i32 = arith.constant 0 : i32
    %c0_i32_0 = arith.constant 0 : i32
    %c0_i32_1 = arith.constant 0 : i32
    %c0_i32_2 = arith.constant 0 : i32
    return %c0_i32, %c0_i32_0, %c0_i32_1 : i32, i32, i32
  }
  func.func @transform_27(%arg0: i32) -> (i32, i32, i32) {
    %c0_i32 = arith.constant 0 : i32
    %c0_i32_0 = arith.constant 0 : i32
    %c0_i32_1 = arith.constant 0 : i32
    %c0_i32_2 = arith.constant 0 : i32
    return %c0_i32, %c0_i32_0, %c0_i32_1 : i32, i32, i32
  }
  func.func @transform_28(%arg0: i32) -> (i32, i32, i32) {
    %c0_i32 = arith.constant 0 : i32
    %c0_i32_0 = arith.constant 0 : i32
    %c0_i32_1 = arith.constant 0 : i32
    %c0_i32_2 = arith.constant 0 : i32
    return %c0_i32, %c0_i32_0, %c0_i32_1 : i32, i32, i32
  }
  func.func @transform_29(%arg0: i32) -> (i32, i32, i32) {
    %c0_i32 = arith.constant 0 : i32
    %c0_i32_0 = arith.constant 0 : i32
    %c0_i32_1 = arith.constant 0 : i32
    %c0_i32_2 = arith.constant 0 : i32
    return %c0_i32, %c0_i32_0, %c0_i32_1 : i32, i32, i32
  }
  func.func @transform_30(%arg0: i32) -> (i32, i32, i32) {
    %c0_i32 = arith.constant 0 : i32
    %c0_i32_0 = arith.constant 0 : i32
    %c0_i32_1 = arith.constant 0 : i32
    %c0_i32_2 = arith.constant 0 : i32
    return %c0_i32, %c0_i32_0, %c0_i32_1 : i32, i32, i32
  }
  func.func @transform_31(%arg0: i32) -> (i32, i32, i32) {
    %c0_i32 = arith.constant 0 : i32
    %c0_i32_0 = arith.constant 0 : i32
    %c0_i32_1 = arith.constant 0 : i32
    %c0_i32_2 = arith.constant 0 : i32
    return %c0_i32, %c0_i32_0, %c0_i32_1 : i32, i32, i32
  }
  func.func @transform_32(%arg0: i32) -> (i32, i32, i32) {
    %c0_i32 = arith.constant 0 : i32
    %c0_i32_0 = arith.constant 0 : i32
    %c0_i32_1 = arith.constant 0 : i32
    %c0_i32_2 = arith.constant 0 : i32
    return %c0_i32, %c0_i32_0, %c0_i32_1 : i32, i32, i32
  }
  func.func @transform_33(%arg0: i32) -> (i32, i32, i32) {
    %c0_i32 = arith.constant 0 : i32
    %c0_i32_0 = arith.constant 0 : i32
    %c0_i32_1 = arith.constant 0 : i32
    %c0_i32_2 = arith.constant 0 : i32
    return %c0_i32, %c0_i32_0, %c0_i32_1 : i32, i32, i32
  }
  func.func @transform_34(%arg0: i32) -> (i32, i32, i32) {
    %c0_i32 = arith.constant 0 : i32
    %c0_i32_0 = arith.constant 0 : i32
    %c0_i32_1 = arith.constant 0 : i32
    %c0_i32_2 = arith.constant 0 : i32
    return %c0_i32, %c0_i32_0, %c0_i32_1 : i32, i32, i32
  }
  func.func @transform_35(%arg0: i32) -> (i32, i32, i32) {
    %c0_i32 = arith.constant 0 : i32
    %c0_i32_0 = arith.constant 0 : i32
    %c0_i32_1 = arith.constant 0 : i32
    %c0_i32_2 = arith.constant 0 : i32
    return %c0_i32, %c0_i32_0, %c0_i32_1 : i32, i32, i32
  }
  func.func @transform_36(%arg0: i32) -> (i32, i32, i32) {
    %c0_i32 = arith.constant 0 : i32
    %c0_i32_0 = arith.constant 0 : i32
    %c0_i32_1 = arith.constant 0 : i32
    %c0_i32_2 = arith.constant 0 : i32
    return %c0_i32, %c0_i32_0, %c0_i32_1 : i32, i32, i32
  }
  func.func @transform_37(%arg0: i32) -> (i32, i32) {
    %c0_i32 = arith.constant 0 : i32
    %c0_i32_0 = arith.constant 0 : i32
    %c0_i32_1 = arith.constant 0 : i32
    return %c0_i32, %c0_i32_0 : i32, i32
  }
  func.func @transform_38(%arg0: i32) -> (i32, i32) {
    %c0_i32 = arith.constant 0 : i32
    %c0_i32_0 = arith.constant 0 : i32
    %c0_i32_1 = arith.constant 0 : i32
    return %c0_i32, %c0_i32_0 : i32, i32
  }
  func.func @transform_39(%arg0: i32) -> (i32, i32) {
    %c0_i32 = arith.constant 0 : i32
    %c0_i32_0 = arith.constant 0 : i32
    %c0_i32_1 = arith.constant 0 : i32
    return %c0_i32, %c0_i32_0 : i32, i32
  }
  func.func @transform_40(%arg0: i32) -> (i32, i32) {
    %c0_i32 = arith.constant 0 : i32
    %c0_i32_0 = arith.constant 0 : i32
    %c0_i32_1 = arith.constant 0 : i32
    return %c0_i32, %c0_i32_0 : i32, i32
  }
  func.func @transform_41(%arg0: i32) -> (i32, i32, i32) {
    %c0_i32 = arith.constant 0 : i32
    %c0_i32_0 = arith.constant 0 : i32
    %c0_i32_1 = arith.constant 0 : i32
    return %arg0, %c0_i32, %c0_i32_0 : i32, i32, i32
  }
}

</mosaic_0001>

<bundles_post_ra>
// kernel: tpu_custom_call.1
= control target key start
LH: loop header
LB: loop body
LE: loop exit
PB: predicated region body
PF: predicated region fallthrough
CT: control target
= control target key end

     0   :  { %s16705_s6 = smov 1   ;;  %s16706_s10 = smov 2   ;;  %s18713_s0 = inlined_call_operand.smem [shape: u32[42], index: -1, kind: input, shape index: {}] }
   0x1   :  { %s16789_s5 = sld [smem:[%s18713_s0]]   ;;  %s16707_s14 = smov 3  }
   0x2   :  { %s16794_s9 = sld [smem:[%s18713_s0 + %s16705_s6]]   ;;  %s16708_s18 = smov 4  }
   0x3   :  { %s16799_s13 = sld [smem:[%s18713_s0 + %s16706_s10]]   ;;  %s16709_s22 = smov 5  }
   0x4   :  { %s16804_s17 = sld [smem:[%s18713_s0 + %s16707_s14]]   ;;  %s16710_s26 = smov 6  }
   0x5   :  { %s16809_s21 = sld [smem:[%s18713_s0 + %s16708_s18]]   ;;  %s16711_s30 = smov 7  }
   0x6   :  { %s16814_s25 = sld [smem:[%s18713_s0 + %s16709_s22]]   ;;  %s16712_s4 = smov 8  }
   0x7   :  { %18837 = sst [smem:[#allocation5_spill]] %s16789_s5  ;;  %s16713_s10 = smov 9  }
   0x8   :  { %18838 = sst [smem:[#allocation6_spill]] %s16794_s9  ;;  %s16714_s15 = smov 10  }
   0x9   :  { %18839 = sst [smem:[#allocation7_spill]] %s16799_s13  ;;  %s16715_s20 = smov 11  }
   0xa   :  { %18840 = sst [smem:[#allocation8_spill]] %s16804_s17  ;;  %s16717_s1 = smov 13  }
   0xb   :  { %18841 = sst [smem:[#allocation9_spill]] %s16809_s21  ;;  %s16718_s7 = smov 14  }
   0xc   :  { %18842 = sst [smem:[#allocation10_spill]] %s16814_s25  ;;  %s16720_s22 = smov 16  }
   0xd   :  { %s16819_s29 = sld [smem:[%s18713_s0 + %s16710_s26]]   ;;  %s16716_s26 = smov 12  }
   0xe   :  { %s16824_s3 = sld [smem:[%s18713_s0 + %s16711_s30]]   ;;  %s16721_s28 = smov 17  }
   0xf   :  { %s16829_s8 = sld [smem:[%s18713_s0 + %s16712_s4]]  }
  0x10   :  { %s16834_s14 = sld [smem:[%s18713_s0 + %s16713_s10]]  }
  0x11   :  { %s16839_s19 = sld [smem:[%s18713_s0 + %s16714_s15]]   ;;  %s16719_s15 = smov 15  }
  0x12   :  { %s16844_s24 = sld [smem:[%s18713_s0 + %s16715_s20]]  }
  0x13   :  { %18843 = sst [smem:[#allocation11_spill]] %s16819_s29 }
  0x14   :  { %18844 = sst [smem:[#allocation12_spill]] %s16824_s3 }
  0x15   :  { %18845 = sst [smem:[#allocation13_spill]] %s16829_s8 }
  0x16   :  { %18846 = sst [smem:[#allocation14_spill]] %s16834_s14 }
  0x17   :  { %18847 = sst [smem:[#allocation15_spill]] %s16839_s19 }
  0x18   :  { %18848 = sst [smem:[#allocation16_spill]] %s16844_s24 }
  0x19   :  { %s16849_s30 = sld [smem:[%s18713_s0 + %s16716_s26]]  }
  0x1a   :  { %s16854_s6 = sld [smem:[%s18713_s0 + %s16717_s1]]  }
  0x1b   :  { %s16859_s12 = sld [smem:[%s18713_s0 + %s16718_s7]]   ;;  %s16722_s7 = smov 18  }
  0x1c   :  { %s16864_s20 = sld [smem:[%s18713_s0 + %s16719_s15]]   ;;  %s16723_s15 = smov 19  }
  0x1d   :  { %s16869_s27 = sld [smem:[%s18713_s0 + %s16720_s22]]   ;;  %s16724_s22 = smov 20  }
  0x1e   :  { %s16874_s4 = sld [smem:[%s18713_s0 + %s16721_s28]]   ;;  %s16725_s28 = smov 21  }
  0x1f   :  { %18849 = sst [smem:[#allocation17_spill]] %s16849_s30 }
  0x20   :  { %18850 = sst [smem:[#allocation18_spill]] %s16854_s6 }
  0x21   :  { %18851 = sst [smem:[#allocation19_spill]] %s16859_s12 }
  0x22   :  { %18852 = sst [smem:[#allocation20_spill]] %s16864_s20 }
  0x23   :  { %18853 = sst [smem:[#allocation21_spill]] %s16869_s27 }
  0x24   :  { %18854 = sst [smem:[#allocation22_spill]] %s16874_s4 }
  0x25   :  { %s16879_s13 = sld [smem:[%s18713_s0 + %s16722_s7]]   ;;  %s16726_s7 = smov 22  }
  0x26   :  { %s16884_s20 = sld [smem:[%s18713_s0 + %s16723_s15]]   ;;  %s16727_s15 = smov 23  }
  0x27   :  { %s16889_s27 = sld [smem:[%s18713_s0 + %s16724_s22]]   ;;  %s16728_s22 = smov 24  }
  0x28   :  { %s16894_s4 = sld [smem:[%s18713_s0 + %s16725_s28]]   ;;  %s16729_s28 = smov 25  }
  0x2b   :  { %18855 = sst [smem:[#allocation23_spill]] %s16879_s13 }
  0x2c   :  { %18856 = sst [smem:[#allocation24_spill]] %s16884_s20 }
  0x2d   :  { %18857 = sst [smem:[#allocation25_spill]] %s16889_s27 }
  0x2e   :  { %18858 = sst [smem:[#allocation26_spill]] %s16894_s4 }
  0x2f   :  { %s16899_s13 = sld [smem:[%s18713_s0 + %s16726_s7]]   ;;  %s16730_s7 = smov 26  }
  0x30   :  { %s16904_s20 = sld [smem:[%s18713_s0 + %s16727_s15]]   ;;  %s16731_s15 = smov 27  }
  0x31   :  { %s16909_s27 = sld [smem:[%s18713_s0 + %s16728_s22]]   ;;  %s16732_s22 = smov 28  }
  0x32   :  { %s16914_s4 = sld [smem:[%s18713_s0 + %s16729_s28]]   ;;  %s16733_s28 = smov 29  }
  0x35   :  { %18859 = sst [smem:[#allocation27_spill]] %s16899_s13 }
  0x36   :  { %18860 = sst [smem:[#allocation28_spill]] %s16904_s20 }
  0x37   :  { %18861 = sst [smem:[#allocation29_spill]] %s16909_s27 }
  0x38   :  { %18862 = sst [smem:[#allocation30_spill]] %s16914_s4 }
  0x39   :  { %s16919_s13 = sld [smem:[%s18713_s0 + %s16730_s7]]   ;;  %s16734_s7 = smov 30  }
  0x3a   :  { %s16924_s20 = sld [smem:[%s18713_s0 + %s16731_s15]]   ;;  %s16735_s15 = smov 31  }
  0x3b   :  { %s16929_s27 = sld [smem:[%s18713_s0 + %s16732_s22]]   ;;  %s16736_s22 = smov 32  }
  0x3c   :  { %s16934_s4 = sld [smem:[%s18713_s0 + %s16733_s28]]   ;;  %s16737_s28 = smov 33  }
  0x3f   :  { %18863 = sst [smem:[#allocation31_spill]] %s16919_s13 }
  0x40   :  { %18864 = sst [smem:[#allocation32_spill]] %s16924_s20 }
  0x41   :  { %18865 = sst [smem:[#allocation33_spill]] %s16929_s27 }
  0x42   :  { %18866 = sst [smem:[#allocation34_spill]] %s16934_s4 }
  0x43   :  { %s16939_s13 = sld [smem:[%s18713_s0 + %s16734_s7]]   ;;  %s16738_s7 = smov 34  }
  0x44   :  { %s16944_s20 = sld [smem:[%s18713_s0 + %s16735_s15]]   ;;  %s16739_s15 = smov 35  }
  0x45   :  { %s16949_s27 = sld [smem:[%s18713_s0 + %s16736_s22]]   ;;  %s16740_s22 = smov 36  }
  0x46   :  { %s16954_s4 = sld [smem:[%s18713_s0 + %s16737_s28]]   ;;  %s16741_s28 = smov 37  }
  0x49   :  { %18867 = sst [smem:[#allocation35_spill]] %s16939_s13 }
  0x4a   :  { %18868 = sst [smem:[#allocation36_spill]] %s16944_s20 }
  0x4b   :  { %18869 = sst [smem:[#allocation37_spill]] %s16949_s27 }
  0x4c   :  { %18870 = sst [smem:[#allocation38_spill]] %s16954_s4 }
  0x4d   :  { %s16959_s13 = sld [smem:[%s18713_s0 + %s16738_s7]]   ;;  %s16742_s7 = smov 38  }
  0x4e   :  { %s16964_s20 = sld [smem:[%s18713_s0 + %s16739_s15]]   ;;  %s16743_s15 = smov 39  }
  0x4f   :  { %s16969_s27 = sld [smem:[%s18713_s0 + %s16740_s22]]   ;;  %s16744_s22 = smov 40  }
  0x50   :  { %s16974_s4 = sld [smem:[%s18713_s0 + %s16741_s28]]   ;;  %s16745_s28 = smov 41  }
  0x53   :  { %18871 = sst [smem:[#allocation39_spill]] %s16959_s13 }
  0x54   :  { %18872 = sst [smem:[#allocation40_spill]] %s16964_s20 }
  0x55   :  { %18873 = sst [smem:[#allocation41_spill]] %s16969_s27 }
  0x56   :  { %18874 = sst [smem:[#allocation42_spill]] %s16974_s4 }
  0x57   :  { %s16979_s13 = sld [smem:[%s18713_s0 + %s16742_s7]]  }
  0x58   :  { %s16984_s20 = sld [smem:[%s18713_s0 + %s16743_s15]]  }
  0x59   :  { %s16989_s27 = sld [smem:[%s18713_s0 + %s16744_s22]]  }
  0x5a   :  { %s16994_s4 = sld [smem:[%s18713_s0 + %s16745_s28]]  }
  0x5d   :  { %18875 = sst [smem:[#allocation43_spill]] %s16979_s13 }
  0x5e   :  { %18876 = sst [smem:[#allocation44_spill]] %s16984_s20 }
  0x5f   :  { %18877 = sst [smem:[#allocation45_spill]] %s16989_s27 }
  0x60   :  { %18878 = sst [smem:[#allocation46_spill]] %s16994_s4 }
  0x61   :  { %88 = vsyncpa [#allocation3], 0 }
  0x62   :  { %90 = vsyncpa [#allocation3 + $0x1], 0  ;;  %s16996_s7 = smov 0   ;;  %s16998_s10 = smov 0  }
  0x63   :  { %s17000_s11 = smov 0   ;;  %s17002_s15 = smov 0  }
  0x64 LB: > { %s18879_s30 = sld [smem:[#allocation17_spill]]  ;;  %s18880_s29 = sld [smem:[#allocation11_spill]]  ;;  %s16691_s7 = sphi %s16996_s7, %s19009_s7   ;;  %s16703_s15 = sphi %s17002_s15, %s19008_s15   ;;  %s16699_s11 = sphi %s17000_s11, %s19011_s11   ;;  %s16695_s10 = sphi %s16998_s10, %s19010_s10  }
  0x65   : > { %s18881_s24 = sld [smem:[#allocation16_spill]]  ;;  %s18882_s19 = sld [smem:[#allocation15_spill]] }
  0x66   : > { %s18883_s12 = sld [smem:[#allocation19_spill]]  ;;  %s18884_s6 = sld [smem:[#allocation18_spill]] }
  0x67   : > { %s18885_s8 = sld [smem:[#allocation13_spill]]  ;;  %s18886_s3 = sld [smem:[#allocation12_spill]] }
  0x68   : > { %s18887_s14 = sld [smem:[#allocation14_spill]]  ;;  %s18888_s25 = sld [smem:[#allocation10_spill]] }
  0x69   : > { %s18889_s21 = sld [smem:[#allocation9_spill]]  ;;  %s18890_s17 = sld [smem:[#allocation8_spill]] }
  0x6a   : > { %s18891_s9 = sld [smem:[#allocation6_spill]]  ;;  %18892 = sst [smem:[#allocation47_spill]] %s16691_s7 }
  0x6b   : > { %18893 = sst [smem:[#allocation48_spill]] %s16695_s10  ;;  %s17017_s0 = sadd.s32 4294967295, %s16703_s15  }
  0x6c   : > { %18894 = sst [smem:[#allocation49_spill]] %s16699_s11  ;;  %s13139_s16 = sadd.s32 4294967294, %s16703_s15  }
  0x6d   : > { %18895 = sst [smem:[#allocation50_spill]] %s16703_s15  ;;  %s17021_s18 = sadd.s32 1, %s16703_s15  }
  0x6e   : > { %18896 = sst [smem:[#allocation51_spill]] %s17017_s0  ;;  %s969_s22 = sadd.s32 1, %s16699_s11 }
  0x6f   : > { %18897 = sst [smem:[#allocation52_spill]] %s17021_s18  ;;  %s966_s23 = ssub.s32 %s16703_s15, %s17021_s18 }
  0x70   : > { %p979_p0 = scmp.ne.s32.totalorder %s16699_s11, %s16695_s10  ;;  %p967_p1 = scmp.eq.s32.totalorder %s966_s23, 0 }
  0x71   : > { %p980_p2 = scmp.eq.s32.totalorder %s17017_s0, 1  ;;  %p985_p3 = scmp.ne.s32.totalorder %s16695_s10, %s16691_s7 }
  0x72   : > { %p986_p4 = scmp.eq.s32.totalorder %s13139_s16, 1  ;;  %p13142_p7 = scmp.ge.s32.totalorder %s16703_s15, 1 }
  0x73   : > { %s17032_s26 = scalar_select %p967_p1, %s16699_s11, %s969_s22  }
  0x74   : > { %p17034_p5 = por %p980_p2, %p979_p0  ;;  %p17038_p6 = por %p986_p4, %p985_p3 }
  0x75   : > { %18898 = sst [smem:[#allocation53_spill]] %s17032_s26  ;;  %p1132_p8 = scmp.lt.s32.totalorder %s16703_s15, 3 }
  0x76   : > { %s18899_s28 = scalar_select %p17034_p5, 1, 0 }
  0x77   : > { %s18901_s1 = scalar_select %p17038_p6, 1, 0 }
  0x78   : > { %18900 = sst [smem:[#allocation54_spill]] %s18899_s28  ;;  %p1133_p9 = pnand %p13142_p7, %p1132_p8 }
  0x79   : > { %18902 = sst [smem:[#allocation55_spill]] %s18901_s1  ;;  %s18903_s5 = sld [smem:[#allocation5_spill]] (!%p1133_p9)  ;;  %v1242_v0 = vld [vmem:[%s18890_s17] sm:$0xff] (!%p1133_p9)  ;;  %v1243_v1 = vld [vmem:[%s18890_s17 + $0x8] sm:$0xff] (!%p1133_p9)  ;;  %v1244_v2 = vld [vmem:[%s18890_s17 + $0x10] sm:$0xff] (!%p1133_p9)  ;;  %vm1261_vm0 = vcmask (!%p1133_p9), 1043456  }
  0x7a   : > { %1136 = sbr.rel (%p1133_p9) target bundleno = 33583 (0x832f), region = 184  ;;  %p1231_p10 = scmp.lt.s32.totalorder (!%p1133_p9), %s17017_s0, 1  ;;  %v15115_v3 = vpack.c.bf16 (!%p1133_p9), %v1243_v1, %v1242_v0  ;;  %v1245_v4 = vld [vmem:[%s18890_s17 + $0x18] sm:$0xff] (!%p1133_p9)  ;;  %v1238_v6 = vld [vmem:[%s18891_s9] sm:$0xff] (!%p1133_p9)  ;;  %v1239_v10 = vld [vmem:[%s18891_s9 + $0x8] sm:$0xff] (!%p1133_p9)  ;;  %vm1254_vm1 = vcmask (!%p1133_p9), 293888  }
  0x7b   : > { %v15119_v5 = vpack.c.bf16 (!%p1133_p9), %v1245_v4, %v1244_v2  ;;  %v1246_v7 = vld [vmem:[%s18890_s17 + $0x20] sm:$0xf] (!%p1133_p9)  ;;  %vm1354_vm2 = vcmask (!%p1133_p9), 31744   ;;  %s18774_s23 = smov (!%p1133_p9), 92   ;;  %vm1440_vm4 = vcmask (!%p1133_p9), 130048   ;;  %vm3216_vm5 = vcmask (!%p1133_p9), 64512  }
  0x7c   : > { %15116 = vmatprep.subr.bf16.mxu0 (!%p1133_p9), %v15115_v3  ;;  %v13145_v13 = vld [vmem:[%s18889_s21] ss:$0 sm:$0xff] (!%p1133_p9)  ;;  %vm17084_vm3 = vmpackc.low (!%p1133_p9), %vm1354_vm2, %vm1354_vm2  ;;  %vm3219_vm6 = vcmask (!%p1133_p9), 97280   ;;  %vm3224_vm7 = vcmask (!%p1133_p9), 162816   ;;  %vm3227_vm8 = vcmask (!%p1133_p9), 195584   ;;  %vm3230_vm9 = vcmask (!%p1133_p9), 228352  }
  0x7d   : > { %15118 = vmatpush3.bf16.msra.mxu0 (!%p1133_p9), %v15115_v3  ;;  %vm3233_vm10 = vcmask (!%p1133_p9), 261120   ;;  %vm3486_vm11 = vcmask (!%p1133_p9), 523264   ;;  %s18911_s9 = smov (!%p1133_p9), 88   ;;  %s18912_s26 = smov (!%p1133_p9), 84   ;;  %vm16778_vm12 = vmmov (!%p1133_p9), 0   ;;  %vm8596_vm13 = vcmask (!%p1133_p9), 286720  }
  0x7e   : > { %15120 = vmatprep.subr.bf16.mxu0 (!%p1133_p9), %v15119_v5  ;;  %s18913_s11 = smov (!%p1133_p9), 52   ;;  %s18914_s18 = smov (!%p1133_p9), 120   ;;  %vm8876_vm14 = vcmask (!%p1133_p9), 122880   ;;  %vm13028_vm15 = vcmask (!%p1133_p9), 32768  }
  0x7f   : > { %s18915_s1 = smov (!%p1133_p9), 80   ;;  %s18916_s7 = smov (!%p1133_p9), 116  }
  0x80   : > { %s18917_s15 = smov (!%p1133_p9), 48   ;;  %s18918_s28 = smov (!%p1133_p9), 76  }
  0x81   : > { %s1232_s2 = scalar_select %p1231_p10, %s17017_s0, 1  ;;  %15122 = vmatpush3.bf16.msra.mxu0 %v15119_v5 }
  0x82   : > { %14112 = vmatprep.subr.msk.mxu0 %vm1261_vm0, %v1246_v7  ;;  %s18919_s4 = smov 112   ;;  %s18920_s0 = smov 44  }
  0x83   : > { %s13588_s16 = sshll.u32 %s1232_s2, 4  ;;  %s18736_s2 = smov 124  }
  0x84   : > { %s1235_s22 = scalar_lea.vmem %s18903_s5, %s13588_s16  ;;  %s18734_s16 = smov 88  }
  0x85   : > { %v1236_v8 = vld [vmem:[%s1235_s22] sm:$0xff]  ;;  %v1237_v9 = vld [vmem:[%s1235_s22 + $0x8] sm:$0xff]  ;;  %14113 = vmatpush3.msk.msra.mxu0 %vm1261_vm0, %v1246_v7  ;;  %s18738_s22 = smov 56   ;;  %s18790_s5 = smov 16  }
  0x86   : > { %v17054_v11 = vadd.f32 %v1238_v6, %v1236_v8  ;;  %v17057_v12 = vadd.f32 %v1239_v10, %v1237_v9  ;;  %s18921_s27 = smov 72   ;;  %s18922_s10 = smov 108  }
  0x87   : > { %s18923_s13 = smov 40   ;;  %s18924_s20 = smov 68  }
  0x88   : > { %14114 = vmatprep.mubr.msk.f32.mxu0 %vm1254_vm1, %v17054_v11 }
  0x89   : > { %14115 = vmatmul.mubr.msk.f32.vlgmr.msra.gmra.mrb[0].mxu0 %vm1254_vm1, %v17057_v12 }
 0x15c   : > { %v14116_v14 = vpop.f32.mrb[0].mxu0 }
 0x15d   : > { %v1337_v15 = vadd.f32 %v14116_v14, %v13145_v13  ;;  %v1331_v16 = vpop.f32.mrb[1].mxu0 }
 0x15e   : > { %v1332_v17 = vadd.f32 %v13145_v13, %v1331_v16 }
 0x15f   : > { %v17073_v20 = vmul.f32 0.5, %v1337_v15 }
 0x160   : > { %v17065_v18 = vpack.i.bf16 %v1337_v15, %v1332_v17  ;;  %v17067_v19 = vmul.f32 0.5, %v1332_v17 }
 0x162   : > { %15852 = vrot.lane.b32.xlu0 %v17065_v18, %s18774_s23  ;;  %1550 = vrot.lane.b32.xlu1 %v17067_v19, %s18736_s2  ;;  %s18782_s23 = smov 28  }
 0x163   : > { %14121 = vmatprep.mubr.msk.f32.mxu1 %vm1354_vm2, %v17067_v19 }
 0x166   : > { %15857 = vrot.lane.b32.xlu0 %v17065_v18, %s18734_s16  ;;  %1552 = vrot.lane.b32.xlu1 %v17073_v20, %s18736_s2  ;;  %s18744_s16 = smov 84   ;;  %s18742_s2 = smov 52  }
 0x1d4   : > { %v15853_v21 = vpop.permute.xlu0 %15852  ;;  %v1551_v22 = vpop.permute.xlu1 %1550 }
 0x1d5   : > { %14135 = vmatprep.mubr.msk.f32.mxu0 %vm1354_vm2, %v1551_v22  ;;  %v15855_v23 = vunpack.i.h.bf16 %v15853_v21  ;;  %v15854_v24 = vunpack.i.l.bf16 %v15853_v21 }
 0x1d7   : > { %v15123_v26 = vpack.c.bf16 %v15855_v23, %v15854_v24 }
 0x1d8   : > { %v15858_v27 = vpop.permute.xlu0 %15857  ;;  %v1553_v31 = vpop.permute.xlu1 %1552 }
 0x1d9   : > { %v15860_v28 = vunpack.i.h.bf16 %v15858_v27  ;;  %v15859_v29 = vunpack.i.l.bf16 %v15858_v27  ;;  %15125 = vmatprep.subr.msk.bf16.mxu1 %vm17084_vm3, %v15123_v26 }
 0x1da   : > { %15128 = vmatpush3.bf16.xpose.msk.msra.mxu1 %vm17084_vm3, %v15123_v26 }
 0x1db   : > { %v15133_v30 = vpack.c.bf16 %v15860_v28, %v15859_v29 }
 0x1dd   : > { %15135 = vmatprep.subr.msk.bf16.mxu0 %vm17084_vm3, %v15133_v30 }
 0x1de   : > { %15138 = vmatpush3.bf16.xpose.msk.msra.mxu0 %vm17084_vm3, %v15133_v30 }
 0x1e1   : > { %14122 = vmatmul.mubr.msk.f32.vlgmr.msra.gmra.mrb[0].mxu1 %vm1354_vm2, %v17073_v20 }
 0x1e5   : > { %14136 = vmatmul.mubr.msk.f32.vlgmr.msra.gmra.mrb[2].mxu0 %vm1354_vm2, %v1553_v31 }
 0x2b4   : > { %v14123_v32 = vpop.f32.mrb[0].mxu1 }
 0x2b5   : > { %v1431_v33 = vpop.f32.mrb[1].mxu1  ;;  %v1444_v34 = vsel %vm1440_vm4, %v14123_v32, -inf }
 0x2b6   : > { %1445 = vmax.xlane.f32.xlu1 %v1444_v34  ;;  %v1441_v35 = vsel %vm1440_vm4, %v1431_v33, -inf }
 0x2b7   : > { %1442 = vmax.xlane.f32.xlu0 %v1441_v35 }
 0x2b8   : > { %v14137_v36 = vpop.f32.mrb[2].mxu0 }
 0x2b9   : > { %v1632_v37 = vpop.f32.mrb[3].mxu0  ;;  %v1644_v39 = vsel %vm1440_vm4, %v14137_v36, -inf }
 0x2ba   : > { %v1641_v38 = vsel %vm1440_vm4, %v1632_v37, -inf }
 0x2bb   : > { %1642 = vmax.xlane.f32.xlu0 %v1641_v38 }
 0x2bf   : > { %1645 = vmax.xlane.f32.xlu0 %v1644_v39 }
 0x2c7   : > { %15862 = vrot.lane.b32.xlu1 %v17065_v18, %s18738_s22  ;;  %s18740_s22 = smov 120  }
 0x343   : > { %v1446_v40 = vpop.xlane.xlu1 %1445 }
 0x344   : > { %v1448_v41 = vsub.f32 %v14123_v32, %v1446_v40  ;;  %v1443_v42 = vpop.xlane.xlu0 %1442 }
 0x345   : > { %v1447_v43 = vsub.f32 %v1431_v33, %v1443_v42 }
 0x346   : > { %v1451_v44 = vmul.f32 1.442695, %v1448_v41 }
 0x347   : > { %v1449_v45 = vmul.f32 1.442695, %v1447_v43  ;;  %v15863_v46 = vpop.permute.xlu1 %15862 }
 0x348   : > { %16311 = vpow2.f32 %v1451_v44  ;;  %v15865_v47 = vunpack.i.h.bf16 %v15863_v46  ;;  %v15864_v48 = vunpack.i.l.bf16 %v15863_v46  ;;  %v1643_v49 = vpop.xlane.xlu0 %1642 }
 0x349   : > { %16313 = vpow2.f32 %v1449_v45  ;;  %v1647_v60 = vsub.f32 %v1632_v37, %v1643_v49 }
 0x34a   : > { %v15129_v50 = vpack.c.bf16 %v15865_v47, %v15864_v48 }
 0x34b   : > { %v1649_v61 = vmul.f32 1.442695, %v1647_v60 }
 0x34c   : > { %15130 = vmatprep.subr.bf16.mxu1 %v15129_v50  ;;  %v1646_v51 = vpop.xlane.xlu0 %1645 }
 0x34d   : > { %v1648_v52 = vsub.f32 %v14137_v36, %v1646_v51  ;;  %15132 = vmatpush3.bf16.msra.mxu1 %v15129_v50 }
 0x34f   : > { %v1651_v53 = vmul.f32 1.442695, %v1648_v52 }
 0x351   : > { %16315 = vpow2.f32 %v1651_v53 }
 0x352   : > { %v16312_v54 = vpop.eup %16311  ;;  %16317 = vpow2.f32 %v1649_v61 }
 0x353   : > { %v16314_v55 = vpop.eup %16313  ;;  %v1456_v56 = vsel %vm1440_vm4, %v16312_v54, 0.0 }
 0x354   : > { %1457 = vadd.xlane.f32.xlu0 %v1456_v56  ;;  %v1453_v57 = vsel %vm1440_vm4, %v16314_v55, 0.0 }
 0x355   : > { %1454 = vadd.xlane.f32.xlu1 %v1453_v57 }
 0x35b   : > { %v16316_v58 = vpop.eup %16315 }
 0x35c   : > { %v1656_v59 = vsel %vm1440_vm4, %v16316_v58, 0.0  ;;  %v16318_v62 = vpop.eup %16317 }
 0x35d   : > { %1657 = vadd.xlane.f32.xlu0 %v1656_v59  ;;  %v1653_v63 = vsel %vm1440_vm4, %v16318_v62, 0.0 }
 0x366   : > { %15872 = vrot.lane.b32.xlu1 %v17065_v18, %s18744_s16  ;;  %s18746_s16 = smov 48  }
 0x373   : > { %15867 = vrot.lane.b32.xlu0 %v17065_v18, %s18742_s2  ;;  %s18748_s2 = smov 116  }
 0x377   : > { %1752 = vrot.lane.b32.xlu0 %v17073_v20, %s18740_s22 }
 0x38a   : > { %1654 = vadd.xlane.f32.xlu1 %v1653_v63 }
 0x39b   : > { %1750 = vrot.lane.b32.xlu1 %v17067_v19, %s18740_s22  ;;  %s18750_s22 = smov 80  }
 0x3e1   : > { %v1458_v0 = vpop.xlane.xlu0 %1457 }
 0x3e2   : > { %16319 = vrcp.f32 %v1458_v0  ;;  %v1455_v1 = vpop.xlane.xlu1 %1454 }
 0x3e3   : > { %16321 = vrcp.f32 %v1455_v1 }
 0x3e6   : > { %v15873_v3 = vpop.permute.xlu1 %15872 }
 0x3e7   : > { %v15875_v6 = vunpack.i.h.bf16 %v15873_v3  ;;  %v15874_v9 = vunpack.i.l.bf16 %v15873_v3 }
 0x3e9   : > { %v15143_v16 = vpack.c.bf16 %v15875_v6, %v15874_v9 }
 0x3ea   : > { %v1658_v2 = vpop.xlane.xlu0 %1657 }
 0x3eb   : > { %16323 = vrcp.f32 %v1658_v2 }
 0x3ec   : > { %v16320_v4 = vpop.eup %16319 }
 0x3ed   : > { %v16322_v5 = vpop.eup %16321  ;;  %v1462_v14 = vmul.f32 %v16320_v4, %v16312_v54 }
 0x3ee   : > { %v15868_v7 = vpop.permute.xlu0 %15867  ;;  %v1461_v8 = vmul.f32 %v16322_v5, %v16314_v55 }
 0x3ef   : > { %v15870_v10 = vunpack.i.h.bf16 %v15868_v7  ;;  %v15869_v13 = vunpack.i.l.bf16 %v15868_v7 }
 0x3f0   : > { %14128 = vmatprep.mubr.msk.f32.mxu1 %vm1440_vm4, %v1461_v8 }
 0x3f1   : > { %14129 = vmatmul.mubr.msk.f32.vlgmr.msra.gmra.mrb[2].mxu1 %vm1440_vm4, %v1462_v14  ;;  %v15139_v15 = vpack.c.bf16 %v15870_v10, %v15869_v13 }
 0x3f2   : > { %v1753_v27 = vpop.permute.xlu0 %1752 }
 0x3f3   : > { %15140 = vmatprep.subr.bf16.mxu1 %v15139_v15 }
 0x3f4   : > { %15142 = vmatpush3.bf16.msra.mxu1 %v15139_v15 }
 0x3f5   : > { %15145 = vmatprep.subr.msk.bf16.mxu1 %vm17084_vm3, %v15143_v16  ;;  %v16324_v21 = vpop.eup %16323 }
 0x3f6   : > { %v1662_v24 = vmul.f32 %v16324_v21, %v16316_v58 }
 0x417   : > { %v1655_v17 = vpop.xlane.xlu1 %1654 }
 0x418   : > { %16325 = vrcp.f32 %v1655_v17 }
 0x41b   : > { %v1751_v26 = vpop.permute.xlu1 %1750 }
 0x422   : > { %v16326_v22 = vpop.eup %16325 }
 0x423   : > { %v1661_v23 = vmul.f32 %v16326_v22, %v16318_v62 }
 0x425   : > { %14142 = vmatprep.mubr.msk.f32.mxu1 %vm1440_vm4, %v1661_v23 }
 0x426   : > { %14143 = vmatmul.mubr.msk.f32.vlgmr.msra.gmra.mrb[4].mxu1 %vm1440_vm4, %v1662_v24 }
 0x427   : > { %15148 = vmatpush3.bf16.xpose.msk.msra.mxu1 %vm17084_vm3, %v15143_v16  ;;  %14149 = vmatprep.mubr.msk.f32.mxu1 %vm1354_vm2, %v1751_v26 }
 0x42e   : > { %14150 = vmatmul.mubr.msk.f32.vlgmr.msra.gmra.mrb[6].mxu1 %vm1354_vm2, %v1753_v27 }
 0x4c4   : > { %v17127_v28 = vpop.f32.mrb[2].mxu1 }
 0x4c5   : > { %v17129_v29 = vpop.f32.mrb[3].mxu1 }
 0x4f9   : > { %v17131_v30 = vpop.f32.mrb[4].mxu1 }
 0x4fa   : > { %v17133_v31 = vpop.f32.mrb[5].mxu1 }
 0x501   : > { %v14151_v32 = vpop.f32.mrb[6].mxu1 }
 0x502   : > { %v1832_v33 = vpop.f32.mrb[7].mxu1  ;;  %v1844_v34 = vsel %vm1440_vm4, %v14151_v32, -inf }
 0x503   : > { %1845 = vmax.xlane.f32.xlu0 %v1844_v34  ;;  %v1841_v35 = vsel %vm1440_vm4, %v1832_v33, -inf }
 0x504   : > { %1842 = vmax.xlane.f32.xlu1 %v1841_v35 }
 0x590   : > { %v1846_v36 = vpop.xlane.xlu0 %1845 }
 0x591   : > { %v1848_v37 = vsub.f32 %v14151_v32, %v1846_v36  ;;  %v1843_v38 = vpop.xlane.xlu1 %1842 }
 0x592   : > { %v1847_v39 = vsub.f32 %v1832_v33, %v1843_v38 }
 0x593   : > { %v1851_v40 = vmul.f32 1.442695, %v1848_v37 }
 0x594   : > { %v1849_v41 = vmul.f32 1.442695, %v1847_v39 }
 0x595   : > { %16327 = vpow2.f32 %v1851_v40 }
 0x596   : > { %16329 = vpow2.f32 %v1849_v41 }
 0x59f   : > { %v16328_v42 = vpop.eup %16327 }
 0x5a0   : > { %v16330_v43 = vpop.eup %16329  ;;  %v1856_v44 = vsel %vm1440_vm4, %v16328_v42, 0.0 }
 0x5a1   : > { %1857 = vadd.xlane.f32.xlu1 %v1856_v44  ;;  %v1853_v45 = vsel %vm1440_vm4, %v16330_v43, 0.0 }
 0x5a2   : > { %1854 = vadd.xlane.f32.xlu0 %v1853_v45 }
 0x5b2   : > { %15882 = vrot.lane.b32.xlu1 %v17065_v18, %s18750_s22  ;;  %s18752_s22 = smov 44  }
 0x5b6   : > { %1950 = vrot.lane.b32.xlu1 %v17067_v19, %s18748_s2 }
 0x5b8   : > { %15877 = vrot.lane.b32.xlu0 %v17065_v18, %s18746_s16  ;;  %s18756_s16 = smov 76  }
 0x5bc   : > { %1952 = vrot.lane.b32.xlu0 %v17073_v20, %s18748_s2  ;;  %s18754_s2 = smov 112  }
 0x62e   : > { %v1858_v46 = vpop.xlane.xlu1 %1857 }
 0x62f   : > { %16331 = vrcp.f32 %v1858_v46  ;;  %v1855_v47 = vpop.xlane.xlu0 %1854 }
 0x630   : > { %16333 = vrcp.f32 %v1855_v47 }
 0x632   : > { %v15883_v48 = vpop.permute.xlu1 %15882 }
 0x633   : > { %v15878_v49 = vpop.permute.xlu0 %15877  ;;  %v15885_v50 = vunpack.i.h.bf16 %v15883_v48  ;;  %v15884_v51 = vunpack.i.l.bf16 %v15883_v48 }
 0x634   : > { %v15880_v52 = vunpack.i.h.bf16 %v15878_v49  ;;  %v15879_v53 = vunpack.i.l.bf16 %v15878_v49 }
 0x635   : > { %v15153_v55 = vpack.c.bf16 %v15885_v50, %v15884_v51 }
 0x636   : > { %v15149_v54 = vpack.c.bf16 %v15880_v52, %v15879_v53  ;;  %v1951_v60 = vpop.permute.xlu1 %1950 }
 0x637   : > { %v1953_v61 = vpop.permute.xlu0 %1952 }
 0x638   : > { %15150 = vmatprep.subr.bf16.mxu0 %v15149_v54 }
 0x639   : > { %v16332_v56 = vpop.eup %16331  ;;  %15152 = vmatpush3.bf16.msra.mxu0 %v15149_v54 }
 0x63a   : > { %v16334_v57 = vpop.eup %16333  ;;  %15155 = vmatprep.subr.msk.bf16.mxu0 %vm17084_vm3, %v15153_v55  ;;  %v1862_v59 = vmul.f32 %v16332_v56, %v16328_v42 }
 0x63b   : > { %v1861_v58 = vmul.f32 %v16334_v57, %v16330_v43 }
 0x63d   : > { %14156 = vmatprep.mubr.msk.f32.mxu0 %vm1440_vm4, %v1861_v58 }
 0x63e   : > { %14157 = vmatmul.mubr.msk.f32.vlgmr.msra.gmra.mrb[4].mxu0 %vm1440_vm4, %v1862_v59 }
 0x63f   : > { %14163 = vmatprep.mubr.msk.f32.mxu0 %vm1354_vm2, %v1951_v60 }
 0x642   : > { %15158 = vmatpush3.bf16.xpose.msk.msra.mxu0 %vm17084_vm3, %v15153_v55 }
 0x649   : > { %14164 = vmatmul.mubr.msk.f32.vlgmr.msra.gmra.mrb[6].mxu0 %vm1354_vm2, %v1953_v61 }
 0x711   : > { %v17155_v62 = vpop.f32.mrb[4].mxu0 }
 0x712   : > { %v17157_v63 = vpop.f32.mrb[5].mxu0 }
 0x71c   : > { %v14165_v0 = vpop.f32.mrb[6].mxu0 }
 0x71d   : > { %v2032_v1 = vpop.f32.mrb[7].mxu0  ;;  %v2044_v2 = vsel %vm1440_vm4, %v14165_v0, -inf }
 0x71e   : > { %2045 = vmax.xlane.f32.xlu0 %v2044_v2  ;;  %v2041_v3 = vsel %vm1440_vm4, %v2032_v1, -inf }
 0x71f   : > { %2042 = vmax.xlane.f32.xlu1 %v2041_v3 }
 0x7ab   : > { %v2046_v4 = vpop.xlane.xlu0 %2045 }
 0x7ac   : > { %v2048_v5 = vsub.f32 %v14165_v0, %v2046_v4  ;;  %v2043_v6 = vpop.xlane.xlu1 %2042 }
 0x7ad   : > { %v2047_v7 = vsub.f32 %v2032_v1, %v2043_v6 }
 0x7ae   : > { %v2051_v8 = vmul.f32 1.442695, %v2048_v5 }
 0x7af   : > { %v2049_v9 = vmul.f32 1.442695, %v2047_v7 }
 0x7b0   : > { %16335 = vpow2.f32 %v2051_v8 }
 0x7b1   : > { %16337 = vpow2.f32 %v2049_v9 }
 0x7ba   : > { %v16336_v10 = vpop.eup %16335 }
 0x7bb   : > { %v16338_v13 = vpop.eup %16337  ;;  %v2056_v14 = vsel %vm1440_vm4, %v16336_v10, 0.0 }
 0x7bc   : > { %2057 = vadd.xlane.f32.xlu1 %v2056_v14  ;;  %v2053_v15 = vsel %vm1440_vm4, %v16338_v13, 0.0 }
 0x7bd   : > { %2054 = vadd.xlane.f32.xlu0 %v2053_v15 }
 0x7cd   : > { %15892 = vrot.lane.b32.xlu1 %v17065_v18, %s18756_s16  ;;  %s18758_s16 = smov 40  }
 0x7d1   : > { %2150 = vrot.lane.b32.xlu1 %v17067_v19, %s18754_s2 }
 0x7d3   : > { %15887 = vrot.lane.b32.xlu0 %v17065_v18, %s18752_s22  ;;  %s18762_s22 = smov 72  }
 0x7d7   : > { %2152 = vrot.lane.b32.xlu0 %v17073_v20, %s18754_s2  ;;  %s18760_s2 = smov 108  }
 0x849   : > { %v2058_v16 = vpop.xlane.xlu1 %2057 }
 0x84a   : > { %16339 = vrcp.f32 %v2058_v16  ;;  %v2055_v17 = vpop.xlane.xlu0 %2054 }
 0x84b   : > { %16341 = vrcp.f32 %v2055_v17 }
 0x84d   : > { %v15893_v21 = vpop.permute.xlu1 %15892 }
 0x84e   : > { %v15888_v22 = vpop.permute.xlu0 %15887  ;;  %v15895_v23 = vunpack.i.h.bf16 %v15893_v21  ;;  %v15894_v24 = vunpack.i.l.bf16 %v15893_v21 }
 0x84f   : > { %v15890_v26 = vunpack.i.h.bf16 %v15888_v22  ;;  %v15889_v27 = vunpack.i.l.bf16 %v15888_v22 }
 0x850   : > { %v15163_v33 = vpack.c.bf16 %v15895_v23, %v15894_v24 }
 0x851   : > { %v15159_v32 = vpack.c.bf16 %v15890_v26, %v15889_v27  ;;  %v2151_v38 = vpop.permute.xlu1 %2150 }
 0x852   : > { %v2153_v39 = vpop.permute.xlu0 %2152 }
 0x853   : > { %15160 = vmatprep.subr.bf16.mxu1 %v15159_v32 }
 0x854   : > { %v16340_v34 = vpop.eup %16339  ;;  %15162 = vmatpush3.bf16.msra.mxu1 %v15159_v32 }
 0x855   : > { %v16342_v35 = vpop.eup %16341  ;;  %15165 = vmatprep.subr.msk.bf16.mxu1 %vm17084_vm3, %v15163_v33  ;;  %v2062_v37 = vmul.f32 %v16340_v34, %v16336_v10 }
 0x856   : > { %v2061_v36 = vmul.f32 %v16342_v35, %v16338_v13 }
 0x858   : > { %14170 = vmatprep.mubr.msk.f32.mxu1 %vm1440_vm4, %v2061_v36 }
 0x859   : > { %14171 = vmatmul.mubr.msk.f32.vlgmr.msra.gmra.mrb[8].mxu1 %vm1440_vm4, %v2062_v37 }
 0x85a   : > { %14177 = vmatprep.mubr.msk.f32.mxu1 %vm1354_vm2, %v2151_v38 }
 0x85d   : > { %15168 = vmatpush3.bf16.xpose.msk.msra.mxu1 %vm17084_vm3, %v15163_v33 }
 0x864   : > { %14178 = vmatmul.mubr.msk.f32.vlgmr.msra.gmra.mrb[10].mxu1 %vm1354_vm2, %v2153_v39 }
 0x92c   : > { %v17179_v40 = vpop.f32.mrb[8].mxu1 }
 0x92d   : > { %v17181_v41 = vpop.f32.mrb[9].mxu1 }
 0x937   : > { %v14179_v42 = vpop.f32.mrb[10].mxu1 }
 0x938   : > { %v2232_v43 = vpop.f32.mrb[11].mxu1  ;;  %v2244_v44 = vsel %vm1440_vm4, %v14179_v42, -inf }
 0x939   : > { %2245 = vmax.xlane.f32.xlu0 %v2244_v44  ;;  %v2241_v45 = vsel %vm1440_vm4, %v2232_v43, -inf }
 0x93a   : > { %2242 = vmax.xlane.f32.xlu1 %v2241_v45 }
 0x9c6   : > { %v2246_v46 = vpop.xlane.xlu0 %2245 }
 0x9c7   : > { %v2248_v47 = vsub.f32 %v14179_v42, %v2246_v46  ;;  %v2243_v48 = vpop.xlane.xlu1 %2242 }
 0x9c8   : > { %v2247_v49 = vsub.f32 %v2232_v43, %v2243_v48 }
 0x9c9   : > { %v2251_v50 = vmul.f32 1.442695, %v2248_v47 }
 0x9ca   : > { %v2249_v51 = vmul.f32 1.442695, %v2247_v49 }
 0x9cb   : > { %16343 = vpow2.f32 %v2251_v50 }
 0x9cc   : > { %16345 = vpow2.f32 %v2249_v51 }
 0x9d5   : > { %v16344_v52 = vpop.eup %16343 }
 0x9d6   : > { %v16346_v53 = vpop.eup %16345  ;;  %v2256_v54 = vsel %vm1440_vm4, %v16344_v52, 0.0 }
 0x9d7   : > { %2257 = vadd.xlane.f32.xlu1 %v2256_v54  ;;  %v2253_v55 = vsel %vm1440_vm4, %v16346_v53, 0.0 }
 0x9d8   : > { %2254 = vadd.xlane.f32.xlu0 %v2253_v55 }
 0x9e8   : > { %15902 = vrot.lane.b32.xlu1 %v17065_v18, %s18762_s22  ;;  %s18764_s22 = smov 36  }
 0x9ec   : > { %2350 = vrot.lane.b32.xlu1 %v17067_v19, %s18760_s2 }
 0x9ee   : > { %15897 = vrot.lane.b32.xlu0 %v17065_v18, %s18758_s16  ;;  %s18768_s16 = smov 68  }
 0x9f2   : > { %2352 = vrot.lane.b32.xlu0 %v17073_v20, %s18760_s2  ;;  %s18766_s2 = smov 104  }
 0xa64   : > { %v2258_v56 = vpop.xlane.xlu1 %2257 }
 0xa65   : > { %16347 = vrcp.f32 %v2258_v56  ;;  %v2255_v57 = vpop.xlane.xlu0 %2254 }
 0xa66   : > { %16349 = vrcp.f32 %v2255_v57 }
 0xa68   : > { %v15903_v58 = vpop.permute.xlu1 %15902 }
 0xa69   : > { %v15898_v59 = vpop.permute.xlu0 %15897  ;;  %v15905_v60 = vunpack.i.h.bf16 %v15903_v58  ;;  %v15904_v61 = vunpack.i.l.bf16 %v15903_v58 }
 0xa6a   : > { %v15900_v0 = vunpack.i.h.bf16 %v15898_v59  ;;  %v15899_v1 = vunpack.i.l.bf16 %v15898_v59 }
 0xa6b   : > { %v15173_v3 = vpack.c.bf16 %v15905_v60, %v15904_v61 }
 0xa6c   : > { %v15169_v2 = vpack.c.bf16 %v15900_v0, %v15899_v1  ;;  %v2351_v8 = vpop.permute.xlu1 %2350 }
 0xa6d   : > { %v2353_v9 = vpop.permute.xlu0 %2352 }
 0xa6e   : > { %15170 = vmatprep.subr.bf16.mxu0 %v15169_v2 }
 0xa6f   : > { %v16348_v4 = vpop.eup %16347  ;;  %15172 = vmatpush3.bf16.msra.mxu0 %v15169_v2 }
 0xa70   : > { %v16350_v5 = vpop.eup %16349  ;;  %15175 = vmatprep.subr.msk.bf16.mxu0 %vm17084_vm3, %v15173_v3  ;;  %v2262_v7 = vmul.f32 %v16348_v4, %v16344_v52 }
 0xa71   : > { %v2261_v6 = vmul.f32 %v16350_v5, %v16346_v53 }
 0xa73   : > { %14184 = vmatprep.mubr.msk.f32.mxu0 %vm1440_vm4, %v2261_v6 }
 0xa74   : > { %14185 = vmatmul.mubr.msk.f32.vlgmr.msra.gmra.mrb[8].mxu0 %vm1440_vm4, %v2262_v7 }
 0xa75   : > { %14191 = vmatprep.mubr.msk.f32.mxu0 %vm1354_vm2, %v2351_v8 }
 0xa78   : > { %15178 = vmatpush3.bf16.xpose.msk.msra.mxu0 %vm17084_vm3, %v15173_v3 }
 0xa7f   : > { %14192 = vmatmul.mubr.msk.f32.vlgmr.msra.gmra.mrb[10].mxu0 %vm1354_vm2, %v2353_v9 }
 0xb47   : > { %v17203_v10 = vpop.f32.mrb[8].mxu0 }
 0xb48   : > { %v17205_v13 = vpop.f32.mrb[9].mxu0 }
 0xb52   : > { %v14193_v14 = vpop.f32.mrb[10].mxu0 }
 0xb53   : > { %v2432_v15 = vpop.f32.mrb[11].mxu0  ;;  %v2444_v16 = vsel %vm1440_vm4, %v14193_v14, -inf }
 0xb54   : > { %2445 = vmax.xlane.f32.xlu0 %v2444_v16  ;;  %v2441_v17 = vsel %vm1440_vm4, %v2432_v15, -inf }
 0xb55   : > { %2442 = vmax.xlane.f32.xlu1 %v2441_v17 }
 0xbe1   : > { %v2446_v21 = vpop.xlane.xlu0 %2445 }
 0xbe2   : > { %v2448_v22 = vsub.f32 %v14193_v14, %v2446_v21  ;;  %v2443_v23 = vpop.xlane.xlu1 %2442 }
 0xbe3   : > { %v2447_v24 = vsub.f32 %v2432_v15, %v2443_v23 }
 0xbe4   : > { %v2451_v26 = vmul.f32 1.442695, %v2448_v22 }
 0xbe5   : > { %v2449_v27 = vmul.f32 1.442695, %v2447_v24 }
 0xbe6   : > { %16351 = vpow2.f32 %v2451_v26 }
 0xbe7   : > { %16353 = vpow2.f32 %v2449_v27 }
 0xbf0   : > { %v16352_v32 = vpop.eup %16351 }
 0xbf1   : > { %v16354_v33 = vpop.eup %16353  ;;  %v2456_v34 = vsel %vm1440_vm4, %v16352_v32, 0.0 }
 0xbf2   : > { %2457 = vadd.xlane.f32.xlu1 %v2456_v34  ;;  %v2453_v35 = vsel %vm1440_vm4, %v16354_v33, 0.0 }
 0xbf3   : > { %2454 = vadd.xlane.f32.xlu0 %v2453_v35 }
 0xc03   : > { %15912 = vrot.lane.b32.xlu1 %v17065_v18, %s18768_s16  ;;  %s18780_s16 = smov 32  }
 0xc07   : > { %2550 = vrot.lane.b32.xlu1 %v17067_v19, %s18766_s2 }
 0xc09   : > { %15907 = vrot.lane.b32.xlu0 %v17065_v18, %s18764_s22  ;;  %s18772_s22 = smov 64  }
 0xc0d   : > { %2552 = vrot.lane.b32.xlu0 %v17073_v20, %s18766_s2  ;;  %s18770_s2 = smov 100  }
 0xc7f   : > { %v2458_v36 = vpop.xlane.xlu1 %2457 }
 0xc80   : > { %16355 = vrcp.f32 %v2458_v36  ;;  %v2455_v37 = vpop.xlane.xlu0 %2454 }
 0xc81   : > { %16357 = vrcp.f32 %v2455_v37 }
 0xc83   : > { %v15913_v38 = vpop.permute.xlu1 %15912 }
 0xc84   : > { %v15908_v39 = vpop.permute.xlu0 %15907  ;;  %v15915_v42 = vunpack.i.h.bf16 %v15913_v38  ;;  %v15914_v43 = vunpack.i.l.bf16 %v15913_v38 }
 0xc85   : > { %v15910_v44 = vunpack.i.h.bf16 %v15908_v39  ;;  %v15909_v45 = vunpack.i.l.bf16 %v15908_v39 }
 0xc86   : > { %v15183_v47 = vpack.c.bf16 %v15915_v42, %v15914_v43 }
 0xc87   : > { %v15179_v46 = vpack.c.bf16 %v15910_v44, %v15909_v45  ;;  %v2551_v52 = vpop.permute.xlu1 %2550 }
 0xc88   : > { %v2553_v53 = vpop.permute.xlu0 %2552 }
 0xc89   : > { %15180 = vmatprep.subr.bf16.mxu1 %v15179_v46 }
 0xc8a   : > { %v16356_v48 = vpop.eup %16355  ;;  %15182 = vmatpush3.bf16.msra.mxu1 %v15179_v46 }
 0xc8b   : > { %v16358_v49 = vpop.eup %16357  ;;  %15185 = vmatprep.subr.msk.bf16.mxu1 %vm17084_vm3, %v15183_v47  ;;  %v2462_v51 = vmul.f32 %v16356_v48, %v16352_v32 }
 0xc8c   : > { %v2461_v50 = vmul.f32 %v16358_v49, %v16354_v33 }
 0xc8e   : > { %14198 = vmatprep.mubr.msk.f32.mxu1 %vm1440_vm4, %v2461_v50 }
 0xc8f   : > { %14199 = vmatmul.mubr.msk.f32.vlgmr.msra.gmra.mrb[12].mxu1 %vm1440_vm4, %v2462_v51 }
 0xc90   : > { %14205 = vmatprep.mubr.msk.f32.mxu1 %vm1354_vm2, %v2551_v52 }
 0xc93   : > { %15188 = vmatpush3.bf16.xpose.msk.msra.mxu1 %vm17084_vm3, %v15183_v47 }
 0xc9a   : > { %14206 = vmatmul.mubr.msk.f32.vlgmr.msra.gmra.mrb[14].mxu1 %vm1354_vm2, %v2553_v53 }
 0xd62   : > { %v17227_v54 = vpop.f32.mrb[12].mxu1 }
 0xd63   : > { %v17229_v55 = vpop.f32.mrb[13].mxu1 }
 0xd6d   : > { %v14207_v56 = vpop.f32.mrb[14].mxu1 }
 0xd6e   : > { %v2632_v57 = vpop.f32.mrb[15].mxu1  ;;  %v2644_v58 = vsel %vm1440_vm4, %v14207_v56, -inf }
 0xd6f   : > { %2645 = vmax.xlane.f32.xlu0 %v2644_v58  ;;  %v2641_v59 = vsel %vm1440_vm4, %v2632_v57, -inf }
 0xd70   : > { %2642 = vmax.xlane.f32.xlu1 %v2641_v59 }
 0xdfc   : > { %v2646_v60 = vpop.xlane.xlu0 %2645 }
 0xdfd   : > { %v2648_v61 = vsub.f32 %v14207_v56, %v2646_v60  ;;  %v2643_v0 = vpop.xlane.xlu1 %2642 }
 0xdfe   : > { %v2647_v1 = vsub.f32 %v2632_v57, %v2643_v0 }
 0xdff   : > { %v2651_v2 = vmul.f32 1.442695, %v2648_v61 }
 0xe00   : > { %v2649_v3 = vmul.f32 1.442695, %v2647_v1 }
 0xe01   : > { %16359 = vpow2.f32 %v2651_v2 }
 0xe02   : > { %16361 = vpow2.f32 %v2649_v3 }
 0xe0b   : > { %v16360_v4 = vpop.eup %16359 }
 0xe0c   : > { %v16362_v5 = vpop.eup %16361  ;;  %v2656_v6 = vsel %vm1440_vm4, %v16360_v4, 0.0 }
 0xe0d   : > { %2657 = vadd.xlane.f32.xlu1 %v2656_v6  ;;  %v2653_v7 = vsel %vm1440_vm4, %v16362_v5, 0.0 }
 0xe0e   : > { %2654 = vadd.xlane.f32.xlu0 %v2653_v7 }
 0xe1e   : > { %15922 = vrot.lane.b32.xlu1 %v17065_v18, %s18772_s22  ;;  %s18776_s22 = smov 96  }
 0xe22   : > { %2750 = vrot.lane.b32.xlu1 %v17067_v19, %s18770_s2 }
 0xe24   : > { %15917 = vrot.lane.b32.xlu0 %v17065_v18, %s18780_s16  ;;  %s18792_s16 = smov 8  }
 0xe28   : > { %2752 = vrot.lane.b32.xlu0 %v17073_v20, %s18770_s2  ;;  %s18778_s2 = smov 60  }
 0xe9a   : > { %v2658_v8 = vpop.xlane.xlu1 %2657 }
 0xe9b   : > { %16363 = vrcp.f32 %v2658_v8  ;;  %v2655_v9 = vpop.xlane.xlu0 %2654 }
 0xe9c   : > { %16365 = vrcp.f32 %v2655_v9 }
 0xe9e   : > { %v15923_v14 = vpop.permute.xlu1 %15922 }
 0xe9f   : > { %v15918_v15 = vpop.permute.xlu0 %15917  ;;  %v15925_v16 = vunpack.i.h.bf16 %v15923_v14  ;;  %v15924_v17 = vunpack.i.l.bf16 %v15923_v14 }
 0xea0   : > { %v15920_v21 = vunpack.i.h.bf16 %v15918_v15  ;;  %v15919_v22 = vunpack.i.l.bf16 %v15918_v15 }
 0xea1   : > { %v15193_v24 = vpack.c.bf16 %v15925_v16, %v15924_v17 }
 0xea2   : > { %v15189_v23 = vpack.c.bf16 %v15920_v21, %v15919_v22  ;;  %v2751_v34 = vpop.permute.xlu1 %2750 }
 0xea3   : > { %v2753_v35 = vpop.permute.xlu0 %2752 }
 0xea4   : > { %15190 = vmatprep.subr.bf16.mxu0 %v15189_v23 }
 0xea5   : > { %v16364_v26 = vpop.eup %16363  ;;  %15192 = vmatpush3.bf16.msra.mxu0 %v15189_v23 }
 0xea6   : > { %v16366_v27 = vpop.eup %16365  ;;  %15195 = vmatprep.subr.msk.bf16.mxu0 %vm17084_vm3, %v15193_v24  ;;  %v2662_v33 = vmul.f32 %v16364_v26, %v16360_v4 }
 0xea7   : > { %v2661_v32 = vmul.f32 %v16366_v27, %v16362_v5 }
 0xea9   : > { %14212 = vmatprep.mubr.msk.f32.mxu0 %vm1440_vm4, %v2661_v32 }
 0xeaa   : > { %14213 = vmatmul.mubr.msk.f32.vlgmr.msra.gmra.mrb[12].mxu0 %vm1440_vm4, %v2662_v33 }
 0xeab   : > { %14219 = vmatprep.mubr.msk.f32.mxu0 %vm1354_vm2, %v2751_v34 }
 0xeae   : > { %15198 = vmatpush3.bf16.xpose.msk.msra.mxu0 %vm17084_vm3, %v15193_v24 }
 0xeb5   : > { %14220 = vmatmul.mubr.msk.f32.vlgmr.msra.gmra.mrb[14].mxu0 %vm1354_vm2, %v2753_v35 }
 0xf7d   : > { %v17251_v36 = vpop.f32.mrb[12].mxu0 }
 0xf7e   : > { %v17253_v37 = vpop.f32.mrb[13].mxu0 }
 0xf88   : > { %v14221_v38 = vpop.f32.mrb[14].mxu0 }
 0xf89   : > { %v2832_v39 = vpop.f32.mrb[15].mxu0  ;;  %v2844_v42 = vsel %vm1440_vm4, %v14221_v38, -inf }
 0xf8a   : > { %2845 = vmax.xlane.f32.xlu0 %v2844_v42  ;;  %v2841_v43 = vsel %vm1440_vm4, %v2832_v39, -inf }
 0xf8b   : > { %2842 = vmax.xlane.f32.xlu1 %v2841_v43  ;;  %v1344_v43 = vld [vmem:[%s18888_s25 + $0x20] sm:$0xf] }
0x1017   : > { %v2846_v44 = vpop.xlane.xlu0 %2845 }
0x1018   : > { %v2848_v45 = vsub.f32 %v14221_v38, %v2846_v44  ;;  %v2843_v46 = vpop.xlane.xlu1 %2842 }
0x1019   : > { %v2847_v47 = vsub.f32 %v2832_v39, %v2843_v46  ;;  %v1343_v39 = vld [vmem:[%s18888_s25 + $0x18] sm:$0xff] }
0x101a   : > { %v2851_v48 = vmul.f32 1.442695, %v2848_v45 }
0x101b   : > { %v2849_v49 = vmul.f32 1.442695, %v2847_v47 }
0x101c   : > { %16367 = vpow2.f32 %v2851_v48 }
0x101d   : > { %16369 = vpow2.f32 %v2849_v49 }
0x1026   : > { %v16368_v50 = vpop.eup %16367 }
0x1027   : > { %v16370_v51 = vpop.eup %16369  ;;  %v2856_v52 = vsel %vm1440_vm4, %v16368_v50, 0.0 }
0x1028   : > { %2857 = vadd.xlane.f32.xlu1 %v2856_v52  ;;  %v2853_v53 = vsel %vm1440_vm4, %v16370_v51, 0.0 }
0x1029   : > { %2854 = vadd.xlane.f32.xlu0 %v2853_v53 }
0x1039   : > { %15932 = vrot.lane.b32.xlu1 %v17065_v18, %s18778_s2  ;;  %s18794_s2 = smov 24  }
0x103d   : > { %2950 = vrot.lane.b32.xlu1 %v17067_v19, %s18776_s22 }
0x103f   : > { %15927 = vrot.lane.b32.xlu0 %v17065_v18, %s18782_s23  ;;  %s18786_s23 = smov 12  }
0x1043   : > { %2952 = vrot.lane.b32.xlu0 %v17073_v20, %s18776_s22  ;;  %s18784_s22 = smov 4  }
0x10b5   : > { %v2858_v56 = vpop.xlane.xlu1 %2857 }
0x10b6   : > { %16371 = vrcp.f32 %v2858_v56  ;;  %v2855_v57 = vpop.xlane.xlu0 %2854 }
0x10b7   : > { %16373 = vrcp.f32 %v2855_v57 }
0x10b9   : > { %v15933_v58 = vpop.permute.xlu1 %15932 }
0x10ba   : > { %v15928_v59 = vpop.permute.xlu0 %15927  ;;  %v15935_v60 = vunpack.i.h.bf16 %v15933_v58  ;;  %v15934_v61 = vunpack.i.l.bf16 %v15933_v58 }
0x10bb   : > { %v15930_v0 = vunpack.i.h.bf16 %v15928_v59  ;;  %v15929_v1 = vunpack.i.l.bf16 %v15928_v59 }
0x10bc   : > { %v15203_v3 = vpack.c.bf16 %v15935_v60, %v15934_v61 }
0x10bd   : > { %v15199_v2 = vpack.c.bf16 %v15930_v0, %v15929_v1  ;;  %v2951_v6 = vpop.permute.xlu1 %2950 }
0x10be   : > { %v2953_v7 = vpop.permute.xlu0 %2952 }
0x10bf   : > { %15200 = vmatprep.subr.bf16.mxu1 %v15199_v2 }
0x10c0   : > { %v16372_v19 = vpop.eup %16371  ;;  %15202 = vmatpush3.bf16.msra.mxu1 %v15199_v2 }
0x10c1   : > { %v16374_v4 = vpop.eup %16373  ;;  %15205 = vmatprep.subr.msk.bf16.mxu1 %vm17084_vm3, %v15203_v3  ;;  %v2862_v5 = vmul.f32 %v16372_v19, %v16368_v50 }
0x10c2   : > { %v2861_v20 = vmul.f32 %v16374_v4, %v16370_v51 }
0x10c4   : > { %14226 = vmatprep.mubr.msk.f32.mxu1 %vm1440_vm4, %v2861_v20 }
0x10c5   : > { %14227 = vmatmul.mubr.msk.f32.vlgmr.msra.gmra.mrb[16].mxu1 %vm1440_vm4, %v2862_v5 }
0x10c6   : > { %14233 = vmatprep.mubr.msk.f32.mxu1 %vm1354_vm2, %v2951_v6 }
0x10c9   : > { %15208 = vmatpush3.bf16.xpose.msk.msra.mxu1 %vm17084_vm3, %v15203_v3 }
0x10d0   : > { %14234 = vmatmul.mubr.msk.f32.vlgmr.msra.gmra.mrb[18].mxu1 %vm1354_vm2, %v2953_v7 }
0x1198   : > { %v14228_v8 = vpop.f32.mrb[16].mxu1 }
0x1199   : > { %v2941_v9 = vpop.f32.mrb[17].mxu1 }
0x11a3   : > { %v14235_v14 = vpop.f32.mrb[18].mxu1 }
0x11a4   : > { %v3032_v15 = vpop.f32.mrb[19].mxu1  ;;  %v3044_v16 = vsel %vm1440_vm4, %v14235_v14, -inf }
0x11a5   : > { %3045 = vmax.xlane.f32.xlu0 %v3044_v16  ;;  %v3041_v17 = vsel %vm1440_vm4, %v3032_v15, -inf }
0x11a6   : > { %3042 = vmax.xlane.f32.xlu1 %v3041_v17 }
0x1232   : > { %v3046_v21 = vpop.xlane.xlu0 %3045 }
0x1233   : > { %v3048_v22 = vsub.f32 %v14235_v14, %v3046_v21  ;;  %v3043_v23 = vpop.xlane.xlu1 %3042  ;;  %v13203_v21 = vld [vmem:[%s18880_s29] ss:$0 sm:$0xff] }
0x1234   : > { %v3047_v24 = vsub.f32 %v3032_v15, %v3043_v23 }
0x1235   : > { %v3051_v26 = vmul.f32 1.442695, %v3048_v22 }
0x1236   : > { %v3049_v27 = vmul.f32 1.442695, %v3047_v24 }
0x1237   : > { %16375 = vpow2.f32 %v3051_v26 }
0x1238   : > { %16377 = vpow2.f32 %v3049_v27 }
0x1241   : > { %v16376_v32 = vpop.eup %16375 }
0x1242   : > { %v16378_v33 = vpop.eup %16377  ;;  %v3056_v34 = vsel %vm1440_vm4, %v16376_v32, 0.0 }
0x1243   : > { %3057 = vadd.xlane.f32.xlu1 %v3056_v34  ;;  %v3053_v35 = vsel %vm1440_vm4, %v16378_v33, 0.0 }
0x1244   : > { %3054 = vadd.xlane.f32.xlu0 %v3053_v35 }
0x1254   : > { %3152 = vrot.lane.b32.xlu1 %v17133_v31, %s18784_s22 }
0x1258   : > { %3154 = vrot.lane.b32.xlu1 %v17131_v30, %s18784_s22  ;;  %s18788_s22 = smov 20  }
0x125a   : > { %15937 = vrot.lane.b32.xlu0 %v17065_v18, %s18794_s2 }
0x125c   : > { %3162 = vrot.lane.b32.xlu1 %v17155_v62, %s18792_s16 }
0x125e   : > { %3160 = vrot.lane.b32.xlu0 %v17157_v63, %s18792_s16  ;;  %s18909_s16 = smov 56  }
0x1260   : > { %3170 = vrot.lane.b32.xlu1 %v17179_v40, %s18786_s23 }
0x1262   : > { %3168 = vrot.lane.b32.xlu0 %v17181_v41, %s18786_s23  ;;  %s18906_s23 = smov 28  }
0x1264   : > { %3178 = vrot.lane.b32.xlu1 %v17203_v10, %s18790_s5 }
0x1266   : > { %3176 = vrot.lane.b32.xlu0 %v17205_v13, %s18790_s5  ;;  %s18908_s5 = smov 92  }
0x1268   : > { %3186 = vrot.lane.b32.xlu1 %v17227_v54, %s18788_s22 }
0x126a   : > { %3184 = vrot.lane.b32.xlu0 %v17229_v55, %s18788_s22  ;;  %v1340_v55 = vld [vmem:[%s18888_s25] sm:$0xff]  ;;  %s18907_s22 = smov 32  }
0x126c   : > { %3194 = vrot.lane.b32.xlu1 %v17251_v36, %s18794_s2  ;;  %v1341_v36 = vld [vmem:[%s18888_s25 + $0x8] sm:$0xff] }
0x126d   : > { %v15213_v38 = vpack.c.bf16 %v1341_v36, %v1340_v55  ;;  %v3376_v36 = vld [vmem:[%s18887_s14 + $0x18] sm:$0xff] }
0x126e   : > { %3192 = vrot.lane.b32.xlu0 %v17253_v37, %s18794_s2  ;;  %v1342_v37 = vld [vmem:[%s18888_s25 + $0x10] sm:$0xff]  ;;  %s18910_s2 = smov 124  }
0x126f   : > { %v15217_v42 = vpack.c.bf16 %v1343_v39, %v1342_v37  ;;  %v3471_v39 = vld [vmem:[%s18881_s24] sm:$0xff] }
0x1270   : > { %3202 = vrot.lane.b32.xlu1 %v14228_v8, %s18906_s23 }
0x1272   : > { %3200 = vrot.lane.b32.xlu0 %v2941_v9, %s18906_s23 }
0x12d0   : > { %v3058_v18 = vpop.xlane.xlu1 %3057 }
0x12d1   : > { %16379 = vrcp.f32 %v3058_v18  ;;  %v3055_v30 = vpop.xlane.xlu0 %3054 }
0x12d2   : > { %16381 = vrcp.f32 %v3055_v30 }
0x12d4   : > { %v3153_v46 = vpop.permute.xlu1 %3152 }
0x12d5   : > { %v15938_v31 = vpop.permute.xlu0 %15937  ;;  %v3214_v60 = vsel %vm1354_vm2, %v17129_v29, %v3153_v46 }
0x12d6   : > { %v15940_v62 = vunpack.i.h.bf16 %v15938_v31  ;;  %v15939_v63 = vunpack.i.l.bf16 %v15938_v31 }
0x12d8   : > { %v15209_v40 = vpack.c.bf16 %v15940_v62, %v15939_v63  ;;  %v3155_v47 = vpop.permute.xlu1 %3154 }
0x12d9   : > { %v3161_v49 = vpop.permute.xlu0 %3160  ;;  %v3215_v61 = vsel %vm1354_vm2, %v17127_v28, %v3155_v47  ;;  %v3475_v47 = vld [vmem:[%s18881_s24 + $0x20] sm:$0xff] }
0x12da   : > { %15210 = vmatprep.subr.bf16.mxu0 %v15209_v40  ;;  %v3217_v0 = vsel %vm3216_vm5, %v3214_v60, %v3161_v49 }
0x12db   : > { %v16380_v41 = vpop.eup %16379  ;;  %15212 = vmatpush3.bf16.msra.mxu0 %v15209_v40 }
0x12dc   : > { %v16382_v10 = vpop.eup %16381  ;;  %v3062_v54 = vmul.f32 %v16380_v41, %v16376_v32  ;;  %15214 = vmatprep.subr.bf16.mxu0 %v15213_v38  ;;  %v3163_v48 = vpop.permute.xlu1 %3162 }
0x12dd   : > { %v3061_v13 = vmul.f32 %v16382_v10, %v16378_v33  ;;  %v3169_v51 = vpop.permute.xlu0 %3168  ;;  %v3218_v2 = vsel %vm3216_vm5, %v3215_v61, %v3163_v48  ;;  %v3373_v10 = vld [vmem:[%s18887_s14] sm:$0xff]  ;;  %v3476_v48 = vld [vmem:[%s18881_s24 + $0x28] sm:$0xff] }
0x12de   : > { %v3220_v3 = vsel %vm3219_vm6, %v3217_v0, %v3169_v51  ;;  %v15237_v49 = vpack.c.bf16 %v3476_v48, %v3475_v47  ;;  %v13208_v61 = vld [vmem:[%s18885_s8] ss:$0 sm:$0xff] }
0x12df   : > { %14240 = vmatprep.mubr.msk.f32.mxu0 %vm1440_vm4, %v3061_v13  ;;  %v3374_v13 = vld [vmem:[%s18887_s14 + $0x8] sm:$0xff] }
0x12e0   : > { %14241 = vmatmul.mubr.msk.f32.vlgmr.msra.gmra.mrb[16].mxu0 %vm1440_vm4, %v3062_v54  ;;  %v3171_v50 = vpop.permute.xlu1 %3170  ;;  %v3375_v54 = vld [vmem:[%s18887_s14 + $0x10] sm:$0xff]  ;;  %v15221_v55 = vpack.c.bf16 %v3374_v13, %v3373_v10  ;;  %v13220_v10 = vld [vmem:[%s18890_s17 + $0x38] sm:$0xff] }
0x12e1   : > { %15216 = vmatpush3.bf16.msra.mxu0 %v15213_v38  ;;  %v3177_v53 = vpop.permute.xlu0 %3176  ;;  %v3221_v4 = vsel %vm3219_vm6, %v3218_v2, %v3171_v50  ;;  %v15225_v37 = vpack.c.bf16 %v3376_v36, %v3375_v54  ;;  %v3377_v38 = vld [vmem:[%s18887_s14 + $0x20] sm:$0xf]  ;;  %v13222_v36 = vld [vmem:[%s18890_s17 + $0x48] sm:$0xf] }
0x12e2   : > { %15218 = vmatprep.subr.bf16.mxu0 %v15217_v42  ;;  %v3222_v20 = vsel %vm1440_vm4, %v3220_v3, %v3177_v53  ;;  %15222 = vmatprep.subr.bf16.mxu1 %v15221_v55  ;;  %v13221_v54 = vld [vmem:[%s18890_s17 + $0x40] sm:$0xff] }
0x12e3   : > { %15224 = vmatpush3.bf16.msra.mxu1 %v15221_v55  ;;  %v15249_v55 = vpack.c.bf16 %v13221_v54, %v13220_v10 }
0x12e4   : > { %v3179_v52 = vpop.permute.xlu1 %3178  ;;  %15226 = vmatprep.subr.bf16.mxu1 %v15225_v37 }
0x12e5   : > { %15220 = vmatpush3.bf16.msra.mxu0 %v15217_v42  ;;  %v3185_v57 = vpop.permute.xlu0 %3184  ;;  %v3223_v29 = vsel %vm1440_vm4, %v3221_v4, %v3179_v52  ;;  %v3472_v42 = vld [vmem:[%s18881_s24 + $0x8] sm:$0xff] }
0x12e6   : > { %14251 = vmatprep.subr.msk.mxu0 %vm1261_vm0, %v1344_v43  ;;  %v3225_v28 = vsel %vm3224_vm7, %v3222_v20, %v3185_v57  ;;  %v3477_v20 = vld [vmem:[%s18881_s24 + $0x30] sm:$0xff] }
0x12e7   : > { %15228 = vmatpush3.bf16.msra.mxu1 %v15225_v37 }
0x12e8   : > { %v3187_v56 = vpop.permute.xlu1 %3186  ;;  %14264 = vmatprep.subr.msk.mxu1 %vm1261_vm0, %v3377_v38 }
0x12e9   : > { %14252 = vmatpush3.msk.msra.mxu0 %vm1261_vm0, %v1344_v43  ;;  %v3193_v59 = vpop.permute.xlu0 %3192  ;;  %v3226_v5 = vsel %vm3224_vm7, %v3223_v29, %v3187_v56  ;;  %v3473_v43 = vld [vmem:[%s18881_s24 + $0x10] sm:$0xff]  ;;  %v3478_v29 = vld [vmem:[%s18881_s24 + $0x38] sm:$0xff] }
0x12ea   : > { %v3228_v6 = vsel %vm3227_vm8, %v3225_v28, %v3193_v59  ;;  %v13207_v59 = vld [vmem:[%s18886_s3] ss:$0 sm:$0xff]  ;;  %v15241_v28 = vpack.c.bf16 %v3478_v29, %v3477_v20 }
0x12eb   : > { %14265 = vmatpush3.msk.msra.mxu1 %vm1261_vm0, %v3377_v38 }
0x12ec   : > { %v3195_v58 = vpop.permute.xlu1 %3194 }
0x12ed   : > { %v3201_v19 = vpop.permute.xlu0 %3200  ;;  %v3229_v8 = vsel %vm3227_vm8, %v3226_v5, %v3195_v58  ;;  %v13209_v5 = vld [vmem:[%s18882_s19] ss:$0 sm:$0xff] }
0x12ee   : > { %v3231_v9 = vsel %vm3230_vm9, %v3228_v6, %v3201_v19 }
0x12f0   : > { %v3203_v1 = vpop.permute.xlu1 %3202 }
0x12f1   : > { %v3232_v15 = vsel %vm3230_vm9, %v3229_v8, %v3203_v1 }
0x13b3   : > { %v14242_v44 = vpop.f32.mrb[16].mxu0 }
0x13b4   : > { %3210 = vrot.lane.b32.xlu1 %v14242_v44, %s18907_s22  ;;  %v3141_v45 = vpop.f32.mrb[17].mxu0  ;;  %v15229_v44 = vpack.c.bf16 %v3472_v42, %v3471_v39 }
0x13b5   : > { %3208 = vrot.lane.b32.xlu0 %v3141_v45, %s18907_s22  ;;  %v3474_v45 = vld [vmem:[%s18881_s24 + $0x18] sm:$0xff] }
0x13b6   : > { %v15233_v46 = vpack.c.bf16 %v3474_v45, %v3473_v43  ;;  %15230 = vmatprep.subr.bf16.mxu0 %v15229_v44 }
0x1426   : > { %v3211_v7 = vpop.permute.xlu1 %3210 }
0x1427   : > { %v3209_v14 = vpop.permute.xlu0 %3208  ;;  %v3235_v17 = vsel %vm3233_vm10, %v3232_v15, %v3211_v7 }
0x1428   : > { %v3234_v16 = vsel %vm3233_vm10, %v3231_v9, %v3209_v14 }
0x1429   : > { %14253 = vmatprep.mubr.msk.f32.mxu0 %vm1254_vm1, %v3234_v16  ;;  %v13213_v16 = vld [vmem:[%s18879_s30] ss:$0 sm:$0xff] }
0x142a   : > { %14254 = vmatmul.mubr.msk.f32.vlgmr.msra.gmra.mrb[18].mxu0 %vm1254_vm1, %v3235_v17 }
0x142b   : > { %15232 = vmatpush3.bf16.msra.mxu0 %v15229_v44 }
0x142c   : > { %15234 = vmatprep.subr.bf16.mxu0 %v15233_v46 }
0x142f   : > { %15236 = vmatpush3.bf16.msra.mxu0 %v15233_v46  ;;  %v13216_v46 = vld [vmem:[%s18884_s6] ss:$0 sm:$0xff] }
0x1430   : > { %15238 = vmatprep.subr.bf16.mxu0 %v15237_v49 }
0x1433   : > { %15240 = vmatpush3.bf16.msra.mxu0 %v15237_v49 }
0x1434   : > { %15242 = vmatprep.subr.bf16.mxu0 %v15241_v28 }
0x1437   : > { %15244 = vmatpush3.bf16.msra.mxu0 %v15241_v28 }
0x14fd   : > { %v14255_v22 = vpop.f32.mrb[18].mxu0 }
0x14fe   : > { %v3323_v23 = vadd.f32 %v14255_v22, %v13203_v21  ;;  %v3317_v24 = vpop.f32.mrb[19].mxu0 }
0x14ff   : > { %v3318_v26 = vadd.f32 %v13203_v21, %v3317_v24 }
0x1500   : > { %v3327_v27 = vadd.f32 %v3323_v23, %v17057_v12 }
0x1501   : > { %v3326_v32 = vadd.f32 %v3318_v26, %v17054_v11 }
0x1502   : > { %v3333_v33 = vsel %vm1254_vm1, %v3327_v27, 0.0 }
0x1503   : > { %3334 = vadd.xlane.f32.xlu1 %v3333_v33  ;;  %v3330_v34 = vsel %vm1254_vm1, %v3326_v32, 0.0 }
0x1504   : > { %3331 = vadd.xlane.f32.xlu0 %v3330_v34 }
0x1590   : > { %v3335_v35 = vpop.xlane.xlu1 %3334 }
0x1591   : > { %v3338_v18 = vmul.f32 0.027777778, %v3335_v35  ;;  %v3332_v30 = vpop.xlane.xlu0 %3331 }
0x1592   : > { %v3337_v31 = vmul.f32 0.027777778, %v3332_v30 }
0x1593   : > { %v3340_v62 = vsub.f32 %v3327_v27, %v3338_v18 }
0x1594   : > { %v3339_v63 = vsub.f32 %v3326_v32, %v3337_v31 }
0x1595   : > { %v3342_v12 = vmul.f32 %v3340_v62, %v3340_v62 }
0x1596   : > { %v3341_v40 = vmul.f32 %v3339_v63, %v3339_v63 }
0x1597   : > { %v3346_v41 = vsel %vm1254_vm1, %v3342_v12, 0.0  ;;  %v13218_v12 = vld [vmem:[%s18890_s17 + $0x28] sm:$0xff] }
0x1598   : > { %v3343_v11 = vsel %vm1254_vm1, %v3341_v40, 0.0 }
0x1599   : > { %3344 = vadd.xlane.f32.xlu0 %v3343_v11 }
0x159d   : > { %3347 = vadd.xlane.f32.xlu0 %v3346_v41  ;;  %v13219_v41 = vld [vmem:[%s18890_s17 + $0x30] sm:$0xff] }
0x159e   : > { %v15245_v13 = vpack.c.bf16 %v13219_v41, %v13218_v12 }
0x15a0   : > { %15246 = vmatprep.subr.bf16.mxu1 %v15245_v13 }
0x1626   : > { %v3345_v50 = vpop.xlane.xlu0 %3344 }
0x1627   : > { %v3349_v51 = vmul.f32 0.027777778, %v3345_v50  ;;  %v13217_v50 = vld [vmem:[%s18883_s12] ss:$0 sm:$0xff] }
0x1629   : > { %v3351_v52 = vadd.f32 1e-05, %v3349_v51 }
0x162a   : > { %v3348_v53 = vpop.xlane.xlu0 %3347 }
0x162b   : > { %16383 = vrsqrt.f32 %v3351_v52  ;;  %v3350_v56 = vmul.f32 0.027777778, %v3348_v53 }
0x162d   : > { %v3352_v57 = vadd.f32 1e-05, %v3350_v56 }
0x162f   : > { %16385 = vrsqrt.f32 %v3352_v57  ;;  %v13224_v57 = vld [vmem:[%s18889_s21 + $0x1] ss:$0 sm:$0xff] }
0x1635   : > { %v16384_v58 = vpop.eup %16383 }
0x1636   : > { %v3355_v60 = vmul.f32 %v16384_v58, %v3339_v63 }
0x1638   : > { %v3363_v0 = vmul.f32 %v13207_v59, %v3355_v60 }
0x1639   : > { %v16386_v1 = vpop.eup %16385 }
0x163a   : > { %v3356_v2 = vmul.f32 %v16386_v1, %v3340_v62  ;;  %v3371_v3 = vadd.f32 %v13208_v61, %v3363_v0 }
0x163c   : > { %v3364_v19 = vmul.f32 %v13207_v59, %v3356_v2  ;;  %14266 = vmatprep.mubr.msk.f32.mxu1 %vm1254_vm1, %v3371_v3 }
0x163e   : > { %v3372_v4 = vadd.f32 %v13208_v61, %v3364_v19 }
0x1640   : > { %14267 = vmatmul.mubr.msk.f32.vlgmr.msra.gmra.mrb[20].mxu1 %vm1254_vm1, %v3372_v4 }
0x1641   : > { %15248 = vmatpush3.bf16.msra.mxu1 %v15245_v13 }
0x1642   : > { %15250 = vmatprep.subr.bf16.mxu1 %v15249_v55 }
0x1645   : > { %15252 = vmatpush3.bf16.msra.mxu1 %v15249_v55 }
0x1646   : > { %14296 = vmatprep.subr.msk.mxu1 %vm1261_vm0, %v13222_v36 }
0x1649   : > { %14297 = vmatpush3.msk.msra.mxu1 %vm1261_vm0, %v13222_v36 }
0x1713   : > { %v14268_v6 = vpop.f32.mrb[20].mxu1 }
0x1714   : > { %v3466_v7 = vadd.f32 %v14268_v6, %v13209_v5  ;;  %v3460_v8 = vpop.f32.mrb[21].mxu1 }
0x1715   : > { %v3461_v9 = vadd.f32 %v13209_v5, %v3460_v8 }
0x1716   : > { %v3470_v15 = vmax.f32 %v3466_v7, 0.0 }
0x1717   : > { %v3469_v14 = vmax.f32 %v3461_v9, 0.0 }
0x1719   : > { %14285 = vmatprep.mubr.msk.f32.mxu0 %vm3486_vm11, %v3469_v14 }
0x171a   : > { %14286 = vmatmul.mubr.msk.f32.vlgmr.msra.gmra.mrb[20].mxu0 %vm3486_vm11, %v3470_v15 }
0x17ed   : > { %v14287_v17 = vpop.f32.mrb[20].mxu0 }
0x17ee   : > { %v3565_v21 = vadd.f32 %v14287_v17, %v13213_v16  ;;  %v3559_v22 = vpop.f32.mrb[21].mxu0 }
0x17ef   : > { %v3560_v23 = vadd.f32 %v13213_v16, %v3559_v22 }
0x17f0   : > { %v3569_v24 = vadd.f32 %v3565_v21, %v3372_v4 }
0x17f1   : > { %v3568_v26 = vadd.f32 %v3560_v23, %v3371_v3 }
0x17f2   : > { %v3575_v27 = vsel %vm1254_vm1, %v3569_v24, 0.0 }
0x17f3   : > { %3576 = vadd.xlane.f32.xlu0 %v3575_v27  ;;  %v3572_v32 = vsel %vm1254_vm1, %v3568_v26, 0.0 }
0x17f4   : > { %3573 = vadd.xlane.f32.xlu1 %v3572_v32 }
0x1880   : > { %v3577_v33 = vpop.xlane.xlu0 %3576 }
0x1881   : > { %v3579_v34 = vmul.f32 0.027777778, %v3577_v33  ;;  %v3574_v35 = vpop.xlane.xlu1 %3573 }
0x1882   : > { %v3578_v18 = vmul.f32 0.027777778, %v3574_v35 }
0x1883   : > { %v3581_v30 = vsub.f32 %v3569_v24, %v3579_v34 }
0x1884   : > { %v3580_v31 = vsub.f32 %v3568_v26, %v3578_v18 }
0x1885   : > { %v3583_v62 = vmul.f32 %v3581_v30, %v3581_v30 }
0x1886   : > { %v3582_v63 = vmul.f32 %v3580_v31, %v3580_v31 }
0x1887   : > { %v3587_v40 = vsel %vm1254_vm1, %v3583_v62, 0.0 }
0x1888   : > { %3588 = vadd.xlane.f32.xlu0 %v3587_v40  ;;  %v3584_v11 = vsel %vm1254_vm1, %v3582_v63, 0.0 }
0x1889   : > { %3585 = vadd.xlane.f32.xlu1 %v3584_v11 }
0x1915   : > { %v3589_v37 = vpop.xlane.xlu0 %3588 }
0x1916   : > { %v3591_v38 = vmul.f32 0.027777778, %v3589_v37  ;;  %v3586_v39 = vpop.xlane.xlu1 %3585 }
0x1917   : > { %v3590_v42 = vmul.f32 0.027777778, %v3586_v39 }
0x1918   : > { %v3593_v43 = vadd.f32 1e-05, %v3591_v38 }
0x1919   : > { %v3592_v44 = vadd.f32 1e-05, %v3590_v42 }
0x191a   : > { %16387 = vrsqrt.f32 %v3593_v43 }
0x191b   : > { %16389 = vrsqrt.f32 %v3592_v44 }
0x1924   : > { %v16388_v45 = vpop.eup %16387 }
0x1925   : > { %v16390_v47 = vpop.eup %16389  ;;  %v3597_v48 = vmul.f32 %v16388_v45, %v3581_v30 }
0x1926   : > { %v3596_v49 = vmul.f32 %v16390_v47, %v3580_v31 }
0x1927   : > { %v3605_v51 = vmul.f32 %v13216_v46, %v3597_v48 }
0x1928   : > { %v3604_v52 = vmul.f32 %v13216_v46, %v3596_v49 }
0x1929   : > { %v17383_v56 = vadd.f32 %v13217_v50, %v3605_v51 }
0x192a   : > { %v17381_v53 = vadd.f32 %v13217_v50, %v3604_v52 }
0x192c   : > { %14298 = vmatprep.mubr.msk.f32.mxu1 %vm1254_vm1, %v17381_v53 }
0x192d   : > { %14299 = vmatmul.mubr.msk.f32.vlgmr.msra.gmra.mrb[22].mxu1 %vm1254_vm1, %v17383_v56 }
0x1a00   : > { %v14300_v58 = vpop.f32.mrb[22].mxu1 }
0x1a01   : > { %v3709_v59 = vadd.f32 %v14300_v58, %v13224_v57  ;;  %v3703_v60 = vpop.f32.mrb[23].mxu1 }
0x1a02   : > { %v3704_v61 = vadd.f32 %v13224_v57, %v3703_v60 }
0x1a03   : > { %v17402_v2 = vmul.f32 0.5, %v3709_v59 }
0x1a04   : > { %v17390_v0 = vpack.i.bf16 %v3709_v59, %v3704_v61  ;;  %v17392_v1 = vmul.f32 0.5, %v3704_v61 }
0x1a06   : > { %15942 = vrot.lane.b32.xlu1 %v17390_v0, %s18908_s5  ;;  %14305 = vmatprep.mubr.msk.f32.mxu1 %vm1354_vm2, %v17392_v1 }
0x1a0a   : > { %15947 = vrot.lane.b32.xlu1 %v17390_v0, %s18909_s16 }
0x1a0e   : > { %3922 = vrot.lane.b32.xlu1 %v17392_v1, %s18910_s2 }
0x1a12   : > { %3924 = vrot.lane.b32.xlu1 %v17402_v2, %s18910_s2 }
0x1a78   : > { %v15943_v3 = vpop.permute.xlu1 %15942 }
0x1a79   : > { %v15945_v19 = vunpack.i.h.bf16 %v15943_v3  ;;  %v15944_v4 = vunpack.i.l.bf16 %v15943_v3 }
0x1a7b   : > { %v15253_v20 = vpack.c.bf16 %v15945_v19, %v15944_v4 }
0x1a7c   : > { %v15948_v29 = vpop.permute.xlu1 %15947 }
0x1a7d   : > { %v15950_v28 = vunpack.i.h.bf16 %v15948_v29  ;;  %v15949_v5 = vunpack.i.l.bf16 %v15948_v29  ;;  %15255 = vmatprep.subr.msk.bf16.mxu1 %vm17084_vm3, %v15253_v20 }
0x1a7e   : > { %15258 = vmatpush3.bf16.xpose.msk.msra.mxu1 %vm17084_vm3, %v15253_v20 }
0x1a7f   : > { %v15259_v6 = vpack.c.bf16 %v15950_v28, %v15949_v5 }
0x1a80   : > { %v3923_v12 = vpop.permute.xlu1 %3922 }
0x1a81   : > { %15260 = vmatprep.subr.bf16.mxu0 %v15259_v6 }
0x1a82   : > { %15262 = vmatpush3.bf16.msra.mxu0 %v15259_v6 }
0x1a84   : > { %v3925_v41 = vpop.permute.xlu1 %3924 }
0x1a85   : > { %14306 = vmatmul.mubr.msk.f32.vlgmr.msra.gmra.mrb[24].mxu1 %vm1354_vm2, %v17402_v2 }
0x1b58   : > { %v14307_v7 = vpop.f32.mrb[24].mxu1 }
0x1b59   : > { %v3804_v8 = vpop.f32.mrb[25].mxu1  ;;  %v3816_v14 = vsel %vm1440_vm4, %v14307_v7, -inf }
0x1b5a   : > { %v3813_v9 = vsel %vm1440_vm4, %v3804_v8, -inf }
0x1b5b   : > { %3814 = vmax.xlane.f32.xlu0 %v3813_v9 }
0x1b5f   : > { %3817 = vmax.xlane.f32.xlu0 %v3816_v14 }
0x1be8   : > { %v3815_v15 = vpop.xlane.xlu0 %3814 }
0x1be9   : > { %v3819_v16 = vsub.f32 %v3804_v8, %v3815_v15 }
0x1beb   : > { %v3821_v22 = vmul.f32 1.442695, %v3819_v16 }
0x1bec   : > { %v3818_v17 = vpop.xlane.xlu0 %3817 }
0x1bed   : > { %v3820_v21 = vsub.f32 %v14307_v7, %v3818_v17 }
0x1bef   : > { %v3823_v23 = vmul.f32 1.442695, %v3820_v21 }
0x1bf1   : > { %16391 = vpow2.f32 %v3823_v23 }
0x1bf2   : > { %16393 = vpow2.f32 %v3821_v22 }
0x1bfb   : > { %v16392_v24 = vpop.eup %16391 }
0x1bfc   : > { %v3828_v26 = vsel %vm1440_vm4, %v16392_v24, 0.0  ;;  %v16394_v27 = vpop.eup %16393 }
0x1bfd   : > { %3829 = vadd.xlane.f32.xlu0 %v3828_v26  ;;  %v3825_v32 = vsel %vm1440_vm4, %v16394_v27, 0.0 }
0x1c01   : > { %3826 = vadd.xlane.f32.xlu0 %v3825_v32 }
0x1c17   : > { %15952 = vrot.lane.b32.xlu0 %v17390_v0, %s18911_s9 }
0x1c8a   : > { %v3830_v33 = vpop.xlane.xlu0 %3829 }
0x1c8b   : > { %16395 = vrcp.f32 %v3830_v33 }
0x1c8e   : > { %v3827_v34 = vpop.xlane.xlu0 %3826 }
0x1c8f   : > { %16397 = vrcp.f32 %v3827_v34 }
0x1c92   : > { %v15953_v35 = vpop.permute.xlu0 %15952 }
0x1c93   : > { %v15955_v18 = vunpack.i.h.bf16 %v15953_v35  ;;  %v15954_v30 = vunpack.i.l.bf16 %v15953_v35 }
0x1c95   : > { %v15263_v31 = vpack.c.bf16 %v15955_v18, %v15954_v30  ;;  %v16396_v62 = vpop.eup %16395 }
0x1c96   : > { %v3834_v11 = vmul.f32 %v16396_v62, %v16392_v24 }
0x1c97   : > { %15265 = vmatprep.subr.msk.bf16.mxu0 %vm17084_vm3, %v15263_v31 }
0x1c99   : > { %v16398_v63 = vpop.eup %16397 }
0x1c9a   : > { %v3833_v40 = vmul.f32 %v16398_v63, %v16394_v27 }
0x1c9c   : > { %14312 = vmatprep.mubr.msk.f32.mxu0 %vm1440_vm4, %v3833_v40 }
0x1c9d   : > { %14313 = vmatmul.mubr.msk.f32.vlgmr.msra.gmra.mrb[22].mxu0 %vm1440_vm4, %v3834_v11 }
0x1c9e   : > { %15268 = vmatpush3.bf16.xpose.msk.msra.mxu0 %vm17084_vm3, %v15263_v31  ;;  %14319 = vmatprep.mubr.msk.f32.mxu0 %vm1354_vm2, %v3923_v12 }
0x1ca5   : > { %14320 = vmatmul.mubr.msk.f32.vlgmr.msra.gmra.mrb[24].mxu0 %vm1354_vm2, %v3925_v41 }
0x1d70   : > { %v17426_v10 = vpop.f32.mrb[22].mxu0 }
0x1d71   : > { %v17428_v13 = vpop.f32.mrb[23].mxu0 }
0x1d78   : > { %v14321_v54 = vpop.f32.mrb[24].mxu0 }
0x1d79   : > { %v4004_v55 = vpop.f32.mrb[25].mxu0  ;;  %v4016_v36 = vsel %vm1440_vm4, %v14321_v54, -inf }
0x1d7a   : > { %4017 = vmax.xlane.f32.xlu0 %v4016_v36  ;;  %v4013_v37 = vsel %vm1440_vm4, %v4004_v55, -inf }
0x1d7b   : > { %4014 = vmax.xlane.f32.xlu1 %v4013_v37 }
0x1d8c   : > { %15962 = vrot.lane.b32.xlu1 %v17390_v0, %s18912_s26 }
0x1d90   : > { %15957 = vrot.lane.b32.xlu0 %v17390_v0, %s18913_s11 }
0x1d94   : > { %4124 = vrot.lane.b32.xlu0 %v17402_v2, %s18914_s18 }
0x1e07   : > { %v4018_v38 = vpop.xlane.xlu0 %4017 }
0x1e08   : > { %v4020_v39 = vsub.f32 %v14321_v54, %v4018_v38  ;;  %v4015_v42 = vpop.xlane.xlu1 %4014 }
0x1e09   : > { %v4019_v43 = vsub.f32 %v4004_v55, %v4015_v42 }
0x1e0a   : > { %v4023_v44 = vmul.f32 1.442695, %v4020_v39 }
0x1e0b   : > { %v4021_v45 = vmul.f32 1.442695, %v4019_v43  ;;  %v15958_v46 = vpop.permute.xlu0 %15957 }
0x1e0c   : > { %16399 = vpow2.f32 %v4023_v44  ;;  %v15960_v47 = vunpack.i.h.bf16 %v15958_v46  ;;  %v15959_v48 = vunpack.i.l.bf16 %v15958_v46  ;;  %v15963_v49 = vpop.permute.xlu1 %15962 }
0x1e0d   : > { %v15965_v50 = vunpack.i.h.bf16 %v15963_v49  ;;  %v15964_v51 = vunpack.i.l.bf16 %v15963_v49  ;;  %16401 = vpow2.f32 %v4021_v45 }
0x1e0e   : > { %v15269_v52 = vpack.c.bf16 %v15960_v47, %v15959_v48 }
0x1e0f   : > { %v15273_v57 = vpack.c.bf16 %v15965_v50, %v15964_v51  ;;  %v4125_v6 = vpop.permute.xlu0 %4124 }
0x1e10   : > { %15270 = vmatprep.subr.bf16.mxu1 %v15269_v52 }
0x1e11   : > { %15272 = vmatpush3.bf16.msra.mxu1 %v15269_v52 }
0x1e12   : > { %15275 = vmatprep.subr.msk.bf16.mxu1 %vm17084_vm3, %v15273_v57 }
0x1e16   : > { %v16400_v58 = vpop.eup %16399 }
0x1e17   : > { %v4028_v59 = vsel %vm1440_vm4, %v16400_v58, 0.0  ;;  %v16402_v60 = vpop.eup %16401 }
0x1e18   : > { %4029 = vadd.xlane.f32.xlu1 %v4028_v59  ;;  %v4025_v61 = vsel %vm1440_vm4, %v16402_v60, 0.0 }
0x1e1c   : > { %4026 = vadd.xlane.f32.xlu1 %v4025_v61 }
0x1e2d   : > { %4122 = vrot.lane.b32.xlu1 %v17392_v1, %s18914_s18 }
0x1ea5   : > { %v4030_v3 = vpop.xlane.xlu1 %4029 }
0x1ea6   : > { %16403 = vrcp.f32 %v4030_v3 }
0x1ea9   : > { %v4027_v19 = vpop.xlane.xlu1 %4026 }
0x1eaa   : > { %16405 = vrcp.f32 %v4027_v19 }
0x1ead   : > { %v4123_v5 = vpop.permute.xlu1 %4122 }
0x1eb0   : > { %v16404_v4 = vpop.eup %16403 }
0x1eb1   : > { %v4034_v28 = vmul.f32 %v16404_v4, %v16400_v58 }
0x1eb4   : > { %v16406_v20 = vpop.eup %16405 }
0x1eb5   : > { %v4033_v29 = vmul.f32 %v16406_v20, %v16402_v60 }
0x1eb7   : > { %14326 = vmatprep.mubr.msk.f32.mxu1 %vm1440_vm4, %v4033_v29 }
0x1eb8   : > { %14327 = vmatmul.mubr.msk.f32.vlgmr.msra.gmra.mrb[26].mxu1 %vm1440_vm4, %v4034_v28 }
0x1eb9   : > { %15278 = vmatpush3.bf16.xpose.msk.msra.mxu1 %vm17084_vm3, %v15273_v57  ;;  %14333 = vmatprep.mubr.msk.f32.mxu1 %vm1354_vm2, %v4123_v5 }
0x1ec0   : > { %14334 = vmatmul.mubr.msk.f32.vlgmr.msra.gmra.mrb[28].mxu1 %vm1354_vm2, %v4125_v6 }
0x1f8b   : > { %v17450_v7 = vpop.f32.mrb[26].mxu1 }
0x1f8c   : > { %v17452_v8 = vpop.f32.mrb[27].mxu1 }
0x1f93   : > { %v14335_v9 = vpop.f32.mrb[28].mxu1 }
0x1f94   : > { %v4204_v14 = vpop.f32.mrb[29].mxu1  ;;  %v4216_v15 = vsel %vm1440_vm4, %v14335_v9, -inf }
0x1f95   : > { %4217 = vmax.xlane.f32.xlu0 %v4216_v15  ;;  %v4213_v16 = vsel %vm1440_vm4, %v4204_v14, -inf }
0x1f96   : > { %4214 = vmax.xlane.f32.xlu1 %v4213_v16 }
0x2022   : > { %v4218_v17 = vpop.xlane.xlu0 %4217 }
0x2023   : > { %v4220_v21 = vsub.f32 %v14335_v9, %v4218_v17  ;;  %v4215_v22 = vpop.xlane.xlu1 %4214 }
0x2024   : > { %v4219_v23 = vsub.f32 %v4204_v14, %v4215_v22 }
0x2025   : > { %v4223_v24 = vmul.f32 1.442695, %v4220_v21 }
0x2026   : > { %v4221_v26 = vmul.f32 1.442695, %v4219_v23 }
0x2027   : > { %16407 = vpow2.f32 %v4223_v24 }
0x2028   : > { %16409 = vpow2.f32 %v4221_v26 }
0x2031   : > { %v16408_v27 = vpop.eup %16407 }
0x2032   : > { %v16410_v32 = vpop.eup %16409  ;;  %v4228_v33 = vsel %vm1440_vm4, %v16408_v27, 0.0 }
0x2033   : > { %4229 = vadd.xlane.f32.xlu1 %v4228_v33  ;;  %v4225_v34 = vsel %vm1440_vm4, %v16410_v32, 0.0 }
0x2034   : > { %4226 = vadd.xlane.f32.xlu0 %v4225_v34 }
0x2044   : > { %15972 = vrot.lane.b32.xlu1 %v17390_v0, %s18915_s1 }
0x2048   : > { %4322 = vrot.lane.b32.xlu1 %v17392_v1, %s18916_s7 }
0x204a   : > { %15967 = vrot.lane.b32.xlu0 %v17390_v0, %s18917_s15 }
0x204e   : > { %4324 = vrot.lane.b32.xlu0 %v17402_v2, %s18916_s7 }
0x20c0   : > { %v4230_v35 = vpop.xlane.xlu1 %4229 }
0x20c1   : > { %16411 = vrcp.f32 %v4230_v35  ;;  %v4227_v18 = vpop.xlane.xlu0 %4226 }
0x20c2   : > { %16413 = vrcp.f32 %v4227_v18 }
0x20c4   : > { %v15973_v30 = vpop.permute.xlu1 %15972 }
0x20c5   : > { %v15968_v31 = vpop.permute.xlu0 %15967  ;;  %v15975_v62 = vunpack.i.h.bf16 %v15973_v30  ;;  %v15974_v63 = vunpack.i.l.bf16 %v15973_v30 }
0x20c6   : > { %v15970_v40 = vunpack.i.h.bf16 %v15968_v31  ;;  %v15969_v11 = vunpack.i.l.bf16 %v15968_v31 }
0x20c7   : > { %v15283_v41 = vpack.c.bf16 %v15975_v62, %v15974_v63 }
0x20c8   : > { %v15279_v12 = vpack.c.bf16 %v15970_v40, %v15969_v11  ;;  %v4323_v38 = vpop.permute.xlu1 %4322 }
0x20c9   : > { %v4325_v39 = vpop.permute.xlu0 %4324 }
0x20ca   : > { %15280 = vmatprep.subr.bf16.mxu0 %v15279_v12 }
0x20cb   : > { %v16412_v54 = vpop.eup %16411  ;;  %15282 = vmatpush3.bf16.msra.mxu0 %v15279_v12 }
0x20cc   : > { %v16414_v55 = vpop.eup %16413  ;;  %15285 = vmatprep.subr.msk.bf16.mxu0 %vm17084_vm3, %v15283_v41  ;;  %v4234_v37 = vmul.f32 %v16412_v54, %v16408_v27 }
0x20cd   : > { %v4233_v36 = vmul.f32 %v16414_v55, %v16410_v32 }
0x20cf   : > { %14340 = vmatprep.mubr.msk.f32.mxu0 %vm1440_vm4, %v4233_v36 }
0x20d0   : > { %14341 = vmatmul.mubr.msk.f32.vlgmr.msra.gmra.mrb[26].mxu0 %vm1440_vm4, %v4234_v37 }
0x20d1   : > { %14347 = vmatprep.mubr.msk.f32.mxu0 %vm1354_vm2, %v4323_v38 }
0x20d4   : > { %15288 = vmatpush3.bf16.xpose.msk.msra.mxu0 %vm17084_vm3, %v15283_v41 }
0x20db   : > { %14348 = vmatmul.mubr.msk.f32.vlgmr.msra.gmra.mrb[28].mxu0 %vm1354_vm2, %v4325_v39 }
0x21a3   : > { %v17474_v42 = vpop.f32.mrb[26].mxu0 }
0x21a4   : > { %v17476_v43 = vpop.f32.mrb[27].mxu0 }
0x21ae   : > { %v14349_v44 = vpop.f32.mrb[28].mxu0 }
0x21af   : > { %v4404_v45 = vpop.f32.mrb[29].mxu0  ;;  %v4416_v46 = vsel %vm1440_vm4, %v14349_v44, -inf }
0x21b0   : > { %4417 = vmax.xlane.f32.xlu0 %v4416_v46  ;;  %v4413_v47 = vsel %vm1440_vm4, %v4404_v45, -inf }
0x21b1   : > { %4414 = vmax.xlane.f32.xlu1 %v4413_v47 }
0x223d   : > { %v4418_v48 = vpop.xlane.xlu0 %4417 }
0x223e   : > { %v4420_v49 = vsub.f32 %v14349_v44, %v4418_v48  ;;  %v4415_v50 = vpop.xlane.xlu1 %4414 }
0x223f   : > { %v4419_v51 = vsub.f32 %v4404_v45, %v4415_v50 }
0x2240   : > { %v4423_v52 = vmul.f32 1.442695, %v4420_v49 }
0x2241   : > { %v4421_v57 = vmul.f32 1.442695, %v4419_v51 }
0x2242   : > { %16415 = vpow2.f32 %v4423_v52 }
0x2243   : > { %16417 = vpow2.f32 %v4421_v57 }
0x224c   : > { %v16416_v58 = vpop.eup %16415 }
0x224d   : > { %v16418_v59 = vpop.eup %16417  ;;  %v4428_v60 = vsel %vm1440_vm4, %v16416_v58, 0.0 }
0x224e   : > { %4429 = vadd.xlane.f32.xlu1 %v4428_v60  ;;  %v4425_v61 = vsel %vm1440_vm4, %v16418_v59, 0.0 }
0x224f   : > { %4426 = vadd.xlane.f32.xlu0 %v4425_v61 }
0x225f   : > { %15982 = vrot.lane.b32.xlu1 %v17390_v0, %s18918_s28 }
0x2263   : > { %4522 = vrot.lane.b32.xlu1 %v17392_v1, %s18919_s4 }
0x2265   : > { %15977 = vrot.lane.b32.xlu0 %v17390_v0, %s18920_s0  ;;  %s18935_s0 = smov 16  }
0x2269   : > { %4524 = vrot.lane.b32.xlu0 %v17402_v2, %s18919_s4 }
0x22db   : > { %v4430_v3 = vpop.xlane.xlu1 %4429 }
0x22dc   : > { %16419 = vrcp.f32 %v4430_v3  ;;  %v4427_v19 = vpop.xlane.xlu0 %4426 }
0x22dd   : > { %16421 = vrcp.f32 %v4427_v19 }
0x22df   : > { %v15983_v4 = vpop.permute.xlu1 %15982 }
0x22e0   : > { %v15978_v20 = vpop.permute.xlu0 %15977  ;;  %v15985_v29 = vunpack.i.h.bf16 %v15983_v4  ;;  %v15984_v28 = vunpack.i.l.bf16 %v15983_v4 }
0x22e1   : > { %v15980_v5 = vunpack.i.h.bf16 %v15978_v20  ;;  %v15979_v6 = vunpack.i.l.bf16 %v15978_v20 }
0x22e2   : > { %v15293_v14 = vpack.c.bf16 %v15985_v29, %v15984_v28 }
0x22e3   : > { %v15289_v9 = vpack.c.bf16 %v15980_v5, %v15979_v6  ;;  %v4523_v22 = vpop.permute.xlu1 %4522 }
0x22e4   : > { %v4525_v23 = vpop.permute.xlu0 %4524 }
0x22e5   : > { %15290 = vmatprep.subr.bf16.mxu1 %v15289_v9 }
0x22e6   : > { %v16420_v15 = vpop.eup %16419  ;;  %15292 = vmatpush3.bf16.msra.mxu1 %v15289_v9 }
0x22e7   : > { %v16422_v16 = vpop.eup %16421  ;;  %15295 = vmatprep.subr.msk.bf16.mxu1 %vm17084_vm3, %v15293_v14  ;;  %v4434_v21 = vmul.f32 %v16420_v15, %v16416_v58 }
0x22e8   : > { %v4433_v17 = vmul.f32 %v16422_v16, %v16418_v59 }
0x22ea   : > { %14354 = vmatprep.mubr.msk.f32.mxu1 %vm1440_vm4, %v4433_v17 }
0x22eb   : > { %14355 = vmatmul.mubr.msk.f32.vlgmr.msra.gmra.mrb[30].mxu1 %vm1440_vm4, %v4434_v21 }
0x22ec   : > { %14361 = vmatprep.mubr.msk.f32.mxu1 %vm1354_vm2, %v4523_v22 }
0x22ef   : > { %15298 = vmatpush3.bf16.xpose.msk.msra.mxu1 %vm17084_vm3, %v15293_v14 }
0x22f6   : > { %14362 = vmatmul.mubr.msk.f32.vlgmr.msra.gmra.mrb[32].mxu1 %vm1354_vm2, %v4525_v23 }
0x23be   : > { %v17498_v24 = vpop.f32.mrb[30].mxu1 }
0x23bf   : > { %v17500_v26 = vpop.f32.mrb[31].mxu1 }
0x23c9   : > { %v14363_v27 = vpop.f32.mrb[32].mxu1 }
0x23ca   : > { %v4604_v32 = vpop.f32.mrb[33].mxu1  ;;  %v4616_v33 = vsel %vm1440_vm4, %v14363_v27, -inf }
0x23cb   : > { %4617 = vmax.xlane.f32.xlu0 %v4616_v33  ;;  %v4613_v34 = vsel %vm1440_vm4, %v4604_v32, -inf }
0x23cc   : > { %4614 = vmax.xlane.f32.xlu1 %v4613_v34 }
0x2458   : > { %v4618_v35 = vpop.xlane.xlu0 %4617 }
0x2459   : > { %v4620_v18 = vsub.f32 %v14363_v27, %v4618_v35  ;;  %v4615_v30 = vpop.xlane.xlu1 %4614 }
0x245a   : > { %v4619_v31 = vsub.f32 %v4604_v32, %v4615_v30 }
0x245b   : > { %v4623_v62 = vmul.f32 1.442695, %v4620_v18 }
0x245c   : > { %v4621_v63 = vmul.f32 1.442695, %v4619_v31 }
0x245d   : > { %16423 = vpow2.f32 %v4623_v62 }
0x245e   : > { %16425 = vpow2.f32 %v4621_v63 }
0x2467   : > { %v16424_v40 = vpop.eup %16423 }
0x2468   : > { %v16426_v11 = vpop.eup %16425  ;;  %v4628_v12 = vsel %vm1440_vm4, %v16424_v40, 0.0 }
0x2469   : > { %4629 = vadd.xlane.f32.xlu1 %v4628_v12  ;;  %v4625_v41 = vsel %vm1440_vm4, %v16426_v11, 0.0 }
0x246a   : > { %4626 = vadd.xlane.f32.xlu0 %v4625_v41 }
0x247a   : > { %15992 = vrot.lane.b32.xlu1 %v17390_v0, %s18921_s27  ;;  %s18934_s27 = smov 12  }
0x247e   : > { %4722 = vrot.lane.b32.xlu1 %v17392_v1, %s18922_s10 }
0x2480   : > { %15987 = vrot.lane.b32.xlu0 %v17390_v0, %s18923_s13  ;;  %s18925_s13 = smov 104  }
0x2484   : > { %4724 = vrot.lane.b32.xlu0 %v17402_v2, %s18922_s10  ;;  %s18926_s10 = smov 36  }
0x24f6   : > { %v4630_v54 = vpop.xlane.xlu1 %4629 }
0x24f7   : > { %16427 = vrcp.f32 %v4630_v54  ;;  %v4627_v55 = vpop.xlane.xlu0 %4626 }
0x24f8   : > { %16429 = vrcp.f32 %v4627_v55 }
0x24fa   : > { %v15993_v36 = vpop.permute.xlu1 %15992 }
0x24fb   : > { %v15988_v37 = vpop.permute.xlu0 %15987  ;;  %v15995_v38 = vunpack.i.h.bf16 %v15993_v36  ;;  %v15994_v39 = vunpack.i.l.bf16 %v15993_v36 }
0x24fc   : > { %v15990_v44 = vunpack.i.h.bf16 %v15988_v37  ;;  %v15989_v45 = vunpack.i.l.bf16 %v15988_v37 }
0x24fd   : > { %v15303_v47 = vpack.c.bf16 %v15995_v38, %v15994_v39 }
0x24fe   : > { %v15299_v46 = vpack.c.bf16 %v15990_v44, %v15989_v45  ;;  %v4723_v52 = vpop.permute.xlu1 %4722 }
0x24ff   : > { %v4725_v57 = vpop.permute.xlu0 %4724 }
0x2500   : > { %15300 = vmatprep.subr.bf16.mxu0 %v15299_v46 }
0x2501   : > { %v16428_v48 = vpop.eup %16427  ;;  %15302 = vmatpush3.bf16.msra.mxu0 %v15299_v46 }
0x2502   : > { %v16430_v49 = vpop.eup %16429  ;;  %15305 = vmatprep.subr.msk.bf16.mxu0 %vm17084_vm3, %v15303_v47  ;;  %v4634_v51 = vmul.f32 %v16428_v48, %v16424_v40 }
0x2503   : > { %v4633_v50 = vmul.f32 %v16430_v49, %v16426_v11 }
0x2505   : > { %14368 = vmatprep.mubr.msk.f32.mxu0 %vm1440_vm4, %v4633_v50 }
0x2506   : > { %14369 = vmatmul.mubr.msk.f32.vlgmr.msra.gmra.mrb[30].mxu0 %vm1440_vm4, %v4634_v51 }
0x2507   : > { %14375 = vmatprep.mubr.msk.f32.mxu0 %vm1354_vm2, %v4723_v52 }
0x250a   : > { %15308 = vmatpush3.bf16.xpose.msk.msra.mxu0 %vm17084_vm3, %v15303_v47 }
0x2511   : > { %14376 = vmatmul.mubr.msk.f32.vlgmr.msra.gmra.mrb[32].mxu0 %vm1354_vm2, %v4725_v57 }
0x25d9   : > { %v17522_v58 = vpop.f32.mrb[30].mxu0 }
0x25da   : > { %v17524_v59 = vpop.f32.mrb[31].mxu0 }
0x25e4   : > { %v14377_v60 = vpop.f32.mrb[32].mxu0 }
0x25e5   : > { %v4804_v61 = vpop.f32.mrb[33].mxu0  ;;  %v4816_v3 = vsel %vm1440_vm4, %v14377_v60, -inf }
0x25e6   : > { %4817 = vmax.xlane.f32.xlu0 %v4816_v3  ;;  %v4813_v19 = vsel %vm1440_vm4, %v4804_v61, -inf }
0x25e7   : > { %4814 = vmax.xlane.f32.xlu1 %v4813_v19 }
0x2673   : > { %v4818_v4 = vpop.xlane.xlu0 %4817 }
0x2674   : > { %v4820_v20 = vsub.f32 %v14377_v60, %v4818_v4  ;;  %v4815_v29 = vpop.xlane.xlu1 %4814 }
0x2675   : > { %v4819_v28 = vsub.f32 %v4804_v61, %v4815_v29 }
0x2676   : > { %v4823_v5 = vmul.f32 1.442695, %v4820_v20 }
0x2677   : > { %v4821_v6 = vmul.f32 1.442695, %v4819_v28 }
0x2678   : > { %16431 = vpow2.f32 %v4823_v5 }
0x2679   : > { %16433 = vpow2.f32 %v4821_v6 }
0x2682   : > { %v16432_v9 = vpop.eup %16431 }
0x2683   : > { %v16434_v14 = vpop.eup %16433  ;;  %v4828_v15 = vsel %vm1440_vm4, %v16432_v9, 0.0 }
0x2684   : > { %4829 = vadd.xlane.f32.xlu1 %v4828_v15  ;;  %v4825_v16 = vsel %vm1440_vm4, %v16434_v14, 0.0 }
0x2685   : > { %4826 = vadd.xlane.f32.xlu0 %v4825_v16 }
0x2695   : > { %16002 = vrot.lane.b32.xlu1 %v17390_v0, %s18924_s20  ;;  %s18933_s20 = smov 8  }
0x2699   : > { %4922 = vrot.lane.b32.xlu1 %v17392_v1, %s18925_s13 }
0x269b   : > { %15997 = vrot.lane.b32.xlu0 %v17390_v0, %s18926_s10  ;;  %s18927_s10 = smov 64  }
0x269f   : > { %4924 = vrot.lane.b32.xlu0 %v17402_v2, %s18925_s13  ;;  %s18928_s13 = smov 100  }
0x2711   : > { %v4830_v17 = vpop.xlane.xlu1 %4829 }
0x2712   : > { %16435 = vrcp.f32 %v4830_v17  ;;  %v4827_v21 = vpop.xlane.xlu0 %4826 }
0x2713   : > { %16437 = vrcp.f32 %v4827_v21 }
0x2715   : > { %v16003_v22 = vpop.permute.xlu1 %16002 }
0x2716   : > { %v15998_v23 = vpop.permute.xlu0 %15997  ;;  %v16005_v27 = vunpack.i.h.bf16 %v16003_v22  ;;  %v16004_v32 = vunpack.i.l.bf16 %v16003_v22 }
0x2717   : > { %v16000_v33 = vunpack.i.h.bf16 %v15998_v23  ;;  %v15999_v34 = vunpack.i.l.bf16 %v15998_v23 }
0x2718   : > { %v15313_v18 = vpack.c.bf16 %v16005_v27, %v16004_v32 }
0x2719   : > { %v15309_v35 = vpack.c.bf16 %v16000_v33, %v15999_v34  ;;  %v4923_v40 = vpop.permute.xlu1 %4922 }
0x271a   : > { %v4925_v11 = vpop.permute.xlu0 %4924 }
0x271b   : > { %15310 = vmatprep.subr.bf16.mxu1 %v15309_v35 }
0x271c   : > { %v16436_v30 = vpop.eup %16435  ;;  %15312 = vmatpush3.bf16.msra.mxu1 %v15309_v35 }
0x271d   : > { %v16438_v31 = vpop.eup %16437  ;;  %15315 = vmatprep.subr.msk.bf16.mxu1 %vm17084_vm3, %v15313_v18  ;;  %v4834_v63 = vmul.f32 %v16436_v30, %v16432_v9 }
0x271e   : > { %v4833_v62 = vmul.f32 %v16438_v31, %v16434_v14 }
0x2720   : > { %14382 = vmatprep.mubr.msk.f32.mxu1 %vm1440_vm4, %v4833_v62 }
0x2721   : > { %14383 = vmatmul.mubr.msk.f32.vlgmr.msra.gmra.mrb[34].mxu1 %vm1440_vm4, %v4834_v63 }
0x2722   : > { %14389 = vmatprep.mubr.msk.f32.mxu1 %vm1354_vm2, %v4923_v40 }
0x2725   : > { %15318 = vmatpush3.bf16.xpose.msk.msra.mxu1 %vm17084_vm3, %v15313_v18 }
0x272c   : > { %14390 = vmatmul.mubr.msk.f32.vlgmr.msra.gmra.mrb[36].mxu1 %vm1354_vm2, %v4925_v11 }
0x27f4   : > { %v17546_v12 = vpop.f32.mrb[34].mxu1 }
0x27f5   : > { %v17548_v41 = vpop.f32.mrb[35].mxu1 }
0x27ff   : > { %v14391_v54 = vpop.f32.mrb[36].mxu1 }
0x2800   : > { %v5004_v55 = vpop.f32.mrb[37].mxu1  ;;  %v5016_v36 = vsel %vm1440_vm4, %v14391_v54, -inf }
0x2801   : > { %5017 = vmax.xlane.f32.xlu0 %v5016_v36  ;;  %v5013_v37 = vsel %vm1440_vm4, %v5004_v55, -inf }
0x2802   : > { %5014 = vmax.xlane.f32.xlu1 %v5013_v37 }
0x288e   : > { %v5018_v38 = vpop.xlane.xlu0 %5017 }
0x288f   : > { %v5020_v39 = vsub.f32 %v14391_v54, %v5018_v38  ;;  %v5015_v44 = vpop.xlane.xlu1 %5014 }
0x2890   : > { %v5019_v45 = vsub.f32 %v5004_v55, %v5015_v44 }
0x2891   : > { %v5023_v46 = vmul.f32 1.442695, %v5020_v39 }
0x2892   : > { %v5021_v47 = vmul.f32 1.442695, %v5019_v45 }
0x2893   : > { %16439 = vpow2.f32 %v5023_v46 }
0x2894   : > { %16441 = vpow2.f32 %v5021_v47 }
0x289d   : > { %v16440_v48 = vpop.eup %16439 }
0x289e   : > { %v16442_v49 = vpop.eup %16441  ;;  %v5028_v50 = vsel %vm1440_vm4, %v16440_v48, 0.0 }
0x289f   : > { %5029 = vadd.xlane.f32.xlu1 %v5028_v50  ;;  %v5025_v51 = vsel %vm1440_vm4, %v16442_v49, 0.0 }
0x28a0   : > { %5026 = vadd.xlane.f32.xlu0 %v5025_v51 }
0x28b0   : > { %16012 = vrot.lane.b32.xlu1 %v17390_v0, %s18927_s10  ;;  %s18930_s10 = smov 96  }
0x28b4   : > { %5122 = vrot.lane.b32.xlu1 %v17392_v1, %s18928_s13 }
0x28b6   : > { %16007 = vrot.lane.b32.xlu0 %v17390_v0, %s18907_s22 }
0x28ba   : > { %5124 = vrot.lane.b32.xlu0 %v17402_v2, %s18928_s13  ;;  %s18929_s13 = smov 60  }
0x292c   : > { %v5030_v52 = vpop.xlane.xlu1 %5029 }
0x292d   : > { %16443 = vrcp.f32 %v5030_v52  ;;  %v5027_v57 = vpop.xlane.xlu0 %5026 }
0x292e   : > { %16445 = vrcp.f32 %v5027_v57 }
0x2930   : > { %v16013_v60 = vpop.permute.xlu1 %16012 }
0x2931   : > { %v16008_v61 = vpop.permute.xlu0 %16007  ;;  %v16015_v3 = vunpack.i.h.bf16 %v16013_v60  ;;  %v16014_v19 = vunpack.i.l.bf16 %v16013_v60 }
0x2932   : > { %v16010_v4 = vunpack.i.h.bf16 %v16008_v61  ;;  %v16009_v20 = vunpack.i.l.bf16 %v16008_v61 }
0x2933   : > { %v15323_v28 = vpack.c.bf16 %v16015_v3, %v16014_v19 }
0x2934   : > { %v15319_v29 = vpack.c.bf16 %v16010_v4, %v16009_v20  ;;  %v5123_v15 = vpop.permute.xlu1 %5122 }
0x2935   : > { %v5125_v16 = vpop.permute.xlu0 %5124 }
0x2936   : > { %15320 = vmatprep.subr.bf16.mxu0 %v15319_v29 }
0x2937   : > { %v16444_v5 = vpop.eup %16443  ;;  %15322 = vmatpush3.bf16.msra.mxu0 %v15319_v29 }
0x2938   : > { %v16446_v6 = vpop.eup %16445  ;;  %15325 = vmatprep.subr.msk.bf16.mxu0 %vm17084_vm3, %v15323_v28  ;;  %v5034_v14 = vmul.f32 %v16444_v5, %v16440_v48 }
0x2939   : > { %v5033_v9 = vmul.f32 %v16446_v6, %v16442_v49 }
0x293b   : > { %14396 = vmatprep.mubr.msk.f32.mxu0 %vm1440_vm4, %v5033_v9 }
0x293c   : > { %14397 = vmatmul.mubr.msk.f32.vlgmr.msra.gmra.mrb[34].mxu0 %vm1440_vm4, %v5034_v14 }
0x293d   : > { %14403 = vmatprep.mubr.msk.f32.mxu0 %vm1354_vm2, %v5123_v15 }
0x2940   : > { %15328 = vmatpush3.bf16.xpose.msk.msra.mxu0 %vm17084_vm3, %v15323_v28 }
0x2947   : > { %14404 = vmatmul.mubr.msk.f32.vlgmr.msra.gmra.mrb[36].mxu0 %vm1354_vm2, %v5125_v16 }
0x2a0f   : > { %v17570_v17 = vpop.f32.mrb[34].mxu0 }
0x2a10   : > { %v17572_v21 = vpop.f32.mrb[35].mxu0 }
0x2a1a   : > { %v14405_v22 = vpop.f32.mrb[36].mxu0 }
0x2a1b   : > { %v5204_v23 = vpop.f32.mrb[37].mxu0  ;;  %v5216_v27 = vsel %vm1440_vm4, %v14405_v22, -inf }
0x2a1c   : > { %5217 = vmax.xlane.f32.xlu0 %v5216_v27  ;;  %v5213_v32 = vsel %vm1440_vm4, %v5204_v23, -inf }
0x2a1d   : > { %5214 = vmax.xlane.f32.xlu1 %v5213_v32  ;;  %v13232_v32 = vld [vmem:[%s18888_s25 + $0x48] sm:$0xf] }
0x2aa9   : > { %v5218_v33 = vpop.xlane.xlu0 %5217 }
0x2aaa   : > { %v5220_v34 = vsub.f32 %v14405_v22, %v5218_v33  ;;  %v5215_v35 = vpop.xlane.xlu1 %5214 }
0x2aab   : > { %v5219_v18 = vsub.f32 %v5204_v23, %v5215_v35  ;;  %v13231_v23 = vld [vmem:[%s18888_s25 + $0x40] sm:$0xff] }
0x2aac   : > { %v5223_v30 = vmul.f32 1.442695, %v5220_v34 }
0x2aad   : > { %v5221_v31 = vmul.f32 1.442695, %v5219_v18 }
0x2aae   : > { %16447 = vpow2.f32 %v5223_v30 }
0x2aaf   : > { %16449 = vpow2.f32 %v5221_v31 }
0x2ab8   : > { %v16448_v62 = vpop.eup %16447 }
0x2ab9   : > { %v16450_v63 = vpop.eup %16449  ;;  %v5228_v40 = vsel %vm1440_vm4, %v16448_v62, 0.0 }
0x2aba   : > { %5229 = vadd.xlane.f32.xlu1 %v5228_v40  ;;  %v5225_v11 = vsel %vm1440_vm4, %v16450_v63, 0.0 }
0x2abb   : > { %5226 = vadd.xlane.f32.xlu0 %v5225_v11 }
0x2acb   : > { %16022 = vrot.lane.b32.xlu1 %v17390_v0, %s18929_s13  ;;  %s18932_s13 = smov 24  }
0x2acf   : > { %5322 = vrot.lane.b32.xlu1 %v17392_v1, %s18930_s10 }
0x2ad1   : > { %16017 = vrot.lane.b32.xlu0 %v17390_v0, %s18906_s23 }
0x2ad5   : > { %5324 = vrot.lane.b32.xlu0 %v17402_v2, %s18930_s10  ;;  %s18931_s10 = smov 4  }
0x2b47   : > { %v5230_v54 = vpop.xlane.xlu1 %5229 }
0x2b48   : > { %16451 = vrcp.f32 %v5230_v54  ;;  %v5227_v55 = vpop.xlane.xlu0 %5226 }
0x2b49   : > { %16453 = vrcp.f32 %v5227_v55 }
0x2b4b   : > { %v16023_v36 = vpop.permute.xlu1 %16022 }
0x2b4c   : > { %v16018_v37 = vpop.permute.xlu0 %16017  ;;  %v16025_v38 = vunpack.i.h.bf16 %v16023_v36  ;;  %v16024_v39 = vunpack.i.l.bf16 %v16023_v36 }
0x2b4d   : > { %v16020_v44 = vunpack.i.h.bf16 %v16018_v37  ;;  %v16019_v45 = vunpack.i.l.bf16 %v16018_v37 }
0x2b4e   : > { %v15333_v47 = vpack.c.bf16 %v16025_v38, %v16024_v39 }
0x2b4f   : > { %v15329_v46 = vpack.c.bf16 %v16020_v44, %v16019_v45  ;;  %v5323_v50 = vpop.permute.xlu1 %5322 }
0x2b50   : > { %v5325_v51 = vpop.permute.xlu0 %5324 }
0x2b51   : > { %15330 = vmatprep.subr.bf16.mxu1 %v15329_v46 }
0x2b52   : > { %v16452_v1 = vpop.eup %16451  ;;  %15332 = vmatpush3.bf16.msra.mxu1 %v15329_v46 }
0x2b53   : > { %v16454_v48 = vpop.eup %16453  ;;  %15335 = vmatprep.subr.msk.bf16.mxu1 %vm17084_vm3, %v15333_v47  ;;  %v5234_v49 = vmul.f32 %v16452_v1, %v16448_v62 }
0x2b54   : > { %v5233_v2 = vmul.f32 %v16454_v48, %v16450_v63 }
0x2b56   : > { %14410 = vmatprep.mubr.msk.f32.mxu1 %vm1440_vm4, %v5233_v2 }
0x2b57   : > { %14411 = vmatmul.mubr.msk.f32.vlgmr.msra.gmra.mrb[38].mxu1 %vm1440_vm4, %v5234_v49 }
0x2b58   : > { %14417 = vmatprep.mubr.msk.f32.mxu1 %vm1354_vm2, %v5323_v50 }
0x2b5b   : > { %15338 = vmatpush3.bf16.xpose.msk.msra.mxu1 %vm17084_vm3, %v15333_v47 }
0x2b62   : > { %14418 = vmatmul.mubr.msk.f32.vlgmr.msra.gmra.mrb[40].mxu1 %vm1354_vm2, %v5325_v51 }
0x2c2a   : > { %v14412_v52 = vpop.f32.mrb[38].mxu1 }
0x2c2b   : > { %v5313_v57 = vpop.f32.mrb[39].mxu1 }
0x2c35   : > { %v14419_v60 = vpop.f32.mrb[40].mxu1 }
0x2c36   : > { %v5404_v61 = vpop.f32.mrb[41].mxu1  ;;  %v5416_v3 = vsel %vm1440_vm4, %v14419_v60, -inf }
0x2c37   : > { %5417 = vmax.xlane.f32.xlu0 %v5416_v3  ;;  %v5413_v19 = vsel %vm1440_vm4, %v5404_v61, -inf }
0x2c38   : > { %5414 = vmax.xlane.f32.xlu1 %v5413_v19 }
0x2cc4   : > { %v5418_v4 = vpop.xlane.xlu0 %5417 }
0x2cc5   : > { %v5420_v20 = vsub.f32 %v14419_v60, %v5418_v4  ;;  %v5415_v29 = vpop.xlane.xlu1 %5414  ;;  %v13288_v4 = vld [vmem:[%s18880_s29 + $0x1] ss:$0 sm:$0xff] }
0x2cc6   : > { %v5419_v28 = vsub.f32 %v5404_v61, %v5415_v29 }
0x2cc7   : > { %v5423_v5 = vmul.f32 1.442695, %v5420_v20 }
0x2cc8   : > { %v5421_v6 = vmul.f32 1.442695, %v5419_v28 }
0x2cc9   : > { %16455 = vpow2.f32 %v5423_v5 }
0x2cca   : > { %16457 = vpow2.f32 %v5421_v6 }
0x2cd3   : > { %v16456_v9 = vpop.eup %16455 }
0x2cd4   : > { %v16458_v14 = vpop.eup %16457  ;;  %v5428_v15 = vsel %vm1440_vm4, %v16456_v9, 0.0 }
0x2cd5   : > { %5429 = vadd.xlane.f32.xlu1 %v5428_v15  ;;  %v5425_v16 = vsel %vm1440_vm4, %v16458_v14, 0.0 }
0x2cd6   : > { %5426 = vadd.xlane.f32.xlu0 %v5425_v16 }
0x2ce6   : > { %5524 = vrot.lane.b32.xlu1 %v17452_v8, %s18931_s10 }
0x2cea   : > { %5526 = vrot.lane.b32.xlu1 %v17450_v7, %s18931_s10  ;;  %s18936_s10 = smov 20  }
0x2cec   : > { %16027 = vrot.lane.b32.xlu0 %v17390_v0, %s18932_s13 }
0x2cee   : > { %5534 = vrot.lane.b32.xlu1 %v17474_v42, %s18933_s20 }
0x2cf0   : > { %5532 = vrot.lane.b32.xlu0 %v17476_v43, %s18933_s20 }
0x2cf2   : > { %5542 = vrot.lane.b32.xlu1 %v17498_v24, %s18934_s27 }
0x2cf4   : > { %5540 = vrot.lane.b32.xlu0 %v17500_v26, %s18934_s27 }
0x2cf6   : > { %5550 = vrot.lane.b32.xlu1 %v17522_v58, %s18935_s0 }
0x2cf8   : > { %5548 = vrot.lane.b32.xlu0 %v17524_v59, %s18935_s0 }
0x2cfa   : > { %5558 = vrot.lane.b32.xlu1 %v17546_v12, %s18936_s10 }
0x2cfc   : > { %5556 = vrot.lane.b32.xlu0 %v17548_v41, %s18936_s10  ;;  %v13228_v41 = vld [vmem:[%s18888_s25 + $0x28] sm:$0xff] }
0x2cfe   : > { %5566 = vrot.lane.b32.xlu1 %v17570_v17, %s18932_s13  ;;  %v13229_v17 = vld [vmem:[%s18888_s25 + $0x30] sm:$0xff] }
0x2cff   : > { %v15343_v22 = vpack.c.bf16 %v13229_v17, %v13228_v41  ;;  %v13299_v17 = vld [vmem:[%s18887_s14 + $0x40] sm:$0xff] }
0x2d00   : > { %5564 = vrot.lane.b32.xlu0 %v17572_v21, %s18932_s13  ;;  %v13230_v21 = vld [vmem:[%s18888_s25 + $0x38] sm:$0xff] }
0x2d01   : > { %v15347_v27 = vpack.c.bf16 %v13231_v23, %v13230_v21  ;;  %v13306_v23 = vld [vmem:[%s18881_s24 + $0x40] sm:$0xff] }
0x2d02   : > { %5574 = vrot.lane.b32.xlu1 %v14412_v52, %s18906_s23 }
0x2d04   : > { %5572 = vrot.lane.b32.xlu0 %v5313_v57, %s18906_s23 }
0x2d62   : > { %v5430_v0 = vpop.xlane.xlu1 %5429 }
0x2d63   : > { %16459 = vrcp.f32 %v5430_v0  ;;  %v5427_v7 = vpop.xlane.xlu0 %5426 }
0x2d64   : > { %16461 = vrcp.f32 %v5427_v7 }
0x2d66   : > { %v5525_v35 = vpop.permute.xlu1 %5524 }
0x2d67   : > { %v16028_v8 = vpop.permute.xlu0 %16027  ;;  %v5586_v38 = vsel %vm1354_vm2, %v17428_v13, %v5525_v35 }
0x2d68   : > { %v16030_v42 = vunpack.i.h.bf16 %v16028_v8  ;;  %v16029_v43 = vunpack.i.l.bf16 %v16028_v8 }
0x2d6a   : > { %v15339_v24 = vpack.c.bf16 %v16030_v42, %v16029_v43  ;;  %v5527_v18 = vpop.permute.xlu1 %5526 }
0x2d6b   : > { %v5533_v31 = vpop.permute.xlu0 %5532  ;;  %v5587_v39 = vsel %vm1354_vm2, %v17426_v10, %v5527_v18  ;;  %v13310_v18 = vld [vmem:[%s18881_s24 + $0x60] sm:$0xff] }
0x2d6c   : > { %15340 = vmatprep.subr.bf16.mxu0 %v15339_v24  ;;  %v5588_v44 = vsel %vm3216_vm5, %v5586_v38, %v5533_v31 }
0x2d6d   : > { %v16460_v26 = vpop.eup %16459  ;;  %15342 = vmatpush3.bf16.msra.mxu0 %v15339_v24 }
0x2d6e   : > { %v16462_v58 = vpop.eup %16461  ;;  %v5434_v12 = vmul.f32 %v16460_v26, %v16456_v9  ;;  %15344 = vmatprep.subr.bf16.mxu0 %v15343_v22  ;;  %v5535_v30 = vpop.permute.xlu1 %5534 }
0x2d6f   : > { %v5433_v59 = vmul.f32 %v16462_v58, %v16458_v14  ;;  %v5541_v63 = vpop.permute.xlu0 %5540  ;;  %v5589_v46 = vsel %vm3216_vm5, %v5587_v39, %v5535_v30  ;;  %v13296_v58 = vld [vmem:[%s18887_s14 + $0x28] sm:$0xff]  ;;  %v13295_v39 = vld [vmem:[%s18885_s8 + $0x1] ss:$0 sm:$0xff] }
0x2d70   : > { %v5590_v47 = vsel %vm3219_vm6, %v5588_v44, %v5541_v63  ;;  %v13311_v30 = vld [vmem:[%s18881_s24 + $0x68] sm:$0xff] }
0x2d71   : > { %14424 = vmatprep.mubr.msk.f32.mxu0 %vm1440_vm4, %v5433_v59  ;;  %v13297_v59 = vld [vmem:[%s18887_s14 + $0x30] sm:$0xff]  ;;  %v15367_v31 = vpack.c.bf16 %v13311_v30, %v13310_v18 }
0x2d72   : > { %14425 = vmatmul.mubr.msk.f32.vlgmr.msra.gmra.mrb[38].mxu0 %vm1440_vm4, %v5434_v12  ;;  %v5543_v62 = vpop.permute.xlu1 %5542  ;;  %v13298_v12 = vld [vmem:[%s18887_s14 + $0x38] sm:$0xff]  ;;  %v15351_v41 = vpack.c.bf16 %v13297_v59, %v13296_v58  ;;  %v13324_v58 = vld [vmem:[%s18890_s17 + $0x60] sm:$0xff] }
0x2d73   : > { %15346 = vmatpush3.bf16.msra.mxu0 %v15343_v22  ;;  %v5549_v11 = vpop.permute.xlu0 %5548  ;;  %v5591_v48 = vsel %vm3219_vm6, %v5589_v46, %v5543_v62  ;;  %v15355_v21 = vpack.c.bf16 %v13299_v17, %v13298_v12  ;;  %v13300_v22 = vld [vmem:[%s18887_s14 + $0x48] sm:$0xf]  ;;  %v13326_v17 = vld [vmem:[%s18890_s17 + $0x70] sm:$0xf] }
0x2d74   : > { %15348 = vmatprep.subr.bf16.mxu0 %v15347_v27  ;;  %v5592_v2 = vsel %vm1440_vm4, %v5590_v47, %v5549_v11  ;;  %15352 = vmatprep.subr.bf16.mxu1 %v15351_v41  ;;  %v13325_v12 = vld [vmem:[%s18890_s17 + $0x68] sm:$0xff] }
0x2d75   : > { %15354 = vmatpush3.bf16.msra.mxu1 %v15351_v41  ;;  %v15379_v41 = vpack.c.bf16 %v13325_v12, %v13324_v58 }
0x2d76   : > { %v5551_v40 = vpop.permute.xlu1 %5550  ;;  %15356 = vmatprep.subr.bf16.mxu1 %v15355_v21 }
0x2d77   : > { %15350 = vmatpush3.bf16.msra.mxu0 %v15347_v27  ;;  %v5557_v55 = vpop.permute.xlu0 %5556  ;;  %v5593_v49 = vsel %vm1440_vm4, %v5591_v48, %v5551_v40  ;;  %v13307_v27 = vld [vmem:[%s18881_s24 + $0x48] sm:$0xff] }
0x2d78   : > { %14435 = vmatprep.subr.msk.mxu0 %vm1261_vm0, %v13232_v32  ;;  %v5594_v13 = vsel %vm3224_vm7, %v5592_v2, %v5557_v55  ;;  %v13312_v2 = vld [vmem:[%s18881_s24 + $0x70] sm:$0xff] }
0x2d79   : > { %15358 = vmatpush3.bf16.msra.mxu1 %v15355_v21 }
0x2d7a   : > { %v5559_v54 = vpop.permute.xlu1 %5558  ;;  %14448 = vmatprep.subr.msk.mxu1 %vm1261_vm0, %v13300_v22 }
0x2d7b   : > { %14436 = vmatpush3.msk.msra.mxu0 %vm1261_vm0, %v13232_v32  ;;  %v5565_v37 = vpop.permute.xlu0 %5564  ;;  %v5595_v50 = vsel %vm3224_vm7, %v5593_v49, %v5559_v54  ;;  %v13308_v32 = vld [vmem:[%s18881_s24 + $0x50] sm:$0xff]  ;;  %v13313_v49 = vld [vmem:[%s18881_s24 + $0x78] sm:$0xff] }
0x2d7c   : > { %v5596_v10 = vsel %vm3227_vm8, %v5594_v13, %v5565_v37  ;;  %v13294_v37 = vld [vmem:[%s18886_s3 + $0x1] ss:$0 sm:$0xff]  ;;  %v15371_v13 = vpack.c.bf16 %v13313_v49, %v13312_v2 }
0x2d7d   : > { %14449 = vmatpush3.msk.msra.mxu1 %vm1261_vm0, %v13300_v22 }
0x2d7e   : > { %v5567_v36 = vpop.permute.xlu1 %5566 }
0x2d7f   : > { %v5573_v1 = vpop.permute.xlu0 %5572  ;;  %v5597_v52 = vsel %vm3227_vm8, %v5595_v50, %v5567_v36  ;;  %v13302_v50 = vld [vmem:[%s18882_s19 + $0x1] ss:$0 sm:$0xff] }
0x2d80   : > { %v5598_v57 = vsel %vm3230_vm9, %v5596_v10, %v5573_v1 }
0x2d82   : > { %v5575_v45 = vpop.permute.xlu1 %5574 }
0x2d83   : > { %v5599_v61 = vsel %vm3230_vm9, %v5597_v52, %v5575_v45 }
0x2e45   : > { %v14426_v33 = vpop.f32.mrb[38].mxu0 }
0x2e46   : > { %5582 = vrot.lane.b32.xlu1 %v14426_v33, %s18907_s22  ;;  %v5513_v34 = vpop.f32.mrb[39].mxu0  ;;  %v15359_v33 = vpack.c.bf16 %v13307_v27, %v13306_v23 }
0x2e47   : > { %5580 = vrot.lane.b32.xlu0 %v5513_v34, %s18907_s22  ;;  %v13309_v34 = vld [vmem:[%s18881_s24 + $0x58] sm:$0xff] }
0x2e48   : > { %v15363_v35 = vpack.c.bf16 %v13309_v34, %v13308_v32  ;;  %15360 = vmatprep.subr.bf16.mxu0 %v15359_v33 }
0x2eb8   : > { %v5583_v51 = vpop.permute.xlu1 %5582 }
0x2eb9   : > { %v5581_v60 = vpop.permute.xlu0 %5580  ;;  %v5601_v19 = vsel %vm3233_vm10, %v5599_v61, %v5583_v51 }
0x2eba   : > { %v5600_v3 = vsel %vm3233_vm10, %v5598_v57, %v5581_v60 }
0x2ebb   : > { %14437 = vmatprep.mubr.msk.f32.mxu0 %vm1254_vm1, %v5600_v3  ;;  %v13315_v3 = vld [vmem:[%s18879_s30 + $0x1] ss:$0 sm:$0xff] }
0x2ebc   : > { %14438 = vmatmul.mubr.msk.f32.vlgmr.msra.gmra.mrb[40].mxu0 %vm1254_vm1, %v5601_v19 }
0x2ebd   : > { %15362 = vmatpush3.bf16.msra.mxu0 %v15359_v33 }
0x2ebe   : > { %15364 = vmatprep.subr.bf16.mxu0 %v15363_v35 }
0x2ec1   : > { %15366 = vmatpush3.bf16.msra.mxu0 %v15363_v35  ;;  %v13320_v35 = vld [vmem:[%s18884_s6 + $0x1] ss:$0 sm:$0xff] }
0x2ec2   : > { %15368 = vmatprep.subr.bf16.mxu0 %v15367_v31 }
0x2ec5   : > { %15370 = vmatpush3.bf16.msra.mxu0 %v15367_v31 }
0x2ec6   : > { %15372 = vmatprep.subr.bf16.mxu0 %v15371_v13 }
0x2ec9   : > { %15374 = vmatpush3.bf16.msra.mxu0 %v15371_v13 }
0x2f8f   : > { %v14439_v20 = vpop.f32.mrb[40].mxu0 }
0x2f90   : > { %v5689_v29 = vadd.f32 %v14439_v20, %v13288_v4  ;;  %v5683_v28 = vpop.f32.mrb[41].mxu0 }
0x2f91   : > { %v5684_v5 = vadd.f32 %v13288_v4, %v5683_v28 }
0x2f92   : > { %v5693_v6 = vadd.f32 %v5689_v29, %v17383_v56 }
0x2f93   : > { %v5692_v9 = vadd.f32 %v5684_v5, %v17381_v53 }
0x2f94   : > { %v5701_v14 = vsel %vm1254_vm1, %v5693_v6, 0.0 }
0x2f95   : > { %5702 = vadd.xlane.f32.xlu1 %v5701_v14  ;;  %v5698_v15 = vsel %vm1254_vm1, %v5692_v9, 0.0 }
0x2f96   : > { %5699 = vadd.xlane.f32.xlu0 %v5698_v15 }
0x3022   : > { %v5703_v16 = vpop.xlane.xlu1 %5702 }
0x3023   : > { %v5705_v0 = vmul.f32 0.027777778, %v5703_v16  ;;  %v5700_v7 = vpop.xlane.xlu0 %5699 }
0x3024   : > { %v5704_v8 = vmul.f32 0.027777778, %v5700_v7 }
0x3025   : > { %v5707_v42 = vsub.f32 %v5693_v6, %v5705_v0 }
0x3026   : > { %v5706_v43 = vsub.f32 %v5692_v9, %v5704_v8 }
0x3027   : > { %v5709_v56 = vmul.f32 %v5707_v42, %v5707_v42 }
0x3028   : > { %v5708_v24 = vmul.f32 %v5706_v43, %v5706_v43 }
0x3029   : > { %v5713_v26 = vsel %vm1254_vm1, %v5709_v56, 0.0  ;;  %v13322_v56 = vld [vmem:[%s18890_s17 + $0x50] sm:$0xff] }
0x302a   : > { %v5710_v53 = vsel %vm1254_vm1, %v5708_v24, 0.0 }
0x302b   : > { %5711 = vadd.xlane.f32.xlu0 %v5710_v53 }
0x302f   : > { %5714 = vadd.xlane.f32.xlu0 %v5713_v26  ;;  %v13323_v26 = vld [vmem:[%s18890_s17 + $0x58] sm:$0xff]  ;;  %s18940_s17 = smov 40  }
0x3030   : > { %v15375_v59 = vpack.c.bf16 %v13323_v26, %v13322_v56 }
0x3032   : > { %15376 = vmatprep.subr.bf16.mxu1 %v15375_v59 }
0x30b8   : > { %v5712_v62 = vpop.xlane.xlu0 %5711 }
0x30b9   : > { %v5716_v63 = vmul.f32 0.027777778, %v5712_v62  ;;  %v13321_v62 = vld [vmem:[%s18883_s12 + $0x1] ss:$0 sm:$0xff] }
0x30bb   : > { %v5718_v40 = vadd.f32 1e-05, %v5716_v63 }
0x30bc   : > { %v5715_v11 = vpop.xlane.xlu0 %5714 }
0x30bd   : > { %16463 = vrsqrt.f32 %v5718_v40  ;;  %v5717_v54 = vmul.f32 0.027777778, %v5715_v11 }
0x30bf   : > { %v5719_v55 = vadd.f32 1e-05, %v5717_v54 }
0x30c1   : > { %16465 = vrsqrt.f32 %v5719_v55  ;;  %v13328_v55 = vld [vmem:[%s18889_s21 + $0x2] ss:$0 sm:$0xff]  ;;  %s18942_s21 = smov 104  }
0x30c7   : > { %v16464_v36 = vpop.eup %16463 }
0x30c8   : > { %v5722_v38 = vmul.f32 %v16464_v36, %v5706_v43 }
0x30ca   : > { %v5730_v44 = vmul.f32 %v13294_v37, %v5722_v38 }
0x30cb   : > { %v16466_v45 = vpop.eup %16465 }
0x30cc   : > { %v5723_v46 = vmul.f32 %v16466_v45, %v5707_v42  ;;  %v5738_v47 = vadd.f32 %v13295_v39, %v5730_v44 }
0x30ce   : > { %v5731_v1 = vmul.f32 %v13294_v37, %v5723_v46  ;;  %14450 = vmatprep.mubr.msk.f32.mxu1 %vm1254_vm1, %v5738_v47 }
0x30d0   : > { %v5739_v48 = vadd.f32 %v13295_v39, %v5731_v1 }
0x30d2   : > { %14451 = vmatmul.mubr.msk.f32.vlgmr.msra.gmra.mrb[42].mxu1 %vm1254_vm1, %v5739_v48 }
0x30d3   : > { %15378 = vmatpush3.bf16.msra.mxu1 %v15375_v59 }
0x30d4   : > { %15380 = vmatprep.subr.bf16.mxu1 %v15379_v41 }
0x30d7   : > { %15382 = vmatpush3.bf16.msra.mxu1 %v15379_v41 }
0x30d8   : > { %14480 = vmatprep.subr.msk.mxu1 %vm1261_vm0, %v13326_v17 }
0x30db   : > { %14481 = vmatpush3.msk.msra.mxu1 %vm1261_vm0, %v13326_v17 }
0x31a5   : > { %v14452_v10 = vpop.f32.mrb[42].mxu1 }
0x31a6   : > { %v5835_v51 = vadd.f32 %v14452_v10, %v13302_v50  ;;  %v5829_v52 = vpop.f32.mrb[43].mxu1 }
0x31a7   : > { %v5830_v57 = vadd.f32 %v13302_v50, %v5829_v52 }
0x31a8   : > { %v5839_v61 = vmax.f32 %v5835_v51, 0.0 }
0x31a9   : > { %v5838_v60 = vmax.f32 %v5830_v57, 0.0 }
0x31ab   : > { %14469 = vmatprep.mubr.msk.f32.mxu0 %vm3486_vm11, %v5838_v60 }
0x31ac   : > { %14470 = vmatmul.mubr.msk.f32.vlgmr.msra.gmra.mrb[42].mxu0 %vm3486_vm11, %v5839_v61 }
0x327f   : > { %v14471_v19 = vpop.f32.mrb[42].mxu0 }
0x3280   : > { %v5935_v4 = vadd.f32 %v14471_v19, %v13315_v3  ;;  %v5929_v20 = vpop.f32.mrb[43].mxu0 }
0x3281   : > { %v5930_v29 = vadd.f32 %v13315_v3, %v5929_v20 }
0x3282   : > { %v5939_v28 = vadd.f32 %v5935_v4, %v5739_v48 }
0x3283   : > { %v5938_v5 = vadd.f32 %v5930_v29, %v5738_v47 }
0x3284   : > { %v5947_v6 = vsel %vm1254_vm1, %v5939_v28, 0.0 }
0x3285   : > { %5948 = vadd.xlane.f32.xlu0 %v5947_v6  ;;  %v5944_v9 = vsel %vm1254_vm1, %v5938_v5, 0.0 }
0x3286   : > { %5945 = vadd.xlane.f32.xlu1 %v5944_v9 }
0x3312   : > { %v5949_v14 = vpop.xlane.xlu0 %5948 }
0x3313   : > { %v5951_v15 = vmul.f32 0.027777778, %v5949_v14  ;;  %v5946_v16 = vpop.xlane.xlu1 %5945 }
0x3314   : > { %v5950_v0 = vmul.f32 0.027777778, %v5946_v16 }
0x3315   : > { %v5953_v7 = vsub.f32 %v5939_v28, %v5951_v15 }
0x3316   : > { %v5952_v8 = vsub.f32 %v5938_v5, %v5950_v0 }
0x3317   : > { %v5955_v42 = vmul.f32 %v5953_v7, %v5953_v7 }
0x3318   : > { %v5954_v43 = vmul.f32 %v5952_v8, %v5952_v8 }
0x3319   : > { %v5959_v24 = vsel %vm1254_vm1, %v5955_v42, 0.0 }
0x331a   : > { %5960 = vadd.xlane.f32.xlu0 %v5959_v24  ;;  %v5956_v53 = vsel %vm1254_vm1, %v5954_v43, 0.0 }
0x331b   : > { %5957 = vadd.xlane.f32.xlu1 %v5956_v53 }
0x33a7   : > { %v5961_v21 = vpop.xlane.xlu0 %5960 }
0x33a8   : > { %v5963_v22 = vmul.f32 0.027777778, %v5961_v21  ;;  %v5958_v23 = vpop.xlane.xlu1 %5957 }
0x33a9   : > { %v5962_v27 = vmul.f32 0.027777778, %v5958_v23 }
0x33aa   : > { %v5965_v32 = vadd.f32 1e-05, %v5963_v22 }
0x33ab   : > { %v5964_v33 = vadd.f32 1e-05, %v5962_v27 }
0x33ac   : > { %16467 = vrsqrt.f32 %v5965_v32 }
0x33ad   : > { %16469 = vrsqrt.f32 %v5964_v33 }
0x33b6   : > { %v16468_v34 = vpop.eup %16467 }
0x33b7   : > { %v16470_v18 = vpop.eup %16469  ;;  %v5969_v30 = vmul.f32 %v16468_v34, %v5953_v7 }
0x33b8   : > { %v5968_v31 = vmul.f32 %v16470_v18, %v5952_v8 }
0x33b9   : > { %v5977_v63 = vmul.f32 %v13320_v35, %v5969_v30 }
0x33ba   : > { %v5976_v40 = vmul.f32 %v13320_v35, %v5968_v31 }
0x33bb   : > { %v17702_v54 = vadd.f32 %v13321_v62, %v5977_v63 }
0x33bc   : > { %v17700_v11 = vadd.f32 %v13321_v62, %v5976_v40 }
0x33be   : > { %14482 = vmatprep.mubr.msk.f32.mxu1 %vm1254_vm1, %v17700_v11 }
0x33bf   : > { %14483 = vmatmul.mubr.msk.f32.vlgmr.msra.gmra.mrb[44].mxu1 %vm1254_vm1, %v17702_v54 }
0x3492   : > { %v14484_v36 = vpop.f32.mrb[44].mxu1 }
0x3493   : > { %v6081_v37 = vadd.f32 %v14484_v36, %v13328_v55  ;;  %v6075_v38 = vpop.f32.mrb[45].mxu1 }
0x3494   : > { %v6076_v39 = vadd.f32 %v13328_v55, %v6075_v38 }
0x3495   : > { %v17721_v46 = vmul.f32 0.5, %v6081_v37 }
0x3496   : > { %v17709_v44 = vpack.i.bf16 %v6081_v37, %v6076_v39  ;;  %v17711_v45 = vmul.f32 0.5, %v6076_v39 }
0x3498   : > { %16037 = vrot.lane.b32.xlu0 %v17709_v44, %s18911_s9  ;;  %16032 = vrot.lane.b32.xlu1 %v17709_v44, %s18908_s5 }
0x3499   : > { %14489 = vmatprep.mubr.msk.f32.mxu1 %vm1354_vm2, %v17711_v45 }
0x349c   : > { %6294 = vrot.lane.b32.xlu1 %v17711_v45, %s18910_s2 }
0x34a0   : > { %6296 = vrot.lane.b32.xlu1 %v17721_v46, %s18910_s2 }
0x350a   : > { %v16038_v47 = vpop.permute.xlu0 %16037  ;;  %v16033_v1 = vpop.permute.xlu1 %16032 }
0x350b   : > { %v16040_v48 = vunpack.i.h.bf16 %v16038_v47  ;;  %v16039_v2 = vunpack.i.l.bf16 %v16038_v47  ;;  %v16035_v49 = vunpack.i.h.bf16 %v16033_v1  ;;  %v16034_v13 = vunpack.i.l.bf16 %v16033_v1 }
0x350d   : > { %v15383_v50 = vpack.c.bf16 %v16035_v49, %v16034_v13  ;;  %v15393_v10 = vpack.c.bf16 %v16040_v48, %v16039_v2 }
0x350e   : > { %v6295_v51 = vpop.permute.xlu1 %6294 }
0x350f   : > { %15385 = vmatprep.subr.msk.bf16.mxu1 %vm17084_vm3, %v15383_v50 }
0x3510   : > { %15388 = vmatpush3.bf16.xpose.msk.msra.mxu1 %vm17084_vm3, %v15383_v50 }
0x3511   : > { %15395 = vmatprep.subr.msk.bf16.mxu1 %vm17084_vm3, %v15393_v10 }
0x3512   : > { %v6297_v52 = vpop.permute.xlu1 %6296 }
0x3517   : > { %14490 = vmatmul.mubr.msk.f32.vlgmr.msra.gmra.mrb[46].mxu1 %vm1354_vm2, %v17721_v46 }
0x3518   : > { %15398 = vmatpush3.bf16.xpose.msk.msra.mxu1 %vm17084_vm3, %v15393_v10  ;;  %14503 = vmatprep.mubr.msk.f32.mxu1 %vm1354_vm2, %v6295_v51 }
0x351f   : > { %14504 = vmatmul.mubr.msk.f32.vlgmr.msra.gmra.mrb[48].mxu1 %vm1354_vm2, %v6297_v52 }
0x35ea   : > { %v14491_v57 = vpop.f32.mrb[46].mxu1 }
0x35eb   : > { %v6176_v60 = vpop.f32.mrb[47].mxu1  ;;  %v6188_v61 = vsel %vm1440_vm4, %v14491_v57, -inf }
0x35ec   : > { %6189 = vmax.xlane.f32.xlu1 %v6188_v61  ;;  %v6185_v3 = vsel %vm1440_vm4, %v6176_v60, -inf }
0x35ed   : > { %6186 = vmax.xlane.f32.xlu0 %v6185_v3 }
0x35f2   : > { %v14505_v19 = vpop.f32.mrb[48].mxu1 }
0x35f3   : > { %v6376_v4 = vpop.f32.mrb[49].mxu1  ;;  %v6388_v29 = vsel %vm1440_vm4, %v14505_v19, -inf }
0x35f4   : > { %v6385_v20 = vsel %vm1440_vm4, %v6376_v4, -inf }
0x35f5   : > { %6386 = vmax.xlane.f32.xlu0 %v6385_v20 }
0x35f9   : > { %6389 = vmax.xlane.f32.xlu0 %v6388_v29 }
0x35fd   : > { %16042 = vrot.lane.b32.xlu1 %v17709_v44, %s18909_s16 }
0x3679   : > { %v6190_v28 = vpop.xlane.xlu1 %6189 }
0x367a   : > { %v6192_v5 = vsub.f32 %v14491_v57, %v6190_v28  ;;  %v6187_v6 = vpop.xlane.xlu0 %6186 }
0x367b   : > { %v6191_v9 = vsub.f32 %v6176_v60, %v6187_v6 }
0x367c   : > { %v6195_v14 = vmul.f32 1.442695, %v6192_v5 }
0x367d   : > { %v6193_v15 = vmul.f32 1.442695, %v6191_v9  ;;  %v16043_v16 = vpop.permute.xlu1 %16042 }
0x367e   : > { %16471 = vpow2.f32 %v6195_v14  ;;  %v16045_v0 = vunpack.i.h.bf16 %v16043_v16  ;;  %v16044_v7 = vunpack.i.l.bf16 %v16043_v16 }
0x367f   : > { %16473 = vpow2.f32 %v6193_v15 }
0x3680   : > { %v15389_v8 = vpack.c.bf16 %v16045_v0, %v16044_v7 }
0x3682   : > { %15390 = vmatprep.subr.bf16.mxu0 %v15389_v8  ;;  %v6387_v42 = vpop.xlane.xlu0 %6386 }
0x3683   : > { %15392 = vmatpush3.bf16.msra.mxu0 %v15389_v8  ;;  %v6391_v17 = vsub.f32 %v6376_v4, %v6387_v42 }
0x3685   : > { %v6393_v21 = vmul.f32 1.442695, %v6391_v17 }
0x3686   : > { %v6390_v43 = vpop.xlane.xlu0 %6389 }
0x3687   : > { %v6392_v24 = vsub.f32 %v14505_v19, %v6390_v43 }
0x3688   : > { %v16472_v53 = vpop.eup %16471 }
0x3689   : > { %v16474_v56 = vpop.eup %16473  ;;  %v6395_v26 = vmul.f32 1.442695, %v6392_v24  ;;  %v6200_v58 = vsel %vm1440_vm4, %v16472_v53, 0.0 }
0x368a   : > { %6201 = vadd.xlane.f32.xlu0 %v6200_v58  ;;  %v6197_v59 = vsel %vm1440_vm4, %v16474_v56, 0.0 }
0x368b   : > { %16475 = vpow2.f32 %v6395_v26  ;;  %6198 = vadd.xlane.f32.xlu1 %v6197_v59 }
0x368c   : > { %16477 = vpow2.f32 %v6393_v21 }
0x3695   : > { %v16476_v12 = vpop.eup %16475 }
0x3696   : > { %v6400_v41 = vsel %vm1440_vm4, %v16476_v12, 0.0  ;;  %v16478_v22 = vpop.eup %16477 }
0x3697   : > { %6401 = vadd.xlane.f32.xlu0 %v6400_v41  ;;  %v6397_v23 = vsel %vm1440_vm4, %v16478_v22, 0.0 }
0x369c   : > { %16052 = vrot.lane.b32.xlu1 %v17709_v44, %s18912_s26 }
0x36ad   : > { %16047 = vrot.lane.b32.xlu0 %v17709_v44, %s18913_s11  ;;  %s18937_s11 = smov 44  }
0x36b1   : > { %6496 = vrot.lane.b32.xlu0 %v17721_v46, %s18914_s18 }
0x36c0   : > { %6398 = vadd.xlane.f32.xlu1 %v6397_v23 }
0x36d1   : > { %6494 = vrot.lane.b32.xlu1 %v17711_v45, %s18914_s18 }
0x3717   : > { %v6202_v27 = vpop.xlane.xlu0 %6201 }
0x3718   : > { %16479 = vrcp.f32 %v6202_v27  ;;  %v6199_v32 = vpop.xlane.xlu1 %6198 }
0x3719   : > { %16481 = vrcp.f32 %v6199_v32 }
0x371c   : > { %v16053_v31 = vpop.permute.xlu1 %16052 }
0x371d   : > { %v16055_v63 = vunpack.i.h.bf16 %v16053_v31  ;;  %v16054_v40 = vunpack.i.l.bf16 %v16053_v31 }
0x371f   : > { %v15403_v38 = vpack.c.bf16 %v16055_v63, %v16054_v40 }
0x3722   : > { %v16480_v33 = vpop.eup %16479 }
0x3723   : > { %v16482_v34 = vpop.eup %16481  ;;  %v6206_v30 = vmul.f32 %v16480_v33, %v16472_v53 }
0x3724   : > { %v6402_v35 = vpop.xlane.xlu0 %6401  ;;  %v6205_v18 = vmul.f32 %v16482_v34, %v16474_v56 }
0x3725   : > { %16483 = vrcp.f32 %v6402_v35 }
0x3726   : > { %14496 = vmatprep.mubr.msk.f32.mxu0 %vm1440_vm4, %v6205_v18 }
0x3727   : > { %14497 = vmatmul.mubr.msk.f32.vlgmr.msra.gmra.mrb[44].mxu0 %vm1440_vm4, %v6206_v30 }
0x3728   : > { %v16048_v62 = vpop.permute.xlu0 %16047 }
0x3729   : > { %v16050_v55 = vunpack.i.h.bf16 %v16048_v62  ;;  %v16049_v36 = vunpack.i.l.bf16 %v16048_v62 }
0x372b   : > { %v15399_v37 = vpack.c.bf16 %v16050_v55, %v16049_v36 }
0x372c   : > { %v6497_v13 = vpop.permute.xlu0 %6496 }
0x372d   : > { %15400 = vmatprep.subr.bf16.mxu0 %v15399_v37 }
0x372e   : > { %15402 = vmatpush3.bf16.msra.mxu0 %v15399_v37 }
0x372f   : > { %15405 = vmatprep.subr.msk.bf16.mxu0 %vm17084_vm3, %v15403_v38  ;;  %v16484_v47 = vpop.eup %16483 }
0x3730   : > { %v6406_v2 = vmul.f32 %v16484_v47, %v16476_v12 }
0x374d   : > { %v6399_v39 = vpop.xlane.xlu1 %6398 }
0x374e   : > { %16485 = vrcp.f32 %v6399_v39 }
0x3751   : > { %v6495_v49 = vpop.permute.xlu1 %6494 }
0x3758   : > { %v16486_v1 = vpop.eup %16485 }
0x3759   : > { %v6405_v48 = vmul.f32 %v16486_v1, %v16478_v22 }
0x375b   : > { %14510 = vmatprep.mubr.msk.f32.mxu0 %vm1440_vm4, %v6405_v48 }
0x375c   : > { %14511 = vmatmul.mubr.msk.f32.vlgmr.msra.gmra.mrb[46].mxu0 %vm1440_vm4, %v6406_v2 }
0x375d   : > { %15408 = vmatpush3.bf16.xpose.msk.msra.mxu0 %vm17084_vm3, %v15403_v38  ;;  %14517 = vmatprep.mubr.msk.f32.mxu0 %vm1354_vm2, %v6495_v49 }
0x3764   : > { %14518 = vmatmul.mubr.msk.f32.vlgmr.msra.gmra.mrb[48].mxu0 %vm1354_vm2, %v6497_v13 }
0x37fa   : > { %v17765_v50 = vpop.f32.mrb[44].mxu0 }
0x37fb   : > { %v17767_v10 = vpop.f32.mrb[45].mxu0 }
0x382f   : > { %v17769_v51 = vpop.f32.mrb[46].mxu0 }
0x3830   : > { %v17771_v52 = vpop.f32.mrb[47].mxu0 }
0x3837   : > { %v14519_v57 = vpop.f32.mrb[48].mxu0 }
0x3838   : > { %v6576_v60 = vpop.f32.mrb[49].mxu0  ;;  %v6588_v61 = vsel %vm1440_vm4, %v14519_v57, -inf }
0x3839   : > { %6589 = vmax.xlane.f32.xlu0 %v6588_v61  ;;  %v6585_v3 = vsel %vm1440_vm4, %v6576_v60, -inf }
0x383a   : > { %6586 = vmax.xlane.f32.xlu1 %v6585_v3 }
0x38c6   : > { %v6590_v19 = vpop.xlane.xlu0 %6589 }
0x38c7   : > { %v6592_v4 = vsub.f32 %v14519_v57, %v6590_v19  ;;  %v6587_v20 = vpop.xlane.xlu1 %6586 }
0x38c8   : > { %v6591_v29 = vsub.f32 %v6576_v60, %v6587_v20 }
0x38c9   : > { %v6595_v28 = vmul.f32 1.442695, %v6592_v4 }
0x38ca   : > { %v6593_v5 = vmul.f32 1.442695, %v6591_v29 }
0x38cb   : > { %16487 = vpow2.f32 %v6595_v28 }
0x38cc   : > { %16489 = vpow2.f32 %v6593_v5 }
0x38d5   : > { %v16488_v6 = vpop.eup %16487 }
0x38d6   : > { %v16490_v9 = vpop.eup %16489  ;;  %v6600_v14 = vsel %vm1440_vm4, %v16488_v6, 0.0 }
0x38d7   : > { %6601 = vadd.xlane.f32.xlu1 %v6600_v14  ;;  %v6597_v15 = vsel %vm1440_vm4, %v16490_v9, 0.0 }
0x38d8   : > { %6598 = vadd.xlane.f32.xlu0 %v6597_v15 }
0x38e8   : > { %16062 = vrot.lane.b32.xlu1 %v17709_v44, %s18915_s1 }
0x38ec   : > { %6694 = vrot.lane.b32.xlu1 %v17711_v45, %s18916_s7 }
0x38ee   : > { %16057 = vrot.lane.b32.xlu0 %v17709_v44, %s18917_s15  ;;  %s18938_s15 = smov 72  }
0x38f2   : > { %6696 = vrot.lane.b32.xlu0 %v17721_v46, %s18916_s7 }
0x3964   : > { %v6602_v16 = vpop.xlane.xlu1 %6601 }
0x3965   : > { %16491 = vrcp.f32 %v6602_v16  ;;  %v6599_v0 = vpop.xlane.xlu0 %6598 }
0x3966   : > { %16493 = vrcp.f32 %v6599_v0 }
0x3968   : > { %v16063_v7 = vpop.permute.xlu1 %16062 }
0x3969   : > { %v16058_v8 = vpop.permute.xlu0 %16057  ;;  %v16065_v42 = vunpack.i.h.bf16 %v16063_v7  ;;  %v16064_v43 = vunpack.i.l.bf16 %v16063_v7 }
0x396a   : > { %v16060_v24 = vunpack.i.h.bf16 %v16058_v8  ;;  %v16059_v53 = vunpack.i.l.bf16 %v16058_v8 }
0x396b   : > { %v15413_v26 = vpack.c.bf16 %v16065_v42, %v16064_v43 }
0x396c   : > { %v15409_v56 = vpack.c.bf16 %v16060_v24, %v16059_v53  ;;  %v6695_v17 = vpop.permute.xlu1 %6694 }
0x396d   : > { %v6697_v21 = vpop.permute.xlu0 %6696 }
0x396e   : > { %15410 = vmatprep.subr.bf16.mxu1 %v15409_v56 }
0x396f   : > { %v16492_v58 = vpop.eup %16491  ;;  %15412 = vmatpush3.bf16.msra.mxu1 %v15409_v56 }
0x3970   : > { %v16494_v59 = vpop.eup %16493  ;;  %15415 = vmatprep.subr.msk.bf16.mxu1 %vm17084_vm3, %v15413_v26  ;;  %v6606_v41 = vmul.f32 %v16492_v58, %v16488_v6 }
0x3971   : > { %v6605_v12 = vmul.f32 %v16494_v59, %v16490_v9 }
0x3973   : > { %14524 = vmatprep.mubr.msk.f32.mxu1 %vm1440_vm4, %v6605_v12 }
0x3974   : > { %14525 = vmatmul.mubr.msk.f32.vlgmr.msra.gmra.mrb[50].mxu1 %vm1440_vm4, %v6606_v41 }
0x3975   : > { %14531 = vmatprep.mubr.msk.f32.mxu1 %vm1354_vm2, %v6695_v17 }
0x3978   : > { %15418 = vmatpush3.bf16.xpose.msk.msra.mxu1 %vm17084_vm3, %v15413_v26 }
0x397f   : > { %14532 = vmatmul.mubr.msk.f32.vlgmr.msra.gmra.mrb[52].mxu1 %vm1354_vm2, %v6697_v21 }
0x3a47   : > { %v17793_v22 = vpop.f32.mrb[50].mxu1 }
0x3a48   : > { %v17795_v23 = vpop.f32.mrb[51].mxu1 }
0x3a52   : > { %v14533_v27 = vpop.f32.mrb[52].mxu1 }
0x3a53   : > { %v6776_v32 = vpop.f32.mrb[53].mxu1  ;;  %v6788_v33 = vsel %vm1440_vm4, %v14533_v27, -inf }
0x3a54   : > { %6789 = vmax.xlane.f32.xlu0 %v6788_v33  ;;  %v6785_v34 = vsel %vm1440_vm4, %v6776_v32, -inf }
0x3a55   : > { %6786 = vmax.xlane.f32.xlu1 %v6785_v34 }
0x3ae1   : > { %v6790_v35 = vpop.xlane.xlu0 %6789 }
0x3ae2   : > { %v6792_v18 = vsub.f32 %v14533_v27, %v6790_v35  ;;  %v6787_v30 = vpop.xlane.xlu1 %6786 }
0x3ae3   : > { %v6791_v31 = vsub.f32 %v6776_v32, %v6787_v30 }
0x3ae4   : > { %v6795_v62 = vmul.f32 1.442695, %v6792_v18 }
0x3ae5   : > { %v6793_v63 = vmul.f32 1.442695, %v6791_v31 }
0x3ae6   : > { %16495 = vpow2.f32 %v6795_v62 }
0x3ae7   : > { %16497 = vpow2.f32 %v6793_v63 }
0x3af0   : > { %v16496_v40 = vpop.eup %16495 }
0x3af1   : > { %v16498_v55 = vpop.eup %16497  ;;  %v6800_v36 = vsel %vm1440_vm4, %v16496_v40, 0.0 }
0x3af2   : > { %6801 = vadd.xlane.f32.xlu1 %v6800_v36  ;;  %v6797_v37 = vsel %vm1440_vm4, %v16498_v55, 0.0 }
0x3af3   : > { %6798 = vadd.xlane.f32.xlu0 %v6797_v37 }
0x3b03   : > { %16072 = vrot.lane.b32.xlu1 %v17709_v44, %s18918_s28 }
0x3b07   : > { %6894 = vrot.lane.b32.xlu1 %v17711_v45, %s18919_s4 }
0x3b09   : > { %16067 = vrot.lane.b32.xlu0 %v17709_v44, %s18937_s11  ;;  %s18939_s11 = smov 108  }
0x3b0d   : > { %6896 = vrot.lane.b32.xlu0 %v17721_v46, %s18919_s4 }
0x3b7f   : > { %v6802_v38 = vpop.xlane.xlu1 %6801 }
0x3b80   : > { %16499 = vrcp.f32 %v6802_v38  ;;  %v6799_v39 = vpop.xlane.xlu0 %6798 }
0x3b81   : > { %16501 = vrcp.f32 %v6799_v39 }
0x3b83   : > { %v16073_v47 = vpop.permute.xlu1 %16072 }
0x3b84   : > { %v16068_v1 = vpop.permute.xlu0 %16067  ;;  %v16075_v48 = vunpack.i.h.bf16 %v16073_v47  ;;  %v16074_v2 = vunpack.i.l.bf16 %v16073_v47 }
0x3b85   : > { %v16070_v49 = vunpack.i.h.bf16 %v16068_v1  ;;  %v16069_v13 = vunpack.i.l.bf16 %v16068_v1 }
0x3b86   : > { %v15423_v60 = vpack.c.bf16 %v16075_v48, %v16074_v2 }
0x3b87   : > { %v15419_v57 = vpack.c.bf16 %v16070_v49, %v16069_v13  ;;  %v6895_v20 = vpop.permute.xlu1 %6894 }
0x3b88   : > { %v6897_v29 = vpop.permute.xlu0 %6896 }
0x3b89   : > { %15420 = vmatprep.subr.bf16.mxu0 %v15419_v57 }
0x3b8a   : > { %v16500_v61 = vpop.eup %16499  ;;  %15422 = vmatpush3.bf16.msra.mxu0 %v15419_v57 }
0x3b8b   : > { %v16502_v3 = vpop.eup %16501  ;;  %15425 = vmatprep.subr.msk.bf16.mxu0 %vm17084_vm3, %v15423_v60  ;;  %v6806_v4 = vmul.f32 %v16500_v61, %v16496_v40 }
0x3b8c   : > { %v6805_v19 = vmul.f32 %v16502_v3, %v16498_v55 }
0x3b8e   : > { %14538 = vmatprep.mubr.msk.f32.mxu0 %vm1440_vm4, %v6805_v19 }
0x3b8f   : > { %14539 = vmatmul.mubr.msk.f32.vlgmr.msra.gmra.mrb[50].mxu0 %vm1440_vm4, %v6806_v4 }
0x3b90   : > { %14545 = vmatprep.mubr.msk.f32.mxu0 %vm1354_vm2, %v6895_v20 }
0x3b93   : > { %15428 = vmatpush3.bf16.xpose.msk.msra.mxu0 %vm17084_vm3, %v15423_v60 }
0x3b9a   : > { %14546 = vmatmul.mubr.msk.f32.vlgmr.msra.gmra.mrb[52].mxu0 %vm1354_vm2, %v6897_v29 }
0x3c62   : > { %v17817_v28 = vpop.f32.mrb[50].mxu0 }
0x3c63   : > { %v17819_v5 = vpop.f32.mrb[51].mxu0 }
0x3c6d   : > { %v14547_v6 = vpop.f32.mrb[52].mxu0 }
0x3c6e   : > { %v6976_v9 = vpop.f32.mrb[53].mxu0  ;;  %v6988_v14 = vsel %vm1440_vm4, %v14547_v6, -inf }
0x3c6f   : > { %6989 = vmax.xlane.f32.xlu0 %v6988_v14  ;;  %v6985_v15 = vsel %vm1440_vm4, %v6976_v9, -inf }
0x3c70   : > { %6986 = vmax.xlane.f32.xlu1 %v6985_v15 }
0x3cfc   : > { %v6990_v16 = vpop.xlane.xlu0 %6989 }
0x3cfd   : > { %v6992_v0 = vsub.f32 %v14547_v6, %v6990_v16  ;;  %v6987_v7 = vpop.xlane.xlu1 %6986 }
0x3cfe   : > { %v6991_v8 = vsub.f32 %v6976_v9, %v6987_v7 }
0x3cff   : > { %v6995_v42 = vmul.f32 1.442695, %v6992_v0 }
0x3d00   : > { %v6993_v43 = vmul.f32 1.442695, %v6991_v8 }
0x3d01   : > { %16503 = vpow2.f32 %v6995_v42 }
0x3d02   : > { %16505 = vpow2.f32 %v6993_v43 }
0x3d0b   : > { %v16504_v24 = vpop.eup %16503 }
0x3d0c   : > { %v16506_v53 = vpop.eup %16505  ;;  %v7000_v56 = vsel %vm1440_vm4, %v16504_v24, 0.0 }
0x3d0d   : > { %7001 = vadd.xlane.f32.xlu1 %v7000_v56  ;;  %v6997_v26 = vsel %vm1440_vm4, %v16506_v53, 0.0 }
0x3d0e   : > { %6998 = vadd.xlane.f32.xlu0 %v6997_v26 }
0x3d1e   : > { %16082 = vrot.lane.b32.xlu1 %v17709_v44, %s18938_s15  ;;  %s18943_s15 = smov 36  }
0x3d22   : > { %7094 = vrot.lane.b32.xlu1 %v17711_v45, %s18939_s11 }
0x3d24   : > { %16077 = vrot.lane.b32.xlu0 %v17709_v44, %s18940_s17  ;;  %s18941_s17 = smov 68  }
0x3d28   : > { %7096 = vrot.lane.b32.xlu0 %v17721_v46, %s18939_s11 }
0x3d9a   : > { %v7002_v58 = vpop.xlane.xlu1 %7001 }
0x3d9b   : > { %16507 = vrcp.f32 %v7002_v58  ;;  %v6999_v59 = vpop.xlane.xlu0 %6998 }
0x3d9c   : > { %16509 = vrcp.f32 %v6999_v59 }
0x3d9e   : > { %v16083_v12 = vpop.permute.xlu1 %16082 }
0x3d9f   : > { %v16078_v41 = vpop.permute.xlu0 %16077  ;;  %v16085_v17 = vunpack.i.h.bf16 %v16083_v12  ;;  %v16084_v21 = vunpack.i.l.bf16 %v16083_v12 }
0x3da0   : > { %v16080_v27 = vunpack.i.h.bf16 %v16078_v41  ;;  %v16079_v32 = vunpack.i.l.bf16 %v16078_v41 }
0x3da1   : > { %v15433_v34 = vpack.c.bf16 %v16085_v17, %v16084_v21 }
0x3da2   : > { %v15429_v33 = vpack.c.bf16 %v16080_v27, %v16079_v32  ;;  %v7095_v62 = vpop.permute.xlu1 %7094 }
0x3da3   : > { %v7097_v63 = vpop.permute.xlu0 %7096 }
0x3da4   : > { %15430 = vmatprep.subr.bf16.mxu1 %v15429_v33 }
0x3da5   : > { %v16508_v35 = vpop.eup %16507  ;;  %15432 = vmatpush3.bf16.msra.mxu1 %v15429_v33 }
0x3da6   : > { %v16510_v18 = vpop.eup %16509  ;;  %15435 = vmatprep.subr.msk.bf16.mxu1 %vm17084_vm3, %v15433_v34  ;;  %v7006_v31 = vmul.f32 %v16508_v35, %v16504_v24 }
0x3da7   : > { %v7005_v30 = vmul.f32 %v16510_v18, %v16506_v53 }
0x3da9   : > { %14552 = vmatprep.mubr.msk.f32.mxu1 %vm1440_vm4, %v7005_v30 }
0x3daa   : > { %14553 = vmatmul.mubr.msk.f32.vlgmr.msra.gmra.mrb[54].mxu1 %vm1440_vm4, %v7006_v31 }
0x3dab   : > { %14559 = vmatprep.mubr.msk.f32.mxu1 %vm1354_vm2, %v7095_v62 }
0x3dae   : > { %15438 = vmatpush3.bf16.xpose.msk.msra.mxu1 %vm17084_vm3, %v15433_v34 }
0x3db5   : > { %14560 = vmatmul.mubr.msk.f32.vlgmr.msra.gmra.mrb[56].mxu1 %vm1354_vm2, %v7097_v63 }
0x3e7d   : > { %v17841_v40 = vpop.f32.mrb[54].mxu1 }
0x3e7e   : > { %v17843_v55 = vpop.f32.mrb[55].mxu1 }
0x3e88   : > { %v14561_v36 = vpop.f32.mrb[56].mxu1 }
0x3e89   : > { %v7176_v37 = vpop.f32.mrb[57].mxu1  ;;  %v7188_v38 = vsel %vm1440_vm4, %v14561_v36, -inf }
0x3e8a   : > { %7189 = vmax.xlane.f32.xlu0 %v7188_v38  ;;  %v7185_v39 = vsel %vm1440_vm4, %v7176_v37, -inf }
0x3e8b   : > { %7186 = vmax.xlane.f32.xlu1 %v7185_v39 }
0x3f17   : > { %v7190_v47 = vpop.xlane.xlu0 %7189 }
0x3f18   : > { %v7192_v1 = vsub.f32 %v14561_v36, %v7190_v47  ;;  %v7187_v48 = vpop.xlane.xlu1 %7186 }
0x3f19   : > { %v7191_v2 = vsub.f32 %v7176_v37, %v7187_v48 }
0x3f1a   : > { %v7195_v49 = vmul.f32 1.442695, %v7192_v1 }
0x3f1b   : > { %v7193_v13 = vmul.f32 1.442695, %v7191_v2 }
0x3f1c   : > { %16511 = vpow2.f32 %v7195_v49 }
0x3f1d   : > { %16513 = vpow2.f32 %v7193_v13 }
0x3f26   : > { %v16512_v57 = vpop.eup %16511 }
0x3f27   : > { %v16514_v60 = vpop.eup %16513  ;;  %v7200_v61 = vsel %vm1440_vm4, %v16512_v57, 0.0 }
0x3f28   : > { %7201 = vadd.xlane.f32.xlu1 %v7200_v61  ;;  %v7197_v3 = vsel %vm1440_vm4, %v16514_v60, 0.0 }
0x3f29   : > { %7198 = vadd.xlane.f32.xlu0 %v7197_v3 }
0x3f39   : > { %16092 = vrot.lane.b32.xlu1 %v17709_v44, %s18941_s17  ;;  %s18945_s17 = smov 100  }
0x3f3d   : > { %7294 = vrot.lane.b32.xlu1 %v17711_v45, %s18942_s21 }
0x3f3f   : > { %16087 = vrot.lane.b32.xlu0 %v17709_v44, %s18943_s15  ;;  %s18944_s15 = smov 64  }
0x3f43   : > { %7296 = vrot.lane.b32.xlu0 %v17721_v46, %s18942_s21 }
0x3fb5   : > { %v7202_v19 = vpop.xlane.xlu1 %7201 }
0x3fb6   : > { %16515 = vrcp.f32 %v7202_v19  ;;  %v7199_v4 = vpop.xlane.xlu0 %7198 }
0x3fb7   : > { %16517 = vrcp.f32 %v7199_v4 }
0x3fb9   : > { %v16093_v20 = vpop.permute.xlu1 %16092 }
0x3fba   : > { %v16088_v29 = vpop.permute.xlu0 %16087  ;;  %v16095_v6 = vunpack.i.h.bf16 %v16093_v20  ;;  %v16094_v9 = vunpack.i.l.bf16 %v16093_v20 }
0x3fbb   : > { %v16090_v14 = vunpack.i.h.bf16 %v16088_v29  ;;  %v16089_v15 = vunpack.i.l.bf16 %v16088_v29 }
0x3fbc   : > { %v15443_v0 = vpack.c.bf16 %v16095_v6, %v16094_v9 }
0x3fbd   : > { %v15439_v16 = vpack.c.bf16 %v16090_v14, %v16089_v15  ;;  %v7295_v24 = vpop.permute.xlu1 %7294 }
0x3fbe   : > { %v7297_v53 = vpop.permute.xlu0 %7296 }
0x3fbf   : > { %15440 = vmatprep.subr.bf16.mxu0 %v15439_v16 }
0x3fc0   : > { %v16516_v7 = vpop.eup %16515  ;;  %15442 = vmatpush3.bf16.msra.mxu0 %v15439_v16 }
0x3fc1   : > { %v16518_v8 = vpop.eup %16517  ;;  %15445 = vmatprep.subr.msk.bf16.mxu0 %vm17084_vm3, %v15443_v0  ;;  %v7206_v43 = vmul.f32 %v16516_v7, %v16512_v57 }
0x3fc2   : > { %v7205_v42 = vmul.f32 %v16518_v8, %v16514_v60 }
0x3fc4   : > { %14566 = vmatprep.mubr.msk.f32.mxu0 %vm1440_vm4, %v7205_v42 }
0x3fc5   : > { %14567 = vmatmul.mubr.msk.f32.vlgmr.msra.gmra.mrb[54].mxu0 %vm1440_vm4, %v7206_v43 }
0x3fc6   : > { %14573 = vmatprep.mubr.msk.f32.mxu0 %vm1354_vm2, %v7295_v24 }
0x3fc9   : > { %15448 = vmatpush3.bf16.xpose.msk.msra.mxu0 %vm17084_vm3, %v15443_v0 }
0x3fd0   : > { %14574 = vmatmul.mubr.msk.f32.vlgmr.msra.gmra.mrb[56].mxu0 %vm1354_vm2, %v7297_v53 }
0x4098   : > { %v17865_v56 = vpop.f32.mrb[54].mxu0 }
0x4099   : > { %v17867_v26 = vpop.f32.mrb[55].mxu0 }
0x40a3   : > { %v14575_v58 = vpop.f32.mrb[56].mxu0 }
0x40a4   : > { %v7376_v59 = vpop.f32.mrb[57].mxu0  ;;  %v7388_v12 = vsel %vm1440_vm4, %v14575_v58, -inf }
0x40a5   : > { %7389 = vmax.xlane.f32.xlu0 %v7388_v12  ;;  %v7385_v41 = vsel %vm1440_vm4, %v7376_v59, -inf }
0x40a6   : > { %7386 = vmax.xlane.f32.xlu1 %v7385_v41 }
0x4132   : > { %v7390_v17 = vpop.xlane.xlu0 %7389 }
0x4133   : > { %v7392_v21 = vsub.f32 %v14575_v58, %v7390_v17  ;;  %v7387_v27 = vpop.xlane.xlu1 %7386 }
0x4134   : > { %v7391_v32 = vsub.f32 %v7376_v59, %v7387_v27 }
0x4135   : > { %v7395_v33 = vmul.f32 1.442695, %v7392_v21 }
0x4136   : > { %v7393_v34 = vmul.f32 1.442695, %v7391_v32 }
0x4137   : > { %16519 = vpow2.f32 %v7395_v33 }
0x4138   : > { %16521 = vpow2.f32 %v7393_v34 }
0x4141   : > { %v16520_v35 = vpop.eup %16519 }
0x4142   : > { %v16522_v18 = vpop.eup %16521  ;;  %v7400_v30 = vsel %vm1440_vm4, %v16520_v35, 0.0 }
0x4143   : > { %7401 = vadd.xlane.f32.xlu1 %v7400_v30  ;;  %v7397_v31 = vsel %vm1440_vm4, %v16522_v18, 0.0 }
0x4144   : > { %7398 = vadd.xlane.f32.xlu0 %v7397_v31 }
0x4154   : > { %16102 = vrot.lane.b32.xlu1 %v17709_v44, %s18944_s15  ;;  %s18946_s15 = smov 60  }
0x4158   : > { %7494 = vrot.lane.b32.xlu1 %v17711_v45, %s18945_s17 }
0x415a   : > { %16097 = vrot.lane.b32.xlu0 %v17709_v44, %s18907_s22 }
0x415e   : > { %7496 = vrot.lane.b32.xlu0 %v17721_v46, %s18945_s17  ;;  %s18947_s17 = smov 96  }
0x41d0   : > { %v7402_v62 = vpop.xlane.xlu1 %7401 }
0x41d1   : > { %16523 = vrcp.f32 %v7402_v62  ;;  %v7399_v63 = vpop.xlane.xlu0 %7398 }
0x41d2   : > { %16525 = vrcp.f32 %v7399_v63 }
0x41d4   : > { %v16103_v36 = vpop.permute.xlu1 %16102 }
0x41d5   : > { %v16098_v37 = vpop.permute.xlu0 %16097  ;;  %v16105_v38 = vunpack.i.h.bf16 %v16103_v36  ;;  %v16104_v39 = vunpack.i.l.bf16 %v16103_v36 }
0x41d6   : > { %v16100_v47 = vunpack.i.h.bf16 %v16098_v37  ;;  %v16099_v1 = vunpack.i.l.bf16 %v16098_v37 }
0x41d7   : > { %v15453_v2 = vpack.c.bf16 %v16105_v38, %v16104_v39 }
0x41d8   : > { %v15449_v48 = vpack.c.bf16 %v16100_v47, %v16099_v1  ;;  %v7495_v61 = vpop.permute.xlu1 %7494 }
0x41d9   : > { %v7497_v3 = vpop.permute.xlu0 %7496 }
0x41da   : > { %15450 = vmatprep.subr.bf16.mxu1 %v15449_v48 }
0x41db   : > { %v16524_v49 = vpop.eup %16523  ;;  %15452 = vmatpush3.bf16.msra.mxu1 %v15449_v48 }
0x41dc   : > { %v16526_v13 = vpop.eup %16525  ;;  %15455 = vmatprep.subr.msk.bf16.mxu1 %vm17084_vm3, %v15453_v2  ;;  %v7406_v60 = vmul.f32 %v16524_v49, %v16520_v35 }
0x41dd   : > { %v7405_v57 = vmul.f32 %v16526_v13, %v16522_v18 }
0x41df   : > { %14580 = vmatprep.mubr.msk.f32.mxu1 %vm1440_vm4, %v7405_v57 }
0x41e0   : > { %14581 = vmatmul.mubr.msk.f32.vlgmr.msra.gmra.mrb[58].mxu1 %vm1440_vm4, %v7406_v60 }
0x41e1   : > { %14587 = vmatprep.mubr.msk.f32.mxu1 %vm1354_vm2, %v7495_v61 }
0x41e4   : > { %15458 = vmatpush3.bf16.xpose.msk.msra.mxu1 %vm17084_vm3, %v15453_v2 }
0x41eb   : > { %14588 = vmatmul.mubr.msk.f32.vlgmr.msra.gmra.mrb[60].mxu1 %vm1354_vm2, %v7497_v3 }
0x42b3   : > { %v17889_v19 = vpop.f32.mrb[58].mxu1 }
0x42b4   : > { %v17891_v4 = vpop.f32.mrb[59].mxu1 }
0x42be   : > { %v14589_v20 = vpop.f32.mrb[60].mxu1 }
0x42bf   : > { %v7576_v29 = vpop.f32.mrb[61].mxu1  ;;  %v7588_v6 = vsel %vm1440_vm4, %v14589_v20, -inf }
0x42c0   : > { %7589 = vmax.xlane.f32.xlu0 %v7588_v6  ;;  %v7585_v9 = vsel %vm1440_vm4, %v7576_v29, -inf }
0x42c1   : > { %7586 = vmax.xlane.f32.xlu1 %v7585_v9  ;;  %v13336_v9 = vld [vmem:[%s18888_s25 + $0x70] sm:$0xf] }
0x434d   : > { %v7590_v14 = vpop.xlane.xlu0 %7589 }
0x434e   : > { %v7592_v15 = vsub.f32 %v14589_v20, %v7590_v14  ;;  %v7587_v16 = vpop.xlane.xlu1 %7586 }
0x434f   : > { %v7591_v0 = vsub.f32 %v7576_v29, %v7587_v16  ;;  %v13335_v29 = vld [vmem:[%s18888_s25 + $0x68] sm:$0xff] }
0x4350   : > { %v7595_v7 = vmul.f32 1.442695, %v7592_v15 }
0x4351   : > { %v7593_v8 = vmul.f32 1.442695, %v7591_v0 }
0x4352   : > { %16527 = vpow2.f32 %v7595_v7 }
0x4353   : > { %16529 = vpow2.f32 %v7593_v8 }
0x435c   : > { %v16528_v42 = vpop.eup %16527 }
0x435d   : > { %v16530_v43 = vpop.eup %16529  ;;  %v7600_v24 = vsel %vm1440_vm4, %v16528_v42, 0.0 }
0x435e   : > { %7601 = vadd.xlane.f32.xlu1 %v7600_v24  ;;  %v7597_v53 = vsel %vm1440_vm4, %v16530_v43, 0.0 }
0x435f   : > { %7598 = vadd.xlane.f32.xlu0 %v7597_v53 }
0x436f   : > { %16112 = vrot.lane.b32.xlu1 %v17709_v44, %s18946_s15  ;;  %s18948_s15 = smov 4  }
0x4373   : > { %7694 = vrot.lane.b32.xlu1 %v17711_v45, %s18947_s17 }
0x4375   : > { %16107 = vrot.lane.b32.xlu0 %v17709_v44, %s18906_s23 }
0x4379   : > { %7696 = vrot.lane.b32.xlu0 %v17721_v46, %s18947_s17 }
0x43eb   : > { %v7602_v58 = vpop.xlane.xlu1 %7601 }
0x43ec   : > { %16531 = vrcp.f32 %v7602_v58  ;;  %v7599_v59 = vpop.xlane.xlu0 %7598 }
0x43ed   : > { %16533 = vrcp.f32 %v7599_v59 }
0x43ef   : > { %v16113_v12 = vpop.permute.xlu1 %16112 }
0x43f0   : > { %v16108_v41 = vpop.permute.xlu0 %16107  ;;  %v16115_v17 = vunpack.i.h.bf16 %v16113_v12  ;;  %v16114_v21 = vunpack.i.l.bf16 %v16113_v12 }
0x43f1   : > { %v16110_v27 = vunpack.i.h.bf16 %v16108_v41  ;;  %v16109_v32 = vunpack.i.l.bf16 %v16108_v41 }
0x43f2   : > { %v15463_v34 = vpack.c.bf16 %v16115_v17, %v16114_v21 }
0x43f3   : > { %v15459_v33 = vpack.c.bf16 %v16110_v27, %v16109_v32  ;;  %v7695_v30 = vpop.permute.xlu1 %7694 }
0x43f4   : > { %v7697_v31 = vpop.permute.xlu0 %7696 }
0x43f5   : > { %15460 = vmatprep.subr.bf16.mxu0 %v15459_v33 }
0x43f6   : > { %v16532_v45 = vpop.eup %16531  ;;  %15462 = vmatpush3.bf16.msra.mxu0 %v15459_v33 }
0x43f7   : > { %v16534_v35 = vpop.eup %16533  ;;  %15465 = vmatprep.subr.msk.bf16.mxu0 %vm17084_vm3, %v15463_v34  ;;  %v7606_v18 = vmul.f32 %v16532_v45, %v16528_v42 }
0x43f8   : > { %v7605_v46 = vmul.f32 %v16534_v35, %v16530_v43 }
0x43fa   : > { %14594 = vmatprep.mubr.msk.f32.mxu0 %vm1440_vm4, %v7605_v46 }
0x43fb   : > { %14595 = vmatmul.mubr.msk.f32.vlgmr.msra.gmra.mrb[58].mxu0 %vm1440_vm4, %v7606_v18 }
0x43fc   : > { %14601 = vmatprep.mubr.msk.f32.mxu0 %vm1354_vm2, %v7695_v30 }
0x43ff   : > { %15468 = vmatpush3.bf16.xpose.msk.msra.mxu0 %vm17084_vm3, %v15463_v34 }
0x4406   : > { %14602 = vmatmul.mubr.msk.f32.vlgmr.msra.gmra.mrb[60].mxu0 %vm1354_vm2, %v7697_v31 }
0x44ce   : > { %v14596_v62 = vpop.f32.mrb[58].mxu0 }
0x44cf   : > { %v7685_v63 = vpop.f32.mrb[59].mxu0 }
0x44d9   : > { %v14603_v36 = vpop.f32.mrb[60].mxu0 }
0x44da   : > { %v7776_v37 = vpop.f32.mrb[61].mxu0  ;;  %v7788_v38 = vsel %vm1440_vm4, %v14603_v36, -inf }
0x44db   : > { %7789 = vmax.xlane.f32.xlu0 %v7788_v38  ;;  %v7785_v39 = vsel %vm1440_vm4, %v7776_v37, -inf }
0x44dc   : > { %7786 = vmax.xlane.f32.xlu1 %v7785_v39 }
0x4568   : > { %v7790_v47 = vpop.xlane.xlu0 %7789 }
0x4569   : > { %v7792_v1 = vsub.f32 %v14603_v36, %v7790_v47  ;;  %v7787_v48 = vpop.xlane.xlu1 %7786  ;;  %v13392_v47 = vld [vmem:[%s18880_s29 + $0x2] ss:$0 sm:$0xff]  ;;  %s18958_s29 = sld [smem:[#allocation32_spill]] }
0x456a   : > { %v7791_v2 = vsub.f32 %v7776_v37, %v7787_v48 }
0x456b   : > { %v7795_v49 = vmul.f32 1.442695, %v7792_v1 }
0x456c   : > { %v7793_v13 = vmul.f32 1.442695, %v7791_v2 }
0x456d   : > { %16535 = vpow2.f32 %v7795_v49 }
0x456e   : > { %16537 = vpow2.f32 %v7793_v13 }
0x4577   : > { %v16536_v57 = vpop.eup %16535 }
0x4578   : > { %v16538_v60 = vpop.eup %16537  ;;  %v7800_v61 = vsel %vm1440_vm4, %v16536_v57, 0.0 }
0x4579   : > { %7801 = vadd.xlane.f32.xlu1 %v7800_v61  ;;  %v7797_v3 = vsel %vm1440_vm4, %v16538_v60, 0.0 }
0x457a   : > { %7798 = vadd.xlane.f32.xlu0 %v7797_v3 }
0x458a   : > { %7896 = vrot.lane.b32.xlu1 %v17771_v52, %s18948_s15 }
0x458e   : > { %7898 = vrot.lane.b32.xlu1 %v17769_v51, %s18948_s15 }
0x4590   : > { %16117 = vrot.lane.b32.xlu0 %v17709_v44, %s18932_s13 }
0x4592   : > { %7906 = vrot.lane.b32.xlu1 %v17793_v22, %s18933_s20 }
0x4594   : > { %7904 = vrot.lane.b32.xlu0 %v17795_v23, %s18933_s20 }
0x4596   : > { %7914 = vrot.lane.b32.xlu1 %v17817_v28, %s18934_s27 }
0x4598   : > { %7912 = vrot.lane.b32.xlu0 %v17819_v5, %s18934_s27 }
0x459a   : > { %7922 = vrot.lane.b32.xlu1 %v17841_v40, %s18935_s0 }
0x459c   : > { %7920 = vrot.lane.b32.xlu0 %v17843_v55, %s18935_s0 }
0x459e   : > { %7930 = vrot.lane.b32.xlu1 %v17865_v56, %s18936_s10 }
0x45a0   : > { %7928 = vrot.lane.b32.xlu0 %v17867_v26, %s18936_s10  ;;  %v13332_v26 = vld [vmem:[%s18888_s25 + $0x50] sm:$0xff] }
0x45a2   : > { %7938 = vrot.lane.b32.xlu1 %v17889_v19, %s18932_s13  ;;  %v13333_v19 = vld [vmem:[%s18888_s25 + $0x58] sm:$0xff] }
0x45a3   : > { %v15473_v20 = vpack.c.bf16 %v13333_v19, %v13332_v26  ;;  %v13403_v19 = vld [vmem:[%s18887_s14 + $0x68] sm:$0xff] }
0x45a4   : > { %7936 = vrot.lane.b32.xlu0 %v17891_v4, %s18932_s13  ;;  %v13334_v4 = vld [vmem:[%s18888_s25 + $0x60] sm:$0xff]  ;;  %s18949_s25 = sld [smem:[#allocation22_spill]] }
0x45a5   : > { %v15477_v6 = vpack.c.bf16 %v13335_v29, %v13334_v4 }
0x45a6   : > { %7946 = vrot.lane.b32.xlu1 %v14596_v62, %s18906_s23 }
0x45a8   : > { %7944 = vrot.lane.b32.xlu0 %v7685_v63, %s18906_s23 }
0x45aa   : > { %v8403_v29 = vld [vmem:[%s18949_s25] sm:$0xff] }
0x4606   : > { %v7802_v44 = vpop.xlane.xlu1 %7801 }
0x4607   : > { %16539 = vrcp.f32 %v7802_v44  ;;  %v7799_v51 = vpop.xlane.xlu0 %7798 }
0x4608   : > { %16541 = vrcp.f32 %v7799_v51 }
0x460a   : > { %v7897_v16 = vpop.permute.xlu1 %7896 }
0x460b   : > { %v16118_v52 = vpop.permute.xlu0 %16117  ;;  %v7958_v17 = vsel %vm1354_vm2, %v17767_v10, %v7897_v16  ;;  %v13410_v16 = vld [vmem:[%s18881_s24 + $0x80] sm:$0xff] }
0x460c   : > { %v16120_v22 = vunpack.i.h.bf16 %v16118_v52  ;;  %v16119_v23 = vunpack.i.l.bf16 %v16118_v52 }
0x460e   : > { %v15469_v28 = vpack.c.bf16 %v16120_v22, %v16119_v23  ;;  %v7899_v0 = vpop.permute.xlu1 %7898 }
0x460f   : > { %v7905_v8 = vpop.permute.xlu0 %7904  ;;  %v7959_v21 = vsel %vm1354_vm2, %v17765_v50, %v7899_v0 }
0x4610   : > { %15470 = vmatprep.subr.bf16.mxu1 %v15469_v28  ;;  %v7960_v27 = vsel %vm3216_vm5, %v7958_v17, %v7905_v8  ;;  %v13412_v8 = vld [vmem:[%s18881_s24 + $0x90] sm:$0xff] }
0x4611   : > { %v16540_v5 = vpop.eup %16539  ;;  %15472 = vmatpush3.bf16.msra.mxu1 %v15469_v28 }
0x4612   : > { %v16542_v40 = vpop.eup %16541  ;;  %v7806_v56 = vmul.f32 %v16540_v5, %v16536_v57  ;;  %15474 = vmatprep.subr.bf16.mxu1 %v15473_v20  ;;  %v7907_v7 = vpop.permute.xlu1 %7906 }
0x4613   : > { %v7805_v55 = vmul.f32 %v16542_v40, %v16538_v60  ;;  %v7913_v43 = vpop.permute.xlu0 %7912  ;;  %v7961_v33 = vsel %vm3216_vm5, %v7959_v21, %v7907_v7  ;;  %v13400_v40 = vld [vmem:[%s18887_s14 + $0x50] sm:$0xff]  ;;  %v13411_v7 = vld [vmem:[%s18881_s24 + $0x88] sm:$0xff] }
0x4614   : > { %v7962_v34 = vsel %vm3219_vm6, %v7960_v27, %v7913_v43  ;;  %v15489_v43 = vpack.c.bf16 %v13411_v7, %v13410_v16 }
0x4615   : > { %14608 = vmatprep.mubr.msk.f32.mxu1 %vm1440_vm4, %v7805_v55  ;;  %v13401_v55 = vld [vmem:[%s18887_s14 + $0x58] sm:$0xff] }
0x4616   : > { %14609 = vmatmul.mubr.msk.f32.vlgmr.msra.gmra.mrb[62].mxu1 %vm1440_vm4, %v7806_v56  ;;  %v7915_v42 = vpop.permute.xlu1 %7914  ;;  %v13402_v56 = vld [vmem:[%s18887_s14 + $0x60] sm:$0xff]  ;;  %v15481_v26 = vpack.c.bf16 %v13401_v55, %v13400_v40 }
0x4617   : > { %15476 = vmatpush3.bf16.msra.mxu1 %v15473_v20  ;;  %v7921_v53 = vpop.permute.xlu0 %7920  ;;  %v7963_v35 = vsel %vm3219_vm6, %v7961_v33, %v7915_v42  ;;  %v15485_v4 = vpack.c.bf16 %v13403_v19, %v13402_v56  ;;  %v13404_v20 = vld [vmem:[%s18887_s14 + $0x70] sm:$0xf]  ;;  %v13413_v42 = vld [vmem:[%s18881_s24 + $0x98] sm:$0xff]  ;;  %s18950_s14 = sld [smem:[#allocation23_spill]] }
0x4618   : > { %15478 = vmatprep.subr.bf16.mxu1 %v15477_v6  ;;  %v7964_v46 = vsel %vm1440_vm4, %v7962_v34, %v7921_v53  ;;  %15482 = vmatprep.subr.bf16.mxu0 %v15481_v26  ;;  %v8407_v53 = vld [vmem:[%s18949_s25 + $0x20] sm:$0xf] }
0x4619   : > { %15484 = vmatpush3.bf16.msra.mxu0 %v15481_v26 }
0x461a   : > { %v7923_v24 = vpop.permute.xlu1 %7922  ;;  %15486 = vmatprep.subr.bf16.mxu0 %v15485_v4 }
0x461b   : > { %15480 = vmatpush3.bf16.msra.mxu1 %v15477_v6  ;;  %v7929_v59 = vpop.permute.xlu0 %7928  ;;  %v7965_v18 = vsel %vm1440_vm4, %v7963_v35, %v7923_v24  ;;  %v8404_v6 = vld [vmem:[%s18949_s25 + $0x8] sm:$0xff]  ;;  %v15493_v24 = vpack.c.bf16 %v13413_v42, %v13412_v8 }
0x461c   : > { %14619 = vmatprep.subr.msk.mxu1 %vm1261_vm0, %v13336_v9  ;;  %v7966_v10 = vsel %vm3224_vm7, %v7964_v46, %v7929_v59  ;;  %v13415_v59 = vld [vmem:[%s18881_s24 + $0xa8] sm:$0xff]  ;;  %v13399_v46 = vld [vmem:[%s18885_s8 + $0x2] ss:$0 sm:$0xff]  ;;  %s18952_s8 = sld [smem:[#allocation24_spill]] }
0x461d   : > { %15488 = vmatpush3.bf16.msra.mxu0 %v15485_v4 }
0x461e   : > { %v7931_v58 = vpop.permute.xlu1 %7930  ;;  %14632 = vmatprep.subr.msk.mxu0 %vm1261_vm0, %v13404_v20 }
0x461f   : > { %14620 = vmatpush3.msk.msra.mxu1 %vm1261_vm0, %v13336_v9  ;;  %v7937_v41 = vpop.permute.xlu0 %7936  ;;  %v7967_v30 = vsel %vm3224_vm7, %v7965_v18, %v7931_v58  ;;  %v8405_v9 = vld [vmem:[%s18949_s25 + $0x10] sm:$0xff]  ;;  %v13414_v58 = vld [vmem:[%s18881_s24 + $0xa0] sm:$0xff] }
0x4620   : > { %v7968_v50 = vsel %vm3227_vm8, %v7966_v10, %v7937_v41  ;;  %15490 = vmatprep.subr.bf16.mxu1 %v15489_v43 }
0x4621   : > { %14633 = vmatpush3.msk.msra.mxu0 %vm1261_vm0, %v13404_v20 }
0x4622   : > { %v7939_v12 = vpop.permute.xlu1 %7938  ;;  %v8512_v40 = vld [vmem:[%s18952_s8 + $0x8] sm:$0xff]  ;;  %v8513_v55 = vld [vmem:[%s18952_s8 + $0x10] sm:$0xff]  ;;  %v8514_v26 = vld [vmem:[%s18952_s8 + $0x18] sm:$0xff] }
0x4623   : > { %v7945_v45 = vpop.permute.xlu0 %7944  ;;  %v7969_v62 = vsel %vm3227_vm8, %v7967_v30, %v7939_v12  ;;  %v15497_v12 = vpack.c.bf16 %v13415_v59, %v13414_v58  ;;  %v15515_v19 = vpack.c.bf16 %v8514_v26, %v8513_v55 }
0x4624   : > { %v7970_v63 = vsel %vm3230_vm9, %v7968_v50, %v7945_v45  ;;  %v13398_v45 = vld [vmem:[%s18886_s3 + $0x2] ss:$0 sm:$0xff]  ;;  %s18951_s3 = sld [smem:[#allocation7_spill]] }
0x4626   : > { %v7947_v32 = vpop.permute.xlu1 %7946 }
0x4627   : > { %v7971_v37 = vsel %vm3230_vm9, %v7969_v62, %v7947_v32 }
0x46e9   : > { %v14610_v14 = vpop.f32.mrb[62].mxu1 }
0x46ea   : > { %7954 = vrot.lane.b32.xlu1 %v14610_v14, %s18907_s22  ;;  %v7885_v15 = vpop.f32.mrb[63].mxu1  ;;  %v16121_v14 = vpack.i.bf16 %v8404_v6, %v8403_v29  ;;  %v8515_v6 = vld [vmem:[%s18952_s8 + $0x20] sm:$0xf] }
0x46eb   : > { %7952 = vrot.lane.b32.xlu0 %v7885_v15, %s18907_s22  ;;  %v8406_v15 = vld [vmem:[%s18949_s25 + $0x18] sm:$0xff] }
0x46ec   : > { %v16126_v0 = vpack.i.bf16 %v8406_v15, %v8405_v9 }
0x475c   : > { %v7955_v31 = vpop.permute.xlu1 %7954 }
0x475d   : > { %v7953_v36 = vpop.permute.xlu0 %7952  ;;  %v7973_v39 = vsel %vm3233_vm10, %v7971_v37, %v7955_v31 }
0x475e   : > { %v7972_v38 = vsel %vm3233_vm10, %v7970_v63, %v7953_v36  ;;  %v13416_v63 = vld [vmem:[%s18881_s24 + $0xb0] sm:$0xff]  ;;  %v13417_v36 = vld [vmem:[%s18881_s24 + $0xb8] sm:$0xff]  ;;  %s18957_s24 = sld [smem:[#allocation21_spill]] }
0x475f   : > { %14621 = vmatprep.mubr.msk.f32.mxu1 %vm1254_vm1, %v7972_v38  ;;  %v15501_v37 = vpack.c.bf16 %v13417_v36, %v13416_v63  ;;  %v13424_v63 = vld [vmem:[%s18884_s6 + $0x2] ss:$0 sm:$0xff]  ;;  %s18954_s6 = sld [smem:[#allocation28_spill]] }
0x4760   : > { %14622 = vmatmul.mubr.msk.f32.vlgmr.msra.gmra.mrb[64].mxu1 %vm1254_vm1, %v7973_v39 }
0x4761   : > { %15492 = vmatpush3.bf16.msra.mxu1 %v15489_v43 }
0x4762   : > { %15494 = vmatprep.subr.bf16.mxu1 %v15493_v24 }
0x4765   : > { %15496 = vmatpush3.bf16.msra.mxu1 %v15493_v24 }
0x4766   : > { %15498 = vmatprep.subr.bf16.mxu1 %v15497_v12 }
0x4769   : > { %15500 = vmatpush3.bf16.msra.mxu1 %v15497_v12 }
0x476a   : > { %15502 = vmatprep.subr.bf16.mxu1 %v15501_v37 }
0x476d   : > { %15504 = vmatpush3.bf16.msra.mxu1 %v15501_v37  ;;  %v13425_v37 = vld [vmem:[%s18883_s12 + $0x2] ss:$0 sm:$0xff]  ;;  %s18955_s12 = sld [smem:[#allocation26_spill]] }
0x4833   : > { %v14623_v1 = vpop.f32.mrb[64].mxu1 }
0x4834   : > { %v8061_v48 = vadd.f32 %v14623_v1, %v13392_v47  ;;  %v8055_v2 = vpop.f32.mrb[65].mxu1 }
0x4835   : > { %v8056_v49 = vadd.f32 %v13392_v47, %v8055_v2 }
0x4836   : > { %v8065_v13 = vadd.f32 %v8061_v48, %v17702_v54  ;;  %v16777_v48 = vmov 0.0|0.0  }
0x4837   : > { %v8064_v57 = vadd.f32 %v8056_v49, %v17700_v11  ;;  %15505 = vmatprep.subr.bf16.mxu0 %v16777_v48  ;;  %15517 = vmatprep.subr.bf16.mxu1 %v16777_v48 }
0x4838   : > { %v8073_v60 = vsel %vm1254_vm1, %v8065_v13, 0.0 }
0x4839   : > { %8074 = vadd.xlane.f32.xlu1 %v8073_v60  ;;  %v8070_v61 = vsel %vm1254_vm1, %v8064_v57, 0.0 }
0x483a   : > { %8071 = vadd.xlane.f32.xlu0 %v8070_v61 }
0x484a   : > { %16122 = vrot.lane.b32.xlu1 %v16121_v14, %s18909_s16  ;;  %v13419_v14 = vld [vmem:[%s18879_s30 + $0x2] ss:$0 sm:$0xff]  ;;  %s18959_s30 = sld [smem:[#allocation33_spill]] }
0x484e   : > { %8422 = vrot.lane.b32.xlu1 %v8407_v53, %s18909_s16 }
0x48c6   : > { %v8075_v3 = vpop.xlane.xlu1 %8074 }
0x48c7   : > { %v8077_v44 = vmul.f32 0.027777778, %v8075_v3  ;;  %v8072_v51 = vpop.xlane.xlu0 %8071 }
0x48c8   : > { %v8076_v52 = vmul.f32 0.027777778, %v8072_v51  ;;  %v13406_v51 = vld [vmem:[%s18882_s19 + $0x2] ss:$0 sm:$0xff]  ;;  %s18956_s19 = sld [smem:[#allocation20_spill]] }
0x48c9   : > { %v8079_v22 = vsub.f32 %v8065_v13, %v8077_v44  ;;  %v16779_v13 = vmov 0.0   ;;  %v18025_v44 = vld [vmem:[%s18951_s3] sm:$0x1]  ;;  %s18953_s3 = sld [smem:[#allocation25_spill]] }
0x48ca   : > { %v8078_v23 = vsub.f32 %v8064_v57, %v8076_v52  ;;  %v16123_v38 = vpop.permute.xlu1 %16122  ;;  %v13428_v57 = vld [vmem:[%s18950_s14] ss:$0 sm:$0xff] }
0x48cb   : > { %v8081_v54 = vmul.f32 %v8079_v22, %v8079_v22  ;;  %v16125_v47 = vunpack.i.h.bf16 %v16123_v38  ;;  %v16124_v1 = vunpack.i.l.bf16 %v16123_v38  ;;  %8433 = vrot.lane.b32.xlu1 %v13428_v57, %s18909_s16 }
0x48cc   : > { %v8080_v28 = vmul.f32 %v8078_v23, %v8078_v23 }
0x48cd   : > { %v8085_v5 = vsel %vm1254_vm1, %v8081_v54, 0.0  ;;  %v15506_v60 = vpack.c.bf16 %v16125_v47, %v16124_v1 }
0x48ce   : > { %v8082_v11 = vsel %vm1254_vm1, %v8080_v28, 0.0  ;;  %v8423_v3 = vpop.permute.xlu1 %8422 }
0x48cf   : > { %8083 = vadd.xlane.f32.xlu0 %v8082_v11 }
0x48d3   : > { %8086 = vadd.xlane.f32.xlu0 %v8085_v5  ;;  %v8511_v5 = vld [vmem:[%s18952_s8] sm:$0xff] }
0x48d4   : > { %v15512_v56 = vpack.c.bf16 %v8512_v40, %v8511_v5 }
0x48e9   : > { %16127 = vrot.lane.b32.xlu0 %v16126_v0, %s18909_s16 }
0x493d   : > { %v8434_v4 = vpop.permute.xlu1 %8433 }
0x495c   : > { %v8084_v41 = vpop.xlane.xlu0 %8083 }
0x495d   : > { %v8088_v17 = vmul.f32 0.027777778, %v8084_v41 }
0x495f   : > { %v8090_v21 = vadd.f32 1e-05, %v8088_v17 }
0x4960   : > { %v8087_v27 = vpop.xlane.xlu0 %8086 }
0x4961   : > { %16543 = vrsqrt.f32 %v8090_v21  ;;  %v8089_v32 = vmul.f32 0.027777778, %v8087_v27 }
0x4963   : > { %v8091_v33 = vadd.f32 1e-05, %v8089_v32 }
0x4964   : > { %v16128_v39 = vpop.permute.xlu0 %16127 }
0x4965   : > { %16545 = vrsqrt.f32 %v8091_v33  ;;  %v16130_v2 = vunpack.i.h.bf16 %v16128_v39  ;;  %v16129_v49 = vunpack.i.l.bf16 %v16128_v39 }
0x4967   : > { %v15509_v61 = vpack.c.bf16 %v16130_v2, %v16129_v49 }
0x496b   : > { %v16544_v34 = vpop.eup %16543 }
0x496c   : > { %v8094_v35 = vmul.f32 %v16544_v34, %v8078_v23 }
0x496e   : > { %v8102_v18 = vmul.f32 %v13398_v45, %v8094_v35 }
0x496f   : > { %v16546_v10 = vpop.eup %16545 }
0x4970   : > { %v8095_v30 = vmul.f32 %v16546_v10, %v8079_v22  ;;  %v18006_v50 = vadd.f32 %v13399_v46, %v8102_v18 }
0x4972   : > { %v8103_v31 = vmul.f32 %v13398_v45, %v8095_v30  ;;  %14634 = vmatprep.mubr.msk.f32.mxu0 %vm1254_vm1, %v18006_v50 }
0x4974   : > { %v18010_v62 = vadd.f32 %v13399_v46, %v8103_v31 }
0x4976   : > { %14635 = vmatmul.mubr.msk.f32.vlgmr.msra.gmra.mrb[62].mxu0 %vm1254_vm1, %v18010_v62 }
0x4977   : > { %14666 = vmatprep.mubr.msk.f32.mxu0 %vm16778_vm12, %v16779_v13  ;;  %15507 = vmatpush3.bf16.msra.mxu0 %v15506_v60 }
0x4978   : > { %15508 = vmatprep.subr.bf16.mxu0 %v16777_v48 }
0x497b   : > { %15510 = vmatpush3.bf16.msra.mxu0 %v15509_v61 }
0x497c   : > { %14664 = vmatprep.subr.mxu0 %v16779_v13 }
0x497f   : > { %14665 = vmatpush3.msk.msra.mxu0 %vm1261_vm0, %v8423_v3 }
0x4980   : > { %14667 = vmatmul.mubr.msk.f32.vlgmr.msra.gmra.mrb[64].mxu0 %vm1254_vm1, %v18025_v44  ;;  %15511 = vmatprep.subr.bf16.mxu0 %v16777_v48 }
0x4981   : > { %14679 = vmatprep.mubr.msk.f32.mxu0 %vm16778_vm12, %v16779_v13  ;;  %15513 = vmatpush3.bf16.msra.mxu0 %v15512_v56 }
0x4982   : > { %15514 = vmatprep.subr.bf16.mxu0 %v16777_v48 }
0x4985   : > { %15516 = vmatpush3.bf16.msra.mxu0 %v15515_v19 }
0x4986   : > { %14677 = vmatprep.subr.mxu0 %v16779_v13 }
0x4989   : > { %14678 = vmatpush3.msk.msra.mxu0 %vm1261_vm0, %v8515_v6  ;;  %v8695_v6 = vld [vmem:[%s18954_s6 + $0x8] sm:$0xff] }
0x4a49   : > { %v14636_v52 = vpop.f32.mrb[62].mxu0 }
0x4a4a   : > { %v8207_v22 = vadd.f32 %v14636_v52, %v13406_v51  ;;  %v8201_v23 = vpop.f32.mrb[63].mxu0 }
0x4a4b   : > { %v8202_v28 = vadd.f32 %v13406_v51, %v8201_v23 }
0x4a4c   : > { %v8211_v54 = vmax.f32 %v8207_v22, 0.0 }
0x4a4d   : > { %v8210_v11 = vmax.f32 %v8202_v28, 0.0 }
0x4a4f   : > { %14653 = vmatprep.mubr.msk.f32.mxu1 %vm3486_vm11, %v8210_v11 }
0x4a50   : > { %14654 = vmatmul.mubr.msk.f32.vlgmr.msra.gmra.mrb[66].mxu1 %vm3486_vm11, %v8211_v54 }
0x4a51   : > { %14692 = vmatprep.mubr.msk.f32.mxu1 %vm16778_vm12, %v16779_v13 }
0x4a53   : > { %v8507_v20 = vpop.f32.mrb[64].mxu0 }
0x4a54   : > { %v8508_v29 = vadd.f32 %v8507_v20, %v8434_v4  ;;  %v14668_v9 = vpop.f32.mrb[65].mxu0 }
0x4a56   : > { %14680 = vmatmul.mubr.msk.f32.vlgmr.msra.gmra.mrb[66].mxu0 %vm1254_vm1, %v8508_v29  ;;  %v8694_v29 = vld [vmem:[%s18954_s6] sm:$0xff] }
0x4a57   : > { %v15523_v9 = vpack.c.bf16 %v8695_v6, %v8694_v29 }
0x4a59   : > { %15524 = vmatprep.subr.bf16.mxu0 %v15523_v9 }
0x4a5a   : > { %15526 = vmatpush3.bf16.msra.mxu0 %v15523_v9 }
0x4b23   : > { %v14655_v15 = vpop.f32.mrb[66].mxu1 }
0x4b24   : > { %v8307_v16 = vadd.f32 %v14655_v15, %v13419_v14  ;;  %v8301_v0 = vpop.f32.mrb[67].mxu1  ;;  %v8613_v15 = vld [vmem:[%s18955_s12 + $0x8] sm:$0xff] }
0x4b25   : > { %v8302_v7 = vadd.f32 %v13419_v14, %v8301_v0  ;;  %v8612_v14 = vld [vmem:[%s18955_s12] sm:$0xff]  ;;  %v8696_v0 = vld [vmem:[%s18954_s6 + $0x10] sm:$0xff] }
0x4b26   : > { %v8311_v8 = vadd.f32 %v8307_v16, %v18010_v62  ;;  %v8516_v62 = vld [vmem:[%s18953_s3] sm:$0x1]  ;;  %v15518_v16 = vpack.c.bf16 %v8613_v15, %v8612_v14  ;;  %s18961_s3 = sld [smem:[#allocation29_spill]] }
0x4b27   : > { %v8310_v42 = vadd.f32 %v8302_v7, %v18006_v50  ;;  %v8697_v7 = vld [vmem:[%s18954_s6 + $0x18] sm:$0xff] }
0x4b28   : > { %v8319_v43 = vsel %vm1254_vm1, %v8311_v8, 0.0  ;;  %15519 = vmatpush3.bf16.msra.mxu1 %v15518_v16 }
0x4b29   : > { %8320 = vadd.xlane.f32.xlu1 %v8319_v43  ;;  %v8316_v24 = vsel %vm1254_vm1, %v8310_v42, 0.0  ;;  %v8589_v34 = vpop.f32.mrb[66].mxu0  ;;  %15520 = vmatprep.subr.bf16.mxu1 %v16777_v48  ;;  %v8615_v43 = vld [vmem:[%s18955_s12 + $0x18] sm:$0xff] }
0x4b2a   : > { %8317 = vadd.xlane.f32.xlu0 %v8316_v24  ;;  %v14681_v45 = vpop.f32.mrb[67].mxu0  ;;  %v8590_v38 = vadd.f32 %v8589_v34, %v8516_v62 }
0x4b2c   : > { %v8593_v49 = vadd.f32 %v8590_v38, %v18025_v44 }
0x4b2e   : > { %v8597_v51 = vsel %vm8596_vm13, %v8593_v49, 0.0 }
0x4bb6   : > { %v8321_v53 = vpop.xlane.xlu1 %8320 }
0x4bb7   : > { %v8323_v58 = vmul.f32 0.027777778, %v8321_v53  ;;  %v8318_v59 = vpop.xlane.xlu0 %8317  ;;  %v8698_v53 = vld [vmem:[%s18954_s6 + $0x20] sm:$0xf] }
0x4bb8   : > { %v8322_v12 = vmul.f32 0.027777778, %v8318_v59 }
0x4bb9   : > { %v8325_v41 = vsub.f32 %v8311_v8, %v8323_v58  ;;  %v8614_v8 = vld [vmem:[%s18955_s12 + $0x10] sm:$0xff]  ;;  %v8616_v58 = vld [vmem:[%s18955_s12 + $0x20] sm:$0xf]  ;;  %s18960_s12 = sld [smem:[#allocation27_spill]] }
0x4bba   : > { %v8324_v17 = vsub.f32 %v8310_v42, %v8322_v12  ;;  %v15527_v42 = vpack.c.bf16 %v8697_v7, %v8696_v0  ;;  %v15521_v24 = vpack.c.bf16 %v8615_v43, %v8614_v8 }
0x4bbb   : > { %v8327_v32 = vmul.f32 %v8325_v41, %v8325_v41 }
0x4bbc   : > { %v8326_v21 = vmul.f32 %v8324_v17, %v8324_v17  ;;  %15528 = vmatprep.subr.bf16.mxu0 %v15527_v42  ;;  %15522 = vmatpush3.bf16.msra.mxu1 %v15521_v24 }
0x4bbd   : > { %v8331_v33 = vsel %vm1254_vm1, %v8327_v32, 0.0  ;;  %15530 = vmatpush3.bf16.msra.mxu0 %v15527_v42  ;;  %14690 = vmatprep.subr.mxu1 %v16779_v13 }
0x4bbe   : > { %v8328_v27 = vsel %vm1254_vm1, %v8326_v21, 0.0  ;;  %14703 = vmatprep.subr.msk.mxu0 %vm1261_vm0, %v8698_v53 }
0x4bbf   : > { %8329 = vadd.xlane.f32.xlu0 %v8328_v27 }
0x4bc0   : > { %14691 = vmatpush3.msk.msra.mxu1 %vm1261_vm0, %v8616_v58 }
0x4bc1   : > { %14704 = vmatpush3.msk.msra.mxu0 %vm1261_vm0, %v8698_v53  ;;  %15531 = vmatprep.subr.bf16.mxu1 %v16777_v48 }
0x4bc2   : > { %15535 = vmatprep.subr.bf16.mxu0 %v16777_v48 }
0x4bc3   : > { %8332 = vadd.xlane.f32.xlu0 %v8331_v33 }
0x4c4c   : > { %v8330_v35 = vpop.xlane.xlu0 %8329 }
0x4c4d   : > { %v8334_v46 = vmul.f32 0.027777778, %v8330_v35  ;;  %v13426_v35 = vld [vmem:[%s18956_s19] ss:$0 sm:$0xff]  ;;  %s18962_s19 = smov 72  }
0x4c4f   : > { %v8336_v18 = vadd.f32 1e-05, %v8334_v46 }
0x4c50   : > { %v8333_v10 = vpop.xlane.xlu0 %8332 }
0x4c51   : > { %16547 = vrsqrt.f32 %v8336_v18  ;;  %v8335_v30 = vmul.f32 0.027777778, %v8333_v10  ;;  %v13427_v18 = vld [vmem:[%s18957_s24] ss:$0 sm:$0xff]  ;;  %s18963_s24 = smov 68  }
0x4c53   : > { %v8337_v50 = vadd.f32 1e-05, %v8335_v30 }
0x4c55   : > { %16549 = vrsqrt.f32 %v8337_v50  ;;  %v8594_v50 = vld [vmem:[%s18958_s29] sm:$0x1] }
0x4c5b   : > { %v16548_v31 = vpop.eup %16547 }
0x4c5c   : > { %v8340_v36 = vmul.f32 %v16548_v31, %v8324_v17 }
0x4c5e   : > { %v8348_v39 = vmul.f32 %v13424_v63, %v8340_v36 }
0x4c5f   : > { %v16550_v47 = vpop.eup %16549 }
0x4c60   : > { %v8356_v1 = vadd.f32 %v13425_v37, %v8348_v39  ;;  %v8341_v2 = vmul.f32 %v16550_v47, %v8325_v41 }
0x4c62   : > { %v8360_v57 = vsel %vm1254_vm1, %v8356_v1, 0.0  ;;  %v8349_v60 = vmul.f32 %v13424_v63, %v8341_v2  ;;  %v8617_v2 = vld [vmem:[%s18960_s12] sm:$0x1] }
0x4c63   : > { %8361 = vadd.xlane.f32.xlu1 %v8360_v57 }
0x4c64   : > { %v8357_v61 = vadd.f32 %v13425_v37, %v8349_v60  ;;  %v8595_v37 = vld [vmem:[%s18959_s30] sm:$0x1] }
0x4c66   : > { %v8363_v3 = vsel %vm1254_vm1, %v8357_v61, 0.0 }
0x4c67   : > { %8364 = vadd.xlane.f32.xlu0 %v8363_v3  ;;  %8598 = vadd.xlane.f32.xlu1 %v8597_v51 }
0x4cf0   : > { %v8362_v52 = vpop.xlane.xlu1 %8361 }
0x4cf1   : > { %v8366_v22 = vmul.f32 0.027777778, %v8362_v52 }
0x4cf3   : > { %v8368_v23 = vsub.f32 %v8356_v1, %v8366_v22 }
0x4cf4   : > { %v8365_v28 = vpop.xlane.xlu0 %8364  ;;  %v8599_v11 = vpop.xlane.xlu1 %8598 }
0x4cf5   : > { %v8367_v44 = vmul.f32 0.027777778, %v8365_v28  ;;  %v8600_v54 = vmul.f32 0.027777778, %v8599_v11  ;;  %v8370_v5 = vmul.f32 %v8368_v23, %v8368_v23 }
0x4cf7   : > { %v8369_v40 = vsub.f32 %v8357_v61, %v8367_v44  ;;  %v8601_v55 = vsub.f32 %v8593_v49, %v8600_v54  ;;  %v8372_v56 = vsel %vm1254_vm1, %v8370_v5, 0.0  ;;  %v13435_v49 = vld [vmem:[%s18961_s3] ss:$0 sm:$0xff] }
0x4cf8   : > { %8373 = vadd.xlane.f32.xlu0 %v8372_v56 }
0x4cf9   : > { %v8371_v26 = vmul.f32 %v8369_v40, %v8369_v40  ;;  %v8602_v19 = vmul.f32 %v8601_v55, %v8601_v55 }
0x4cfb   : > { %v8375_v4 = vsel %vm1254_vm1, %v8371_v26, 0.0  ;;  %v8603_v20 = vsel %vm8596_vm13, %v8602_v19, 0.0 }
0x4cfc   : > { %8376 = vadd.xlane.f32.xlu1 %v8375_v4  ;;  %8604 = vadd.xlane.f32.xlu0 %v8603_v20 }
0x4d85   : > { %v8374_v59 = vpop.xlane.xlu0 %8373 }
0x4d86   : > { %v8378_v12 = vmul.f32 0.027777778, %v8374_v59 }
0x4d88   : > { %v8380_v41 = vadd.f32 1e-05, %v8378_v12 }
0x4d89   : > { %v8605_v17 = vpop.xlane.xlu0 %8604  ;;  %v8377_v21 = vpop.xlane.xlu1 %8376 }
0x4d8a   : > { %16551 = vrsqrt.f32 %v8380_v41  ;;  %v8606_v27 = vmul.f32 0.027777778, %v8605_v17  ;;  %v8379_v32 = vmul.f32 0.027777778, %v8377_v21 }
0x4d8c   : > { %v8607_v33 = vadd.f32 1e-05, %v8606_v27  ;;  %v8381_v34 = vadd.f32 1e-05, %v8379_v32 }
0x4d8e   : > { %16553 = vrsqrt.f32 %v8607_v33 }
0x4d8f   : > { %16555 = vrsqrt.f32 %v8381_v34 }
0x4d94   : > { %v16552_v45 = vpop.eup %16551 }
0x4d95   : > { %v8384_v46 = vmul.f32 %v16552_v45, %v8368_v23 }
0x4d97   : > { %v8392_v10 = vmul.f32 %v13426_v35, %v8384_v46 }
0x4d98   : > { %v16554_v30 = vpop.eup %16553 }
0x4d99   : > { %v16556_v31 = vpop.eup %16555  ;;  %v8609_v62 = vmul.f32 %v16554_v30, %v8601_v55  ;;  %v18084_v63 = vadd.f32 %v13427_v18, %v8392_v10 }
0x4d9a   : > { %v8385_v36 = vmul.f32 %v16556_v31, %v8369_v40 }
0x4d9b   : > { %14705 = vmatprep.mubr.msk.f32.mxu0 %vm1254_vm1, %v18084_v63  ;;  %v8610_v38 = vmul.f32 %v8609_v62, %v8594_v50 }
0x4d9c   : > { %v8393_v39 = vmul.f32 %v13426_v35, %v8385_v36 }
0x4d9d   : > { %v18089_v47 = vadd.f32 %v8610_v38, %v8595_v37 }
0x4d9e   : > { %v18091_v1 = vadd.f32 %v13427_v18, %v8393_v39 }
0x4d9f   : > { %14693 = vmatmul.mubr.msk.f32.vlgmr.msra.gmra.mrb[68].mxu1 %vm1254_vm1, %v18089_v47 }
0x4da0   : > { %14706 = vmatmul.mubr.msk.f32.vlgmr.msra.gmra.mrb[68].mxu0 %vm1254_vm1, %v18091_v1  ;;  %14712 = vmatprep.mubr.msk.f32.mxu1 %vm16778_vm12, %v16779_v13 }
0x4da1   : > { %14719 = vmatprep.mubr.msk.f32.mxu0 %vm16778_vm12, %v16779_v13 }
0x4e72   : > { %v8690_v57 = vpop.f32.mrb[68].mxu1 }
0x4e73   : > { %v8691_v60 = vadd.f32 %v8690_v57, %v8617_v2  ;;  %v14707_v61 = vpop.f32.mrb[68].mxu0  ;;  %v14694_v3 = vpop.f32.mrb[69].mxu1 }
0x4e74   : > { %v8787_v51 = vadd.f32 %v14707_v61, %v13435_v49  ;;  %v8781_v52 = vpop.f32.mrb[69].mxu0 }
0x4e75   : > { %v18103_v22 = vmul.f32 0.5, %v8691_v60  ;;  %v8782_v23 = vadd.f32 %v13435_v49, %v8781_v52 }
0x4e77   : > { %8967 = vrot.lane.b32.xlu0 %v18103_v22, %s18910_s2  ;;  %v18107_v28 = vpack.i.bf16 %v8787_v51, %v8782_v23  ;;  %v15532_v11 = vpack.c.bf16 %v8787_v51, %v8782_v23 }
0x4e79   : > { %16132 = vrot.lane.b32.xlu1 %v18107_v28, %s18910_s2  ;;  %15534 = vmatpush3.bf16.xpose.msk.msra.mxu1 %vm17084_vm3, %v15532_v11 }
0x4e7a   : > { %15538 = vmatprep.subr.bf16.mxu1 %v16777_v48 }
0x4e80   : > { %14713 = vmatmul.mubr.msk.f32.vlgmr.msra.gmra.mrb[70].mxu1 %vm1354_vm2, %v18103_v22 }
0x4e81   : > { %14726 = vmatprep.mubr.msk.f32.mxu1 %vm16778_vm12, %v16779_v13 }
0x4ee9   : > { %v8968_v55 = vpop.permute.xlu0 %8967 }
0x4eeb   : > { %v16133_v44 = vpop.permute.xlu1 %16132 }
0x4eec   : > { %v16135_v54 = vunpack.i.h.bf16 %v16133_v44  ;;  %v16134_v5 = vunpack.i.l.bf16 %v16133_v44 }
0x4eee   : > { %v15539_v40 = vpack.c.bf16 %v16135_v54, %v16134_v5 }
0x4ef0   : > { %15541 = vmatpush3.bf16.xpose.msk.msra.mxu1 %vm17084_vm3, %v15539_v40 }
0x4ef1   : > { %15549 = vmatprep.subr.bf16.mxu1 %v16777_v48 }
0x4ef7   : > { %14727 = vmatmul.mubr.msk.f32.vlgmr.msra.gmra.mrb[72].mxu1 %vm1354_vm2, %v8968_v55 }
0x4ef8   : > { %14747 = vmatprep.mubr.msk.f32.mxu1 %vm16778_vm12, %v16779_v13 }
0x4f53   : > { %v8872_v56 = vpop.f32.mrb[70].mxu1 }
0x4f54   : > { %v14714_v26 = vpop.f32.mrb[71].mxu1  ;;  %v8877_v19 = vsel %vm8876_vm14, %v8872_v56, -inf }
0x4f55   : > { %8878 = vmax.xlane.f32.xlu1 %v8877_v19 }
0x4f66   : > { %16137 = vrot.lane.b32.xlu1 %v18107_v28, %s18908_s5 }
0x4fca   : > { %v9045_v4 = vpop.f32.mrb[72].mxu1 }
0x4fcb   : > { %v14728_v20 = vpop.f32.mrb[73].mxu1  ;;  %v9049_v29 = vsel %vm8876_vm14, %v9045_v4, -inf }
0x4fcc   : > { %9050 = vmax.xlane.f32.xlu0 %v9049_v29 }
0x4fe2   : > { %v8879_v6 = vpop.xlane.xlu1 %8878 }
0x4fe3   : > { %v8880_v9 = vsub.f32 %v8872_v56, %v8879_v6 }
0x4fe5   : > { %v8881_v14 = vmul.f32 1.442695, %v8880_v9 }
0x4fe6   : > { %v16138_v15 = vpop.permute.xlu1 %16137 }
0x4fe7   : > { %16557 = vpow2.f32 %v8881_v14  ;;  %v16140_v16 = vunpack.i.h.bf16 %v16138_v15  ;;  %v16139_v0 = vunpack.i.l.bf16 %v16138_v15 }
0x4fe9   : > { %v15536_v7 = vpack.c.bf16 %v16140_v16, %v16139_v0 }
0x4feb   : > { %15537 = vmatpush3.bf16.msra.mxu0 %v15536_v7 }
0x4fec   : > { %15542 = vmatprep.subr.bf16.mxu0 %v16777_v48 }
0x4ff1   : > { %v16558_v8 = vpop.eup %16557 }
0x4ff2   : > { %v8883_v42 = vsel %vm8876_vm14, %v16558_v8, 0.0 }
0x4ff3   : > { %8884 = vadd.xlane.f32.xlu1 %v8883_v42 }
0x5004   : > { %16147 = vrot.lane.b32.xlu1 %v18107_v28, %s18914_s18 }
0x5008   : > { %9139 = vrot.lane.b32.xlu1 %v18103_v22, %s18914_s18 }
0x5059   : > { %v9051_v43 = vpop.xlane.xlu0 %9050 }
0x505a   : > { %v9052_v24 = vsub.f32 %v9045_v4, %v9051_v43 }
0x505c   : > { %v9053_v53 = vmul.f32 1.442695, %v9052_v24 }
0x505e   : > { %16559 = vpow2.f32 %v9053_v53 }
0x5068   : > { %v16560_v58 = vpop.eup %16559 }
0x5069   : > { %v9055_v59 = vsel %vm8876_vm14, %v16560_v58, 0.0 }
0x506a   : > { %9056 = vadd.xlane.f32.xlu0 %v9055_v59 }
0x5080   : > { %v8885_v12 = vpop.xlane.xlu1 %8884  ;;  %16142 = vrot.lane.b32.xlu0 %v18107_v28, %s18911_s9 }
0x5081   : > { %16561 = vrcp.f32 %v8885_v12 }
0x5084   : > { %v16148_v45 = vpop.permute.xlu1 %16147 }
0x5085   : > { %v16150_v46 = vunpack.i.h.bf16 %v16148_v45  ;;  %v16149_v18 = vunpack.i.l.bf16 %v16148_v45 }
0x5087   : > { %v15546_v30 = vpack.c.bf16 %v16150_v46, %v16149_v18 }
0x5088   : > { %v9140_v50 = vpop.permute.xlu1 %9139 }
0x508b   : > { %v16562_v41 = vpop.eup %16561 }
0x508c   : > { %v8887_v17 = vmul.f32 %v16562_v41, %v16558_v8 }
0x508e   : > { %14720 = vmatmul.mubr.msk.f32.vlgmr.msra.gmra.mrb[70].mxu0 %vm1440_vm4, %v8887_v17 }
0x508f   : > { %14733 = vmatprep.mubr.msk.f32.mxu0 %vm16778_vm12, %v16779_v13 }
0x50f7   : > { %v9057_v21 = vpop.xlane.xlu0 %9056 }
0x50f8   : > { %16563 = vrcp.f32 %v9057_v21 }
0x50fb   : > { %v16143_v27 = vpop.permute.xlu0 %16142 }
0x50fc   : > { %v16145_v32 = vunpack.i.h.bf16 %v16143_v27  ;;  %v16144_v33 = vunpack.i.l.bf16 %v16143_v27 }
0x50fe   : > { %v15543_v34 = vpack.c.bf16 %v16145_v32, %v16144_v33 }
0x5100   : > { %15544 = vmatpush3.bf16.msra.mxu0 %v15543_v34 }
0x5101   : > { %15545 = vmatprep.subr.bf16.mxu0 %v16777_v48 }
0x5102   : > { %v16564_v35 = vpop.eup %16563 }
0x5103   : > { %v9059_v10 = vmul.f32 %v16564_v35, %v16560_v58 }
0x5105   : > { %14734 = vmatmul.mubr.msk.f32.vlgmr.msra.gmra.mrb[72].mxu0 %vm1440_vm4, %v9059_v10 }
0x5106   : > { %14740 = vmatprep.mubr.msk.f32.mxu0 %vm16778_vm12, %v16779_v13 }
0x5109   : > { %15548 = vmatpush3.bf16.xpose.msk.msra.mxu0 %vm17084_vm3, %v15546_v30 }
0x510a   : > { %15556 = vmatprep.subr.bf16.mxu0 %v16777_v48 }
0x5110   : > { %14741 = vmatmul.mubr.msk.f32.vlgmr.msra.gmra.mrb[74].mxu0 %vm1354_vm2, %v9140_v50 }
0x5111   : > { %14761 = vmatprep.mubr.msk.f32.mxu0 %vm16778_vm12, %v16779_v13 }
0x5161   : > { %v18150_v31 = vpop.f32.mrb[70].mxu0 }
0x5162   : > { %v14721_v62 = vpop.f32.mrb[71].mxu0 }
0x51d8   : > { %v18152_v36 = vpop.f32.mrb[72].mxu0 }
0x51d9   : > { %v14735_v37 = vpop.f32.mrb[73].mxu0 }
0x51e3   : > { %v9217_v38 = vpop.f32.mrb[74].mxu0 }
0x51e4   : > { %v14742_v39 = vpop.f32.mrb[75].mxu0  ;;  %v9221_v2 = vsel %vm8876_vm14, %v9217_v38, -inf }
0x51e5   : > { %9222 = vmax.xlane.f32.xlu0 %v9221_v2 }
0x51fb   : > { %16152 = vrot.lane.b32.xlu0 %v18107_v28, %s18912_s26 }
0x51ff   : > { %9311 = vrot.lane.b32.xlu0 %v18103_v22, %s18916_s7 }
0x5272   : > { %v9223_v49 = vpop.xlane.xlu0 %9222 }
0x5273   : > { %v9224_v57 = vsub.f32 %v9217_v38, %v9223_v49 }
0x5275   : > { %v9225_v60 = vmul.f32 1.442695, %v9224_v57 }
0x5276   : > { %v16153_v61 = vpop.permute.xlu0 %16152 }
0x5277   : > { %16565 = vpow2.f32 %v9225_v60  ;;  %v16155_v3 = vunpack.i.h.bf16 %v16153_v61  ;;  %v16154_v51 = vunpack.i.l.bf16 %v16153_v61 }
0x5279   : > { %v15550_v52 = vpack.c.bf16 %v16155_v3, %v16154_v51 }
0x527a   : > { %v9312_v19 = vpop.permute.xlu0 %9311 }
0x527b   : > { %15551 = vmatpush3.bf16.msra.mxu1 %v15550_v52 }
0x527c   : > { %15552 = vmatprep.subr.bf16.mxu1 %v16777_v48 }
0x5281   : > { %v16566_v23 = vpop.eup %16565 }
0x5282   : > { %v9227_v11 = vsel %vm8876_vm14, %v16566_v23, 0.0 }
0x5283   : > { %9228 = vadd.xlane.f32.xlu1 %v9227_v11 }
0x5294   : > { %16157 = vrot.lane.b32.xlu1 %v18107_v28, %s18916_s7 }
0x5310   : > { %v9229_v44 = vpop.xlane.xlu1 %9228 }
0x5311   : > { %16567 = vrcp.f32 %v9229_v44 }
0x5314   : > { %v16158_v54 = vpop.permute.xlu1 %16157 }
0x5315   : > { %v16160_v5 = vunpack.i.h.bf16 %v16158_v54  ;;  %v16159_v40 = vunpack.i.l.bf16 %v16158_v54 }
0x5317   : > { %v15553_v26 = vpack.c.bf16 %v16160_v5, %v16159_v40 }
0x531b   : > { %v16568_v55 = vpop.eup %16567 }
0x531c   : > { %v9231_v56 = vmul.f32 %v16568_v55, %v16566_v23 }
0x531e   : > { %14748 = vmatmul.mubr.msk.f32.vlgmr.msra.gmra.mrb[74].mxu1 %vm1440_vm4, %v9231_v56 }
0x531f   : > { %15555 = vmatpush3.bf16.xpose.msk.msra.mxu1 %vm17084_vm3, %v15553_v26  ;;  %14754 = vmatprep.mubr.msk.f32.mxu1 %vm16778_vm12, %v16779_v13 }
0x5320   : > { %15563 = vmatprep.subr.bf16.mxu1 %v16777_v48 }
0x5326   : > { %14755 = vmatmul.mubr.msk.f32.vlgmr.msra.gmra.mrb[76].mxu1 %vm1354_vm2, %v9312_v19 }
0x5327   : > { %14775 = vmatprep.mubr.msk.f32.mxu1 %vm16778_vm12, %v16779_v13 }
0x53f1   : > { %v18172_v4 = vpop.f32.mrb[74].mxu1 }
0x53f2   : > { %v14749_v20 = vpop.f32.mrb[75].mxu1 }
0x53f9   : > { %v9389_v29 = vpop.f32.mrb[76].mxu1 }
0x53fa   : > { %v14756_v6 = vpop.f32.mrb[77].mxu1  ;;  %v9393_v9 = vsel %vm8876_vm14, %v9389_v29, -inf }
0x53fb   : > { %9394 = vmax.xlane.f32.xlu1 %v9393_v9 }
0x540c   : > { %16167 = vrot.lane.b32.xlu1 %v18107_v28, %s18919_s4 }
0x5410   : > { %9483 = vrot.lane.b32.xlu1 %v18103_v22, %s18919_s4 }
0x5488   : > { %v9395_v14 = vpop.xlane.xlu1 %9394 }
0x5489   : > { %v9396_v15 = vsub.f32 %v9389_v29, %v9395_v14 }
0x548b   : > { %v9397_v16 = vmul.f32 1.442695, %v9396_v15 }
0x548c   : > { %v16168_v58 = vpop.permute.xlu1 %16167 }
0x548d   : > { %16569 = vpow2.f32 %v9397_v16  ;;  %v16170_v12 = vunpack.i.h.bf16 %v16168_v58  ;;  %v16169_v41 = vunpack.i.l.bf16 %v16168_v58 }
0x548f   : > { %v15560_v21 = vpack.c.bf16 %v16170_v12, %v16169_v41 }
0x5490   : > { %v9484_v27 = vpop.permute.xlu1 %9483 }
0x5497   : > { %v16570_v0 = vpop.eup %16569 }
0x5498   : > { %v9399_v7 = vsel %vm8876_vm14, %v16570_v0, 0.0 }
0x5499   : > { %9400 = vadd.xlane.f32.xlu0 %v9399_v7 }
0x54af   : > { %16162 = vrot.lane.b32.xlu0 %v18107_v28, %s18915_s1 }
0x5526   : > { %v9401_v8 = vpop.xlane.xlu0 %9400 }
0x5527   : > { %16571 = vrcp.f32 %v9401_v8 }
0x552a   : > { %v16163_v42 = vpop.permute.xlu0 %16162 }
0x552b   : > { %v16165_v43 = vunpack.i.h.bf16 %v16163_v42  ;;  %v16164_v24 = vunpack.i.l.bf16 %v16163_v42 }
0x552d   : > { %v15557_v53 = vpack.c.bf16 %v16165_v43, %v16164_v24 }
0x552f   : > { %15558 = vmatpush3.bf16.msra.mxu0 %v15557_v53 }
0x5530   : > { %15559 = vmatprep.subr.bf16.mxu0 %v16777_v48 }
0x5531   : > { %v16572_v59 = vpop.eup %16571 }
0x5532   : > { %v9403_v17 = vmul.f32 %v16572_v59, %v16570_v0 }
0x5534   : > { %14762 = vmatmul.mubr.msk.f32.vlgmr.msra.gmra.mrb[76].mxu0 %vm1440_vm4, %v9403_v17 }
0x5535   : > { %14768 = vmatprep.mubr.msk.f32.mxu0 %vm16778_vm12, %v16779_v13 }
0x5538   : > { %15562 = vmatpush3.bf16.xpose.msk.msra.mxu0 %vm17084_vm3, %v15560_v21 }
0x5539   : > { %15570 = vmatprep.subr.bf16.mxu0 %v16777_v48 }
0x553f   : > { %14769 = vmatmul.mubr.msk.f32.vlgmr.msra.gmra.mrb[78].mxu0 %vm1354_vm2, %v9484_v27 }
0x5540   : > { %14789 = vmatprep.mubr.msk.f32.mxu0 %vm16778_vm12, %v16779_v13 }
0x5607   : > { %v18192_v32 = vpop.f32.mrb[76].mxu0 }
0x5608   : > { %v14763_v33 = vpop.f32.mrb[77].mxu0 }
0x5612   : > { %v9561_v34 = vpop.f32.mrb[78].mxu0 }
0x5613   : > { %v14770_v45 = vpop.f32.mrb[79].mxu0  ;;  %v9565_v35 = vsel %vm8876_vm14, %v9561_v34, -inf }
0x5614   : > { %9566 = vmax.xlane.f32.xlu0 %v9565_v35 }
0x562a   : > { %16172 = vrot.lane.b32.xlu0 %v18107_v28, %s18918_s28 }
0x562e   : > { %9655 = vrot.lane.b32.xlu0 %v18103_v22, %s18939_s11 }
0x56a1   : > { %v9567_v46 = vpop.xlane.xlu0 %9566 }
0x56a2   : > { %v9568_v18 = vsub.f32 %v9561_v34, %v9567_v46 }
0x56a4   : > { %v9569_v10 = vmul.f32 1.442695, %v9568_v18 }
0x56a5   : > { %v16173_v30 = vpop.permute.xlu0 %16172 }
0x56a6   : > { %16573 = vpow2.f32 %v9569_v10  ;;  %v16175_v50 = vunpack.i.h.bf16 %v16173_v30  ;;  %v16174_v62 = vunpack.i.l.bf16 %v16173_v30 }
0x56a8   : > { %v15564_v37 = vpack.c.bf16 %v16175_v50, %v16174_v62 }
0x56a9   : > { %v9656_v52 = vpop.permute.xlu0 %9655 }
0x56aa   : > { %15565 = vmatpush3.bf16.msra.mxu1 %v15564_v37 }
0x56ab   : > { %15566 = vmatprep.subr.bf16.mxu1 %v16777_v48 }
0x56b0   : > { %v16574_v38 = vpop.eup %16573 }
0x56b1   : > { %v9571_v39 = vsel %vm8876_vm14, %v16574_v38, 0.0 }
0x56b2   : > { %9572 = vadd.xlane.f32.xlu1 %v9571_v39 }
0x56c3   : > { %16177 = vrot.lane.b32.xlu1 %v18107_v28, %s18939_s11 }
0x573f   : > { %v9573_v2 = vpop.xlane.xlu1 %9572 }
0x5740   : > { %16575 = vrcp.f32 %v9573_v2 }
0x5743   : > { %v16178_v49 = vpop.permute.xlu1 %16177 }
0x5744   : > { %v16180_v57 = vunpack.i.h.bf16 %v16178_v49  ;;  %v16179_v60 = vunpack.i.l.bf16 %v16178_v49 }
0x5746   : > { %v15567_v51 = vpack.c.bf16 %v16180_v57, %v16179_v60 }
0x574a   : > { %v16576_v61 = vpop.eup %16575 }
0x574b   : > { %v9575_v3 = vmul.f32 %v16576_v61, %v16574_v38 }
0x574d   : > { %14776 = vmatmul.mubr.msk.f32.vlgmr.msra.gmra.mrb[78].mxu1 %vm1440_vm4, %v9575_v3 }
0x574e   : > { %15569 = vmatpush3.bf16.xpose.msk.msra.mxu1 %vm17084_vm3, %v15567_v51  ;;  %14782 = vmatprep.mubr.msk.f32.mxu1 %vm16778_vm12, %v16779_v13 }
0x574f   : > { %15577 = vmatprep.subr.bf16.mxu1 %v16777_v48 }
0x5755   : > { %14783 = vmatmul.mubr.msk.f32.vlgmr.msra.gmra.mrb[80].mxu1 %vm1354_vm2, %v9656_v52 }
0x5756   : > { %14803 = vmatprep.mubr.msk.f32.mxu1 %vm16778_vm12, %v16779_v13 }
0x5820   : > { %v18212_v23 = vpop.f32.mrb[78].mxu1 }
0x5821   : > { %v14777_v11 = vpop.f32.mrb[79].mxu1 }
0x5828   : > { %v9733_v44 = vpop.f32.mrb[80].mxu1 }
0x5829   : > { %v14784_v54 = vpop.f32.mrb[81].mxu1  ;;  %v9737_v5 = vsel %vm8876_vm14, %v9733_v44, -inf }
0x582a   : > { %9738 = vmax.xlane.f32.xlu1 %v9737_v5 }
0x583b   : > { %16187 = vrot.lane.b32.xlu1 %v18107_v28, %s18942_s21 }
0x583f   : > { %9827 = vrot.lane.b32.xlu1 %v18103_v22, %s18942_s21  ;;  %s18964_s21 = smov 100  }
0x58b7   : > { %v9739_v40 = vpop.xlane.xlu1 %9738 }
0x58b8   : > { %v9740_v55 = vsub.f32 %v9733_v44, %v9739_v40 }
0x58ba   : > { %v9741_v56 = vmul.f32 1.442695, %v9740_v55 }
0x58bb   : > { %v16188_v15 = vpop.permute.xlu1 %16187 }
0x58bc   : > { %16577 = vpow2.f32 %v9741_v56  ;;  %v16190_v0 = vunpack.i.h.bf16 %v16188_v15  ;;  %v16189_v7 = vunpack.i.l.bf16 %v16188_v15 }
0x58be   : > { %v15574_v42 = vpack.c.bf16 %v16190_v0, %v16189_v7 }
0x58bf   : > { %v9828_v43 = vpop.permute.xlu1 %9827 }
0x58c6   : > { %v16578_v26 = vpop.eup %16577 }
0x58c7   : > { %v9743_v19 = vsel %vm8876_vm14, %v16578_v26, 0.0 }
0x58c8   : > { %9744 = vadd.xlane.f32.xlu0 %v9743_v19 }
0x58de   : > { %16182 = vrot.lane.b32.xlu0 %v18107_v28, %s18962_s19 }
0x5955   : > { %v9745_v20 = vpop.xlane.xlu0 %9744 }
0x5956   : > { %16579 = vrcp.f32 %v9745_v20 }
0x5959   : > { %v16183_v29 = vpop.permute.xlu0 %16182 }
0x595a   : > { %v16185_v6 = vunpack.i.h.bf16 %v16183_v29  ;;  %v16184_v9 = vunpack.i.l.bf16 %v16183_v29 }
0x595c   : > { %v15571_v14 = vpack.c.bf16 %v16185_v6, %v16184_v9 }
0x595e   : > { %15572 = vmatpush3.bf16.msra.mxu0 %v15571_v14 }
0x595f   : > { %15573 = vmatprep.subr.bf16.mxu0 %v16777_v48 }
0x5960   : > { %v16580_v16 = vpop.eup %16579 }
0x5961   : > { %v9747_v8 = vmul.f32 %v16580_v16, %v16578_v26 }
0x5963   : > { %14790 = vmatmul.mubr.msk.f32.vlgmr.msra.gmra.mrb[80].mxu0 %vm1440_vm4, %v9747_v8 }
0x5964   : > { %14796 = vmatprep.mubr.msk.f32.mxu0 %vm16778_vm12, %v16779_v13 }
0x5967   : > { %15576 = vmatpush3.bf16.xpose.msk.msra.mxu0 %vm17084_vm3, %v15574_v42 }
0x5968   : > { %15584 = vmatprep.subr.bf16.mxu0 %v16777_v48 }
0x596e   : > { %14797 = vmatmul.mubr.msk.f32.vlgmr.msra.gmra.mrb[82].mxu0 %vm1354_vm2, %v9828_v43 }
0x596f   : > { %14817 = vmatprep.mubr.msk.f32.mxu0 %vm16778_vm12, %v16779_v13 }
0x5a36   : > { %v18232_v24 = vpop.f32.mrb[80].mxu0 }
0x5a37   : > { %v14791_v53 = vpop.f32.mrb[81].mxu0 }
0x5a41   : > { %v9905_v58 = vpop.f32.mrb[82].mxu0 }
0x5a42   : > { %v14798_v59 = vpop.f32.mrb[83].mxu0  ;;  %v9909_v12 = vsel %vm8876_vm14, %v9905_v58, -inf }
0x5a43   : > { %9910 = vmax.xlane.f32.xlu0 %v9909_v12 }
0x5a59   : > { %16192 = vrot.lane.b32.xlu0 %v18107_v28, %s18963_s24  ;;  %s18965_s24 = smov 64  }
0x5a5d   : > { %9999 = vrot.lane.b32.xlu0 %v18103_v22, %s18964_s21 }
0x5ad0   : > { %v9911_v41 = vpop.xlane.xlu0 %9910 }
0x5ad1   : > { %v9912_v17 = vsub.f32 %v9905_v58, %v9911_v41 }
0x5ad3   : > { %v9913_v21 = vmul.f32 1.442695, %v9912_v17 }
0x5ad4   : > { %v16193_v27 = vpop.permute.xlu0 %16192 }
0x5ad5   : > { %16581 = vpow2.f32 %v9913_v21  ;;  %v16195_v33 = vunpack.i.h.bf16 %v16193_v27  ;;  %v16194_v34 = vunpack.i.l.bf16 %v16193_v27 }
0x5ad7   : > { %v15578_v45 = vpack.c.bf16 %v16195_v33, %v16194_v34 }
0x5ad8   : > { %v10000_v39 = vpop.permute.xlu0 %9999 }
0x5ad9   : > { %15579 = vmatpush3.bf16.msra.mxu1 %v15578_v45 }
0x5ada   : > { %15580 = vmatprep.subr.bf16.mxu1 %v16777_v48 }
0x5adf   : > { %v16582_v35 = vpop.eup %16581 }
0x5ae0   : > { %v9915_v46 = vsel %vm8876_vm14, %v16582_v35, 0.0 }
0x5ae1   : > { %9916 = vadd.xlane.f32.xlu1 %v9915_v46 }
0x5af2   : > { %16197 = vrot.lane.b32.xlu1 %v18107_v28, %s18964_s21 }
0x5b6e   : > { %v9917_v18 = vpop.xlane.xlu1 %9916 }
0x5b6f   : > { %16583 = vrcp.f32 %v9917_v18 }
0x5b72   : > { %v16198_v10 = vpop.permute.xlu1 %16197 }
0x5b73   : > { %v16200_v30 = vunpack.i.h.bf16 %v16198_v10  ;;  %v16199_v50 = vunpack.i.l.bf16 %v16198_v10 }
0x5b75   : > { %v15581_v38 = vpack.c.bf16 %v16200_v30, %v16199_v50 }
0x5b79   : > { %v16584_v62 = vpop.eup %16583 }
0x5b7a   : > { %v9919_v37 = vmul.f32 %v16584_v62, %v16582_v35 }
0x5b7c   : > { %14804 = vmatmul.mubr.msk.f32.vlgmr.msra.gmra.mrb[82].mxu1 %vm1440_vm4, %v9919_v37 }
0x5b7d   : > { %15583 = vmatpush3.bf16.xpose.msk.msra.mxu1 %vm17084_vm3, %v15581_v38  ;;  %14810 = vmatprep.mubr.msk.f32.mxu1 %vm16778_vm12, %v16779_v13 }
0x5b7e   : > { %15591 = vmatprep.subr.bf16.mxu1 %v16777_v48 }
0x5b84   : > { %14811 = vmatmul.mubr.msk.f32.vlgmr.msra.gmra.mrb[84].mxu1 %vm1354_vm2, %v10000_v39 }
0x5b85   : > { %14831 = vmatprep.mubr.msk.f32.mxu1 %vm16778_vm12, %v16779_v13 }
0x5c4f   : > { %v9995_v2 = vpop.f32.mrb[82].mxu1 }
0x5c50   : > { %v14805_v49 = vpop.f32.mrb[83].mxu1 }
0x5c57   : > { %v10077_v57 = vpop.f32.mrb[84].mxu1 }
0x5c58   : > { %v14812_v60 = vpop.f32.mrb[85].mxu1  ;;  %v10081_v61 = vsel %vm8876_vm14, %v10077_v57, -inf }
0x5c59   : > { %10082 = vmax.xlane.f32.xlu1 %v10081_v61 }
0x5c6a   : > { %16207 = vrot.lane.b32.xlu1 %v18107_v28, %s18947_s17 }
0x5c6e   : > { %10171 = vrot.lane.b32.xlu1 %v18103_v22, %s18947_s17  ;;  %s18966_s17 = smov 60  }
0x5ce6   : > { %v10083_v3 = vpop.xlane.xlu1 %10082 }
0x5ce7   : > { %v10084_v51 = vsub.f32 %v10077_v57, %v10083_v3 }
0x5ce9   : > { %v10085_v52 = vmul.f32 1.442695, %v10084_v51 }
0x5cea   : > { %v16208_v26 = vpop.permute.xlu1 %16207 }
0x5ceb   : > { %16585 = vpow2.f32 %v10085_v52  ;;  %v16210_v19 = vunpack.i.h.bf16 %v16208_v26  ;;  %v16209_v20 = vunpack.i.l.bf16 %v16208_v26 }
0x5ced   : > { %v15588_v6 = vpack.c.bf16 %v16210_v19, %v16209_v20 }
0x5cee   : > { %v10172_v9 = vpop.permute.xlu1 %10171 }
0x5cf5   : > { %v16586_v11 = vpop.eup %16585 }
0x5cf6   : > { %v10087_v44 = vsel %vm8876_vm14, %v16586_v11, 0.0 }
0x5cf7   : > { %10088 = vadd.xlane.f32.xlu0 %v10087_v44 }
0x5d0d   : > { %16202 = vrot.lane.b32.xlu0 %v18107_v28, %s18965_s24  ;;  %s18967_s24 = sld [smem:[#allocation30_spill]] }
0x5d13   : > { %v8790_v21 = vld [vmem:[%s18967_s24] sm:$0xff]  ;;  %v8792_v27 = vld [vmem:[%s18967_s24 + $0x10] sm:$0xff] }
0x5d84   : > { %v10089_v54 = vpop.xlane.xlu0 %10088 }
0x5d85   : > { %16587 = vrcp.f32 %v10089_v54 }
0x5d88   : > { %v16203_v5 = vpop.permute.xlu0 %16202 }
0x5d89   : > { %v16205_v40 = vunpack.i.h.bf16 %v16203_v5  ;;  %v16204_v55 = vunpack.i.l.bf16 %v16203_v5 }
0x5d8b   : > { %v15585_v56 = vpack.c.bf16 %v16205_v40, %v16204_v55 }
0x5d8d   : > { %15586 = vmatpush3.bf16.msra.mxu0 %v15585_v56 }
0x5d8e   : > { %15587 = vmatprep.subr.bf16.mxu0 %v16777_v48 }
0x5d8f   : > { %v16588_v22 = vpop.eup %16587 }
0x5d90   : > { %v10091_v29 = vmul.f32 %v16588_v22, %v16586_v11 }
0x5d92   : > { %14818 = vmatmul.mubr.msk.f32.vlgmr.msra.gmra.mrb[84].mxu0 %vm1440_vm4, %v10091_v29 }
0x5d93   : > { %14824 = vmatprep.mubr.msk.f32.mxu0 %vm16778_vm12, %v16779_v13 }
0x5d96   : > { %15590 = vmatpush3.bf16.xpose.msk.msra.mxu0 %vm17084_vm3, %v15588_v6 }
0x5d97   : > { %15600 = vmatprep.subr.bf16.mxu0 %v16777_v48 }
0x5d9d   : > { %14825 = vmatmul.mubr.msk.f32.vlgmr.msra.gmra.mrb[86].mxu0 %vm1354_vm2, %v10172_v9 }
0x5d9e   : > { %14857 = vmatprep.mubr.msk.f32.mxu0 %vm16778_vm12, %v16779_v13 }
0x5e65   : > { %v10167_v14 = vpop.f32.mrb[84].mxu0 }
0x5e66   : > { %v14819_v15 = vpop.f32.mrb[85].mxu0 }
0x5e70   : > { %v10249_v16 = vpop.f32.mrb[86].mxu0 }
0x5e71   : > { %v14826_v0 = vpop.f32.mrb[87].mxu0  ;;  %v10253_v7 = vsel %vm8876_vm14, %v10249_v16, -inf }
0x5e72   : > { %10254 = vmax.xlane.f32.xlu0 %v10253_v7 }
0x5e88   : > { %16212 = vrot.lane.b32.xlu0 %v18107_v28, %s18966_s17  ;;  %s18975_s17 = sld [smem:[#allocation41_spill]] }
0x5e8c   : > { %10348 = vrot.lane.b32.xlu0 %v18172_v4, %s18933_s20 }
0x5e90   : > { %10356 = vrot.lane.b32.xlu0 %v18212_v23, %s18935_s0 }
0x5e94   : > { %10364 = vrot.lane.b32.xlu0 %v9995_v2, %s18932_s13 }
0x5eff   : > { %v10255_v8 = vpop.xlane.xlu0 %10254 }
0x5f00   : > { %v10256_v42 = vsub.f32 %v10249_v16, %v10255_v8 }
0x5f02   : > { %v10257_v43 = vmul.f32 1.442695, %v10256_v42 }
0x5f03   : > { %v16213_v53 = vpop.permute.xlu0 %16212 }
0x5f04   : > { %16589 = vpow2.f32 %v10257_v43  ;;  %v16215_v58 = vunpack.i.h.bf16 %v16213_v53  ;;  %v16214_v59 = vunpack.i.l.bf16 %v16213_v53 }
0x5f06   : > { %v15592_v12 = vpack.c.bf16 %v16215_v58, %v16214_v59 }
0x5f07   : > { %v10349_v18 = vpop.permute.xlu0 %10348 }
0x5f08   : > { %15593 = vmatpush3.bf16.msra.mxu1 %v15592_v12 }
0x5f09   : > { %15594 = vmatprep.subr.bf16.mxu1 %v16777_v48 }
0x5f0b   : > { %v10357_v50 = vpop.permute.xlu0 %10356 }
0x5f0e   : > { %v16590_v28 = vpop.eup %16589 }
0x5f0f   : > { %v10259_v4 = vsel %vm8876_vm14, %v16590_v28, 0.0  ;;  %v10365_v2 = vpop.permute.xlu0 %10364 }
0x5f10   : > { %10260 = vadd.xlane.f32.xlu1 %v10259_v4 }
0x5f21   : > { %10344 = vrot.lane.b32.xlu1 %v18152_v36, %s18948_s15  ;;  %v8791_v36 = vld [vmem:[%s18967_s24 + $0x8] sm:$0xff] }
0x5f22   : > { %v15595_v33 = vpack.c.bf16 %v8791_v36, %v8790_v21 }
0x5f25   : > { %10352 = vrot.lane.b32.xlu1 %v18192_v32, %s18934_s27  ;;  %v8793_v32 = vld [vmem:[%s18967_s24 + $0x18] sm:$0xff]  ;;  %s18973_s27 = sld [smem:[#allocation35_spill]] }
0x5f26   : > { %v15598_v34 = vpack.c.bf16 %v8793_v32, %v8792_v27 }
0x5f29   : > { %10360 = vrot.lane.b32.xlu1 %v18232_v24, %s18936_s10  ;;  %v8794_v24 = vld [vmem:[%s18967_s24 + $0x20] sm:$0xf]  ;;  %s18970_s10 = sld [smem:[#allocation40_spill]] }
0x5f2d   : > { %10368 = vrot.lane.b32.xlu1 %v10167_v14, %s18906_s23  ;;  %s18968_s23 = sld [smem:[#allocation31_spill]] }
0x5f2f   : > { %s18971_s24 = smov %s18970_s10  ;;  %v10560_v15 = vld [vmem:[%s18970_s10] sm:$0xff]  ;;  %s18974_s10 = sld [smem:[#allocation39_spill]] }
0x5f30   : > { %v10561_v16 = vld [vmem:[%s18971_s24 + $0x8] sm:$0xff]  ;;  %v10562_v0 = vld [vmem:[%s18971_s24 + $0x10] sm:$0xff]  ;;  %v10563_v8 = vld [vmem:[%s18971_s24 + $0x18] sm:$0xff] }
0x5f31   : > { %v15607_v7 = vpack.c.bf16 %v10561_v16, %v10560_v15  ;;  %v15610_v42 = vpack.c.bf16 %v10563_v8, %v10562_v0  ;;  %v10564_v43 = vld [vmem:[%s18971_s24 + $0x20] sm:$0xff]  ;;  %v10565_v53 = vld [vmem:[%s18971_s24 + $0x28] sm:$0xff]  ;;  %v10566_v27 = vld [vmem:[%s18971_s24 + $0x30] sm:$0xff] }
0x5f32   : > { %v15613_v58 = vpack.c.bf16 %v10565_v53, %v10564_v43  ;;  %v13489_v16 = vld [vmem:[%s18952_s8 + $0x28] sm:$0xff]  ;;  %v13490_v0 = vld [vmem:[%s18952_s8 + $0x30] sm:$0xff]  ;;  %v13491_v53 = vld [vmem:[%s18952_s8 + $0x38] sm:$0xff] }
0x5f9d   : > { %v10261_v23 = vpop.xlane.xlu1 %10260 }
0x5f9e   : > { %16591 = vrcp.f32 %v10261_v23 }
0x5fa1   : > { %v10345_v46 = vpop.permute.xlu1 %10344 }
0x5fa2   : > { %v10375_v30 = vsel %vm1354_vm2, %v18150_v31, %v10345_v46  ;;  %v8795_v31 = vld [vmem:[%s18968_s23] sm:$0x1]  ;;  %s18972_s23 = sld [smem:[#allocation34_spill]] }
0x5fa3   : > { %v10376_v62 = vsel %vm3216_vm5, %v10375_v30, %v10349_v18  ;;  %v13482_v18 = vld [vmem:[%s18949_s25 + $0x38] sm:$0xff] }
0x5fa5   : > { %v10353_v10 = vpop.permute.xlu1 %10352 }
0x5fa6   : > { %v10377_v38 = vsel %vm3219_vm6, %v10376_v62, %v10353_v10  ;;  %v13483_v10 = vld [vmem:[%s18949_s25 + $0x40] sm:$0xff] }
0x5fa7   : > { %v10378_v39 = vsel %vm1440_vm4, %v10377_v38, %v10357_v50  ;;  %v16221_v30 = vpack.i.bf16 %v13483_v10, %v13482_v18  ;;  %v10568_v50 = vld [vmem:[%s18975_s17] sm:$0x1]  ;;  %v13513_v10 = vld [vmem:[%s18961_s3 + $0x1] ss:$0 sm:$0xff] }
0x5fa8   : > { %v16592_v41 = vpop.eup %16591  ;;  %v10460_v23 = vld [vmem:[%s18972_s23] sm:$0x1] }
0x5fa9   : > { %v10263_v17 = vmul.f32 %v16592_v41, %v16590_v28  ;;  %v10361_v37 = vpop.permute.xlu1 %10360 }
0x5faa   : > { %v10379_v49 = vsel %vm3224_vm7, %v10378_v39, %v10361_v37 }
0x5fab   : > { %14832 = vmatmul.mubr.msk.f32.vlgmr.msra.gmra.mrb[86].mxu1 %vm1440_vm4, %v10263_v17  ;;  %v10380_v60 = vsel %vm3227_vm8, %v10379_v49, %v10365_v2  ;;  %v10461_v17 = vld [vmem:[%s18973_s27] sm:$0x1]  ;;  %v13480_v49 = vld [vmem:[%s18949_s25 + $0x28] sm:$0xff] }
0x5fac   : > { %14844 = vmatprep.mubr.msk.f32.mxu1 %vm16778_vm12, %v16779_v13  ;;  %15596 = vmatpush3.bf16.msra.mxu1 %v15595_v33  ;;  %v10567_v33 = vld [vmem:[%s18971_s24 + $0x38] sm:$0xff] }
0x5fad   : > { %15597 = vmatprep.subr.bf16.mxu1 %v16777_v48  ;;  %v10369_v57 = vpop.permute.xlu1 %10368  ;;  %v15616_v32 = vpack.c.bf16 %v10567_v33, %v10566_v27 }
0x5fae   : > { %v10381_v61 = vsel %vm3230_vm9, %v10380_v60, %v10369_v57  ;;  %v13481_v57 = vld [vmem:[%s18949_s25 + $0x30] sm:$0xff] }
0x5faf   : > { %v16216_v60 = vpack.i.bf16 %v13481_v57, %v13480_v49 }
0x5fb0   : > { %15599 = vmatpush3.bf16.msra.mxu1 %v15598_v34  ;;  %v10482_v34 = vld [vmem:[%s18974_s10] sm:$0x1]  ;;  %s18976_s10 = sld [smem:[#allocation36_spill]] }
0x5fb1   : > { %14842 = vmatprep.subr.mxu1 %v16779_v13 }
0x5fb4   : > { %14843 = vmatpush3.msk.msra.mxu1 %vm1261_vm0, %v8794_v24 }
0x5fb5   : > { %15606 = vmatprep.subr.bf16.mxu1 %v16777_v48 }
0x5fb6   : > { %s18977_s17 = smov %s18976_s10 }
0x607e   : > { %v10339_v45 = vpop.f32.mrb[86].mxu1 }
0x607f   : > { %10372 = vrot.lane.b32.xlu0 %v10339_v45, %s18907_s22  ;;  %v14833_v35 = vpop.f32.mrb[87].mxu1  ;;  %s18969_s22 = sld [smem:[#allocation38_spill]] }
0x6085   : > { %v10477_v19 = vld [vmem:[%s18969_s22] sm:$0xff]  ;;  %v10478_v20 = vld [vmem:[%s18969_s22 + $0x8] sm:$0xff]  ;;  %v10480_v6 = vld [vmem:[%s18969_s22 + $0x18] sm:$0xff] }
0x6086   : > { %v15601_v29 = vpack.c.bf16 %v10478_v20, %v10477_v19  ;;  %v10481_v14 = vld [vmem:[%s18969_s22 + $0x20] sm:$0xf] }
0x6087   : > { %v13486_v19 = vld [vmem:[%s18950_s14 + $0x1] ss:$0 sm:$0xff] }
0x6088   : > { %15602 = vmatpush3.bf16.msra.mxu0 %v15601_v29 }
0x6089   : > { %15603 = vmatprep.subr.bf16.mxu0 %v16777_v48 }
0x60f1   : > { %v10373_v3 = vpop.permute.xlu0 %10372 }
0x60f2   : > { %v10382_v51 = vsel %vm3233_vm10, %v10381_v61, %v10373_v3 }
0x60f3   : > { %14845 = vmatmul.mubr.msk.f32.vlgmr.msra.gmra.mrb[88].mxu1 %vm1254_vm1, %v10382_v51 }
0x60f4   : > { %14876 = vmatprep.mubr.msk.f32.mxu1 %vm16778_vm12, %v16779_v13  ;;  %15608 = vmatpush3.bf16.msra.mxu1 %v15607_v7 }
0x60f5   : > { %15609 = vmatprep.subr.bf16.mxu1 %v16777_v48 }
0x60f8   : > { %15611 = vmatpush3.bf16.msra.mxu1 %v15610_v42  ;;  %v15625_v42 = vpack.c.bf16 %v13490_v0, %v13489_v16 }
0x60f9   : > { %15612 = vmatprep.subr.bf16.mxu1 %v16777_v48 }
0x60fc   : > { %15614 = vmatpush3.bf16.msra.mxu1 %v15613_v58  ;;  %v13492_v58 = vld [vmem:[%s18952_s8 + $0x40] sm:$0xff] }
0x60fd   : > { %15615 = vmatprep.subr.bf16.mxu1 %v16777_v48 }
0x6100   : > { %15617 = vmatpush3.bf16.msra.mxu1 %v15616_v32 }
0x6101   : > { %15630 = vmatprep.subr.bf16.mxu1 %v16777_v48 }
0x61c6   : > { %v10455_v52 = vpop.f32.mrb[88].mxu1 }
0x61c7   : > { %v10456_v11 = vadd.f32 %v10455_v52, %v8795_v31  ;;  %v14846_v44 = vpop.f32.mrb[89].mxu1 }
0x61c9   : > { %v10459_v54 = vadd.f32 %v10456_v11, %v18089_v47  ;;  %v10479_v47 = vld [vmem:[%s18969_s22 + $0x10] sm:$0xff]  ;;  %s18978_s22 = sld [smem:[#allocation37_spill]] }
0x61ca   : > { %v15604_v9 = vpack.c.bf16 %v10480_v6, %v10479_v47 }
0x61cb   : > { %v10462_v5 = vsel %vm8596_vm13, %v10459_v54, 0.0 }
0x61cc   : > { %10463 = vadd.xlane.f32.xlu1 %v10462_v5  ;;  %15605 = vmatpush3.bf16.msra.mxu0 %v15604_v9 }
0x61cd   : > { %14855 = vmatprep.subr.mxu0 %v16779_v13 }
0x61cf   : > { %v10644_v7 = vld [vmem:[%s18978_s22] sm:$0x1] }
0x61d0   : > { %14856 = vmatpush3.msk.msra.mxu0 %vm1261_vm0, %v10481_v14  ;;  %v10643_v14 = vld [vmem:[%s18976_s10] sm:$0x1]  ;;  %s18980_s10 = sld [smem:[#allocation26_spill]] }
0x61d1   : > { %15618 = vmatprep.subr.bf16.mxu0 %v16777_v48 }
0x61dd   : > { %16222 = vrot.lane.b32.xlu1 %v16221_v30, %s18909_s16 }
0x6259   : > { %v10464_v40 = vpop.xlane.xlu1 %10463 }
0x625a   : > { %v10465_v55 = vmul.f32 0.027777778, %v10464_v40 }
0x625c   : > { %v10466_v56 = vsub.f32 %v10459_v54, %v10465_v55 }
0x625d   : > { %v16223_v51 = vpop.permute.xlu1 %16222 }
0x625e   : > { %v10467_v26 = vmul.f32 %v10466_v56, %v10466_v56  ;;  %v16225_v11 = vunpack.i.h.bf16 %v16223_v51  ;;  %v16224_v40 = vunpack.i.l.bf16 %v16223_v51 }
0x6260   : > { %v10468_v22 = vsel %vm8596_vm13, %v10467_v26, 0.0  ;;  %v15622_v26 = vpack.c.bf16 %v16225_v11, %v16224_v40 }
0x6261   : > { %10469 = vadd.xlane.f32.xlu0 %v10468_v22  ;;  %v13484_v22 = vld [vmem:[%s18949_s25 + $0x48] sm:$0xf] }
0x62ee   : > { %v10470_v59 = vpop.xlane.xlu0 %10469 }
0x62ef   : > { %v10471_v12 = vmul.f32 0.027777778, %v10470_v59  ;;  %v15628_v59 = vpack.c.bf16 %v13492_v58, %v13491_v53 }
0x62f1   : > { %v10472_v28 = vadd.f32 1e-05, %v10471_v12  ;;  %v13507_v12 = vld [vmem:[%s18954_s6 + $0x28] sm:$0xff] }
0x62f3   : > { %16593 = vrsqrt.f32 %v10472_v28  ;;  %v13508_v28 = vld [vmem:[%s18954_s6 + $0x30] sm:$0xff] }
0x62fd   : > { %v16594_v4 = vpop.eup %16593 }
0x62fe   : > { %v10474_v41 = vmul.f32 %v16594_v4, %v10466_v56  ;;  %v13493_v4 = vld [vmem:[%s18952_s8 + $0x48] sm:$0xf] }
0x6300   : > { %v10475_v21 = vmul.f32 %v10474_v41, %v10460_v23  ;;  %v15636_v23 = vpack.c.bf16 %v13508_v28, %v13507_v12 }
0x6302   : > { %v10476_v36 = vadd.f32 %v10475_v21, %v10461_v17  ;;  %v13509_v17 = vld [vmem:[%s18954_s6 + $0x38] sm:$0xff]  ;;  %v13510_v21 = vld [vmem:[%s18954_s6 + $0x40] sm:$0xff] }
0x6303   : > { %v15640_v32 = vpack.c.bf16 %v13510_v21, %v13509_v17 }
0x6304   : > { %14858 = vmatmul.mubr.msk.f32.vlgmr.msra.gmra.mrb[88].mxu0 %vm1254_vm1, %v10476_v36 }
0x6305   : > { %14889 = vmatprep.mubr.msk.f32.mxu0 %vm16778_vm12, %v16779_v13 }
0x63d7   : > { %v10555_v24 = vpop.f32.mrb[88].mxu0 }
0x63d8   : > { %v10556_v45 = vadd.f32 %v10555_v24, %v10482_v34  ;;  %v14859_v35 = vpop.f32.mrb[89].mxu0  ;;  %v13511_v34 = vld [vmem:[%s18954_s6 + $0x48] sm:$0xf]  ;;  %s18981_s6 = smov %s18980_s10 }
0x63da   : > { %v10559_v46 = vmax.f32 %v10556_v45, 0.0 }
0x63dc   : > { %14877 = vmatmul.mubr.msk.f32.vlgmr.msra.gmra.mrb[90].mxu1 %vm3486_vm11, %v10559_v46 }
0x63dd   : > { %14915 = vmatprep.mubr.msk.f32.mxu1 %vm16778_vm12, %v16779_v13 }
0x64af   : > { %v10638_v62 = vpop.f32.mrb[90].mxu1 }
0x64b0   : > { %v10639_v37 = vadd.f32 %v10638_v62, %v10568_v50  ;;  %v14878_v38 = vpop.f32.mrb[91].mxu1 }
0x64b2   : > { %v10642_v39 = vadd.f32 %v10639_v37, %v10476_v36 }
0x64b4   : > { %v10645_v2 = vsel %vm8596_vm13, %v10642_v39, 0.0 }
0x64b5   : > { %10646 = vadd.xlane.f32.xlu0 %v10645_v2 }
0x64cb   : > { %16217 = vrot.lane.b32.xlu0 %v16216_v60, %s18909_s16 }
0x64cf   : > { %10692 = vrot.lane.b32.xlu0 %v13486_v19, %s18909_s16 }
0x6542   : > { %v10647_v61 = vpop.xlane.xlu0 %10646 }
0x6543   : > { %v10648_v3 = vmul.f32 0.027777778, %v10647_v61  ;;  %v13499_v61 = vld [vmem:[%s18980_s10 + $0x28] sm:$0xff]  ;;  %s18999_s10 = sld [smem:[#allocation43_spill]] }
0x6545   : > { %v10649_v31 = vsub.f32 %v10642_v39, %v10648_v3  ;;  %v13500_v3 = vld [vmem:[%s18981_s6 + $0x30] sm:$0xff] }
0x6546   : > { %v16218_v52 = vpop.permute.xlu0 %16217  ;;  %v15631_v51 = vpack.c.bf16 %v13500_v3, %v13499_v61 }
0x6547   : > { %v10650_v44 = vmul.f32 %v10649_v31, %v10649_v31  ;;  %v16220_v54 = vunpack.i.h.bf16 %v16218_v52  ;;  %v16219_v5 = vunpack.i.l.bf16 %v16218_v52  ;;  %v13502_v52 = vld [vmem:[%s18981_s6 + $0x40] sm:$0xff] }
0x6548   : > { %15632 = vmatpush3.bf16.msra.mxu1 %v15631_v51 }
0x6549   : > { %v10651_v55 = vsel %vm8596_vm13, %v10650_v44, 0.0  ;;  %v15619_v56 = vpack.c.bf16 %v16220_v54, %v16219_v5  ;;  %15633 = vmatprep.subr.bf16.mxu1 %v16777_v48  ;;  %v13503_v44 = vld [vmem:[%s18981_s6 + $0x48] sm:$0xf] }
0x654a   : > { %10652 = vadd.xlane.f32.xlu1 %v10651_v55  ;;  %v10693_v41 = vpop.permute.xlu0 %10692 }
0x654b   : > { %15620 = vmatpush3.bf16.msra.mxu0 %v15619_v56  ;;  %v13497_v56 = vld [vmem:[%s18958_s29 + $0x1] sm:$0x1] }
0x654c   : > { %15621 = vmatprep.subr.bf16.mxu0 %v16777_v48 }
0x654f   : > { %15623 = vmatpush3.bf16.msra.mxu0 %v15622_v26 }
0x6550   : > { %14887 = vmatprep.subr.mxu0 %v16779_v13 }
0x655b   : > { %10681 = vrot.lane.b32.xlu1 %v13484_v22, %s18909_s16  ;;  %s18979_s16 = sld [smem:[#allocation25_spill]]  ;;  %v13498_v22 = vld [vmem:[%s18959_s30 + $0x1] sm:$0x1] }
0x6561   : > { %v13494_v24 = vld [vmem:[%s18979_s16 + $0x1] sm:$0x1]  ;;  %s18998_s16 = sld [smem:[#allocation42_spill]] }
0x65d7   : > { %v10653_v20 = vpop.xlane.xlu1 %10652 }
0x65d8   : > { %v10654_v29 = vmul.f32 0.027777778, %v10653_v20 }
0x65da   : > { %v10655_v47 = vadd.f32 1e-05, %v10654_v29 }
0x65db   : > { %v10682_v6 = vpop.permute.xlu1 %10681 }
0x65dc   : > { %16595 = vrsqrt.f32 %v10655_v47  ;;  %14888 = vmatpush3.msk.msra.mxu0 %vm1261_vm0, %v10682_v6  ;;  %v13504_v47 = vld [vmem:[%s18960_s12 + $0x1] sm:$0x1] }
0x65dd   : > { %15624 = vmatprep.subr.bf16.mxu0 %v16777_v48 }
0x65e6   : > { %v16596_v9 = vpop.eup %16595 }
0x65e7   : > { %v10657_v15 = vmul.f32 %v16596_v9, %v10649_v31  ;;  %v13501_v31 = vld [vmem:[%s18981_s6 + $0x38] sm:$0xff] }
0x65e8   : > { %v15634_v11 = vpack.c.bf16 %v13502_v52, %v13501_v31 }
0x65e9   : > { %v10658_v8 = vmul.f32 %v10657_v15, %v10643_v14 }
0x65ea   : > { %15635 = vmatpush3.bf16.msra.mxu1 %v15634_v11 }
0x65eb   : > { %v10659_v43 = vadd.f32 %v10658_v8, %v10644_v7  ;;  %14913 = vmatprep.subr.mxu1 %v16779_v13 }
0x65ed   : > { %14890 = vmatmul.mubr.msk.f32.vlgmr.msra.gmra.mrb[90].mxu0 %vm1254_vm1, %v10659_v43 }
0x65ee   : > { %15626 = vmatpush3.bf16.msra.mxu0 %v15625_v42  ;;  %14902 = vmatprep.mubr.msk.f32.mxu0 %vm16778_vm12, %v16779_v13 }
0x65ef   : > { %15627 = vmatprep.subr.bf16.mxu0 %v16777_v48  ;;  %14914 = vmatpush3.msk.msra.mxu1 %vm1261_vm0, %v13503_v44 }
0x65f0   : > { %15644 = vmatprep.subr.bf16.mxu1 %v16777_v48 }
0x65f2   : > { %15629 = vmatpush3.bf16.msra.mxu0 %v15628_v59 }
0x65f3   : > { %14900 = vmatprep.subr.mxu0 %v16779_v13 }
0x65f6   : > { %14901 = vmatpush3.msk.msra.mxu0 %vm1261_vm0, %v13493_v4 }
0x65f7   : > { %15637 = vmatprep.subr.bf16.mxu0 %v15636_v23 }
0x66c0   : > { %v10766_v36 = vpop.f32.mrb[90].mxu0 }
0x66c1   : > { %v10767_v27 = vadd.f32 %v10766_v36, %v10693_v41  ;;  %v14891_v33 = vpop.f32.mrb[91].mxu0 }
0x66c3   : > { %14903 = vmatmul.mubr.msk.f32.vlgmr.msra.gmra.mrb[92].mxu0 %vm1254_vm1, %v10767_v27 }
0x66c4   : > { %15639 = vmatpush3.bf16.msra.mxu0 %v15636_v23  ;;  %14928 = vmatprep.mubr.msk.f32.mxu0 %vm1254_vm1, %v18084_v63 }
0x66c5   : > { %15641 = vmatprep.subr.bf16.mxu0 %v15640_v32 }
0x66c8   : > { %15643 = vmatpush3.bf16.msra.mxu0 %v15640_v32 }
0x66c9   : > { %14926 = vmatprep.subr.msk.mxu0 %vm1261_vm0, %v13511_v34 }
0x66cc   : > { %14927 = vmatpush3.msk.msra.mxu0 %vm1261_vm0, %v13511_v34 }
0x66cd   : > { %14929 = vmatmul.mubr.msk.f32.vlgmr.msra.gmra.mrb[94].mxu0 %vm1254_vm1, %v18091_v1  ;;  %15648 = vmatprep.subr.bf16.mxu0 %v16777_v48 }
0x66ce   : > { %14942 = vmatprep.mubr.msk.f32.mxu0 %vm16778_vm12, %v16779_v13 }
0x6796   : > { %v10850_v45 = vpop.f32.mrb[92].mxu0 }
0x6797   : > { %v10851_v35 = vadd.f32 %v13494_v24, %v10850_v45  ;;  %v14904_v63 = vpop.f32.mrb[93].mxu0 }
0x6799   : > { %v10854_v46 = vadd.f32 %v10851_v35, %v10659_v43 }
0x679b   : > { %v10859_v18 = vsel %vm8596_vm13, %v10854_v46, 0.0 }
0x679c   : > { %10860 = vadd.xlane.f32.xlu1 %v10859_v18 }
0x67a0   : > { %v14930_v30 = vpop.f32.mrb[94].mxu0 }
0x67a1   : > { %v11047_v50 = vadd.f32 %v14930_v30, %v13513_v10  ;;  %v11041_v62 = vpop.f32.mrb[95].mxu0 }
0x67a2   : > { %v11042_v1 = vadd.f32 %v13513_v10, %v11041_v62 }
0x67a4   : > { %v18394_v37 = vpack.i.bf16 %v11047_v50, %v11042_v1  ;;  %v15645_v38 = vpack.c.bf16 %v11047_v50, %v11042_v1 }
0x6829   : > { %v10861_v39 = vpop.xlane.xlu1 %10860 }
0x682a   : > { %v10862_v2 = vmul.f32 0.027777778, %v10861_v39 }
0x682c   : > { %v10863_v49 = vsub.f32 %v10854_v46, %v10862_v2 }
0x682e   : > { %v10864_v57 = vmul.f32 %v10863_v49, %v10863_v49 }
0x6830   : > { %v10865_v60 = vsel %vm8596_vm13, %v10864_v57, 0.0 }
0x6831   : > { %10866 = vadd.xlane.f32.xlu0 %v10865_v60 }
0x6847   : > { %16227 = vrot.lane.b32.xlu0 %v18394_v37, %s18910_s2 }
0x68be   : > { %v10867_v54 = vpop.xlane.xlu0 %10866 }
0x68bf   : > { %v10868_v5 = vmul.f32 0.027777778, %v10867_v54 }
0x68c1   : > { %v10869_v40 = vadd.f32 1e-05, %v10868_v5 }
0x68c2   : > { %v16228_v29 = vpop.permute.xlu0 %16227 }
0x68c3   : > { %16597 = vrsqrt.f32 %v10869_v40  ;;  %v16230_v6 = vunpack.i.h.bf16 %v16228_v29  ;;  %v16229_v9 = vunpack.i.l.bf16 %v16228_v29 }
0x68c5   : > { %v15652_v7 = vpack.c.bf16 %v16230_v6, %v16229_v9 }
0x68cd   : > { %v16598_v55 = vpop.eup %16597 }
0x68ce   : > { %v10871_v26 = vmul.f32 %v16598_v55, %v10863_v49 }
0x68d0   : > { %v10872_v19 = vmul.f32 %v13497_v56, %v10871_v26 }
0x68d2   : > { %v18410_v20 = vadd.f32 %v13498_v22, %v10872_v19 }
0x68d4   : > { %14916 = vmatmul.mubr.msk.f32.vlgmr.msra.gmra.mrb[92].mxu1 %vm1254_vm1, %v18410_v20 }
0x68d5   : > { %15647 = vmatpush3.bf16.xpose.msk.msra.mxu1 %vm17084_vm3, %v15645_v38  ;;  %14935 = vmatprep.mubr.msk.f32.mxu1 %vm16778_vm12, %v16779_v13 }
0x68d6   : > { %15651 = vmatprep.subr.bf16.mxu1 %v16777_v48 }
0x69a7   : > { %v10954_v14 = vpop.f32.mrb[92].mxu1 }
0x69a8   : > { %v10955_v15 = vadd.f32 %v13504_v47, %v10954_v14  ;;  %v14917_v16 = vpop.f32.mrb[93].mxu1 }
0x69aa   : > { %v18420_v0 = vmul.f32 0.5, %v10955_v15 }
0x69ac   : > { %11228 = vrot.lane.b32.xlu1 %v18420_v0, %s18910_s2  ;;  %14936 = vmatmul.mubr.msk.f32.vlgmr.msra.gmra.mrb[94].mxu1 %vm1354_vm2, %v18420_v0  ;;  %s18994_s2 = sld [smem:[#allocation39_spill]] }
0x69ad   : > { %15654 = vmatpush3.bf16.xpose.msk.msra.mxu1 %vm17084_vm3, %v15652_v7  ;;  %14949 = vmatprep.mubr.msk.f32.mxu1 %vm16778_vm12, %v16779_v13 }
0x69ae   : > { %15662 = vmatprep.subr.bf16.mxu1 %v16777_v48 }
0x6a1e   : > { %v11229_v8 = vpop.permute.xlu1 %11228 }
0x6a1f   : > { %14950 = vmatmul.mubr.msk.f32.vlgmr.msra.gmra.mrb[96].mxu1 %vm1354_vm2, %v11229_v8 }
0x6a20   : > { %14970 = vmatprep.mubr.msk.f32.mxu1 %vm16778_vm12, %v16779_v13 }
0x6a7f   : > { %v11134_v42 = vpop.f32.mrb[94].mxu1 }
0x6a80   : > { %v14937_v43 = vpop.f32.mrb[95].mxu1  ;;  %v11138_v53 = vsel %vm8876_vm14, %v11134_v42, -inf }
0x6a81   : > { %11139 = vmax.xlane.f32.xlu1 %v11138_v53 }
0x6a92   : > { %16237 = vrot.lane.b32.xlu1 %v18394_v37, %s18911_s9  ;;  %s18983_s9 = smov 68  }
0x6af2   : > { %v11306_v58 = vpop.f32.mrb[96].mxu1 }
0x6af3   : > { %v14951_v59 = vpop.f32.mrb[97].mxu1  ;;  %v11310_v12 = vsel %vm8876_vm14, %v11306_v58, -inf }
0x6af4   : > { %11311 = vmax.xlane.f32.xlu0 %v11310_v12 }
0x6b0e   : > { %v11140_v28 = vpop.xlane.xlu1 %11139 }
0x6b0f   : > { %v11141_v4 = vsub.f32 %v11134_v42, %v11140_v28 }
0x6b11   : > { %v11142_v23 = vmul.f32 1.442695, %v11141_v4 }
0x6b12   : > { %v16238_v63 = vpop.permute.xlu1 %16237 }
0x6b13   : > { %16599 = vpow2.f32 %v11142_v23  ;;  %v16240_v18 = vunpack.i.h.bf16 %v16238_v63  ;;  %v16239_v10 = vunpack.i.l.bf16 %v16238_v63 }
0x6b15   : > { %v15656_v62 = vpack.c.bf16 %v16240_v18, %v16239_v10 }
0x6b1d   : > { %v16600_v41 = vpop.eup %16599 }
0x6b1e   : > { %v11144_v17 = vsel %vm8876_vm14, %v16600_v41, 0.0 }
0x6b1f   : > { %11145 = vadd.xlane.f32.xlu0 %v11144_v17 }
0x6b35   : > { %16232 = vrot.lane.b32.xlu0 %v18394_v37, %s18908_s5  ;;  %s18982_s5 = smov 104  }
0x6b39   : > { %11400 = vrot.lane.b32.xlu0 %v18420_v0, %s18914_s18 }
0x6b81   : > { %v11312_v21 = vpop.xlane.xlu0 %11311 }
0x6b82   : > { %v11313_v36 = vsub.f32 %v11306_v58, %v11312_v21 }
0x6b84   : > { %v11314_v27 = vmul.f32 1.442695, %v11313_v36 }
0x6b86   : > { %16601 = vpow2.f32 %v11314_v27 }
0x6b90   : > { %v16602_v33 = vpop.eup %16601 }
0x6b91   : > { %v11316_v32 = vsel %vm8876_vm14, %v16602_v33, 0.0 }
0x6b92   : > { %11317 = vadd.xlane.f32.xlu1 %v11316_v32 }
0x6ba3   : > { %16242 = vrot.lane.b32.xlu1 %v18394_v37, %s18914_s18  ;;  %s18987_s18 = smov 12  }
0x6bac   : > { %v11146_v34 = vpop.xlane.xlu0 %11145 }
0x6bad   : > { %16603 = vrcp.f32 %v11146_v34 }
0x6bb0   : > { %v16233_v24 = vpop.permute.xlu0 %16232 }
0x6bb1   : > { %v16235_v45 = vunpack.i.h.bf16 %v16233_v24  ;;  %v16234_v35 = vunpack.i.l.bf16 %v16233_v24 }
0x6bb3   : > { %v15649_v46 = vpack.c.bf16 %v16235_v45, %v16234_v35 }
0x6bb4   : > { %v11401_v61 = vpop.permute.xlu0 %11400 }
0x6bb5   : > { %15650 = vmatpush3.bf16.msra.mxu0 %v15649_v46 }
0x6bb6   : > { %15655 = vmatprep.subr.bf16.mxu0 %v16777_v48 }
0x6bb7   : > { %v16604_v30 = vpop.eup %16603 }
0x6bb8   : > { %v11148_v50 = vmul.f32 %v16604_v30, %v16600_v41 }
0x6bba   : > { %14943 = vmatmul.mubr.msk.f32.vlgmr.msra.gmra.mrb[96].mxu0 %vm1440_vm4, %v11148_v50 }
0x6bbb   : > { %15657 = vmatpush3.bf16.msra.mxu0 %v15656_v62  ;;  %14956 = vmatprep.mubr.msk.f32.mxu0 %vm16778_vm12, %v16779_v13 }
0x6bbc   : > { %15658 = vmatprep.subr.bf16.mxu0 %v16777_v48 }
0x6c1f   : > { %v11318_v1 = vpop.xlane.xlu1 %11317 }
0x6c20   : > { %16605 = vrcp.f32 %v11318_v1 }
0x6c23   : > { %v16243_v38 = vpop.permute.xlu1 %16242 }
0x6c24   : > { %v16245_v39 = vunpack.i.h.bf16 %v16243_v38  ;;  %v16244_v2 = vunpack.i.l.bf16 %v16243_v38 }
0x6c26   : > { %v15659_v60 = vpack.c.bf16 %v16245_v39, %v16244_v2 }
0x6c2a   : > { %v16606_v49 = vpop.eup %16605 }
0x6c2b   : > { %v11320_v57 = vmul.f32 %v16606_v49, %v16602_v33 }
0x6c2d   : > { %14957 = vmatmul.mubr.msk.f32.vlgmr.msra.gmra.mrb[98].mxu0 %vm1440_vm4, %v11320_v57 }
0x6c2e   : > { %15661 = vmatpush3.bf16.xpose.msk.msra.mxu0 %vm17084_vm3, %v15659_v60  ;;  %14963 = vmatprep.mubr.msk.f32.mxu0 %vm16778_vm12, %v16779_v13 }
0x6c2f   : > { %15669 = vmatprep.subr.bf16.mxu0 %v16777_v48 }
0x6c35   : > { %14964 = vmatmul.mubr.msk.f32.vlgmr.msra.gmra.mrb[100].mxu0 %vm1354_vm2, %v11401_v61 }
0x6c36   : > { %14984 = vmatprep.mubr.msk.f32.mxu0 %vm16778_vm12, %v16779_v13 }
0x6c8d   : > { %v18460_v3 = vpop.f32.mrb[96].mxu0 }
0x6c8e   : > { %v14944_v51 = vpop.f32.mrb[97].mxu0 }
0x6d00   : > { %v18462_v31 = vpop.f32.mrb[98].mxu0 }
0x6d01   : > { %v14958_v52 = vpop.f32.mrb[99].mxu0 }
0x6d08   : > { %v11478_v11 = vpop.f32.mrb[100].mxu0 }
0x6d09   : > { %v14965_v44 = vpop.f32.mrb[101].mxu0  ;;  %v11482_v54 = vsel %vm8876_vm14, %v11478_v11, -inf }
0x6d0a   : > { %11483 = vmax.xlane.f32.xlu1 %v11482_v54 }
0x6d1b   : > { %16252 = vrot.lane.b32.xlu1 %v18394_v37, %s18916_s7 }
0x6d1f   : > { %11572 = vrot.lane.b32.xlu1 %v18420_v0, %s18916_s7  ;;  %s18986_s7 = smov 60  }
0x6d97   : > { %v11484_v5 = vpop.xlane.xlu1 %11483 }
0x6d98   : > { %v11485_v40 = vsub.f32 %v11478_v11, %v11484_v5 }
0x6d9a   : > { %v11486_v55 = vmul.f32 1.442695, %v11485_v40 }
0x6d9b   : > { %v16253_v9 = vpop.permute.xlu1 %16252 }
0x6d9c   : > { %16607 = vpow2.f32 %v11486_v55  ;;  %v16255_v15 = vunpack.i.h.bf16 %v16253_v9  ;;  %v16254_v16 = vunpack.i.l.bf16 %v16253_v9 }
0x6d9e   : > { %v15666_v8 = vpack.c.bf16 %v16255_v15, %v16254_v16 }
0x6d9f   : > { %v11573_v42 = vpop.permute.xlu1 %11572 }
0x6da6   : > { %v16608_v56 = vpop.eup %16607 }
0x6da7   : > { %v11488_v26 = vsel %vm8876_vm14, %v16608_v56, 0.0 }
0x6da8   : > { %11489 = vadd.xlane.f32.xlu0 %v11488_v26 }
0x6dbe   : > { %16247 = vrot.lane.b32.xlu0 %v18394_v37, %s18912_s26  ;;  %s18988_s26 = sld [smem:[#allocation30_spill]] }
0x6e35   : > { %v11490_v22 = vpop.xlane.xlu0 %11489 }
0x6e36   : > { %16609 = vrcp.f32 %v11490_v22 }
0x6e39   : > { %v16248_v19 = vpop.permute.xlu0 %16247 }
0x6e3a   : > { %v16250_v29 = vunpack.i.h.bf16 %v16248_v19  ;;  %v16249_v47 = vunpack.i.l.bf16 %v16248_v19 }
0x6e3c   : > { %v15663_v6 = vpack.c.bf16 %v16250_v29, %v16249_v47 }
0x6e3e   : > { %15664 = vmatpush3.bf16.msra.mxu1 %v15663_v6 }
0x6e3f   : > { %15665 = vmatprep.subr.bf16.mxu1 %v16777_v48 }
0x6e40   : > { %v16610_v14 = vpop.eup %16609 }
0x6e41   : > { %v11492_v7 = vmul.f32 %v16610_v14, %v16608_v56 }
0x6e43   : > { %14971 = vmatmul.mubr.msk.f32.vlgmr.msra.gmra.mrb[98].mxu1 %vm1440_vm4, %v11492_v7 }
0x6e44   : > { %14977 = vmatprep.mubr.msk.f32.mxu1 %vm16778_vm12, %v16779_v13 }
0x6e47   : > { %15668 = vmatpush3.bf16.xpose.msk.msra.mxu1 %vm17084_vm3, %v15666_v8 }
0x6e48   : > { %15676 = vmatprep.subr.bf16.mxu1 %v16777_v48 }
0x6e4e   : > { %14978 = vmatmul.mubr.msk.f32.vlgmr.msra.gmra.mrb[100].mxu1 %vm1354_vm2, %v11573_v42 }
0x6e4f   : > { %14998 = vmatprep.mubr.msk.f32.mxu1 %vm16778_vm12, %v16779_v13 }
0x6f16   : > { %v18482_v43 = vpop.f32.mrb[98].mxu1 }
0x6f17   : > { %v14972_v53 = vpop.f32.mrb[99].mxu1 }
0x6f21   : > { %v11650_v58 = vpop.f32.mrb[100].mxu1 }
0x6f22   : > { %v14979_v59 = vpop.f32.mrb[101].mxu1  ;;  %v11654_v12 = vsel %vm8876_vm14, %v11650_v58, -inf }
0x6f23   : > { %11655 = vmax.xlane.f32.xlu0 %v11654_v12 }
0x6f39   : > { %16257 = vrot.lane.b32.xlu0 %v18394_v37, %s18915_s1  ;;  %s18993_s1 = sld [smem:[#allocation38_spill]] }
0x6f3d   : > { %11744 = vrot.lane.b32.xlu0 %v18420_v0, %s18919_s4 }
0x6fb0   : > { %v11656_v28 = vpop.xlane.xlu0 %11655 }
0x6fb1   : > { %v11657_v4 = vsub.f32 %v11650_v58, %v11656_v28 }
0x6fb3   : > { %v11658_v23 = vmul.f32 1.442695, %v11657_v4 }
0x6fb4   : > { %v16258_v41 = vpop.permute.xlu0 %16257 }
0x6fb5   : > { %16611 = vpow2.f32 %v11658_v23  ;;  %v16260_v17 = vunpack.i.h.bf16 %v16258_v41  ;;  %v16259_v21 = vunpack.i.l.bf16 %v16258_v41 }
0x6fb7   : > { %v15670_v36 = vpack.c.bf16 %v16260_v17, %v16259_v21 }
0x6fb8   : > { %v11745_v18 = vpop.permute.xlu0 %11744 }
0x6fb9   : > { %15671 = vmatpush3.bf16.msra.mxu0 %v15670_v36 }
0x6fba   : > { %15672 = vmatprep.subr.bf16.mxu0 %v16777_v48 }
0x6fbf   : > { %v16612_v27 = vpop.eup %16611 }
0x6fc0   : > { %v11660_v33 = vsel %vm8876_vm14, %v16612_v27, 0.0 }
0x6fc1   : > { %11661 = vadd.xlane.f32.xlu1 %v11660_v33 }
0x6fd2   : > { %16262 = vrot.lane.b32.xlu1 %v18394_v37, %s18919_s4  ;;  %s18985_s4 = smov 96  }
0x704e   : > { %v11662_v32 = vpop.xlane.xlu1 %11661 }
0x704f   : > { %16613 = vrcp.f32 %v11662_v32 }
0x7052   : > { %v16263_v34 = vpop.permute.xlu1 %16262 }
0x7053   : > { %v16265_v24 = vunpack.i.h.bf16 %v16263_v34  ;;  %v16264_v45 = vunpack.i.l.bf16 %v16263_v34 }
0x7055   : > { %v15673_v46 = vpack.c.bf16 %v16265_v24, %v16264_v45 }
0x7059   : > { %v16614_v35 = vpop.eup %16613 }
0x705a   : > { %v11664_v63 = vmul.f32 %v16614_v35, %v16612_v27 }
0x705c   : > { %14985 = vmatmul.mubr.msk.f32.vlgmr.msra.gmra.mrb[102].mxu0 %vm1440_vm4, %v11664_v63 }
0x705d   : > { %15675 = vmatpush3.bf16.xpose.msk.msra.mxu0 %vm17084_vm3, %v15673_v46  ;;  %14991 = vmatprep.mubr.msk.f32.mxu0 %vm16778_vm12, %v16779_v13 }
0x705e   : > { %15683 = vmatprep.subr.bf16.mxu0 %v16777_v48 }
0x7064   : > { %14992 = vmatmul.mubr.msk.f32.vlgmr.msra.gmra.mrb[104].mxu0 %vm1354_vm2, %v11745_v18 }
0x7065   : > { %15012 = vmatprep.mubr.msk.f32.mxu0 %vm16778_vm12, %v16779_v13 }
0x712f   : > { %v18502_v10 = vpop.f32.mrb[102].mxu0 }
0x7130   : > { %v14986_v30 = vpop.f32.mrb[103].mxu0 }
0x7137   : > { %v11822_v50 = vpop.f32.mrb[104].mxu0 }
0x7138   : > { %v14993_v62 = vpop.f32.mrb[105].mxu0  ;;  %v11826_v1 = vsel %vm8876_vm14, %v11822_v50, -inf }
0x7139   : > { %11827 = vmax.xlane.f32.xlu1 %v11826_v1 }
0x714a   : > { %16272 = vrot.lane.b32.xlu1 %v18394_v37, %s18939_s11 }
0x714e   : > { %11916 = vrot.lane.b32.xlu1 %v18420_v0, %s18939_s11  ;;  %s18995_s11 = sld [smem:[#allocation41_spill]] }
0x71c6   : > { %v11828_v38 = vpop.xlane.xlu1 %11827 }
0x71c7   : > { %v11829_v39 = vsub.f32 %v11822_v50, %v11828_v38 }
0x71c9   : > { %v11830_v2 = vmul.f32 1.442695, %v11829_v39 }
0x71ca   : > { %v16273_v44 = vpop.permute.xlu1 %16272 }
0x71cb   : > { %16615 = vpow2.f32 %v11830_v2  ;;  %v16275_v5 = vunpack.i.h.bf16 %v16273_v44  ;;  %v16274_v40 = vunpack.i.l.bf16 %v16273_v44 }
0x71cd   : > { %v15680_v56 = vpack.c.bf16 %v16275_v5, %v16274_v40 }
0x71ce   : > { %v11917_v26 = vpop.permute.xlu1 %11916 }
0x71d5   : > { %v16616_v49 = vpop.eup %16615 }
0x71d6   : > { %v11832_v57 = vsel %vm8876_vm14, %v16616_v49, 0.0 }
0x71d7   : > { %11833 = vadd.xlane.f32.xlu0 %v11832_v57 }
0x71ed   : > { %16267 = vrot.lane.b32.xlu0 %v18394_v37, %s18918_s28  ;;  %s18992_s28 = sld [smem:[#allocation31_spill]] }
0x7264   : > { %v11834_v60 = vpop.xlane.xlu0 %11833 }
0x7265   : > { %16617 = vrcp.f32 %v11834_v60 }
0x7268   : > { %v16268_v61 = vpop.permute.xlu0 %16267 }
0x7269   : > { %v16270_v51 = vunpack.i.h.bf16 %v16268_v61  ;;  %v16269_v52 = vunpack.i.l.bf16 %v16268_v61 }
0x726b   : > { %v15677_v11 = vpack.c.bf16 %v16270_v51, %v16269_v52 }
0x726d   : > { %15678 = vmatpush3.bf16.msra.mxu1 %v15677_v11 }
0x726e   : > { %15679 = vmatprep.subr.bf16.mxu1 %v16777_v48 }
0x726f   : > { %v16618_v54 = vpop.eup %16617 }
0x7270   : > { %v11836_v55 = vmul.f32 %v16618_v54, %v16616_v49 }
0x7272   : > { %14999 = vmatmul.mubr.msk.f32.vlgmr.msra.gmra.mrb[102].mxu1 %vm1440_vm4, %v11836_v55 }
0x7273   : > { %15005 = vmatprep.mubr.msk.f32.mxu1 %vm16778_vm12, %v16779_v13 }
0x7276   : > { %15682 = vmatpush3.bf16.xpose.msk.msra.mxu1 %vm17084_vm3, %v15680_v56 }
0x7277   : > { %15690 = vmatprep.subr.bf16.mxu1 %v16777_v48 }
0x727d   : > { %15006 = vmatmul.mubr.msk.f32.vlgmr.msra.gmra.mrb[104].mxu1 %vm1354_vm2, %v11917_v26 }
0x727e   : > { %15026 = vmatprep.mubr.msk.f32.mxu1 %vm16778_vm12, %v16779_v13 }
0x7345   : > { %v18522_v22 = vpop.f32.mrb[102].mxu1 }
0x7346   : > { %v15000_v19 = vpop.f32.mrb[103].mxu1 }
0x7350   : > { %v11994_v29 = vpop.f32.mrb[104].mxu1 }
0x7351   : > { %v15007_v47 = vpop.f32.mrb[105].mxu1  ;;  %v11998_v6 = vsel %vm8876_vm14, %v11994_v29, -inf }
0x7352   : > { %11999 = vmax.xlane.f32.xlu0 %v11998_v6 }
0x7368   : > { %16277 = vrot.lane.b32.xlu0 %v18394_v37, %s18962_s19 }
0x736c   : > { %12088 = vrot.lane.b32.xlu0 %v18420_v0, %s18982_s5 }
0x73df   : > { %v12000_v9 = vpop.xlane.xlu0 %11999 }
0x73e0   : > { %v12001_v14 = vsub.f32 %v11994_v29, %v12000_v9 }
0x73e2   : > { %v12002_v15 = vmul.f32 1.442695, %v12001_v14 }
0x73e3   : > { %v16278_v16 = vpop.permute.xlu0 %16277 }
0x73e4   : > { %16619 = vpow2.f32 %v12002_v15  ;;  %v16280_v7 = vunpack.i.h.bf16 %v16278_v16  ;;  %v16279_v8 = vunpack.i.l.bf16 %v16278_v16 }
0x73e6   : > { %v15684_v42 = vpack.c.bf16 %v16280_v7, %v16279_v8 }
0x73e7   : > { %v12089_v21 = vpop.permute.xlu0 %12088 }
0x73e8   : > { %15685 = vmatpush3.bf16.msra.mxu0 %v15684_v42 }
0x73e9   : > { %15686 = vmatprep.subr.bf16.mxu0 %v16777_v48 }
0x73ee   : > { %v16620_v53 = vpop.eup %16619 }
0x73ef   : > { %v12004_v58 = vsel %vm8876_vm14, %v16620_v53, 0.0 }
0x73f0   : > { %12005 = vadd.xlane.f32.xlu1 %v12004_v58 }
0x7401   : > { %16282 = vrot.lane.b32.xlu1 %v18394_v37, %s18982_s5  ;;  %s19000_s5 = sld [smem:[#allocation48_spill]] }
0x747d   : > { %v12006_v59 = vpop.xlane.xlu1 %12005 }
0x747e   : > { %16621 = vrcp.f32 %v12006_v59 }
0x7481   : > { %v16283_v12 = vpop.permute.xlu1 %16282 }
0x7482   : > { %v16285_v28 = vunpack.i.h.bf16 %v16283_v12  ;;  %v16284_v4 = vunpack.i.l.bf16 %v16283_v12 }
0x7484   : > { %v15687_v17 = vpack.c.bf16 %v16285_v28, %v16284_v4 }
0x7488   : > { %v16622_v23 = vpop.eup %16621 }
0x7489   : > { %v12008_v41 = vmul.f32 %v16622_v23, %v16620_v53 }
0x748b   : > { %15013 = vmatmul.mubr.msk.f32.vlgmr.msra.gmra.mrb[106].mxu0 %vm1440_vm4, %v12008_v41 }
0x748c   : > { %15689 = vmatpush3.bf16.xpose.msk.msra.mxu0 %vm17084_vm3, %v15687_v17  ;;  %15019 = vmatprep.mubr.msk.f32.mxu0 %vm16778_vm12, %v16779_v13 }
0x748d   : > { %15697 = vmatprep.subr.bf16.mxu0 %v16777_v48 }
0x7493   : > { %15020 = vmatmul.mubr.msk.f32.vlgmr.msra.gmra.mrb[108].mxu0 %vm1354_vm2, %v12089_v21 }
0x7494   : > { %15040 = vmatprep.mubr.msk.f32.mxu0 %vm16778_vm12, %v16779_v13 }
0x755e   : > { %v18542_v36 = vpop.f32.mrb[106].mxu0 }
0x755f   : > { %v15014_v27 = vpop.f32.mrb[107].mxu0 }
0x7566   : > { %v12166_v33 = vpop.f32.mrb[108].mxu0 }
0x7567   : > { %v15021_v32 = vpop.f32.mrb[109].mxu0  ;;  %v12170_v34 = vsel %vm8876_vm14, %v12166_v33, -inf }
0x7568   : > { %12171 = vmax.xlane.f32.xlu1 %v12170_v34  ;;  %v13519_v32 = vld [vmem:[%s18988_s26 + $0x38] sm:$0xff] }
0x7579   : > { %16292 = vrot.lane.b32.xlu1 %v18394_v37, %s18964_s21 }
0x757d   : > { %12260 = vrot.lane.b32.xlu1 %v18420_v0, %s18964_s21  ;;  %s18984_s21 = smov 64  }
0x75f5   : > { %v12172_v24 = vpop.xlane.xlu1 %12171 }
0x75f6   : > { %v12173_v45 = vsub.f32 %v12166_v33, %v12172_v24  ;;  %v13518_v33 = vld [vmem:[%s18988_s26 + $0x30] sm:$0xff]  ;;  %v13520_v24 = vld [vmem:[%s18988_s26 + $0x40] sm:$0xff] }
0x75f8   : > { %v12174_v35 = vmul.f32 1.442695, %v12173_v45  ;;  %v15711_v45 = vpack.c.bf16 %v13520_v24, %v13519_v32  ;;  %v13568_v32 = vld [vmem:[%s18994_s2 + $0x1] sm:$0x1] }
0x75f9   : > { %v16293_v38 = vpop.permute.xlu1 %16292 }
0x75fa   : > { %16623 = vpow2.f32 %v12174_v35  ;;  %v16295_v2 = vunpack.i.h.bf16 %v16293_v38  ;;  %v16294_v49 = vunpack.i.l.bf16 %v16293_v38  ;;  %v13521_v35 = vld [vmem:[%s18988_s26 + $0x48] sm:$0xf] }
0x75fc   : > { %v15694_v60 = vpack.c.bf16 %v16295_v2, %v16294_v49 }
0x75fd   : > { %v12261_v61 = vpop.permute.xlu1 %12260 }
0x7604   : > { %v16624_v63 = vpop.eup %16623 }
0x7605   : > { %v12176_v46 = vsel %vm8876_vm14, %v16624_v63, 0.0 }
0x7606   : > { %12177 = vadd.xlane.f32.xlu0 %v12176_v46 }
0x761c   : > { %16287 = vrot.lane.b32.xlu0 %v18394_v37, %s18983_s9  ;;  %s19001_s9 = sld [smem:[#allocation45_spill]] }
0x7693   : > { %v12178_v18 = vpop.xlane.xlu0 %12177 }
0x7694   : > { %16625 = vrcp.f32 %v12178_v18 }
0x7697   : > { %v16288_v30 = vpop.permute.xlu0 %16287 }
0x7698   : > { %v16290_v50 = vunpack.i.h.bf16 %v16288_v30  ;;  %v16289_v62 = vunpack.i.l.bf16 %v16288_v30 }
0x769a   : > { %v15691_v1 = vpack.c.bf16 %v16290_v50, %v16289_v62 }
0x769c   : > { %15692 = vmatpush3.bf16.msra.mxu1 %v15691_v1 }
0x769d   : > { %15693 = vmatprep.subr.bf16.mxu1 %v16777_v48 }
0x769e   : > { %v16626_v39 = vpop.eup %16625 }
0x769f   : > { %v12180_v57 = vmul.f32 %v16626_v39, %v16624_v63 }
0x76a1   : > { %15027 = vmatmul.mubr.msk.f32.vlgmr.msra.gmra.mrb[106].mxu1 %vm1440_vm4, %v12180_v57 }
0x76a2   : > { %15033 = vmatprep.mubr.msk.f32.mxu1 %vm16778_vm12, %v16779_v13 }
0x76a5   : > { %15696 = vmatpush3.bf16.xpose.msk.msra.mxu1 %vm17084_vm3, %v15694_v60 }
0x76a6   : > { %15704 = vmatprep.subr.bf16.mxu1 %v16777_v48 }
0x76ac   : > { %15034 = vmatmul.mubr.msk.f32.vlgmr.msra.gmra.mrb[108].mxu1 %vm1354_vm2, %v12261_v61 }
0x76ad   : > { %15054 = vmatprep.mubr.msk.f32.mxu1 %vm16778_vm12, %v16779_v13 }
0x7774   : > { %v12256_v51 = vpop.f32.mrb[106].mxu1 }
0x7775   : > { %v15028_v52 = vpop.f32.mrb[107].mxu1 }
0x777f   : > { %v12338_v11 = vpop.f32.mrb[108].mxu1 }
0x7780   : > { %v15035_v44 = vpop.f32.mrb[109].mxu1  ;;  %v12342_v54 = vsel %vm8876_vm14, %v12338_v11, -inf }
0x7781   : > { %12343 = vmax.xlane.f32.xlu0 %v12342_v54 }
0x7797   : > { %16297 = vrot.lane.b32.xlu0 %v18394_v37, %s18984_s21  ;;  %s19002_s21 = sld [smem:[#allocation51_spill]] }
0x779b   : > { %12432 = vrot.lane.b32.xlu0 %v18420_v0, %s18985_s4 }
0x780e   : > { %v12344_v5 = vpop.xlane.xlu0 %12343 }
0x780f   : > { %v12345_v40 = vsub.f32 %v12338_v11, %v12344_v5 }
0x7811   : > { %v12346_v55 = vmul.f32 1.442695, %v12345_v40 }
0x7812   : > { %v16298_v56 = vpop.permute.xlu0 %16297 }
0x7813   : > { %16627 = vpow2.f32 %v12346_v55  ;;  %v16300_v26 = vunpack.i.h.bf16 %v16298_v56  ;;  %v16299_v19 = vunpack.i.l.bf16 %v16298_v56 }
0x7815   : > { %v15698_v29 = vpack.c.bf16 %v16300_v26, %v16299_v19 }
0x7816   : > { %v12433_v42 = vpop.permute.xlu0 %12432 }
0x7817   : > { %15699 = vmatpush3.bf16.msra.mxu0 %v15698_v29 }
0x7818   : > { %15700 = vmatprep.subr.bf16.mxu0 %v16777_v48 }
0x781d   : > { %v16628_v47 = vpop.eup %16627 }
0x781e   : > { %v12348_v6 = vsel %vm8876_vm14, %v16628_v47, 0.0 }
0x781f   : > { %12349 = vadd.xlane.f32.xlu1 %v12348_v6 }
0x7830   : > { %16302 = vrot.lane.b32.xlu1 %v18394_v37, %s18985_s4  ;;  %s19003_s4 = sld [smem:[#allocation46_spill]] }
0x78ac   : > { %v12350_v9 = vpop.xlane.xlu1 %12349 }
0x78ad   : > { %16629 = vrcp.f32 %v12350_v9  ;;  %v13563_v9 = vld [vmem:[%s18993_s1 + $0x28] sm:$0xff] }
0x78b0   : > { %v16303_v0 = vpop.permute.xlu1 %16302 }
0x78b1   : > { %v16305_v14 = vunpack.i.h.bf16 %v16303_v0  ;;  %v16304_v15 = vunpack.i.l.bf16 %v16303_v0  ;;  %v13564_v0 = vld [vmem:[%s18993_s1 + $0x30] sm:$0xff] }
0x78b3   : > { %v15701_v8 = vpack.c.bf16 %v16305_v14, %v16304_v15  ;;  %v15714_v14 = vpack.c.bf16 %v13564_v0, %v13563_v9  ;;  %v13566_v15 = vld [vmem:[%s18993_s1 + $0x40] sm:$0xff] }
0x78b7   : > { %v16630_v16 = vpop.eup %16629 }
0x78b8   : > { %v12352_v7 = vmul.f32 %v16630_v16, %v16628_v47 }
0x78ba   : > { %15041 = vmatmul.mubr.msk.f32.vlgmr.msra.gmra.mrb[110].mxu0 %vm1440_vm4, %v12352_v7  ;;  %v13567_v7 = vld [vmem:[%s18993_s1 + $0x48] sm:$0xf] }
0x78bb   : > { %15703 = vmatpush3.bf16.xpose.msk.msra.mxu0 %vm17084_vm3, %v15701_v8  ;;  %15047 = vmatprep.mubr.msk.f32.mxu0 %vm16778_vm12, %v16779_v13  ;;  %v13571_v8 = vld [vmem:[%s18971_s24 + $0x40] sm:$0xff] }
0x78bc   : > { %15713 = vmatprep.subr.bf16.mxu0 %v16777_v48 }
0x78c2   : > { %15048 = vmatmul.mubr.msk.f32.vlgmr.msra.gmra.mrb[112].mxu0 %vm1354_vm2, %v12433_v42  ;;  %v13572_v42 = vld [vmem:[%s18971_s24 + $0x48] sm:$0xff] }
0x78c3   : > { %15080 = vmatprep.mubr.msk.f32.mxu0 %vm16778_vm12, %v16779_v13  ;;  %15715 = vmatpush3.bf16.msra.mxu0 %v15714_v14 }
0x78c4   : > { %15716 = vmatprep.subr.bf16.mxu0 %v16777_v48 }
0x798d   : > { %v12428_v53 = vpop.f32.mrb[110].mxu0 }
0x798e   : > { %v15042_v58 = vpop.f32.mrb[111].mxu0 }
0x798f   : > { %v15720_v58 = vpack.c.bf16 %v13572_v42, %v13571_v8  ;;  %v12929_v42 = vld [vmem:[%s18998_s16] sm:$0x1] }
0x7995   : > { %v12510_v59 = vpop.f32.mrb[112].mxu0 }
0x7996   : > { %v15049_v12 = vpop.f32.mrb[113].mxu0  ;;  %v12514_v28 = vsel %vm8876_vm14, %v12510_v59, -inf }
0x7997   : > { %12515 = vmax.xlane.f32.xlu1 %v12514_v28  ;;  %v13575_v28 = vld [vmem:[%s18971_s24 + $0x60] sm:$0xff] }
0x79a8   : > { %12605 = vrot.lane.b32.xlu1 %v18462_v31, %s18948_s15  ;;  %s18996_s15 = sld [smem:[#allocation44_spill]] }
0x79ac   : > { %12609 = vrot.lane.b32.xlu1 %v18482_v43, %s18933_s20  ;;  %s18989_s20 = smov 20  }
0x79ae   : > { %s18997_s19 = smov %s18996_s15 }
0x79af   : > { %v12948_v9 = vld [vmem:[%s18997_s19 + $0x10] sm:$0xff]  ;;  %v12949_v0 = vld [vmem:[%s18997_s19 + $0x18] sm:$0xff] }
0x79b0   : > { %12617 = vrot.lane.b32.xlu1 %v18522_v22, %s18935_s0  ;;  %s18991_s0 = smov 32   ;;  %v15735_v14 = vpack.c.bf16 %v12949_v0, %v12948_v9 }
0x79b4   : > { %12625 = vrot.lane.b32.xlu1 %v12256_v51, %s18932_s13  ;;  %s18990_s13 = smov 28  }
0x7a24   : > { %v12516_v25 = vpop.xlane.xlu1 %12515 }
0x7a25   : > { %v12517_v4 = vsub.f32 %v12510_v59, %v12516_v25  ;;  %v13574_v59 = vld [vmem:[%s18971_s24 + $0x58] sm:$0xff]  ;;  %v13576_v25 = vld [vmem:[%s18971_s24 + $0x68] sm:$0xff] }
0x7a27   : > { %v12518_v23 = vmul.f32 1.442695, %v12517_v4  ;;  %v15726_v4 = vpack.c.bf16 %v13576_v25, %v13575_v28 }
0x7a28   : > { %v12606_v18 = vpop.permute.xlu1 %12605 }
0x7a29   : > { %16631 = vpow2.f32 %v12518_v23  ;;  %v12636_v62 = vsel %vm1354_vm2, %v18460_v3, %v12606_v18  ;;  %v13522_v3 = vld [vmem:[%s18992_s28 + $0x1] sm:$0x1] }
0x7a2c   : > { %v12610_v30 = vpop.permute.xlu1 %12609 }
0x7a2d   : > { %v12637_v38 = vsel %vm3216_vm5, %v12636_v62, %v12610_v30 }
0x7a30   : > { %v12618_v1 = vpop.permute.xlu1 %12617 }
0x7a33   : > { %v16632_v41 = vpop.eup %16631 }
0x7a34   : > { %v12520_v17 = vsel %vm8876_vm14, %v16632_v41, 0.0  ;;  %v12626_v57 = vpop.permute.xlu1 %12625 }
0x7a35   : > { %12521 = vadd.xlane.f32.xlu0 %v12520_v17 }
0x7a4b   : > { %16307 = vrot.lane.b32.xlu0 %v18394_v37, %s18986_s7 }
0x7a4f   : > { %12613 = vrot.lane.b32.xlu0 %v18502_v10, %s18987_s18  ;;  %s1229_s18 = sand.u32 1, %s19000_s5  }
0x7a50   : > { %s13031_s2 = scalar_lea.sflag [#allocation3], %s1229_s18 }
0x7a53   : > { %12621 = vrot.lane.b32.xlu0 %v18542_v36, %s18989_s20  ;;  %v13517_v36 = vld [vmem:[%s18988_s26 + $0x28] sm:$0xff]  ;;  %s13585_s20 = sshll.u32 %s19002_s21, 4 }
0x7a54   : > { %v15708_v34 = vpack.c.bf16 %v13518_v33, %v13517_v36  ;;  %v13578_v36 = vld [vmem:[%s18971_s24 + $0x78] sm:$0xff]  ;;  %s18675_s28 = scalar_lea.hbm %s19003_s4, %s13585_s20 }
0x7a57   : > { %12629 = vrot.lane.b32.xlu0 %v12428_v53, %s18990_s13  ;;  %v13573_v53 = vld [vmem:[%s18971_s24 + $0x50] sm:$0xff]  ;;  %s1230_s13 = scalar_lea.vmem [#allocation2], %s1229_s18 }
0x7a58   : > { %v15723_v12 = vpack.c.bf16 %v13574_v59, %v13573_v53  ;;  %v12930_v53 = vld [vmem:[%s18999_s10] sm:$0x1] }
0x7ac2   : > { %v12522_v31 = vpop.xlane.xlu0 %12521 }
0x7ac3   : > { %16633 = vrcp.f32 %v12522_v31 }
0x7ac6   : > { %v16308_v43 = vpop.permute.xlu0 %16307 }
0x7ac7   : > { %v16310_v22 = vunpack.i.h.bf16 %v16308_v43  ;;  %v16309_v21 = vunpack.i.l.bf16 %v16308_v43  ;;  %v13561_v43 = vld [vmem:[%s18972_s23 + $0x1] sm:$0x1] }
0x7ac9   : > { %v15705_v27 = vpack.c.bf16 %v16310_v22, %v16309_v21  ;;  %v13562_v21 = vld [vmem:[%s18973_s27 + $0x1] sm:$0x1] }
0x7aca   : > { %v12614_v50 = vpop.permute.xlu0 %12613 }
0x7acb   : > { %15706 = vmatpush3.bf16.msra.mxu1 %v15705_v27  ;;  %v12638_v2 = vsel %vm3219_vm6, %v12637_v38, %v12614_v50 }
0x7acc   : > { %15707 = vmatprep.subr.bf16.mxu1 %v16777_v48  ;;  %v12639_v49 = vsel %vm1440_vm4, %v12638_v2, %v12618_v1 }
0x7acd   : > { %v16634_v37 = vpop.eup %16633 }
0x7ace   : > { %v12524_v10 = vmul.f32 %v16634_v37, %v16632_v41  ;;  %v12622_v39 = vpop.permute.xlu0 %12621 }
0x7acf   : > { %v12640_v60 = vsel %vm3224_vm7, %v12639_v49, %v12622_v39 }
0x7ad0   : > { %15055 = vmatmul.mubr.msk.f32.vlgmr.msra.gmra.mrb[110].mxu1 %vm1440_vm4, %v12524_v10  ;;  %v12641_v51 = vsel %vm3227_vm8, %v12640_v60, %v12626_v57  ;;  %v13577_v10 = vld [vmem:[%s18971_s24 + $0x70] sm:$0xff] }
0x7ad1   : > { %15067 = vmatprep.mubr.msk.f32.mxu1 %vm16778_vm12, %v16779_v13  ;;  %15709 = vmatpush3.bf16.msra.mxu1 %v15708_v34  ;;  %v15729_v33 = vpack.c.bf16 %v13578_v36, %v13577_v10 }
0x7ad2   : > { %15710 = vmatprep.subr.bf16.mxu1 %v16777_v48  ;;  %v12630_v61 = vpop.permute.xlu0 %12629 }
0x7ad3   : > { %v12642_v52 = vsel %vm3230_vm9, %v12641_v51, %v12630_v61 }
0x7ad5   : > { %15712 = vmatpush3.bf16.msra.mxu1 %v15711_v45 }
0x7ad6   : > { %15065 = vmatprep.subr.mxu1 %v16779_v13 }
0x7ad9   : > { %15066 = vmatpush3.msk.msra.mxu1 %vm1261_vm0, %v13521_v35 }
0x7ada   : > { %15719 = vmatprep.subr.bf16.mxu1 %v16777_v48 }
0x7ba3   : > { %v12600_v63 = vpop.f32.mrb[110].mxu1 }
0x7ba4   : > { %12633 = vrot.lane.b32.xlu1 %v12600_v63, %s18991_s0  ;;  %v15056_v46 = vpop.f32.mrb[111].mxu1  ;;  %v13579_v63 = vld [vmem:[%s18995_s11 + $0x1] sm:$0x1]  ;;  %s13043_s0 = sshll.u32 %s1230_s13, 4  ;;  %s18677_s0 = int_to_ptr.vmem [resolvable:$true] %s13043_s0 }
0x7ba5   : > { %s16641_s11 = scalar_lea.vmem %s18677_s0, 16 }
0x7ba6   : > { %p16642_p11 = scmp.ne.s32.totalorder %s18677_s0, %s16641_s11 }
0x7ba8   : > { %p16643_p12 = pnand %p16642_p11, %p17034_p5 }
0x7baa   : > { %p16644_p13 = pneg %p16643_p12 }
0x7c16   : > { %v12634_v11 = vpop.permute.xlu1 %12633 }
0x7c17   : > { %v12643_v44 = vsel %vm3233_vm10, %v12642_v52, %v12634_v11  ;;  %v13581_v52 = vld [vmem:[%s18977_s17 + $0x1] sm:$0x1] }
0x7c18   : > { %15068 = vmatmul.mubr.msk.f32.vlgmr.msra.gmra.mrb[112].mxu1 %vm1254_vm1, %v12643_v44  ;;  %v13582_v44 = vld [vmem:[%s18978_s22 + $0x1] sm:$0x1] }
0x7c19   : > { %15099 = vmatprep.mubr.msk.f32.mxu1 %vm16778_vm12, %v16779_v13  ;;  %15721 = vmatpush3.bf16.msra.mxu1 %v15720_v58 }
0x7c1a   : > { %15722 = vmatprep.subr.bf16.mxu1 %v16777_v48 }
0x7c1d   : > { %15724 = vmatpush3.bf16.msra.mxu1 %v15723_v12 }
0x7c1e   : > { %15725 = vmatprep.subr.bf16.mxu1 %v16777_v48 }
0x7c21   : > { %15727 = vmatpush3.bf16.msra.mxu1 %v15726_v4 }
0x7c22   : > { %15728 = vmatprep.subr.bf16.mxu1 %v16777_v48 }
0x7c25   : > { %15730 = vmatpush3.bf16.msra.mxu1 %v15729_v33 }
0x7ceb   : > { %v12716_v54 = vpop.f32.mrb[112].mxu1 }
0x7cec   : > { %v12717_v5 = vadd.f32 %v13522_v3, %v12716_v54  ;;  %v15069_v40 = vpop.f32.mrb[113].mxu1 }
0x7cee   : > { %v12720_v55 = vadd.f32 %v12717_v5, %v18410_v20  ;;  %v13565_v20 = vld [vmem:[%s18993_s1 + $0x38] sm:$0xff] }
0x7cef   : > { %v15717_v16 = vpack.c.bf16 %v13566_v15, %v13565_v20  ;;  %v12950_v20 = vld [vmem:[%s18997_s19 + $0x20] sm:$0xf] }
0x7cf0   : > { %v12725_v56 = vsel %vm8596_vm13, %v12720_v55, 0.0 }
0x7cf1   : > { %12726 = vadd.xlane.f32.xlu0 %v12725_v56  ;;  %15718 = vmatpush3.bf16.msra.mxu0 %v15717_v16 }
0x7cf2   : > { %15078 = vmatprep.subr.mxu0 %v16779_v13 }
0x7cf5   : > { %15079 = vmatpush3.msk.msra.mxu0 %vm1261_vm0, %v13567_v7 }
0x7cf6   : > { %15731 = vmatprep.subr.bf16.mxu0 %v16777_v48 }
0x7d7e   : > { %v12727_v26 = vpop.xlane.xlu0 %12726 }
0x7d7f   : > { %v12728_v19 = vmul.f32 0.027777778, %v12727_v26 }
0x7d81   : > { %v12729_v29 = vsub.f32 %v12720_v55, %v12728_v19 }
0x7d83   : > { %v12730_v47 = vmul.f32 %v12729_v29, %v12729_v29 }
0x7d85   : > { %v12731_v6 = vsel %vm8596_vm13, %v12730_v47, 0.0  ;;  %v12947_v47 = vld [vmem:[%s18997_s19 + $0x8] sm:$0xff] }
0x7d86   : > { %12732 = vadd.xlane.f32.xlu1 %v12731_v6 }
0x7e13   : > { %v12733_v23 = vpop.xlane.xlu1 %12732 }
0x7e14   : > { %v12734_v41 = vmul.f32 0.027777778, %v12733_v23 }
0x7e16   : > { %v12735_v17 = vadd.f32 1e-05, %v12734_v41 }
0x7e18   : > { %16635 = vrsqrt.f32 %v12735_v17 }
0x7e22   : > { %v16636_v31 = vpop.eup %16635 }
0x7e23   : > { %v12737_v22 = vmul.f32 %v16636_v31, %v12729_v29  ;;  %v12946_v29 = vld [vmem:[%s18996_s15] sm:$0xff]  ;;  %s16780_s15 = smov [#allocation2]  }
0x7e24   : > { %v15732_v6 = vpack.c.bf16 %v12947_v47, %v12946_v29  ;;  %s16645_s16 = sshll.u32 %s16780_s15, 4  ;;  %s16646_s16 = int_to_ptr.vmem [resolvable:$false] %s16645_s16 }
0x7e25   : > { %v12738_v27 = vmul.f32 %v13561_v43, %v12737_v22  ;;  %s16647_s10 = scalar_lea.vmem %s16646_s16, 32  ;;  %p16648_p0 = scmp.lt.s32.totalorder %s18677_s0, %s16646_s16 }
0x7e26   : > { %p16649_p1 = scmp.lt.s32.totalorder %s16647_s10, %s16641_s11 }
0x7e27   : > { %v12739_v37 = vadd.f32 %v13562_v21, %v12738_v27 }
0x7e28   : > { %p16650_p2 = por %p16649_p1, %p16648_p0 }
0x7e29   : > { %15081 = vmatmul.mubr.msk.f32.vlgmr.msra.gmra.mrb[114].mxu0 %vm1254_vm1, %v12739_v37 }
0x7e2a   : > { %15112 = vmatprep.mubr.msk.f32.mxu0 %vm16778_vm12, %v16779_v13  ;;  %15733 = vmatpush3.bf16.msra.mxu0 %v15732_v6  ;;  %p16651_p3 = pnand %p16650_p2, %p16644_p13 }
0x7e2b   : > { %15734 = vmatprep.subr.bf16.mxu0 %v16777_v48 }
0x7e2e   : > { %15736 = vmatpush3.bf16.msra.mxu0 %v15735_v14 }
0x7e2f   : > { %15110 = vmatprep.subr.mxu0 %v16779_v13  ;;  %v12951_v13 = vld [vmem:[%s19001_s9] sm:$0x1] }
0x7e32   : > { %15111 = vmatpush3.msk.msra.mxu0 %vm1261_vm0, %v12950_v20 }
0x7efc   : > { %v12820_v34 = vpop.f32.mrb[114].mxu0 }
0x7efd   : > { %v12821_v24 = vadd.f32 %v13568_v32, %v12820_v34  ;;  %v15082_v45 = vpop.f32.mrb[115].mxu0 }
0x7eff   : > { %v12824_v35 = vmax.f32 %v12821_v24, 0.0 }
0x7f01   : > { %15100 = vmatmul.mubr.msk.f32.vlgmr.msra.gmra.mrb[114].mxu1 %vm3486_vm11, %v12824_v35 }
0x7fd4   : > { %v12905_v46 = vpop.f32.mrb[114].mxu1 }
0x7fd5   : > { %v12906_v18 = vadd.f32 %v13579_v63, %v12905_v46  ;;  %v15101_v30 = vpop.f32.mrb[115].mxu1 }
0x7fd7   : > { %v12909_v50 = vadd.f32 %v12906_v18, %v12739_v37 }
0x7fd9   : > { %v12914_v62 = vsel %vm8596_vm13, %v12909_v50, 0.0 }
0x7fda   : > { %12915 = vadd.xlane.f32.xlu0 %v12914_v62 }
0x8067   : > { %v12916_v1 = vpop.xlane.xlu0 %12915 }
0x8068   : > { %v12917_v38 = vmul.f32 0.027777778, %v12916_v1 }
0x806a   : > { %v12918_v39 = vsub.f32 %v12909_v50, %v12917_v38 }
0x806c   : > { %v12919_v2 = vmul.f32 %v12918_v39, %v12918_v39 }
0x806e   : > { %v12920_v49 = vsel %vm8596_vm13, %v12919_v2, 0.0 }
0x806f   : > { %12921 = vadd.xlane.f32.xlu0 %v12920_v49 }
0x80fc   : > { %v12922_v57 = vpop.xlane.xlu0 %12921 }
0x80fd   : > { %v12923_v60 = vmul.f32 0.027777778, %v12922_v57 }
0x80ff   : > { %v12924_v61 = vadd.f32 1e-05, %v12923_v60 }
0x8101   : > { %16637 = vrsqrt.f32 %v12924_v61 }
0x810b   : > { %v16638_v51 = vpop.eup %16637 }
0x810c   : > { %v12926_v11 = vmul.f32 %v16638_v51, %v12918_v39 }
0x810e   : > { %v12927_v3 = vmul.f32 %v13581_v52, %v12926_v11 }
0x8110   : > { %v12928_v54 = vadd.f32 %v13582_v44, %v12927_v3 }
0x8112   : > { %v12931_v5 = vsel %vm8596_vm13, %v12928_v54, 0.0 }
0x8113   : > { %12932 = vadd.xlane.f32.xlu1 %v12931_v5 }
0x81a0   : > { %v12933_v40 = vpop.xlane.xlu1 %12932 }
0x81a1   : > { %v12934_v55 = vmul.f32 0.027777778, %v12933_v40 }
0x81a3   : > { %v12935_v56 = vsub.f32 %v12928_v54, %v12934_v55 }
0x81a5   : > { %v12936_v26 = vmul.f32 %v12935_v56, %v12935_v56 }
0x81a7   : > { %v12937_v19 = vsel %vm8596_vm13, %v12936_v26, 0.0 }
0x81a8   : > { %12938 = vadd.xlane.f32.xlu0 %v12937_v19 }
0x8235   : > { %v12939_v15 = vpop.xlane.xlu0 %12938 }
0x8236   : > { %v12940_v16 = vmul.f32 0.027777778, %v12939_v15 }
0x8238   : > { %v12941_v7 = vadd.f32 1e-05, %v12940_v16 }
0x823a   : > { %16639 = vrsqrt.f32 %v12941_v7 }
0x8244   : > { %v16640_v8 = vpop.eup %16639 }
0x8245   : > { %v12943_v48 = vmul.f32 %v16640_v8, %v12935_v56 }
0x8247   : > { %v12944_v58 = vmul.f32 %v12943_v48, %v12929_v42 }
0x8249   : > { %v12945_v59 = vadd.f32 %v12944_v58, %v12930_v53 }
0x824b   : > { %15113 = vmatmul.mubr.msk.f32.vlgmr.msra.gmra.mrb[116].mxu0 %vm1254_vm1, %v12945_v59 }
0x831e   : > { %v13024_v12 = vpop.f32.mrb[116].mxu0 }
0x831f   : > { %v13025_v28 = vadd.f32 %v13024_v12, %v12951_v13  ;;  %v15114_v25 = vpop.f32.mrb[117].mxu0 }
0x8321   : > { %13029 = vst.msk [vmem:[%s1230_s13] sm:$0x1] %vm13028_vm15, %v13025_v28 }
0x8322   : > { %16654 = shalt.err (!%p16651_p3)
}
0x8323   : > { %s16655_s5 = scalar_lea.hbm %s18675_s28, 16  ;;  %s16659_s9 = scalar_lea.hbm %s19003_s4, 32 }
0x8324   : > { %p16656_p4 = scmp.ne.s32.totalorder %s18675_s28, %s16655_s5  ;;  %p16660_p9 = scmp.lt.u32.totalorder %s18675_s28, %s19003_s4 }
0x8325   : > { %p16661_p10 = scmp.lt.u32.totalorder %s16659_s9, %s16655_s5  ;;  %p16663_p12 = scmp.lt.u32.totalorder %s16655_s5, %s18675_s28 }
0x8326   : > { %p16657_p7 = pnand %p16656_p4, %p17034_p5 }
0x8327   : > { %p16662_p11 = por %p16661_p10, %p16660_p9 }
0x8328   : > { %p16658_p8 = pneg %p16657_p7 }
0x8329   : > { %p16664_p0 = por %p16663_p12, %p16662_p11 }
0x832b   : > { %p16665_p13 = pnand %p16664_p0, %p16658_p8 }
0x832d   : > { %16668 = shalt.err (!%p16665_p13)
}
0x832e   : > { %15737 = dma.vmem_to_hbm [thread:$0]  (%p17034_p5), %s18677_s0, 16, %s18675_s28, %s13031_s2  }
0x832f PF: > { %s19005_s21 = sld [smem:[#allocation50_spill]]  ;;  %s19006_s18 = sld [smem:[#allocation47_spill]] }
0x8335   : > { %p15743_p1 = scmp.ge.s32.totalorder %s19005_s21, 2  ;;  %s13055_s13 = sand.u32 1, %s19006_s18  }
0x8336   : > { %s13056_s11 = scalar_lea.sflag [#allocation3], %s13055_s13 }
0x8337   : > { %p15740_p2 = pnand %p15743_p1, %p17038_p6 }
0x8339   : > { %16686 = dma.done.wait (!%p15740_p2), %s13056_s11, 16  }
0x833a   : > { %16688 = vsyncadd (!%p15740_p2), %s13056_s11, 4294967280  ;;  %s19008_s15 = sld [smem:[#allocation52_spill]]  ;;  %s19009_s7 = sld [smem:[#allocation48_spill]] }
0x833b   : > { %s19010_s10 = sld [smem:[#allocation49_spill]]  ;;  %s19011_s11 = sld [smem:[#allocation53_spill]] }
0x8340   : > { %p93_p3 = scmp.ge.s32.totalorder %s19008_s15, 4  }
0x8342   :  { %95 = sbr.rel (!%p93_p3) target bundleno = 100 (0x64), region = 304 }
0x8349   :  { %13060 = vsyncpa [#allocation3], 1 }
0x834a   :  { %13062 = vsyncpa [#allocation3 + $0x1], 1 }

</bundles_post_ra>
